<compile_context>
chip_gen: v6e
topology: v6e:2x2x1
jax: 0.10.0
libtpu: 0.0.40
codegen_flags: <defaults>
</compile_context>

<pallas_src>
import functools
import math

import jax
import jax.numpy as jnp
from jax import lax
from jax.experimental import pallas as pl
from jax.experimental.pallas import tpu as pltpu


# ------------------------- in-kernel building blocks -------------------------

def _matmul(x, w, b=None):
    """x: (R, K) f32 -> bf16 on the MXU, w: (K, N) bf16, b: (1, N) f32."""
    acc = jnp.dot(x.astype(jnp.bfloat16), w, preferred_element_type=jnp.float32)
    if b is not None:
        acc = acc + b
    return acc


def _layernorm(x, g, b):
    """x: (R, D) f32, g/b: (1, D) f32.  eps matches nn.LayerNorm default."""
    mu = jnp.mean(x, axis=-1, keepdims=True)
    xc = x - mu
    var = jnp.mean(xc * xc, axis=-1, keepdims=True)
    return xc * lax.rsqrt(var + 1e-5) * g + b


def _heads_attention(q, k, v, num_heads):
    """q (pre-scaled), k, v: (S, D) f32 -> (S, D) f32.

    Statically unrolled per-head attention; per-head dots run on the MXU in
    bf16 with f32 accumulation, softmax math stays f32."""
    S, D = q.shape
    Dh = D // num_heads
    outs = []
    for h in range(num_heads):
        sl = slice(h * Dh, (h + 1) * Dh)
        qh = q[:, sl].astype(jnp.bfloat16)
        kh = k[:, sl].astype(jnp.bfloat16)
        vh = v[:, sl].astype(jnp.bfloat16)
        s = lax.dot_general(qh, kh, (((1,), (1,)), ((), ())),
                            preferred_element_type=jnp.float32)      # (S, S)
        m = jnp.max(s, axis=-1, keepdims=True)
        p = jnp.exp(s - m)
        p = p * pl.reciprocal(jnp.sum(p, axis=-1, keepdims=True), approx=True)
        outs.append(jnp.dot(p.astype(jnp.bfloat16), vh,
                            preferred_element_type=jnp.float32))     # (S, Dh)
    return jnp.concatenate(outs, axis=-1)                            # (S, D)


def _self_attn_rows(x, wqkv, bqkv, wo, bo, *, bb, seq, num_heads):
    """Fused-QKV multi-head self-attention on flattened rows.

    x: (bb*seq, D).  Attention runs over `seq` positions independently per
    batch element.  The QKV and output projections use all bb*seq rows (big M
    on the MXU); only the tiny per-(batch, head) score/context dots are
    unrolled.  seq == 1 short-circuits softmax-over-one-key to ctx = v."""
    D = x.shape[-1]
    qkv = _matmul(x, wqkv, bqkv)                                     # (R, 3D)
    if seq == 1:
        ctx = qkv[:, 2 * D:]                                         # ctx == v
    else:
        scale = 1.0 / math.sqrt(D // num_heads)
        ctxs = []
        for b in range(bb):                                          # static
            rows = slice(b * seq, (b + 1) * seq)
            ctxs.append(_heads_attention(qkv[rows, :D] * scale,
                                         qkv[rows, D:2 * D],
                                         qkv[rows, 2 * D:], num_heads))
        ctx = ctxs[0] if bb == 1 else jnp.concatenate(ctxs, axis=0)  # (R, D)
    return _matmul(ctx, wo, bo)                                      # (R, D)


def _encoder_layer_from_refs(x, wqkv_ref, bqkv_ref, wo_ref, bo_ref,
                             ln1g_ref, ln1b_ref, w1_ref, b1_ref, w2_ref, b2_ref,
                             ln2g_ref, ln2b_ref, *, bb, seq, num_heads):
    """One post-norm nn.TransformerEncoderLayer (relu FF, no dropout)."""
    sa = _self_attn_rows(x, wqkv_ref[0], bqkv_ref[0], wo_ref[0], bo_ref[0],
                         bb=bb, seq=seq, num_heads=num_heads)
    y = _layernorm(x + sa, ln1g_ref[0], ln1b_ref[0])
    h = jnp.maximum(_matmul(y, w1_ref[0], b1_ref[0]), 0.0)
    ff = _matmul(h, w2_ref[0], b2_ref[0])
    return _layernorm(y + ff, ln2g_ref[0], ln2b_ref[0])


# ------------------------------- Pallas kernels -------------------------------

def _encoder_stack_kernel(x_ref,
                          wqkv_ref, bqkv_ref, wo_ref, bo_ref,
                          ln1g_ref, ln1b_ref, w1_ref, b1_ref, w2_ref, b2_ref,
                          ln2g_ref, ln2b_ref,
                          o_ref, *, bb, seq, num_heads):
    """Whole TransformerExpert stack: grid axis 1 iterates layers; the
    activation is carried in the VMEM-resident output block."""
    l = pl.program_id(1)

    @pl.when(l == 0)
    def _():
        o_ref[...] = x_ref[...]

    x = o_ref[...]                                                   # (R, D)
    o_ref[...] = _encoder_layer_from_refs(
        x, wqkv_ref, bqkv_ref, wo_ref, bo_ref, ln1g_ref, ln1b_ref,
        w1_ref, b1_ref, w2_ref, b2_ref, ln2g_ref, ln2b_ref,
        bb=bb, seq=seq, num_heads=num_heads)


def _text_expert_stack_kernel(x_ref,
                              t_wqkv_ref, t_bqkv_ref, t_wo_ref, t_bo_ref,
                              wqkv_ref, bqkv_ref, wo_ref, bo_ref,
                              ln1g_ref, ln1b_ref, w1_ref, b1_ref, w2_ref, b2_ref,
                              ln2g_ref, ln2b_ref,
                              o_ref, temb_ref, *, bb, seq, num_heads, text_heads):
    """Text expert stack with the SparseTextEmbedding 8-head attention fused
    into the layer-0 step.  Second output = text_emb (decoder tgt)."""
    l = pl.program_id(1)

    @pl.when(l == 0)
    def _():
        te = _self_attn_rows(x_ref[...], t_wqkv_ref[...], t_bqkv_ref[...],
                             t_wo_ref[...], t_bo_ref[...],
                             bb=bb, seq=seq, num_heads=text_heads)
        temb_ref[...] = te
        o_ref[...] = te

    x = o_ref[...]
    o_ref[...] = _encoder_layer_from_refs(
        x, wqkv_ref, bqkv_ref, wo_ref, bo_ref, ln1g_ref, ln1b_ref,
        w1_ref, b1_ref, w2_ref, b2_ref, ln2g_ref, ln2b_ref,
        bb=bb, seq=seq, num_heads=num_heads)


def _decoder_stack_kernel(x_ref, mem_ref,
                          sa_wqkv_ref, sa_bqkv_ref, sa_wo_ref, sa_bo_ref,
                          ln1g_ref, ln1b_ref,
                          ca_wv_ref, ca_bv_ref, ca_wo_ref, ca_bo_ref,
                          ln2g_ref, ln2b_ref,
                          w1_ref, b1_ref, w2_ref, b2_ref,
                          ln3g_ref, ln3b_ref,
                          proj_w_ref, proj_b_ref,
                          o_ref, *, bb, seq, num_heads):
    """Whole nn.TransformerDecoder stack + final projection (fused at the
    last layer).  Memory has sequence length 1 per batch element."""
    l = pl.program_id(1)
    num_layers = pl.num_programs(1)

    @pl.when(l == 0)
    def _():
        o_ref[...] = x_ref[...]

    x = o_ref[...]                                                   # (R, D)
    sa = _self_attn_rows(x, sa_wqkv_ref[0], sa_bqkv_ref[0],
                         sa_wo_ref[0], sa_bo_ref[0],
                         bb=bb, seq=seq, num_heads=num_heads)
    y = _layernorm(x + sa, ln1g_ref[0], ln1b_ref[0])

    # Cross-attention with a length-1 memory: softmax over one key == 1, so
    # the context for every query is the value projection of the memory
    # token; the query/key projections are mathematically inert and skipped.
    vo = _matmul(_matmul(mem_ref[...], ca_wv_ref[0], ca_bv_ref[0]),
                 ca_wo_ref[0], ca_bo_ref[0])                         # (bb, D)
    if seq == 1:
        yc = y + vo
    else:
        parts = [y[b * seq:(b + 1) * seq, :] + vo[b:b + 1, :]
                 for b in range(bb)]                                 # static
        yc = parts[0] if bb == 1 else jnp.concatenate(parts, axis=0)
    z = _layernorm(yc, ln2g_ref[0], ln2b_ref[0])

    h = jnp.maximum(_matmul(z, w1_ref[0], b1_ref[0]), 0.0)
    ff = _matmul(h, w2_ref[0], b2_ref[0])
    zf = _layernorm(z + ff, ln3g_ref[0], ln3b_ref[0])
    o_ref[...] = zf

    @pl.when(l == num_layers - 1)
    def _():
        o_ref[...] = _matmul(zf, proj_w_ref[...], proj_b_ref[...])


# ------------------------------ pallas_call wrappers ------------------------------

_ENC_KEYS = ('wqkv', 'bqkv', 'wo', 'bo', 'ln1g', 'ln1b',
             'w1', 'b1', 'w2', 'b2', 'ln2g', 'ln2b')
_DEC_KEYS = ('sa_wqkv', 'sa_bqkv', 'sa_wo', 'sa_bo', 'ln1g', 'ln1b',
             'ca_wv', 'ca_bv', 'ca_wo', 'ca_bo', 'ln2g', 'ln2b',
             'w1', 'b1', 'w2', 'b2', 'ln3g', 'ln3b')

_CPARAMS = pltpu.CompilerParams(
    dimension_semantics=("parallel", "arbitrary"),
    vmem_limit_bytes=32 * 1024 * 1024,
)


def _rows_spec(rows_per_block, d):
    """Lane-dense (rows, D) activation block, resident across the layer axis."""
    return pl.BlockSpec((rows_per_block, d), lambda b, l: (b, 0))


def _layer_spec(stacked):
    """One layer slice of a (L, ...)-stacked parameter per grid step."""
    blk = (1,) + stacked.shape[1:]
    zeros = (0,) * (stacked.ndim - 1)
    return pl.BlockSpec(blk, lambda b, l: (l,) + zeros)


def _const_spec(arr):
    """Full-array block with a constant index_map (stays VMEM-resident)."""
    zeros = (0,) * arr.ndim
    return pl.BlockSpec(arr.shape, lambda b, l: zeros)


def _batch_split(total_batch, batch_block):
    bb = total_batch if batch_block is None else batch_block
    assert total_batch % bb == 0
    return bb, total_batch // bb


def encoder_expert(x, layers, *, seq, num_heads, batch_block=None):
    """x: (B*seq, D) flattened rows; layers: dict of (L, ...) stacked params.

    batch_block=None processes the whole batch per block (max M).  For v7x,
    batch_block=B//2 gives two 'parallel' blocks so both TensorCores work."""
    rows, d = x.shape
    bb, nb = _batch_split(rows // seq, batch_block)
    num_layers = layers['wqkv'].shape[0]
    weights = [layers[k] for k in _ENC_KEYS]
    return pl.pallas_call(
        functools.partial(_encoder_stack_kernel, bb=bb, seq=seq,
                          num_heads=num_heads),
        out_shape=jax.ShapeDtypeStruct((rows, d), jnp.float32),
        grid=(nb, num_layers),
        in_specs=[_rows_spec(bb * seq, d)] + [_layer_spec(w) for w in weights],
        out_specs=_rows_spec(bb * seq, d),
        compiler_params=_CPARAMS,
    )(x, *weights)


def text_expert(tok_emb, text_attn, layers, *, seq, num_heads, text_heads,
                batch_block=None):
    """Text path: fused SparseTextEmbedding attention + encoder stack.

    Returns (expert_output, text_emb), both (B*seq, D)."""
    rows, d = tok_emb.shape
    bb, nb = _batch_split(rows // seq, batch_block)
    num_layers = layers['wqkv'].shape[0]
    tw = [text_attn[k] for k in ('wqkv', 'bqkv', 'wo', 'bo')]
    weights = [layers[k] for k in _ENC_KEYS]
    return pl.pallas_call(
        functools.partial(_text_expert_stack_kernel, bb=bb, seq=seq,
                          num_heads=num_heads, text_heads=text_heads),
        out_shape=(jax.ShapeDtypeStruct((rows, d), jnp.float32),
                   jax.ShapeDtypeStruct((rows, d), jnp.float32)),
        grid=(nb, num_layers),
        in_specs=([_rows_spec(bb * seq, d)]
                  + [_const_spec(a) for a in tw]
                  + [_layer_spec(w) for w in weights]),
        out_specs=(_rows_spec(bb * seq, d), _rows_spec(bb * seq, d)),
        compiler_params=_CPARAMS,
    )(tok_emb, *tw, *weights)


def decoder_stack(tgt, mem, layers, proj_w, proj_b, *, seq, num_heads,
                  batch_block=None):
    """tgt: (B*seq, D) rows, mem: (B, D) (length-1 memory per batch)."""
    rows, d = tgt.shape
    bb, nb = _batch_split(rows // seq, batch_block)
    num_layers = layers['sa_wqkv'].shape[0]
    weights = [layers[k] for k in _DEC_KEYS]
    in_specs = ([_rows_spec(bb * seq, d),
                 pl.BlockSpec((bb, d), lambda b, l: (b, 0))]
                + [_layer_spec(w) for w in weights]
                + [_const_spec(proj_w), _const_spec(proj_b)])
    return pl.pallas_call(
        functools.partial(_decoder_stack_kernel, bb=bb, seq=seq,
                          num_heads=num_heads),
        out_shape=jax.ShapeDtypeStruct((rows, d), jnp.float32),
        grid=(nb, num_layers),
        in_specs=in_specs,
        out_specs=_rows_spec(bb * seq, d),
        compiler_params=_CPARAMS,
    )(tgt, mem, *weights, proj_w, proj_b)


# --------------------------------- forward pass ---------------------------------

def enedina_forward(params, text_input, image_input, eq_input, *, h_text, h):
    B, S = text_input.shape
    D = params['embedding'].shape[-1]

    # Embedding gather (XLA glue) -> flattened rows (B*S, D), row = b*S + s.
    tok = jnp.take(params['embedding'], text_input.reshape(-1), axis=0)

    # Text expert (SparseTextEmbedding attention fused at layer 0) + text_emb.
    text_out, text_emb = text_expert(tok, params['text_attn'],
                                     params['experts'][0],
                                     seq=S, num_heads=h, text_heads=h_text)

    # GenericProcessors (Linear + ReLU): 2-row matmuls, left in XLA.
    img = jax.nn.relu(image_input @ params['image_proc']['w']
                      + params['image_proc']['b'])                   # (B, D)
    eqe = jax.nn.relu(eq_input @ params['eq_proc']['w']
                      + params['eq_proc']['b'])                      # (B, D)

    # Image / equation experts: encoder stacks over a length-1 sequence.
    img_out = encoder_expert(img, params['experts'][1], seq=1, num_heads=h)
    eq_out = encoder_expert(eqe, params['experts'][2], seq=1, num_heads=h)

    # Last sequence position per expert.
    text_last = text_out.reshape(B, S, D)[:, -1, :]
    expert_outputs = [text_last, img_out, eq_out]                    # (B, D) each

    # Gating: 3-lane output -> plain XLA.
    combined = jnp.concatenate(expert_outputs, axis=-1)              # (B, 3D)
    gate_logits = combined @ params['gate']['w'] + params['gate']['b']
    gate_w = jax.nn.softmax(gate_logits, axis=-1)                    # (B, 3)
    stack = jnp.stack(expert_outputs, axis=1)                        # (B, 3, D)
    mem = jnp.sum(gate_w[..., None] * stack, axis=1)                 # (B, D)

    # Decoder stack (tgt = text_emb, memory length 1) + fused final projection.
    dec = decoder_stack(text_emb, mem, params['dec_layers'],
                        params['dec_proj']['w'], params['dec_proj']['b'],
                        seq=S, num_heads=h)                          # (B*S, D)

    return dec.reshape(B, S, D).transpose(1, 0, 2)                   # PyTorch (S, B, D)


# --------------------------------- parameter init ---------------------------------

def init_params(key, *, num_tokens, image_dim, eq_dim, D, L, FF):
    kit = iter(jax.random.split(key, 64))

    def w(shape):   # MXU-side weights stored bf16 (f32 accumulation in kernels)
        return (jax.random.normal(next(kit), shape, jnp.float32) * 0.02
                ).astype(jnp.bfloat16)

    def wf(shape):  # XLA-side weights stay f32
        return jax.random.normal(next(kit), shape, jnp.float32) * 0.02

    def zeros(shape):
        return jnp.zeros(shape, jnp.float32)

    def ones(shape):
        return jnp.ones(shape, jnp.float32)

    def enc_stack():
        return {'wqkv': w((L, D, 3 * D)), 'bqkv': zeros((L, 1, 3 * D)),
                'wo': w((L, D, D)), 'bo': zeros((L, 1, D)),
                'ln1g': ones((L, 1, D)), 'ln1b': zeros((L, 1, D)),
                'w1': w((L, D, FF)), 'b1': zeros((L, 1, FF)),
                'w2': w((L, FF, D)), 'b2': zeros((L, 1, D)),
                'ln2g': ones((L, 1, D)), 'ln2b': zeros((L, 1, D))}

    def dec_stack():
        # Cross-attention q/k projections are omitted: with a length-1 memory
        # the softmax is identically 1, so the output does not depend on them.
        return {'sa_wqkv': w((L, D, 3 * D)), 'sa_bqkv': zeros((L, 1, 3 * D)),
                'sa_wo': w((L, D, D)), 'sa_bo': zeros((L, 1, D)),
                'ln1g': ones((L, 1, D)), 'ln1b': zeros((L, 1, D)),
                'ca_wv': w((L, D, D)), 'ca_bv': zeros((L, 1, D)),
                'ca_wo': w((L, D, D)), 'ca_bo': zeros((L, 1, D)),
                'ln2g': ones((L, 1, D)), 'ln2b': zeros((L, 1, D)),
                'w1': w((L, D, FF)), 'b1': zeros((L, 1, FF)),
                'w2': w((L, FF, D)), 'b2': zeros((L, 1, D)),
                'ln3g': ones((L, 1, D)), 'ln3b': zeros((L, 1, D))}

    return {
        'embedding': wf((num_tokens, D)),
        'text_attn': {'wqkv': w((D, 3 * D)), 'bqkv': zeros((1, 3 * D)),
                      'wo': w((D, D)), 'bo': zeros((1, D))},
        'image_proc': {'w': wf((image_dim, D)), 'b': zeros((D,))},
        'eq_proc': {'w': wf((eq_dim, D)), 'b': zeros((D,))},
        'experts': [enc_stack() for _ in range(3)],
        'gate': {'w': wf((3 * D, 3)), 'b': zeros((3,))},
        'dec_layers': dec_stack(),
        'dec_proj': {'w': w((D, D)), 'b': zeros((1, D))},
    }


# -------------------------------------- main --------------------------------------

if __name__ == "__main__":
    # Small shapes consistent with the module's forward (scaled down):
    B, S = 2, 16                   # batch, text sequence length
    D, H, L, FF = 128, 4, 2, 256   # emb_dim, num_heads, num_layers, ff_dim
    H_TEXT = 8                     # SparseTextEmbedding always uses 8 heads
    NUM_TOKENS = 512
    IMAGE_DIM = 64
    EQ_DIM = 64

    root = jax.random.PRNGKey(0)
    kp, kt, ki, ke = jax.random.split(root, 4)
    params = init_params(kp, num_tokens=NUM_TOKENS, image_dim=IMAGE_DIM,
                         eq_dim=EQ_DIM, D=D, L=L, FF=FF)

    text_input = jax.random.randint(kt, (B, S), 0, NUM_TOKENS)
    image_input = jax.random.normal(ki, (B, IMAGE_DIM), jnp.float32)
    eq_input = jax.random.normal(ke, (B, EQ_DIM), jnp.float32)

    fwd = jax.jit(functools.partial(enedina_forward, h_text=H_TEXT, h=H))
    out = fwd(params, text_input, image_input, eq_input)
    jax.block_until_ready(out)

    assert out.shape == (S, B, D), out.shape
    assert out.dtype == jnp.float32
    assert bool(jnp.isfinite(out).all())
    print("KERNEL_OK")
</pallas_src>

<mosaic_0001>
module attributes {stable_mosaic.version = 11 : i64} {
  func.func @_encoder_stack_kernel(%arg0: i32, %arg1: i32, %arg2: memref<2x128xf32, #tpu.memory_space<vmem>>, %arg3: memref<1x128x384xbf16, #tpu.memory_space<vmem>>, %arg4: memref<1x1x384xf32, #tpu.memory_space<vmem>>, %arg5: memref<1x128x128xbf16, #tpu.memory_space<vmem>>, %arg6: memref<1x1x128xf32, #tpu.memory_space<vmem>>, %arg7: memref<1x1x128xf32, #tpu.memory_space<vmem>>, %arg8: memref<1x1x128xf32, #tpu.memory_space<vmem>>, %arg9: memref<1x128x256xbf16, #tpu.memory_space<vmem>>, %arg10: memref<1x1x256xf32, #tpu.memory_space<vmem>>, %arg11: memref<1x256x128xbf16, #tpu.memory_space<vmem>>, %arg12: memref<1x1x128xf32, #tpu.memory_space<vmem>>, %arg13: memref<1x1x128xf32, #tpu.memory_space<vmem>>, %arg14: memref<1x1x128xf32, #tpu.memory_space<vmem>>, %arg15: memref<2x128xf32, #tpu.memory_space<vmem>>) attributes {dimension_semantics = [#tpu.dimension_semantics<parallel>, #tpu.dimension_semantics<arbitrary>], iteration_bounds = array<i64: 1, 2>, scalar_prefetch = 0 : i64, scratch_operands = 0 : i64, tpu.core_type = #tpu.core_type<tc>, window_params = [{transform_indices = @transform_0, window_bounds = array<i64: 2, 128>}, {transform_indices = @transform_1, window_bounds = array<i64: 1, 128, 384>}, {transform_indices = @transform_2, window_bounds = array<i64: 1, 1, 384>}, {transform_indices = @transform_3, window_bounds = array<i64: 1, 128, 128>}, {transform_indices = @transform_4, window_bounds = array<i64: 1, 1, 128>}, {transform_indices = @transform_5, window_bounds = array<i64: 1, 1, 128>}, {transform_indices = @transform_6, window_bounds = array<i64: 1, 1, 128>}, {transform_indices = @transform_7, window_bounds = array<i64: 1, 128, 256>}, {transform_indices = @transform_8, window_bounds = array<i64: 1, 1, 256>}, {transform_indices = @transform_9, window_bounds = array<i64: 1, 256, 128>}, {transform_indices = @transform_10, window_bounds = array<i64: 1, 1, 128>}, {transform_indices = @transform_11, window_bounds = array<i64: 1, 1, 128>}, {transform_indices = @transform_12, window_bounds = array<i64: 1, 1, 128>}, {transform_indices = @transform_13, window_bounds = array<i64: 2, 128>}]} {
    %c0_i32 = arith.constant 0 : i32
    %0 = arith.cmpi eq, %arg1, %c0_i32 : i32
    %1 = arith.extui %0 : i1 to i32
    %c0_i32_0 = arith.constant 0 : i32
    %2 = arith.cmpi ne, %1, %c0_i32_0 : i32
    scf.if %2 {
      %c0_54 = arith.constant 0 : index
      %c0_55 = arith.constant 0 : index
      %90 = vector.load %arg2[%c0_54, %c0_55] : memref<2x128xf32, #tpu.memory_space<vmem>>, vector<2x128xf32>
      %c0_56 = arith.constant 0 : index
      %c0_57 = arith.constant 0 : index
      %91 = vector.load %arg15[%c0_56, %c0_57] : memref<2x128xf32, #tpu.memory_space<vmem>>, vector<2x128xf32>
      tpu.vector_store %arg15[%c0_56, %c0_57], %90 {strides = array<i32>} : memref<2x128xf32, #tpu.memory_space<vmem>>, vector<2x128xf32>,
    } else {
    }
    %c0 = arith.constant 0 : index
    %c0_1 = arith.constant 0 : index
    %3 = vector.load %arg15[%c0, %c0_1] : memref<2x128xf32, #tpu.memory_space<vmem>>, vector<2x128xf32>
    %c0_2 = arith.constant 0 : index
    %c0_3 = arith.constant 0 : index
    %c0_4 = arith.constant 0 : index
    %4 = vector.load %arg3[%c0_2, %c0_3, %c0_4] : memref<1x128x384xbf16, #tpu.memory_space<vmem>>, vector<1x128x384xbf16>
    %5 = vector.shape_cast %4 : vector<1x128x384xbf16> to vector<128x384xbf16>
    %c0_5 = arith.constant 0 : index
    %c0_6 = arith.constant 0 : index
    %c0_7 = arith.constant 0 : index
    %6 = vector.load %arg4[%c0_5, %c0_6, %c0_7] : memref<1x1x384xf32, #tpu.memory_space<vmem>>, vector<1x1x384xf32>
    %7 = vector.shape_cast %6 : vector<1x1x384xf32> to vector<1x384xf32>
    %c0_8 = arith.constant 0 : index
    %c0_9 = arith.constant 0 : index
    %c0_10 = arith.constant 0 : index
    %8 = vector.load %arg5[%c0_8, %c0_9, %c0_10] : memref<1x128x128xbf16, #tpu.memory_space<vmem>>, vector<1x128x128xbf16>
    %9 = vector.shape_cast %8 : vector<1x128x128xbf16> to vector<128x128xbf16>
    %c0_11 = arith.constant 0 : index
    %c0_12 = arith.constant 0 : index
    %c0_13 = arith.constant 0 : index
    %10 = vector.load %arg6[%c0_11, %c0_12, %c0_13] : memref<1x1x128xf32, #tpu.memory_space<vmem>>, vector<1x1x128xf32>
    %11 = vector.shape_cast %10 : vector<1x1x128xf32> to vector<1x128xf32>
    %12 = arith.truncf %3 : vector<2x128xf32> to vector<2x128xbf16>
    %cst = arith.constant dense<0.000000e+00> : vector<2x384xf32>
    %13 = tpu.matmul %12, %5, %cst {dimension_numbers = #tpu.dot_dimension_numbers<[1], [0], [0], [1], [0, 0, 1, 1], [], []>} : vector<2x128xbf16>, vector<128x384xbf16>, vector<2x384xf32> -> vector<2x384xf32>
    %14 = vector.broadcast %7 : vector<1x384xf32> to vector<2x384xf32>
    %15 = arith.addf %13, %14 : vector<2x384xf32>
    %16 = vector.extract_strided_slice %15 {offsets = [0, 256], sizes = [2, 128], strides = [1, 1]} : vector<2x384xf32> to vector<2x128xf32>
    %17 = arith.truncf %16 : vector<2x128xf32> to vector<2x128xbf16>
    %cst_14 = arith.constant dense<0.000000e+00> : vector<2x128xf32>
    %18 = tpu.matmul %17, %9, %cst_14 {dimension_numbers = #tpu.dot_dimension_numbers<[1], [0], [0], [1], [0, 0, 1, 1], [], []>} : vector<2x128xbf16>, vector<128x128xbf16>, vector<2x128xf32> -> vector<2x128xf32>
    %19 = vector.broadcast %11 : vector<1x128xf32> to vector<2x128xf32>
    %20 = arith.addf %18, %19 : vector<2x128xf32>
    %21 = arith.addf %3, %20 : vector<2x128xf32>
    %c0_15 = arith.constant 0 : index
    %c0_16 = arith.constant 0 : index
    %c0_17 = arith.constant 0 : index
    %22 = vector.load %arg7[%c0_15, %c0_16, %c0_17] : memref<1x1x128xf32, #tpu.memory_space<vmem>>, vector<1x1x128xf32>
    %23 = vector.shape_cast %22 : vector<1x1x128xf32> to vector<1x128xf32>
    %c0_18 = arith.constant 0 : index
    %c0_19 = arith.constant 0 : index
    %c0_20 = arith.constant 0 : index
    %24 = vector.load %arg8[%c0_18, %c0_19, %c0_20] : memref<1x1x128xf32, #tpu.memory_space<vmem>>, vector<1x1x128xf32>
    %25 = vector.shape_cast %24 : vector<1x1x128xf32> to vector<1x128xf32>
    %cst_21 = arith.constant dense<0.000000e+00> : vector<2xf32>
    %26 = vector.multi_reduction <add>, %21, %cst_21 [1] : vector<2x128xf32> to vector<2xf32>
    %27 = vector.shape_cast %26 : vector<2xf32> to vector<2x1xf32>
    %cst_22 = arith.constant 1.280000e+02 : f32
    %28 = vector.broadcast %cst_22 : f32 to vector<2x1xf32>
    %29 = arith.divf %27, %28 : vector<2x1xf32>
    %30 = vector.broadcast %29 : vector<2x1xf32> to vector<2x128xf32>
    %31 = arith.subf %21, %30 : vector<2x128xf32>
    %32 = arith.mulf %31, %31 : vector<2x128xf32>
    %cst_23 = arith.constant dense<0.000000e+00> : vector<2xf32>
    %33 = vector.multi_reduction <add>, %32, %cst_23 [1] : vector<2x128xf32> to vector<2xf32>
    %34 = vector.shape_cast %33 : vector<2xf32> to vector<2x1xf32>
    %cst_24 = arith.constant 1.280000e+02 : f32
    %35 = vector.broadcast %cst_24 : f32 to vector<2x1xf32>
    %36 = arith.divf %34, %35 : vector<2x1xf32>
    %cst_25 = arith.constant 9.99999974E-6 : f32
    %37 = vector.broadcast %cst_25 : f32 to vector<2x1xf32>
    %38 = arith.addf %36, %37 : vector<2x1xf32>
    %39 = math.rsqrt %38 : vector<2x1xf32>
    %40 = vector.broadcast %39 : vector<2x1xf32> to vector<2x128xf32>
    %41 = arith.mulf %31, %40 : vector<2x128xf32>
    %42 = vector.broadcast %23 : vector<1x128xf32> to vector<2x128xf32>
    %43 = arith.mulf %41, %42 : vector<2x128xf32>
    %44 = vector.broadcast %25 : vector<1x128xf32> to vector<2x128xf32>
    %45 = arith.addf %43, %44 : vector<2x128xf32>
    %c0_26 = arith.constant 0 : index
    %c0_27 = arith.constant 0 : index
    %c0_28 = arith.constant 0 : index
    %46 = vector.load %arg9[%c0_26, %c0_27, %c0_28] : memref<1x128x256xbf16, #tpu.memory_space<vmem>>, vector<1x128x256xbf16>
    %47 = vector.shape_cast %46 : vector<1x128x256xbf16> to vector<128x256xbf16>
    %c0_29 = arith.constant 0 : index
    %c0_30 = arith.constant 0 : index
    %c0_31 = arith.constant 0 : index
    %48 = vector.load %arg10[%c0_29, %c0_30, %c0_31] : memref<1x1x256xf32, #tpu.memory_space<vmem>>, vector<1x1x256xf32>
    %49 = vector.shape_cast %48 : vector<1x1x256xf32> to vector<1x256xf32>
    %50 = arith.truncf %45 : vector<2x128xf32> to vector<2x128xbf16>
    %cst_32 = arith.constant dense<0.000000e+00> : vector<2x256xf32>
    %51 = tpu.matmul %50, %47, %cst_32 {dimension_numbers = #tpu.dot_dimension_numbers<[1], [0], [0], [1], [0, 0, 1, 1], [], []>} : vector<2x128xbf16>, vector<128x256xbf16>, vector<2x256xf32> -> vector<2x256xf32>
    %52 = vector.broadcast %49 : vector<1x256xf32> to vector<2x256xf32>
    %53 = arith.addf %51, %52 : vector<2x256xf32>
    %cst_33 = arith.constant 0.000000e+00 : f32
    %54 = vector.broadcast %cst_33 : f32 to vector<2x256xf32>
    %55 = arith.maximumf %53, %54 : vector<2x256xf32>
    %c0_34 = arith.constant 0 : index
    %c0_35 = arith.constant 0 : index
    %c0_36 = arith.constant 0 : index
    %56 = vector.load %arg11[%c0_34, %c0_35, %c0_36] : memref<1x256x128xbf16, #tpu.memory_space<vmem>>, vector<1x256x128xbf16>
    %57 = vector.shape_cast %56 : vector<1x256x128xbf16> to vector<256x128xbf16>
    %c0_37 = arith.constant 0 : index
    %c0_38 = arith.constant 0 : index
    %c0_39 = arith.constant 0 : index
    %58 = vector.load %arg12[%c0_37, %c0_38, %c0_39] : memref<1x1x128xf32, #tpu.memory_space<vmem>>, vector<1x1x128xf32>
    %59 = vector.shape_cast %58 : vector<1x1x128xf32> to vector<1x128xf32>
    %60 = arith.truncf %55 : vector<2x256xf32> to vector<2x256xbf16>
    %cst_40 = arith.constant dense<0.000000e+00> : vector<2x128xf32>
    %61 = tpu.matmul %60, %57, %cst_40 {dimension_numbers = #tpu.dot_dimension_numbers<[1], [0], [0], [1], [0, 0, 1, 1], [], []>} : vector<2x256xbf16>, vector<256x128xbf16>, vector<2x128xf32> -> vector<2x128xf32>
    %62 = vector.broadcast %59 : vector<1x128xf32> to vector<2x128xf32>
    %63 = arith.addf %61, %62 : vector<2x128xf32>
    %64 = arith.addf %45, %63 : vector<2x128xf32>
    %c0_41 = arith.constant 0 : index
    %c0_42 = arith.constant 0 : index
    %c0_43 = arith.constant 0 : index
    %65 = vector.load %arg13[%c0_41, %c0_42, %c0_43] : memref<1x1x128xf32, #tpu.memory_space<vmem>>, vector<1x1x128xf32>
    %66 = vector.shape_cast %65 : vector<1x1x128xf32> to vector<1x128xf32>
    %c0_44 = arith.constant 0 : index
    %c0_45 = arith.constant 0 : index
    %c0_46 = arith.constant 0 : index
    %67 = vector.load %arg14[%c0_44, %c0_45, %c0_46] : memref<1x1x128xf32, #tpu.memory_space<vmem>>, vector<1x1x128xf32>
    %68 = vector.shape_cast %67 : vector<1x1x128xf32> to vector<1x128xf32>
    %cst_47 = arith.constant dense<0.000000e+00> : vector<2xf32>
    %69 = vector.multi_reduction <add>, %64, %cst_47 [1] : vector<2x128xf32> to vector<2xf32>
    %70 = vector.shape_cast %69 : vector<2xf32> to vector<2x1xf32>
    %cst_48 = arith.constant 1.280000e+02 : f32
    %71 = vector.broadcast %cst_48 : f32 to vector<2x1xf32>
    %72 = arith.divf %70, %71 : vector<2x1xf32>
    %73 = vector.broadcast %72 : vector<2x1xf32> to vector<2x128xf32>
    %74 = arith.subf %64, %73 : vector<2x128xf32>
    %75 = arith.mulf %74, %74 : vector<2x128xf32>
    %cst_49 = arith.constant dense<0.000000e+00> : vector<2xf32>
    %76 = vector.multi_reduction <add>, %75, %cst_49 [1] : vector<2x128xf32> to vector<2xf32>
    %77 = vector.shape_cast %76 : vector<2xf32> to vector<2x1xf32>
    %cst_50 = arith.constant 1.280000e+02 : f32
    %78 = vector.broadcast %cst_50 : f32 to vector<2x1xf32>
    %79 = arith.divf %77, %78 : vector<2x1xf32>
    %cst_51 = arith.constant 9.99999974E-6 : f32
    %80 = vector.broadcast %cst_51 : f32 to vector<2x1xf32>
    %81 = arith.addf %79, %80 : vector<2x1xf32>
    %82 = math.rsqrt %81 : vector<2x1xf32>
    %83 = vector.broadcast %82 : vector<2x1xf32> to vector<2x128xf32>
    %84 = arith.mulf %74, %83 : vector<2x128xf32>
    %85 = vector.broadcast %66 : vector<1x128xf32> to vector<2x128xf32>
    %86 = arith.mulf %84, %85 : vector<2x128xf32>
    %87 = vector.broadcast %68 : vector<1x128xf32> to vector<2x128xf32>
    %88 = arith.addf %86, %87 : vector<2x128xf32>
    %c0_52 = arith.constant 0 : index
    %c0_53 = arith.constant 0 : index
    %89 = vector.load %arg15[%c0_52, %c0_53] : memref<2x128xf32, #tpu.memory_space<vmem>>, vector<2x128xf32>
    tpu.vector_store %arg15[%c0_52, %c0_53], %88 {strides = array<i32>} : memref<2x128xf32, #tpu.memory_space<vmem>>, vector<2x128xf32>,
    return
  }
  func.func @transform_0(%arg0: i32, %arg1: i32) -> (i32, i32) {
    %c0_i32 = arith.constant 0 : i32
    %c0_i32_0 = arith.constant 0 : i32
    return %arg0, %c0_i32 : i32, i32
  }
  func.func @transform_1(%arg0: i32, %arg1: i32) -> (i32, i32, i32) {
    %c0_i32 = arith.constant 0 : i32
    %c0_i32_0 = arith.constant 0 : i32
    %c0_i32_1 = arith.constant 0 : i32
    return %arg1, %c0_i32, %c0_i32_0 : i32, i32, i32
  }
  func.func @transform_2(%arg0: i32, %arg1: i32) -> (i32, i32, i32) {
    %c0_i32 = arith.constant 0 : i32
    %c0_i32_0 = arith.constant 0 : i32
    %c0_i32_1 = arith.constant 0 : i32
    return %arg1, %c0_i32, %c0_i32_0 : i32, i32, i32
  }
  func.func @transform_3(%arg0: i32, %arg1: i32) -> (i32, i32, i32) {
    %c0_i32 = arith.constant 0 : i32
    %c0_i32_0 = arith.constant 0 : i32
    %c0_i32_1 = arith.constant 0 : i32
    return %arg1, %c0_i32, %c0_i32_0 : i32, i32, i32
  }
  func.func @transform_4(%arg0: i32, %arg1: i32) -> (i32, i32, i32) {
    %c0_i32 = arith.constant 0 : i32
    %c0_i32_0 = arith.constant 0 : i32
    %c0_i32_1 = arith.constant 0 : i32
    return %arg1, %c0_i32, %c0_i32_0 : i32, i32, i32
  }
  func.func @transform_5(%arg0: i32, %arg1: i32) -> (i32, i32, i32) {
    %c0_i32 = arith.constant 0 : i32
    %c0_i32_0 = arith.constant 0 : i32
    %c0_i32_1 = arith.constant 0 : i32
    return %arg1, %c0_i32, %c0_i32_0 : i32, i32, i32
  }
  func.func @transform_6(%arg0: i32, %arg1: i32) -> (i32, i32, i32) {
    %c0_i32 = arith.constant 0 : i32
    %c0_i32_0 = arith.constant 0 : i32
    %c0_i32_1 = arith.constant 0 : i32
    return %arg1, %c0_i32, %c0_i32_0 : i32, i32, i32
  }
  func.func @transform_7(%arg0: i32, %arg1: i32) -> (i32, i32, i32) {
    %c0_i32 = arith.constant 0 : i32
    %c0_i32_0 = arith.constant 0 : i32
    %c0_i32_1 = arith.constant 0 : i32
    return %arg1, %c0_i32, %c0_i32_0 : i32, i32, i32
  }
  func.func @transform_8(%arg0: i32, %arg1: i32) -> (i32, i32, i32) {
    %c0_i32 = arith.constant 0 : i32
    %c0_i32_0 = arith.constant 0 : i32
    %c0_i32_1 = arith.constant 0 : i32
    return %arg1, %c0_i32, %c0_i32_0 : i32, i32, i32
  }
  func.func @transform_9(%arg0: i32, %arg1: i32) -> (i32, i32, i32) {
    %c0_i32 = arith.constant 0 : i32
    %c0_i32_0 = arith.constant 0 : i32
    %c0_i32_1 = arith.constant 0 : i32
    return %arg1, %c0_i32, %c0_i32_0 : i32, i32, i32
  }
  func.func @transform_10(%arg0: i32, %arg1: i32) -> (i32, i32, i32) {
    %c0_i32 = arith.constant 0 : i32
    %c0_i32_0 = arith.constant 0 : i32
    %c0_i32_1 = arith.constant 0 : i32
    return %arg1, %c0_i32, %c0_i32_0 : i32, i32, i32
  }
  func.func @transform_11(%arg0: i32, %arg1: i32) -> (i32, i32, i32) {
    %c0_i32 = arith.constant 0 : i32
    %c0_i32_0 = arith.constant 0 : i32
    %c0_i32_1 = arith.constant 0 : i32
    return %arg1, %c0_i32, %c0_i32_0 : i32, i32, i32
  }
  func.func @transform_12(%arg0: i32, %arg1: i32) -> (i32, i32, i32) {
    %c0_i32 = arith.constant 0 : i32
    %c0_i32_0 = arith.constant 0 : i32
    %c0_i32_1 = arith.constant 0 : i32
    return %arg1, %c0_i32, %c0_i32_0 : i32, i32, i32
  }
  func.func @transform_13(%arg0: i32, %arg1: i32) -> (i32, i32) {
    %c0_i32 = arith.constant 0 : i32
    %c0_i32_0 = arith.constant 0 : i32
    return %arg0, %c0_i32 : i32, i32
  }
}

module attributes {stable_mosaic.version = 11 : i64} {
  func.func @_encoder_stack_kernel(%arg0: i32, %arg1: i32, %arg2: memref<2x128xf32, #tpu.memory_space<vmem>>, %arg3: memref<1x128x384xbf16, #tpu.memory_space<vmem>>, %arg4: memref<1x1x384xf32, #tpu.memory_space<vmem>>, %arg5: memref<1x128x128xbf16, #tpu.memory_space<vmem>>, %arg6: memref<1x1x128xf32, #tpu.memory_space<vmem>>, %arg7: memref<1x1x128xf32, #tpu.memory_space<vmem>>, %arg8: memref<1x1x128xf32, #tpu.memory_space<vmem>>, %arg9: memref<1x128x256xbf16, #tpu.memory_space<vmem>>, %arg10: memref<1x1x256xf32, #tpu.memory_space<vmem>>, %arg11: memref<1x256x128xbf16, #tpu.memory_space<vmem>>, %arg12: memref<1x1x128xf32, #tpu.memory_space<vmem>>, %arg13: memref<1x1x128xf32, #tpu.memory_space<vmem>>, %arg14: memref<1x1x128xf32, #tpu.memory_space<vmem>>, %arg15: memref<2x128xf32, #tpu.memory_space<vmem>>) attributes {dimension_semantics = [#tpu.dimension_semantics<parallel>, #tpu.dimension_semantics<arbitrary>], iteration_bounds = array<i64: 1, 2>, scalar_prefetch = 0 : i64, scratch_operands = 0 : i64, tpu.core_type = #tpu.core_type<tc>, window_params = [{transform_indices = @transform_0, window_bounds = array<i64: 2, 128>}, {transform_indices = @transform_1, window_bounds = array<i64: 1, 128, 384>}, {transform_indices = @transform_2, window_bounds = array<i64: 1, 1, 384>}, {transform_indices = @transform_3, window_bounds = array<i64: 1, 128, 128>}, {transform_indices = @transform_4, window_bounds = array<i64: 1, 1, 128>}, {transform_indices = @transform_5, window_bounds = array<i64: 1, 1, 128>}, {transform_indices = @transform_6, window_bounds = array<i64: 1, 1, 128>}, {transform_indices = @transform_7, window_bounds = array<i64: 1, 128, 256>}, {transform_indices = @transform_8, window_bounds = array<i64: 1, 1, 256>}, {transform_indices = @transform_9, window_bounds = array<i64: 1, 256, 128>}, {transform_indices = @transform_10, window_bounds = array<i64: 1, 1, 128>}, {transform_indices = @transform_11, window_bounds = array<i64: 1, 1, 128>}, {transform_indices = @transform_12, window_bounds = array<i64: 1, 1, 128>}, {transform_indices = @transform_13, window_bounds = array<i64: 2, 128>}]} {
    %c0_i32 = arith.constant 0 : i32
    %0 = arith.cmpi eq, %arg1, %c0_i32 : i32
    %1 = arith.extui %0 : i1 to i32
    %c0_i32_0 = arith.constant 0 : i32
    %2 = arith.cmpi ne, %1, %c0_i32_0 : i32
    scf.if %2 {
      %c0_54 = arith.constant 0 : index
      %c0_55 = arith.constant 0 : index
      %90 = vector.load %arg2[%c0_54, %c0_55] : memref<2x128xf32, #tpu.memory_space<vmem>>, vector<2x128xf32>
      %c0_56 = arith.constant 0 : index
      %c0_57 = arith.constant 0 : index
      %91 = vector.load %arg15[%c0_56, %c0_57] : memref<2x128xf32, #tpu.memory_space<vmem>>, vector<2x128xf32>
      tpu.vector_store %arg15[%c0_56, %c0_57], %90 {strides = array<i32>} : memref<2x128xf32, #tpu.memory_space<vmem>>, vector<2x128xf32>,
    } else {
    }
    %c0 = arith.constant 0 : index
    %c0_1 = arith.constant 0 : index
    %3 = vector.load %arg15[%c0, %c0_1] : memref<2x128xf32, #tpu.memory_space<vmem>>, vector<2x128xf32>
    %c0_2 = arith.constant 0 : index
    %c0_3 = arith.constant 0 : index
    %c0_4 = arith.constant 0 : index
    %4 = vector.load %arg3[%c0_2, %c0_3, %c0_4] : memref<1x128x384xbf16, #tpu.memory_space<vmem>>, vector<1x128x384xbf16>
    %5 = vector.shape_cast %4 : vector<1x128x384xbf16> to vector<128x384xbf16>
    %c0_5 = arith.constant 0 : index
    %c0_6 = arith.constant 0 : index
    %c0_7 = arith.constant 0 : index
    %6 = vector.load %arg4[%c0_5, %c0_6, %c0_7] : memref<1x1x384xf32, #tpu.memory_space<vmem>>, vector<1x1x384xf32>
    %7 = vector.shape_cast %6 : vector<1x1x384xf32> to vector<1x384xf32>
    %c0_8 = arith.constant 0 : index
    %c0_9 = arith.constant 0 : index
    %c0_10 = arith.constant 0 : index
    %8 = vector.load %arg5[%c0_8, %c0_9, %c0_10] : memref<1x128x128xbf16, #tpu.memory_space<vmem>>, vector<1x128x128xbf16>
    %9 = vector.shape_cast %8 : vector<1x128x128xbf16> to vector<128x128xbf16>
    %c0_11 = arith.constant 0 : index
    %c0_12 = arith.constant 0 : index
    %c0_13 = arith.constant 0 : index
    %10 = vector.load %arg6[%c0_11, %c0_12, %c0_13] : memref<1x1x128xf32, #tpu.memory_space<vmem>>, vector<1x1x128xf32>
    %11 = vector.shape_cast %10 : vector<1x1x128xf32> to vector<1x128xf32>
    %12 = arith.truncf %3 : vector<2x128xf32> to vector<2x128xbf16>
    %cst = arith.constant dense<0.000000e+00> : vector<2x384xf32>
    %13 = tpu.matmul %12, %5, %cst {dimension_numbers = #tpu.dot_dimension_numbers<[1], [0], [0], [1], [0, 0, 1, 1], [], []>} : vector<2x128xbf16>, vector<128x384xbf16>, vector<2x384xf32> -> vector<2x384xf32>
    %14 = vector.broadcast %7 : vector<1x384xf32> to vector<2x384xf32>
    %15 = arith.addf %13, %14 : vector<2x384xf32>
    %16 = vector.extract_strided_slice %15 {offsets = [0, 256], sizes = [2, 128], strides = [1, 1]} : vector<2x384xf32> to vector<2x128xf32>
    %17 = arith.truncf %16 : vector<2x128xf32> to vector<2x128xbf16>
    %cst_14 = arith.constant dense<0.000000e+00> : vector<2x128xf32>
    %18 = tpu.matmul %17, %9, %cst_14 {dimension_numbers = #tpu.dot_dimension_numbers<[1], [0], [0], [1], [0, 0, 1, 1], [], []>} : vector<2x128xbf16>, vector<128x128xbf16>, vector<2x128xf32> -> vector<2x128xf32>
    %19 = vector.broadcast %11 : vector<1x128xf32> to vector<2x128xf32>
    %20 = arith.addf %18, %19 : vector<2x128xf32>
    %21 = arith.addf %3, %20 : vector<2x128xf32>
    %c0_15 = arith.constant 0 : index
    %c0_16 = arith.constant 0 : index
    %c0_17 = arith.constant 0 : index
    %22 = vector.load %arg7[%c0_15, %c0_16, %c0_17] : memref<1x1x128xf32, #tpu.memory_space<vmem>>, vector<1x1x128xf32>
    %23 = vector.shape_cast %22 : vector<1x1x128xf32> to vector<1x128xf32>
    %c0_18 = arith.constant 0 : index
    %c0_19 = arith.constant 0 : index
    %c0_20 = arith.constant 0 : index
    %24 = vector.load %arg8[%c0_18, %c0_19, %c0_20] : memref<1x1x128xf32, #tpu.memory_space<vmem>>, vector<1x1x128xf32>
    %25 = vector.shape_cast %24 : vector<1x1x128xf32> to vector<1x128xf32>
    %cst_21 = arith.constant dense<0.000000e+00> : vector<2xf32>
    %26 = vector.multi_reduction <add>, %21, %cst_21 [1] : vector<2x128xf32> to vector<2xf32>
    %27 = vector.shape_cast %26 : vector<2xf32> to vector<2x1xf32>
    %cst_22 = arith.constant 1.280000e+02 : f32
    %28 = vector.broadcast %cst_22 : f32 to vector<2x1xf32>
    %29 = arith.divf %27, %28 : vector<2x1xf32>
    %30 = vector.broadcast %29 : vector<2x1xf32> to vector<2x128xf32>
    %31 = arith.subf %21, %30 : vector<2x128xf32>
    %32 = arith.mulf %31, %31 : vector<2x128xf32>
    %cst_23 = arith.constant dense<0.000000e+00> : vector<2xf32>
    %33 = vector.multi_reduction <add>, %32, %cst_23 [1] : vector<2x128xf32> to vector<2xf32>
    %34 = vector.shape_cast %33 : vector<2xf32> to vector<2x1xf32>
    %cst_24 = arith.constant 1.280000e+02 : f32
    %35 = vector.broadcast %cst_24 : f32 to vector<2x1xf32>
    %36 = arith.divf %34, %35 : vector<2x1xf32>
    %cst_25 = arith.constant 9.99999974E-6 : f32
    %37 = vector.broadcast %cst_25 : f32 to vector<2x1xf32>
    %38 = arith.addf %36, %37 : vector<2x1xf32>
    %39 = math.rsqrt %38 : vector<2x1xf32>
    %40 = vector.broadcast %39 : vector<2x1xf32> to vector<2x128xf32>
    %41 = arith.mulf %31, %40 : vector<2x128xf32>
    %42 = vector.broadcast %23 : vector<1x128xf32> to vector<2x128xf32>
    %43 = arith.mulf %41, %42 : vector<2x128xf32>
    %44 = vector.broadcast %25 : vector<1x128xf32> to vector<2x128xf32>
    %45 = arith.addf %43, %44 : vector<2x128xf32>
    %c0_26 = arith.constant 0 : index
    %c0_27 = arith.constant 0 : index
    %c0_28 = arith.constant 0 : index
    %46 = vector.load %arg9[%c0_26, %c0_27, %c0_28] : memref<1x128x256xbf16, #tpu.memory_space<vmem>>, vector<1x128x256xbf16>
    %47 = vector.shape_cast %46 : vector<1x128x256xbf16> to vector<128x256xbf16>
    %c0_29 = arith.constant 0 : index
    %c0_30 = arith.constant 0 : index
    %c0_31 = arith.constant 0 : index
    %48 = vector.load %arg10[%c0_29, %c0_30, %c0_31] : memref<1x1x256xf32, #tpu.memory_space<vmem>>, vector<1x1x256xf32>
    %49 = vector.shape_cast %48 : vector<1x1x256xf32> to vector<1x256xf32>
    %50 = arith.truncf %45 : vector<2x128xf32> to vector<2x128xbf16>
    %cst_32 = arith.constant dense<0.000000e+00> : vector<2x256xf32>
    %51 = tpu.matmul %50, %47, %cst_32 {dimension_numbers = #tpu.dot_dimension_numbers<[1], [0], [0], [1], [0, 0, 1, 1], [], []>} : vector<2x128xbf16>, vector<128x256xbf16>, vector<2x256xf32> -> vector<2x256xf32>
    %52 = vector.broadcast %49 : vector<1x256xf32> to vector<2x256xf32>
    %53 = arith.addf %51, %52 : vector<2x256xf32>
    %cst_33 = arith.constant 0.000000e+00 : f32
    %54 = vector.broadcast %cst_33 : f32 to vector<2x256xf32>
    %55 = arith.maximumf %53, %54 : vector<2x256xf32>
    %c0_34 = arith.constant 0 : index
    %c0_35 = arith.constant 0 : index
    %c0_36 = arith.constant 0 : index
    %56 = vector.load %arg11[%c0_34, %c0_35, %c0_36] : memref<1x256x128xbf16, #tpu.memory_space<vmem>>, vector<1x256x128xbf16>
    %57 = vector.shape_cast %56 : vector<1x256x128xbf16> to vector<256x128xbf16>
    %c0_37 = arith.constant 0 : index
    %c0_38 = arith.constant 0 : index
    %c0_39 = arith.constant 0 : index
    %58 = vector.load %arg12[%c0_37, %c0_38, %c0_39] : memref<1x1x128xf32, #tpu.memory_space<vmem>>, vector<1x1x128xf32>
    %59 = vector.shape_cast %58 : vector<1x1x128xf32> to vector<1x128xf32>
    %60 = arith.truncf %55 : vector<2x256xf32> to vector<2x256xbf16>
    %cst_40 = arith.constant dense<0.000000e+00> : vector<2x128xf32>
    %61 = tpu.matmul %60, %57, %cst_40 {dimension_numbers = #tpu.dot_dimension_numbers<[1], [0], [0], [1], [0, 0, 1, 1], [], []>} : vector<2x256xbf16>, vector<256x128xbf16>, vector<2x128xf32> -> vector<2x128xf32>
    %62 = vector.broadcast %59 : vector<1x128xf32> to vector<2x128xf32>
    %63 = arith.addf %61, %62 : vector<2x128xf32>
    %64 = arith.addf %45, %63 : vector<2x128xf32>
    %c0_41 = arith.constant 0 : index
    %c0_42 = arith.constant 0 : index
    %c0_43 = arith.constant 0 : index
    %65 = vector.load %arg13[%c0_41, %c0_42, %c0_43] : memref<1x1x128xf32, #tpu.memory_space<vmem>>, vector<1x1x128xf32>
    %66 = vector.shape_cast %65 : vector<1x1x128xf32> to vector<1x128xf32>
    %c0_44 = arith.constant 0 : index
    %c0_45 = arith.constant 0 : index
    %c0_46 = arith.constant 0 : index
    %67 = vector.load %arg14[%c0_44, %c0_45, %c0_46] : memref<1x1x128xf32, #tpu.memory_space<vmem>>, vector<1x1x128xf32>
    %68 = vector.shape_cast %67 : vector<1x1x128xf32> to vector<1x128xf32>
    %cst_47 = arith.constant dense<0.000000e+00> : vector<2xf32>
    %69 = vector.multi_reduction <add>, %64, %cst_47 [1] : vector<2x128xf32> to vector<2xf32>
    %70 = vector.shape_cast %69 : vector<2xf32> to vector<2x1xf32>
    %cst_48 = arith.constant 1.280000e+02 : f32
    %71 = vector.broadcast %cst_48 : f32 to vector<2x1xf32>
    %72 = arith.divf %70, %71 : vector<2x1xf32>
    %73 = vector.broadcast %72 : vector<2x1xf32> to vector<2x128xf32>
    %74 = arith.subf %64, %73 : vector<2x128xf32>
    %75 = arith.mulf %74, %74 : vector<2x128xf32>
    %cst_49 = arith.constant dense<0.000000e+00> : vector<2xf32>
    %76 = vector.multi_reduction <add>, %75, %cst_49 [1] : vector<2x128xf32> to vector<2xf32>
    %77 = vector.shape_cast %76 : vector<2xf32> to vector<2x1xf32>
    %cst_50 = arith.constant 1.280000e+02 : f32
    %78 = vector.broadcast %cst_50 : f32 to vector<2x1xf32>
    %79 = arith.divf %77, %78 : vector<2x1xf32>
    %cst_51 = arith.constant 9.99999974E-6 : f32
    %80 = vector.broadcast %cst_51 : f32 to vector<2x1xf32>
    %81 = arith.addf %79, %80 : vector<2x1xf32>
    %82 = math.rsqrt %81 : vector<2x1xf32>
    %83 = vector.broadcast %82 : vector<2x1xf32> to vector<2x128xf32>
    %84 = arith.mulf %74, %83 : vector<2x128xf32>
    %85 = vector.broadcast %66 : vector<1x128xf32> to vector<2x128xf32>
    %86 = arith.mulf %84, %85 : vector<2x128xf32>
    %87 = vector.broadcast %68 : vector<1x128xf32> to vector<2x128xf32>
    %88 = arith.addf %86, %87 : vector<2x128xf32>
    %c0_52 = arith.constant 0 : index
    %c0_53 = arith.constant 0 : index
    %89 = vector.load %arg15[%c0_52, %c0_53] : memref<2x128xf32, #tpu.memory_space<vmem>>, vector<2x128xf32>
    tpu.vector_store %arg15[%c0_52, %c0_53], %88 {strides = array<i32>} : memref<2x128xf32, #tpu.memory_space<vmem>>, vector<2x128xf32>,
    return
  }
  func.func @transform_0(%arg0: i32, %arg1: i32) -> (i32, i32) {
    %c0_i32 = arith.constant 0 : i32
    %c0_i32_0 = arith.constant 0 : i32
    return %arg0, %c0_i32 : i32, i32
  }
  func.func @transform_1(%arg0: i32, %arg1: i32) -> (i32, i32, i32) {
    %c0_i32 = arith.constant 0 : i32
    %c0_i32_0 = arith.constant 0 : i32
    %c0_i32_1 = arith.constant 0 : i32
    return %arg1, %c0_i32, %c0_i32_0 : i32, i32, i32
  }
  func.func @transform_2(%arg0: i32, %arg1: i32) -> (i32, i32, i32) {
    %c0_i32 = arith.constant 0 : i32
    %c0_i32_0 = arith.constant 0 : i32
    %c0_i32_1 = arith.constant 0 : i32
    return %arg1, %c0_i32, %c0_i32_0 : i32, i32, i32
  }
  func.func @transform_3(%arg0: i32, %arg1: i32) -> (i32, i32, i32) {
    %c0_i32 = arith.constant 0 : i32
    %c0_i32_0 = arith.constant 0 : i32
    %c0_i32_1 = arith.constant 0 : i32
    return %arg1, %c0_i32, %c0_i32_0 : i32, i32, i32
  }
  func.func @transform_4(%arg0: i32, %arg1: i32) -> (i32, i32, i32) {
    %c0_i32 = arith.constant 0 : i32
    %c0_i32_0 = arith.constant 0 : i32
    %c0_i32_1 = arith.constant 0 : i32
    return %arg1, %c0_i32, %c0_i32_0 : i32, i32, i32
  }
  func.func @transform_5(%arg0: i32, %arg1: i32) -> (i32, i32, i32) {
    %c0_i32 = arith.constant 0 : i32
    %c0_i32_0 = arith.constant 0 : i32
    %c0_i32_1 = arith.constant 0 : i32
    return %arg1, %c0_i32, %c0_i32_0 : i32, i32, i32
  }
  func.func @transform_6(%arg0: i32, %arg1: i32) -> (i32, i32, i32) {
    %c0_i32 = arith.constant 0 : i32
    %c0_i32_0 = arith.constant 0 : i32
    %c0_i32_1 = arith.constant 0 : i32
    return %arg1, %c0_i32, %c0_i32_0 : i32, i32, i32
  }
  func.func @transform_7(%arg0: i32, %arg1: i32) -> (i32, i32, i32) {
    %c0_i32 = arith.constant 0 : i32
    %c0_i32_0 = arith.constant 0 : i32
    %c0_i32_1 = arith.constant 0 : i32
    return %arg1, %c0_i32, %c0_i32_0 : i32, i32, i32
  }
  func.func @transform_8(%arg0: i32, %arg1: i32) -> (i32, i32, i32) {
    %c0_i32 = arith.constant 0 : i32
    %c0_i32_0 = arith.constant 0 : i32
    %c0_i32_1 = arith.constant 0 : i32
    return %arg1, %c0_i32, %c0_i32_0 : i32, i32, i32
  }
  func.func @transform_9(%arg0: i32, %arg1: i32) -> (i32, i32, i32) {
    %c0_i32 = arith.constant 0 : i32
    %c0_i32_0 = arith.constant 0 : i32
    %c0_i32_1 = arith.constant 0 : i32
    return %arg1, %c0_i32, %c0_i32_0 : i32, i32, i32
  }
  func.func @transform_10(%arg0: i32, %arg1: i32) -> (i32, i32, i32) {
    %c0_i32 = arith.constant 0 : i32
    %c0_i32_0 = arith.constant 0 : i32
    %c0_i32_1 = arith.constant 0 : i32
    return %arg1, %c0_i32, %c0_i32_0 : i32, i32, i32
  }
  func.func @transform_11(%arg0: i32, %arg1: i32) -> (i32, i32, i32) {
    %c0_i32 = arith.constant 0 : i32
    %c0_i32_0 = arith.constant 0 : i32
    %c0_i32_1 = arith.constant 0 : i32
    return %arg1, %c0_i32, %c0_i32_0 : i32, i32, i32
  }
  func.func @transform_12(%arg0: i32, %arg1: i32) -> (i32, i32, i32) {
    %c0_i32 = arith.constant 0 : i32
    %c0_i32_0 = arith.constant 0 : i32
    %c0_i32_1 = arith.constant 0 : i32
    return %arg1, %c0_i32, %c0_i32_0 : i32, i32, i32
  }
  func.func @transform_13(%arg0: i32, %arg1: i32) -> (i32, i32) {
    %c0_i32 = arith.constant 0 : i32
    %c0_i32_0 = arith.constant 0 : i32
    return %arg0, %c0_i32 : i32, i32
  }
}

module attributes {stable_mosaic.version = 11 : i64} {
  func.func @_text_expert_stack_kernel(%arg0: i32, %arg1: i32, %arg2: memref<32x128xf32, #tpu.memory_space<vmem>>, %arg3: memref<128x384xbf16, #tpu.memory_space<vmem>>, %arg4: memref<1x384xf32, #tpu.memory_space<vmem>>, %arg5: memref<128x128xbf16, #tpu.memory_space<vmem>>, %arg6: memref<1x128xf32, #tpu.memory_space<vmem>>, %arg7: memref<1x128x384xbf16, #tpu.memory_space<vmem>>, %arg8: memref<1x1x384xf32, #tpu.memory_space<vmem>>, %arg9: memref<1x128x128xbf16, #tpu.memory_space<vmem>>, %arg10: memref<1x1x128xf32, #tpu.memory_space<vmem>>, %arg11: memref<1x1x128xf32, #tpu.memory_space<vmem>>, %arg12: memref<1x1x128xf32, #tpu.memory_space<vmem>>, %arg13: memref<1x128x256xbf16, #tpu.memory_space<vmem>>, %arg14: memref<1x1x256xf32, #tpu.memory_space<vmem>>, %arg15: memref<1x256x128xbf16, #tpu.memory_space<vmem>>, %arg16: memref<1x1x128xf32, #tpu.memory_space<vmem>>, %arg17: memref<1x1x128xf32, #tpu.memory_space<vmem>>, %arg18: memref<1x1x128xf32, #tpu.memory_space<vmem>>, %arg19: memref<32x128xf32, #tpu.memory_space<vmem>>, %arg20: memref<32x128xf32, #tpu.memory_space<vmem>>) attributes {dimension_semantics = [#tpu.dimension_semantics<parallel>, #tpu.dimension_semantics<arbitrary>], iteration_bounds = array<i64: 1, 2>, scalar_prefetch = 0 : i64, scratch_operands = 0 : i64, tpu.core_type = #tpu.core_type<tc>, window_params = [{transform_indices = @transform_0, window_bounds = array<i64: 32, 128>}, {pipeline_mode = #tpu.pipeline_mode<synchronous>, transform_indices = @transform_1, window_bounds = array<i64: 128, 384>}, {pipeline_mode = #tpu.pipeline_mode<synchronous>, transform_indices = @transform_2, window_bounds = array<i64: 1, 384>}, {pipeline_mode = #tpu.pipeline_mode<synchronous>, transform_indices = @transform_3, window_bounds = array<i64: 128, 128>}, {pipeline_mode = #tpu.pipeline_mode<synchronous>, transform_indices = @transform_4, window_bounds = array<i64: 1, 128>}, {transform_indices = @transform_5, window_bounds = array<i64: 1, 128, 384>}, {transform_indices = @transform_6, window_bounds = array<i64: 1, 1, 384>}, {transform_indices = @transform_7, window_bounds = array<i64: 1, 128, 128>}, {transform_indices = @transform_8, window_bounds = array<i64: 1, 1, 128>}, {transform_indices = @transform_9, window_bounds = array<i64: 1, 1, 128>}, {transform_indices = @transform_10, window_bounds = array<i64: 1, 1, 128>}, {transform_indices = @transform_11, window_bounds = array<i64: 1, 128, 256>}, {transform_indices = @transform_12, window_bounds = array<i64: 1, 1, 256>}, {transform_indices = @transform_13, window_bounds = array<i64: 1, 256, 128>}, {transform_indices = @transform_14, window_bounds = array<i64: 1, 1, 128>}, {transform_indices = @transform_15, window_bounds = array<i64: 1, 1, 128>}, {transform_indices = @transform_16, window_bounds = array<i64: 1, 1, 128>}, {transform_indices = @transform_17, window_bounds = array<i64: 32, 128>}, {transform_indices = @transform_18, window_bounds = array<i64: 32, 128>}]} {
    %c0_i32 = arith.constant 0 : i32
    %0 = arith.cmpi eq, %arg1, %c0_i32 : i32
    %1 = arith.extui %0 : i1 to i32
    %c0_i32_0 = arith.constant 0 : i32
    %2 = arith.cmpi ne, %1, %c0_i32_0 : i32
    scf.if %2 {
      %c0_88 = arith.constant 0 : index
      %c0_89 = arith.constant 0 : index
      %254 = vector.load %arg2[%c0_88, %c0_89] : memref<32x128xf32, #tpu.memory_space<vmem>>, vector<32x128xf32>
      %c0_90 = arith.constant 0 : index
      %c0_91 = arith.constant 0 : index
      %255 = vector.load %arg3[%c0_90, %c0_91] : memref<128x384xbf16, #tpu.memory_space<vmem>>, vector<128x384xbf16>
      %c0_92 = arith.constant 0 : index
      %c0_93 = arith.constant 0 : index
      %256 = vector.load %arg4[%c0_92, %c0_93] : memref<1x384xf32, #tpu.memory_space<vmem>>, vector<1x384xf32>
      %c0_94 = arith.constant 0 : index
      %c0_95 = arith.constant 0 : index
      %257 = vector.load %arg5[%c0_94, %c0_95] : memref<128x128xbf16, #tpu.memory_space<vmem>>, vector<128x128xbf16>
      %c0_96 = arith.constant 0 : index
      %c0_97 = arith.constant 0 : index
      %258 = vector.load %arg6[%c0_96, %c0_97] : memref<1x128xf32, #tpu.memory_space<vmem>>, vector<1x128xf32>
      %259 = arith.truncf %254 : vector<32x128xf32> to vector<32x128xbf16>
      %cst_98 = arith.constant dense<0.000000e+00> : vector<32x384xf32>
      %260 = tpu.matmul %259, %255, %cst_98 {dimension_numbers = #tpu.dot_dimension_numbers<[1], [0], [0], [1], [0, 0, 1, 1], [], []>} : vector<32x128xbf16>, vector<128x384xbf16>, vector<32x384xf32> -> vector<32x384xf32>
      %261 = vector.broadcast %256 : vector<1x384xf32> to vector<32x384xf32>
      %262 = arith.addf %260, %261 : vector<32x384xf32>
      %263 = vector.extract_strided_slice %262 {offsets = [0, 0], sizes = [16, 128], strides = [1, 1]} : vector<32x384xf32> to vector<16x128xf32>
      %cst_99 = arith.constant 2.500000e-01 : f32
      %264 = vector.broadcast %cst_99 : f32 to vector<16x128xf32>
      %265 = arith.mulf %263, %264 : vector<16x128xf32>
      %266 = vector.extract_strided_slice %262 {offsets = [0, 128], sizes = [16, 128], strides = [1, 1]} : vector<32x384xf32> to vector<16x128xf32>
      %267 = vector.extract_strided_slice %262 {offsets = [0, 256], sizes = [16, 128], strides = [1, 1]} : vector<32x384xf32> to vector<16x128xf32>
      %268 = vector.extract_strided_slice %265 {offsets = [0, 0], sizes = [16, 16], strides = [1, 1]} : vector<16x128xf32> to vector<16x16xf32>
      %269 = arith.truncf %268 : vector<16x16xf32> to vector<16x16xbf16>
      %270 = vector.extract_strided_slice %266 {offsets = [0, 0], sizes = [16, 16], strides = [1, 1]} : vector<16x128xf32> to vector<16x16xf32>
      %271 = arith.truncf %270 : vector<16x16xf32> to vector<16x16xbf16>
      %272 = vector.extract_strided_slice %267 {offsets = [0, 0], sizes = [16, 16], strides = [1, 1]} : vector<16x128xf32> to vector<16x16xf32>
      %273 = arith.truncf %272 : vector<16x16xf32> to vector<16x16xbf16>
      %cst_100 = arith.constant dense<0.000000e+00> : vector<16x16xf32>
      %274 = tpu.matmul %269, %271, %cst_100 {dimension_numbers = #tpu.dot_dimension_numbers<[1], [1], [0], [0], [0, 0, 1, 0], [], []>} : vector<16x16xbf16>, vector<16x16xbf16>, vector<16x16xf32> -> vector<16x16xf32>
      %cst_101 = arith.constant dense<0xFF800000> : vector<16xf32>
      %275 = vector.multi_reduction <maximumf>, %274, %cst_101 [1] : vector<16x16xf32> to vector<16xf32>
      %276 = vector.shape_cast %275 : vector<16xf32> to vector<16x1xf32>
      %277 = vector.broadcast %276 : vector<16x1xf32> to vector<16x16xf32>
      %278 = arith.subf %274, %277 : vector<16x16xf32>
      %279 = math.exp %278 : vector<16x16xf32>
      %cst_102 = arith.constant dense<0.000000e+00> : vector<16xf32>
      %280 = vector.multi_reduction <add>, %279, %cst_102 [1] : vector<16x16xf32> to vector<16xf32>
      %281 = vector.shape_cast %280 : vector<16xf32> to vector<16x1xf32>
      %282 = tpu.reciprocal %281 {approx = true} : vector<16x1xf32> -> vector<16x1xf32>
      %283 = vector.broadcast %282 : vector<16x1xf32> to vector<16x16xf32>
      %284 = arith.mulf %279, %283 : vector<16x16xf32>
      %285 = arith.truncf %284 : vector<16x16xf32> to vector<16x16xbf16>
      %cst_103 = arith.constant dense<0.000000e+00> : vector<16x16xf32>
      %286 = tpu.matmul %285, %273, %cst_103 {dimension_numbers = #tpu.dot_dimension_numbers<[1], [0], [0], [1], [0, 0, 1, 1], [], []>} : vector<16x16xbf16>, vector<16x16xbf16>, vector<16x16xf32> -> vector<16x16xf32>
      %287 = vector.extract_strided_slice %265 {offsets = [0, 16], sizes = [16, 16], strides = [1, 1]} : vector<16x128xf32> to vector<16x16xf32>
      %288 = arith.truncf %287 : vector<16x16xf32> to vector<16x16xbf16>
      %289 = vector.extract_strided_slice %266 {offsets = [0, 16], sizes = [16, 16], strides = [1, 1]} : vector<16x128xf32> to vector<16x16xf32>
      %290 = arith.truncf %289 : vector<16x16xf32> to vector<16x16xbf16>
      %291 = vector.extract_strided_slice %267 {offsets = [0, 16], sizes = [16, 16], strides = [1, 1]} : vector<16x128xf32> to vector<16x16xf32>
      %292 = arith.truncf %291 : vector<16x16xf32> to vector<16x16xbf16>
      %cst_104 = arith.constant dense<0.000000e+00> : vector<16x16xf32>
      %293 = tpu.matmul %288, %290, %cst_104 {dimension_numbers = #tpu.dot_dimension_numbers<[1], [1], [0], [0], [0, 0, 1, 0], [], []>} : vector<16x16xbf16>, vector<16x16xbf16>, vector<16x16xf32> -> vector<16x16xf32>
      %cst_105 = arith.constant dense<0xFF800000> : vector<16xf32>
      %294 = vector.multi_reduction <maximumf>, %293, %cst_105 [1] : vector<16x16xf32> to vector<16xf32>
      %295 = vector.shape_cast %294 : vector<16xf32> to vector<16x1xf32>
      %296 = vector.broadcast %295 : vector<16x1xf32> to vector<16x16xf32>
      %297 = arith.subf %293, %296 : vector<16x16xf32>
      %298 = math.exp %297 : vector<16x16xf32>
      %cst_106 = arith.constant dense<0.000000e+00> : vector<16xf32>
      %299 = vector.multi_reduction <add>, %298, %cst_106 [1] : vector<16x16xf32> to vector<16xf32>
      %300 = vector.shape_cast %299 : vector<16xf32> to vector<16x1xf32>
      %301 = tpu.reciprocal %300 {approx = true} : vector<16x1xf32> -> vector<16x1xf32>
      %302 = vector.broadcast %301 : vector<16x1xf32> to vector<16x16xf32>
      %303 = arith.mulf %298, %302 : vector<16x16xf32>
      %304 = arith.truncf %303 : vector<16x16xf32> to vector<16x16xbf16>
      %cst_107 = arith.constant dense<0.000000e+00> : vector<16x16xf32>
      %305 = tpu.matmul %304, %292, %cst_107 {dimension_numbers = #tpu.dot_dimension_numbers<[1], [0], [0], [1], [0, 0, 1, 1], [], []>} : vector<16x16xbf16>, vector<16x16xbf16>, vector<16x16xf32> -> vector<16x16xf32>
      %306 = vector.extract_strided_slice %265 {offsets = [0, 32], sizes = [16, 16], strides = [1, 1]} : vector<16x128xf32> to vector<16x16xf32>
      %307 = arith.truncf %306 : vector<16x16xf32> to vector<16x16xbf16>
      %308 = vector.extract_strided_slice %266 {offsets = [0, 32], sizes = [16, 16], strides = [1, 1]} : vector<16x128xf32> to vector<16x16xf32>
      %309 = arith.truncf %308 : vector<16x16xf32> to vector<16x16xbf16>
      %310 = vector.extract_strided_slice %267 {offsets = [0, 32], sizes = [16, 16], strides = [1, 1]} : vector<16x128xf32> to vector<16x16xf32>
      %311 = arith.truncf %310 : vector<16x16xf32> to vector<16x16xbf16>
      %cst_108 = arith.constant dense<0.000000e+00> : vector<16x16xf32>
      %312 = tpu.matmul %307, %309, %cst_108 {dimension_numbers = #tpu.dot_dimension_numbers<[1], [1], [0], [0], [0, 0, 1, 0], [], []>} : vector<16x16xbf16>, vector<16x16xbf16>, vector<16x16xf32> -> vector<16x16xf32>
      %cst_109 = arith.constant dense<0xFF800000> : vector<16xf32>
      %313 = vector.multi_reduction <maximumf>, %312, %cst_109 [1] : vector<16x16xf32> to vector<16xf32>
      %314 = vector.shape_cast %313 : vector<16xf32> to vector<16x1xf32>
      %315 = vector.broadcast %314 : vector<16x1xf32> to vector<16x16xf32>
      %316 = arith.subf %312, %315 : vector<16x16xf32>
      %317 = math.exp %316 : vector<16x16xf32>
      %cst_110 = arith.constant dense<0.000000e+00> : vector<16xf32>
      %318 = vector.multi_reduction <add>, %317, %cst_110 [1] : vector<16x16xf32> to vector<16xf32>
      %319 = vector.shape_cast %318 : vector<16xf32> to vector<16x1xf32>
      %320 = tpu.reciprocal %319 {approx = true} : vector<16x1xf32> -> vector<16x1xf32>
      %321 = vector.broadcast %320 : vector<16x1xf32> to vector<16x16xf32>
      %322 = arith.mulf %317, %321 : vector<16x16xf32>
      %323 = arith.truncf %322 : vector<16x16xf32> to vector<16x16xbf16>
      %cst_111 = arith.constant dense<0.000000e+00> : vector<16x16xf32>
      %324 = tpu.matmul %323, %311, %cst_111 {dimension_numbers = #tpu.dot_dimension_numbers<[1], [0], [0], [1], [0, 0, 1, 1], [], []>} : vector<16x16xbf16>, vector<16x16xbf16>, vector<16x16xf32> -> vector<16x16xf32>
      %325 = vector.extract_strided_slice %265 {offsets = [0, 48], sizes = [16, 16], strides = [1, 1]} : vector<16x128xf32> to vector<16x16xf32>
      %326 = arith.truncf %325 : vector<16x16xf32> to vector<16x16xbf16>
      %327 = vector.extract_strided_slice %266 {offsets = [0, 48], sizes = [16, 16], strides = [1, 1]} : vector<16x128xf32> to vector<16x16xf32>
      %328 = arith.truncf %327 : vector<16x16xf32> to vector<16x16xbf16>
      %329 = vector.extract_strided_slice %267 {offsets = [0, 48], sizes = [16, 16], strides = [1, 1]} : vector<16x128xf32> to vector<16x16xf32>
      %330 = arith.truncf %329 : vector<16x16xf32> to vector<16x16xbf16>
      %cst_112 = arith.constant dense<0.000000e+00> : vector<16x16xf32>
      %331 = tpu.matmul %326, %328, %cst_112 {dimension_numbers = #tpu.dot_dimension_numbers<[1], [1], [0], [0], [0, 0, 1, 0], [], []>} : vector<16x16xbf16>, vector<16x16xbf16>, vector<16x16xf32> -> vector<16x16xf32>
      %cst_113 = arith.constant dense<0xFF800000> : vector<16xf32>
      %332 = vector.multi_reduction <maximumf>, %331, %cst_113 [1] : vector<16x16xf32> to vector<16xf32>
      %333 = vector.shape_cast %332 : vector<16xf32> to vector<16x1xf32>
      %334 = vector.broadcast %333 : vector<16x1xf32> to vector<16x16xf32>
      %335 = arith.subf %331, %334 : vector<16x16xf32>
      %336 = math.exp %335 : vector<16x16xf32>
      %cst_114 = arith.constant dense<0.000000e+00> : vector<16xf32>
      %337 = vector.multi_reduction <add>, %336, %cst_114 [1] : vector<16x16xf32> to vector<16xf32>
      %338 = vector.shape_cast %337 : vector<16xf32> to vector<16x1xf32>
      %339 = tpu.reciprocal %338 {approx = true} : vector<16x1xf32> -> vector<16x1xf32>
      %340 = vector.broadcast %339 : vector<16x1xf32> to vector<16x16xf32>
      %341 = arith.mulf %336, %340 : vector<16x16xf32>
      %342 = arith.truncf %341 : vector<16x16xf32> to vector<16x16xbf16>
      %cst_115 = arith.constant dense<0.000000e+00> : vector<16x16xf32>
      %343 = tpu.matmul %342, %330, %cst_115 {dimension_numbers = #tpu.dot_dimension_numbers<[1], [0], [0], [1], [0, 0, 1, 1], [], []>} : vector<16x16xbf16>, vector<16x16xbf16>, vector<16x16xf32> -> vector<16x16xf32>
      %344 = vector.extract_strided_slice %265 {offsets = [0, 64], sizes = [16, 16], strides = [1, 1]} : vector<16x128xf32> to vector<16x16xf32>
      %345 = arith.truncf %344 : vector<16x16xf32> to vector<16x16xbf16>
      %346 = vector.extract_strided_slice %266 {offsets = [0, 64], sizes = [16, 16], strides = [1, 1]} : vector<16x128xf32> to vector<16x16xf32>
      %347 = arith.truncf %346 : vector<16x16xf32> to vector<16x16xbf16>
      %348 = vector.extract_strided_slice %267 {offsets = [0, 64], sizes = [16, 16], strides = [1, 1]} : vector<16x128xf32> to vector<16x16xf32>
      %349 = arith.truncf %348 : vector<16x16xf32> to vector<16x16xbf16>
      %cst_116 = arith.constant dense<0.000000e+00> : vector<16x16xf32>
      %350 = tpu.matmul %345, %347, %cst_116 {dimension_numbers = #tpu.dot_dimension_numbers<[1], [1], [0], [0], [0, 0, 1, 0], [], []>} : vector<16x16xbf16>, vector<16x16xbf16>, vector<16x16xf32> -> vector<16x16xf32>
      %cst_117 = arith.constant dense<0xFF800000> : vector<16xf32>
      %351 = vector.multi_reduction <maximumf>, %350, %cst_117 [1] : vector<16x16xf32> to vector<16xf32>
      %352 = vector.shape_cast %351 : vector<16xf32> to vector<16x1xf32>
      %353 = vector.broadcast %352 : vector<16x1xf32> to vector<16x16xf32>
      %354 = arith.subf %350, %353 : vector<16x16xf32>
      %355 = math.exp %354 : vector<16x16xf32>
      %cst_118 = arith.constant dense<0.000000e+00> : vector<16xf32>
      %356 = vector.multi_reduction <add>, %355, %cst_118 [1] : vector<16x16xf32> to vector<16xf32>
      %357 = vector.shape_cast %356 : vector<16xf32> to vector<16x1xf32>
      %358 = tpu.reciprocal %357 {approx = true} : vector<16x1xf32> -> vector<16x1xf32>
      %359 = vector.broadcast %358 : vector<16x1xf32> to vector<16x16xf32>
      %360 = arith.mulf %355, %359 : vector<16x16xf32>
      %361 = arith.truncf %360 : vector<16x16xf32> to vector<16x16xbf16>
      %cst_119 = arith.constant dense<0.000000e+00> : vector<16x16xf32>
      %362 = tpu.matmul %361, %349, %cst_119 {dimension_numbers = #tpu.dot_dimension_numbers<[1], [0], [0], [1], [0, 0, 1, 1], [], []>} : vector<16x16xbf16>, vector<16x16xbf16>, vector<16x16xf32> -> vector<16x16xf32>
      %363 = vector.extract_strided_slice %265 {offsets = [0, 80], sizes = [16, 16], strides = [1, 1]} : vector<16x128xf32> to vector<16x16xf32>
      %364 = arith.truncf %363 : vector<16x16xf32> to vector<16x16xbf16>
      %365 = vector.extract_strided_slice %266 {offsets = [0, 80], sizes = [16, 16], strides = [1, 1]} : vector<16x128xf32> to vector<16x16xf32>
      %366 = arith.truncf %365 : vector<16x16xf32> to vector<16x16xbf16>
      %367 = vector.extract_strided_slice %267 {offsets = [0, 80], sizes = [16, 16], strides = [1, 1]} : vector<16x128xf32> to vector<16x16xf32>
      %368 = arith.truncf %367 : vector<16x16xf32> to vector<16x16xbf16>
      %cst_120 = arith.constant dense<0.000000e+00> : vector<16x16xf32>
      %369 = tpu.matmul %364, %366, %cst_120 {dimension_numbers = #tpu.dot_dimension_numbers<[1], [1], [0], [0], [0, 0, 1, 0], [], []>} : vector<16x16xbf16>, vector<16x16xbf16>, vector<16x16xf32> -> vector<16x16xf32>
      %cst_121 = arith.constant dense<0xFF800000> : vector<16xf32>
      %370 = vector.multi_reduction <maximumf>, %369, %cst_121 [1] : vector<16x16xf32> to vector<16xf32>
      %371 = vector.shape_cast %370 : vector<16xf32> to vector<16x1xf32>
      %372 = vector.broadcast %371 : vector<16x1xf32> to vector<16x16xf32>
      %373 = arith.subf %369, %372 : vector<16x16xf32>
      %374 = math.exp %373 : vector<16x16xf32>
      %cst_122 = arith.constant dense<0.000000e+00> : vector<16xf32>
      %375 = vector.multi_reduction <add>, %374, %cst_122 [1] : vector<16x16xf32> to vector<16xf32>
      %376 = vector.shape_cast %375 : vector<16xf32> to vector<16x1xf32>
      %377 = tpu.reciprocal %376 {approx = true} : vector<16x1xf32> -> vector<16x1xf32>
      %378 = vector.broadcast %377 : vector<16x1xf32> to vector<16x16xf32>
      %379 = arith.mulf %374, %378 : vector<16x16xf32>
      %380 = arith.truncf %379 : vector<16x16xf32> to vector<16x16xbf16>
      %cst_123 = arith.constant dense<0.000000e+00> : vector<16x16xf32>
      %381 = tpu.matmul %380, %368, %cst_123 {dimension_numbers = #tpu.dot_dimension_numbers<[1], [0], [0], [1], [0, 0, 1, 1], [], []>} : vector<16x16xbf16>, vector<16x16xbf16>, vector<16x16xf32> -> vector<16x16xf32>
      %382 = vector.extract_strided_slice %265 {offsets = [0, 96], sizes = [16, 16], strides = [1, 1]} : vector<16x128xf32> to vector<16x16xf32>
      %383 = arith.truncf %382 : vector<16x16xf32> to vector<16x16xbf16>
      %384 = vector.extract_strided_slice %266 {offsets = [0, 96], sizes = [16, 16], strides = [1, 1]} : vector<16x128xf32> to vector<16x16xf32>
      %385 = arith.truncf %384 : vector<16x16xf32> to vector<16x16xbf16>
      %386 = vector.extract_strided_slice %267 {offsets = [0, 96], sizes = [16, 16], strides = [1, 1]} : vector<16x128xf32> to vector<16x16xf32>
      %387 = arith.truncf %386 : vector<16x16xf32> to vector<16x16xbf16>
      %cst_124 = arith.constant dense<0.000000e+00> : vector<16x16xf32>
      %388 = tpu.matmul %383, %385, %cst_124 {dimension_numbers = #tpu.dot_dimension_numbers<[1], [1], [0], [0], [0, 0, 1, 0], [], []>} : vector<16x16xbf16>, vector<16x16xbf16>, vector<16x16xf32> -> vector<16x16xf32>
      %cst_125 = arith.constant dense<0xFF800000> : vector<16xf32>
      %389 = vector.multi_reduction <maximumf>, %388, %cst_125 [1] : vector<16x16xf32> to vector<16xf32>
      %390 = vector.shape_cast %389 : vector<16xf32> to vector<16x1xf32>
      %391 = vector.broadcast %390 : vector<16x1xf32> to vector<16x16xf32>
      %392 = arith.subf %388, %391 : vector<16x16xf32>
      %393 = math.exp %392 : vector<16x16xf32>
      %cst_126 = arith.constant dense<0.000000e+00> : vector<16xf32>
      %394 = vector.multi_reduction <add>, %393, %cst_126 [1] : vector<16x16xf32> to vector<16xf32>
      %395 = vector.shape_cast %394 : vector<16xf32> to vector<16x1xf32>
      %396 = tpu.reciprocal %395 {approx = true} : vector<16x1xf32> -> vector<16x1xf32>
      %397 = vector.broadcast %396 : vector<16x1xf32> to vector<16x16xf32>
      %398 = arith.mulf %393, %397 : vector<16x16xf32>
      %399 = arith.truncf %398 : vector<16x16xf32> to vector<16x16xbf16>
      %cst_127 = arith.constant dense<0.000000e+00> : vector<16x16xf32>
      %400 = tpu.matmul %399, %387, %cst_127 {dimension_numbers = #tpu.dot_dimension_numbers<[1], [0], [0], [1], [0, 0, 1, 1], [], []>} : vector<16x16xbf16>, vector<16x16xbf16>, vector<16x16xf32> -> vector<16x16xf32>
      %401 = vector.extract_strided_slice %265 {offsets = [0, 112], sizes = [16, 16], strides = [1, 1]} : vector<16x128xf32> to vector<16x16xf32>
      %402 = arith.truncf %401 : vector<16x16xf32> to vector<16x16xbf16>
      %403 = vector.extract_strided_slice %266 {offsets = [0, 112], sizes = [16, 16], strides = [1, 1]} : vector<16x128xf32> to vector<16x16xf32>
      %404 = arith.truncf %403 : vector<16x16xf32> to vector<16x16xbf16>
      %405 = vector.extract_strided_slice %267 {offsets = [0, 112], sizes = [16, 16], strides = [1, 1]} : vector<16x128xf32> to vector<16x16xf32>
      %406 = arith.truncf %405 : vector<16x16xf32> to vector<16x16xbf16>
      %cst_128 = arith.constant dense<0.000000e+00> : vector<16x16xf32>
      %407 = tpu.matmul %402, %404, %cst_128 {dimension_numbers = #tpu.dot_dimension_numbers<[1], [1], [0], [0], [0, 0, 1, 0], [], []>} : vector<16x16xbf16>, vector<16x16xbf16>, vector<16x16xf32> -> vector<16x16xf32>
      %cst_129 = arith.constant dense<0xFF800000> : vector<16xf32>
      %408 = vector.multi_reduction <maximumf>, %407, %cst_129 [1] : vector<16x16xf32> to vector<16xf32>
      %409 = vector.shape_cast %408 : vector<16xf32> to vector<16x1xf32>
      %410 = vector.broadcast %409 : vector<16x1xf32> to vector<16x16xf32>
      %411 = arith.subf %407, %410 : vector<16x16xf32>
      %412 = math.exp %411 : vector<16x16xf32>
      %cst_130 = arith.constant dense<0.000000e+00> : vector<16xf32>
      %413 = vector.multi_reduction <add>, %412, %cst_130 [1] : vector<16x16xf32> to vector<16xf32>
      %414 = vector.shape_cast %413 : vector<16xf32> to vector<16x1xf32>
      %415 = tpu.reciprocal %414 {approx = true} : vector<16x1xf32> -> vector<16x1xf32>
      %416 = vector.broadcast %415 : vector<16x1xf32> to vector<16x16xf32>
      %417 = arith.mulf %412, %416 : vector<16x16xf32>
      %418 = arith.truncf %417 : vector<16x16xf32> to vector<16x16xbf16>
      %cst_131 = arith.constant dense<0.000000e+00> : vector<16x16xf32>
      %419 = tpu.matmul %418, %406, %cst_131 {dimension_numbers = #tpu.dot_dimension_numbers<[1], [0], [0], [1], [0, 0, 1, 1], [], []>} : vector<16x16xbf16>, vector<16x16xbf16>, vector<16x16xf32> -> vector<16x16xf32>
      %420 = tpu.concatenate %286, %305, %324, %343, %362, %381, %400, %419 in 1 : vector<16x16xf32>, vector<16x16xf32>, vector<16x16xf32>, vector<16x16xf32>, vector<16x16xf32>, vector<16x16xf32>, vector<16x16xf32>, vector<16x16xf32> -> vector<16x128xf32>
      %421 = vector.extract_strided_slice %262 {offsets = [16, 0], sizes = [16, 128], strides = [1, 1]} : vector<32x384xf32> to vector<16x128xf32>
      %cst_132 = arith.constant 2.500000e-01 : f32
      %422 = vector.broadcast %cst_132 : f32 to vector<16x128xf32>
      %423 = arith.mulf %421, %422 : vector<16x128xf32>
      %424 = vector.extract_strided_slice %262 {offsets = [16, 128], sizes = [16, 128], strides = [1, 1]} : vector<32x384xf32> to vector<16x128xf32>
      %425 = vector.extract_strided_slice %262 {offsets = [16, 256], sizes = [16, 128], strides = [1, 1]} : vector<32x384xf32> to vector<16x128xf32>
      %426 = vector.extract_strided_slice %423 {offsets = [0, 0], sizes = [16, 16], strides = [1, 1]} : vector<16x128xf32> to vector<16x16xf32>
      %427 = arith.truncf %426 : vector<16x16xf32> to vector<16x16xbf16>
      %428 = vector.extract_strided_slice %424 {offsets = [0, 0], sizes = [16, 16], strides = [1, 1]} : vector<16x128xf32> to vector<16x16xf32>
      %429 = arith.truncf %428 : vector<16x16xf32> to vector<16x16xbf16>
      %430 = vector.extract_strided_slice %425 {offsets = [0, 0], sizes = [16, 16], strides = [1, 1]} : vector<16x128xf32> to vector<16x16xf32>
      %431 = arith.truncf %430 : vector<16x16xf32> to vector<16x16xbf16>
      %cst_133 = arith.constant dense<0.000000e+00> : vector<16x16xf32>
      %432 = tpu.matmul %427, %429, %cst_133 {dimension_numbers = #tpu.dot_dimension_numbers<[1], [1], [0], [0], [0, 0, 1, 0], [], []>} : vector<16x16xbf16>, vector<16x16xbf16>, vector<16x16xf32> -> vector<16x16xf32>
      %cst_134 = arith.constant dense<0xFF800000> : vector<16xf32>
      %433 = vector.multi_reduction <maximumf>, %432, %cst_134 [1] : vector<16x16xf32> to vector<16xf32>
      %434 = vector.shape_cast %433 : vector<16xf32> to vector<16x1xf32>
      %435 = vector.broadcast %434 : vector<16x1xf32> to vector<16x16xf32>
      %436 = arith.subf %432, %435 : vector<16x16xf32>
      %437 = math.exp %436 : vector<16x16xf32>
      %cst_135 = arith.constant dense<0.000000e+00> : vector<16xf32>
      %438 = vector.multi_reduction <add>, %437, %cst_135 [1] : vector<16x16xf32> to vector<16xf32>
      %439 = vector.shape_cast %438 : vector<16xf32> to vector<16x1xf32>
      %440 = tpu.reciprocal %439 {approx = true} : vector<16x1xf32> -> vector<16x1xf32>
      %441 = vector.broadcast %440 : vector<16x1xf32> to vector<16x16xf32>
      %442 = arith.mulf %437, %441 : vector<16x16xf32>
      %443 = arith.truncf %442 : vector<16x16xf32> to vector<16x16xbf16>
      %cst_136 = arith.constant dense<0.000000e+00> : vector<16x16xf32>
      %444 = tpu.matmul %443, %431, %cst_136 {dimension_numbers = #tpu.dot_dimension_numbers<[1], [0], [0], [1], [0, 0, 1, 1], [], []>} : vector<16x16xbf16>, vector<16x16xbf16>, vector<16x16xf32> -> vector<16x16xf32>
      %445 = vector.extract_strided_slice %423 {offsets = [0, 16], sizes = [16, 16], strides = [1, 1]} : vector<16x128xf32> to vector<16x16xf32>
      %446 = arith.truncf %445 : vector<16x16xf32> to vector<16x16xbf16>
      %447 = vector.extract_strided_slice %424 {offsets = [0, 16], sizes = [16, 16], strides = [1, 1]} : vector<16x128xf32> to vector<16x16xf32>
      %448 = arith.truncf %447 : vector<16x16xf32> to vector<16x16xbf16>
      %449 = vector.extract_strided_slice %425 {offsets = [0, 16], sizes = [16, 16], strides = [1, 1]} : vector<16x128xf32> to vector<16x16xf32>
      %450 = arith.truncf %449 : vector<16x16xf32> to vector<16x16xbf16>
      %cst_137 = arith.constant dense<0.000000e+00> : vector<16x16xf32>
      %451 = tpu.matmul %446, %448, %cst_137 {dimension_numbers = #tpu.dot_dimension_numbers<[1], [1], [0], [0], [0, 0, 1, 0], [], []>} : vector<16x16xbf16>, vector<16x16xbf16>, vector<16x16xf32> -> vector<16x16xf32>
      %cst_138 = arith.constant dense<0xFF800000> : vector<16xf32>
      %452 = vector.multi_reduction <maximumf>, %451, %cst_138 [1] : vector<16x16xf32> to vector<16xf32>
      %453 = vector.shape_cast %452 : vector<16xf32> to vector<16x1xf32>
      %454 = vector.broadcast %453 : vector<16x1xf32> to vector<16x16xf32>
      %455 = arith.subf %451, %454 : vector<16x16xf32>
      %456 = math.exp %455 : vector<16x16xf32>
      %cst_139 = arith.constant dense<0.000000e+00> : vector<16xf32>
      %457 = vector.multi_reduction <add>, %456, %cst_139 [1] : vector<16x16xf32> to vector<16xf32>
      %458 = vector.shape_cast %457 : vector<16xf32> to vector<16x1xf32>
      %459 = tpu.reciprocal %458 {approx = true} : vector<16x1xf32> -> vector<16x1xf32>
      %460 = vector.broadcast %459 : vector<16x1xf32> to vector<16x16xf32>
      %461 = arith.mulf %456, %460 : vector<16x16xf32>
      %462 = arith.truncf %461 : vector<16x16xf32> to vector<16x16xbf16>
      %cst_140 = arith.constant dense<0.000000e+00> : vector<16x16xf32>
      %463 = tpu.matmul %462, %450, %cst_140 {dimension_numbers = #tpu.dot_dimension_numbers<[1], [0], [0], [1], [0, 0, 1, 1], [], []>} : vector<16x16xbf16>, vector<16x16xbf16>, vector<16x16xf32> -> vector<16x16xf32>
      %464 = vector.extract_strided_slice %423 {offsets = [0, 32], sizes = [16, 16], strides = [1, 1]} : vector<16x128xf32> to vector<16x16xf32>
      %465 = arith.truncf %464 : vector<16x16xf32> to vector<16x16xbf16>
      %466 = vector.extract_strided_slice %424 {offsets = [0, 32], sizes = [16, 16], strides = [1, 1]} : vector<16x128xf32> to vector<16x16xf32>
      %467 = arith.truncf %466 : vector<16x16xf32> to vector<16x16xbf16>
      %468 = vector.extract_strided_slice %425 {offsets = [0, 32], sizes = [16, 16], strides = [1, 1]} : vector<16x128xf32> to vector<16x16xf32>
      %469 = arith.truncf %468 : vector<16x16xf32> to vector<16x16xbf16>
      %cst_141 = arith.constant dense<0.000000e+00> : vector<16x16xf32>
      %470 = tpu.matmul %465, %467, %cst_141 {dimension_numbers = #tpu.dot_dimension_numbers<[1], [1], [0], [0], [0, 0, 1, 0], [], []>} : vector<16x16xbf16>, vector<16x16xbf16>, vector<16x16xf32> -> vector<16x16xf32>
      %cst_142 = arith.constant dense<0xFF800000> : vector<16xf32>
      %471 = vector.multi_reduction <maximumf>, %470, %cst_142 [1] : vector<16x16xf32> to vector<16xf32>
      %472 = vector.shape_cast %471 : vector<16xf32> to vector<16x1xf32>
      %473 = vector.broadcast %472 : vector<16x1xf32> to vector<16x16xf32>
      %474 = arith.subf %470, %473 : vector<16x16xf32>
      %475 = math.exp %474 : vector<16x16xf32>
      %cst_143 = arith.constant dense<0.000000e+00> : vector<16xf32>
      %476 = vector.multi_reduction <add>, %475, %cst_143 [1] : vector<16x16xf32> to vector<16xf32>
      %477 = vector.shape_cast %476 : vector<16xf32> to vector<16x1xf32>
      %478 = tpu.reciprocal %477 {approx = true} : vector<16x1xf32> -> vector<16x1xf32>
      %479 = vector.broadcast %478 : vector<16x1xf32> to vector<16x16xf32>
      %480 = arith.mulf %475, %479 : vector<16x16xf32>
      %481 = arith.truncf %480 : vector<16x16xf32> to vector<16x16xbf16>
      %cst_144 = arith.constant dense<0.000000e+00> : vector<16x16xf32>
      %482 = tpu.matmul %481, %469, %cst_144 {dimension_numbers = #tpu.dot_dimension_numbers<[1], [0], [0], [1], [0, 0, 1, 1], [], []>} : vector<16x16xbf16>, vector<16x16xbf16>, vector<16x16xf32> -> vector<16x16xf32>
      %483 = vector.extract_strided_slice %423 {offsets = [0, 48], sizes = [16, 16], strides = [1, 1]} : vector<16x128xf32> to vector<16x16xf32>
      %484 = arith.truncf %483 : vector<16x16xf32> to vector<16x16xbf16>
      %485 = vector.extract_strided_slice %424 {offsets = [0, 48], sizes = [16, 16], strides = [1, 1]} : vector<16x128xf32> to vector<16x16xf32>
      %486 = arith.truncf %485 : vector<16x16xf32> to vector<16x16xbf16>
      %487 = vector.extract_strided_slice %425 {offsets = [0, 48], sizes = [16, 16], strides = [1, 1]} : vector<16x128xf32> to vector<16x16xf32>
      %488 = arith.truncf %487 : vector<16x16xf32> to vector<16x16xbf16>
      %cst_145 = arith.constant dense<0.000000e+00> : vector<16x16xf32>
      %489 = tpu.matmul %484, %486, %cst_145 {dimension_numbers = #tpu.dot_dimension_numbers<[1], [1], [0], [0], [0, 0, 1, 0], [], []>} : vector<16x16xbf16>, vector<16x16xbf16>, vector<16x16xf32> -> vector<16x16xf32>
      %cst_146 = arith.constant dense<0xFF800000> : vector<16xf32>
      %490 = vector.multi_reduction <maximumf>, %489, %cst_146 [1] : vector<16x16xf32> to vector<16xf32>
      %491 = vector.shape_cast %490 : vector<16xf32> to vector<16x1xf32>
      %492 = vector.broadcast %491 : vector<16x1xf32> to vector<16x16xf32>
      %493 = arith.subf %489, %492 : vector<16x16xf32>
      %494 = math.exp %493 : vector<16x16xf32>
      %cst_147 = arith.constant dense<0.000000e+00> : vector<16xf32>
      %495 = vector.multi_reduction <add>, %494, %cst_147 [1] : vector<16x16xf32> to vector<16xf32>
      %496 = vector.shape_cast %495 : vector<16xf32> to vector<16x1xf32>
      %497 = tpu.reciprocal %496 {approx = true} : vector<16x1xf32> -> vector<16x1xf32>
      %498 = vector.broadcast %497 : vector<16x1xf32> to vector<16x16xf32>
      %499 = arith.mulf %494, %498 : vector<16x16xf32>
      %500 = arith.truncf %499 : vector<16x16xf32> to vector<16x16xbf16>
      %cst_148 = arith.constant dense<0.000000e+00> : vector<16x16xf32>
      %501 = tpu.matmul %500, %488, %cst_148 {dimension_numbers = #tpu.dot_dimension_numbers<[1], [0], [0], [1], [0, 0, 1, 1], [], []>} : vector<16x16xbf16>, vector<16x16xbf16>, vector<16x16xf32> -> vector<16x16xf32>
      %502 = vector.extract_strided_slice %423 {offsets = [0, 64], sizes = [16, 16], strides = [1, 1]} : vector<16x128xf32> to vector<16x16xf32>
      %503 = arith.truncf %502 : vector<16x16xf32> to vector<16x16xbf16>
      %504 = vector.extract_strided_slice %424 {offsets = [0, 64], sizes = [16, 16], strides = [1, 1]} : vector<16x128xf32> to vector<16x16xf32>
      %505 = arith.truncf %504 : vector<16x16xf32> to vector<16x16xbf16>
      %506 = vector.extract_strided_slice %425 {offsets = [0, 64], sizes = [16, 16], strides = [1, 1]} : vector<16x128xf32> to vector<16x16xf32>
      %507 = arith.truncf %506 : vector<16x16xf32> to vector<16x16xbf16>
      %cst_149 = arith.constant dense<0.000000e+00> : vector<16x16xf32>
      %508 = tpu.matmul %503, %505, %cst_149 {dimension_numbers = #tpu.dot_dimension_numbers<[1], [1], [0], [0], [0, 0, 1, 0], [], []>} : vector<16x16xbf16>, vector<16x16xbf16>, vector<16x16xf32> -> vector<16x16xf32>
      %cst_150 = arith.constant dense<0xFF800000> : vector<16xf32>
      %509 = vector.multi_reduction <maximumf>, %508, %cst_150 [1] : vector<16x16xf32> to vector<16xf32>
      %510 = vector.shape_cast %509 : vector<16xf32> to vector<16x1xf32>
      %511 = vector.broadcast %510 : vector<16x1xf32> to vector<16x16xf32>
      %512 = arith.subf %508, %511 : vector<16x16xf32>
      %513 = math.exp %512 : vector<16x16xf32>
      %cst_151 = arith.constant dense<0.000000e+00> : vector<16xf32>
      %514 = vector.multi_reduction <add>, %513, %cst_151 [1] : vector<16x16xf32> to vector<16xf32>
      %515 = vector.shape_cast %514 : vector<16xf32> to vector<16x1xf32>
      %516 = tpu.reciprocal %515 {approx = true} : vector<16x1xf32> -> vector<16x1xf32>
      %517 = vector.broadcast %516 : vector<16x1xf32> to vector<16x16xf32>
      %518 = arith.mulf %513, %517 : vector<16x16xf32>
      %519 = arith.truncf %518 : vector<16x16xf32> to vector<16x16xbf16>
      %cst_152 = arith.constant dense<0.000000e+00> : vector<16x16xf32>
      %520 = tpu.matmul %519, %507, %cst_152 {dimension_numbers = #tpu.dot_dimension_numbers<[1], [0], [0], [1], [0, 0, 1, 1], [], []>} : vector<16x16xbf16>, vector<16x16xbf16>, vector<16x16xf32> -> vector<16x16xf32>
      %521 = vector.extract_strided_slice %423 {offsets = [0, 80], sizes = [16, 16], strides = [1, 1]} : vector<16x128xf32> to vector<16x16xf32>
      %522 = arith.truncf %521 : vector<16x16xf32> to vector<16x16xbf16>
      %523 = vector.extract_strided_slice %424 {offsets = [0, 80], sizes = [16, 16], strides = [1, 1]} : vector<16x128xf32> to vector<16x16xf32>
      %524 = arith.truncf %523 : vector<16x16xf32> to vector<16x16xbf16>
      %525 = vector.extract_strided_slice %425 {offsets = [0, 80], sizes = [16, 16], strides = [1, 1]} : vector<16x128xf32> to vector<16x16xf32>
      %526 = arith.truncf %525 : vector<16x16xf32> to vector<16x16xbf16>
      %cst_153 = arith.constant dense<0.000000e+00> : vector<16x16xf32>
      %527 = tpu.matmul %522, %524, %cst_153 {dimension_numbers = #tpu.dot_dimension_numbers<[1], [1], [0], [0], [0, 0, 1, 0], [], []>} : vector<16x16xbf16>, vector<16x16xbf16>, vector<16x16xf32> -> vector<16x16xf32>
      %cst_154 = arith.constant dense<0xFF800000> : vector<16xf32>
      %528 = vector.multi_reduction <maximumf>, %527, %cst_154 [1] : vector<16x16xf32> to vector<16xf32>
      %529 = vector.shape_cast %528 : vector<16xf32> to vector<16x1xf32>
      %530 = vector.broadcast %529 : vector<16x1xf32> to vector<16x16xf32>
      %531 = arith.subf %527, %530 : vector<16x16xf32>
      %532 = math.exp %531 : vector<16x16xf32>
      %cst_155 = arith.constant dense<0.000000e+00> : vector<16xf32>
      %533 = vector.multi_reduction <add>, %532, %cst_155 [1] : vector<16x16xf32> to vector<16xf32>
      %534 = vector.shape_cast %533 : vector<16xf32> to vector<16x1xf32>
      %535 = tpu.reciprocal %534 {approx = true} : vector<16x1xf32> -> vector<16x1xf32>
      %536 = vector.broadcast %535 : vector<16x1xf32> to vector<16x16xf32>
      %537 = arith.mulf %532, %536 : vector<16x16xf32>
      %538 = arith.truncf %537 : vector<16x16xf32> to vector<16x16xbf16>
      %cst_156 = arith.constant dense<0.000000e+00> : vector<16x16xf32>
      %539 = tpu.matmul %538, %526, %cst_156 {dimension_numbers = #tpu.dot_dimension_numbers<[1], [0], [0], [1], [0, 0, 1, 1], [], []>} : vector<16x16xbf16>, vector<16x16xbf16>, vector<16x16xf32> -> vector<16x16xf32>
      %540 = vector.extract_strided_slice %423 {offsets = [0, 96], sizes = [16, 16], strides = [1, 1]} : vector<16x128xf32> to vector<16x16xf32>
      %541 = arith.truncf %540 : vector<16x16xf32> to vector<16x16xbf16>
      %542 = vector.extract_strided_slice %424 {offsets = [0, 96], sizes = [16, 16], strides = [1, 1]} : vector<16x128xf32> to vector<16x16xf32>
      %543 = arith.truncf %542 : vector<16x16xf32> to vector<16x16xbf16>
      %544 = vector.extract_strided_slice %425 {offsets = [0, 96], sizes = [16, 16], strides = [1, 1]} : vector<16x128xf32> to vector<16x16xf32>
      %545 = arith.truncf %544 : vector<16x16xf32> to vector<16x16xbf16>
      %cst_157 = arith.constant dense<0.000000e+00> : vector<16x16xf32>
      %546 = tpu.matmul %541, %543, %cst_157 {dimension_numbers = #tpu.dot_dimension_numbers<[1], [1], [0], [0], [0, 0, 1, 0], [], []>} : vector<16x16xbf16>, vector<16x16xbf16>, vector<16x16xf32> -> vector<16x16xf32>
      %cst_158 = arith.constant dense<0xFF800000> : vector<16xf32>
      %547 = vector.multi_reduction <maximumf>, %546, %cst_158 [1] : vector<16x16xf32> to vector<16xf32>
      %548 = vector.shape_cast %547 : vector<16xf32> to vector<16x1xf32>
      %549 = vector.broadcast %548 : vector<16x1xf32> to vector<16x16xf32>
      %550 = arith.subf %546, %549 : vector<16x16xf32>
      %551 = math.exp %550 : vector<16x16xf32>
      %cst_159 = arith.constant dense<0.000000e+00> : vector<16xf32>
      %552 = vector.multi_reduction <add>, %551, %cst_159 [1] : vector<16x16xf32> to vector<16xf32>
      %553 = vector.shape_cast %552 : vector<16xf32> to vector<16x1xf32>
      %554 = tpu.reciprocal %553 {approx = true} : vector<16x1xf32> -> vector<16x1xf32>
      %555 = vector.broadcast %554 : vector<16x1xf32> to vector<16x16xf32>
      %556 = arith.mulf %551, %555 : vector<16x16xf32>
      %557 = arith.truncf %556 : vector<16x16xf32> to vector<16x16xbf16>
      %cst_160 = arith.constant dense<0.000000e+00> : vector<16x16xf32>
      %558 = tpu.matmul %557, %545, %cst_160 {dimension_numbers = #tpu.dot_dimension_numbers<[1], [0], [0], [1], [0, 0, 1, 1], [], []>} : vector<16x16xbf16>, vector<16x16xbf16>, vector<16x16xf32> -> vector<16x16xf32>
      %559 = vector.extract_strided_slice %423 {offsets = [0, 112], sizes = [16, 16], strides = [1, 1]} : vector<16x128xf32> to vector<16x16xf32>
      %560 = arith.truncf %559 : vector<16x16xf32> to vector<16x16xbf16>
      %561 = vector.extract_strided_slice %424 {offsets = [0, 112], sizes = [16, 16], strides = [1, 1]} : vector<16x128xf32> to vector<16x16xf32>
      %562 = arith.truncf %561 : vector<16x16xf32> to vector<16x16xbf16>
      %563 = vector.extract_strided_slice %425 {offsets = [0, 112], sizes = [16, 16], strides = [1, 1]} : vector<16x128xf32> to vector<16x16xf32>
      %564 = arith.truncf %563 : vector<16x16xf32> to vector<16x16xbf16>
      %cst_161 = arith.constant dense<0.000000e+00> : vector<16x16xf32>
      %565 = tpu.matmul %560, %562, %cst_161 {dimension_numbers = #tpu.dot_dimension_numbers<[1], [1], [0], [0], [0, 0, 1, 0], [], []>} : vector<16x16xbf16>, vector<16x16xbf16>, vector<16x16xf32> -> vector<16x16xf32>
      %cst_162 = arith.constant dense<0xFF800000> : vector<16xf32>
      %566 = vector.multi_reduction <maximumf>, %565, %cst_162 [1] : vector<16x16xf32> to vector<16xf32>
      %567 = vector.shape_cast %566 : vector<16xf32> to vector<16x1xf32>
      %568 = vector.broadcast %567 : vector<16x1xf32> to vector<16x16xf32>
      %569 = arith.subf %565, %568 : vector<16x16xf32>
      %570 = math.exp %569 : vector<16x16xf32>
      %cst_163 = arith.constant dense<0.000000e+00> : vector<16xf32>
      %571 = vector.multi_reduction <add>, %570, %cst_163 [1] : vector<16x16xf32> to vector<16xf32>
      %572 = vector.shape_cast %571 : vector<16xf32> to vector<16x1xf32>
      %573 = tpu.reciprocal %572 {approx = true} : vector<16x1xf32> -> vector<16x1xf32>
      %574 = vector.broadcast %573 : vector<16x1xf32> to vector<16x16xf32>
      %575 = arith.mulf %570, %574 : vector<16x16xf32>
      %576 = arith.truncf %575 : vector<16x16xf32> to vector<16x16xbf16>
      %cst_164 = arith.constant dense<0.000000e+00> : vector<16x16xf32>
      %577 = tpu.matmul %576, %564, %cst_164 {dimension_numbers = #tpu.dot_dimension_numbers<[1], [0], [0], [1], [0, 0, 1, 1], [], []>} : vector<16x16xbf16>, vector<16x16xbf16>, vector<16x16xf32> -> vector<16x16xf32>
      %578 = tpu.concatenate %444, %463, %482, %501, %520, %539, %558, %577 in 1 : vector<16x16xf32>, vector<16x16xf32>, vector<16x16xf32>, vector<16x16xf32>, vector<16x16xf32>, vector<16x16xf32>, vector<16x16xf32>, vector<16x16xf32> -> vector<16x128xf32>
      %579 = tpu.concatenate %420, %578 in 0 : vector<16x128xf32>, vector<16x128xf32> -> vector<32x128xf32>
      %580 = arith.truncf %579 : vector<32x128xf32> to vector<32x128xbf16>
      %cst_165 = arith.constant dense<0.000000e+00> : vector<32x128xf32>
      %581 = tpu.matmul %580, %257, %cst_165 {dimension_numbers = #tpu.dot_dimension_numbers<[1], [0], [0], [1], [0, 0, 1, 1], [], []>} : vector<32x128xbf16>, vector<128x128xbf16>, vector<32x128xf32> -> vector<32x128xf32>
      %582 = vector.broadcast %258 : vector<1x128xf32> to vector<32x128xf32>
      %583 = arith.addf %581, %582 : vector<32x128xf32>
      %c0_166 = arith.constant 0 : index
      %c0_167 = arith.constant 0 : index
      %584 = vector.load %arg20[%c0_166, %c0_167] : memref<32x128xf32, #tpu.memory_space<vmem>>, vector<32x128xf32>
      tpu.vector_store %arg20[%c0_166, %c0_167], %583 {strides = array<i32>} : memref<32x128xf32, #tpu.memory_space<vmem>>, vector<32x128xf32>,
      %c0_168 = arith.constant 0 : index
      %c0_169 = arith.constant 0 : index
      %585 = vector.load %arg19[%c0_168, %c0_169] : memref<32x128xf32, #tpu.memory_space<vmem>>, vector<32x128xf32>
      tpu.vector_store %arg19[%c0_168, %c0_169], %583 {strides = array<i32>} : memref<32x128xf32, #tpu.memory_space<vmem>>, vector<32x128xf32>,
    } else {
    }
    %c0 = arith.constant 0 : index
    %c0_1 = arith.constant 0 : index
    %3 = vector.load %arg19[%c0, %c0_1] : memref<32x128xf32, #tpu.memory_space<vmem>>, vector<32x128xf32>
    %c0_2 = arith.constant 0 : index
    %c0_3 = arith.constant 0 : index
    %c0_4 = arith.constant 0 : index
    %4 = vector.load %arg7[%c0_2, %c0_3, %c0_4] : memref<1x128x384xbf16, #tpu.memory_space<vmem>>, vector<1x128x384xbf16>
    %5 = vector.shape_cast %4 : vector<1x128x384xbf16> to vector<128x384xbf16>
    %c0_5 = arith.constant 0 : index
    %c0_6 = arith.constant 0 : index
    %c0_7 = arith.constant 0 : index
    %6 = vector.load %arg8[%c0_5, %c0_6, %c0_7] : memref<1x1x384xf32, #tpu.memory_space<vmem>>, vector<1x1x384xf32>
    %7 = vector.shape_cast %6 : vector<1x1x384xf32> to vector<1x384xf32>
    %c0_8 = arith.constant 0 : index
    %c0_9 = arith.constant 0 : index
    %c0_10 = arith.constant 0 : index
    %8 = vector.load %arg9[%c0_8, %c0_9, %c0_10] : memref<1x128x128xbf16, #tpu.memory_space<vmem>>, vector<1x128x128xbf16>
    %9 = vector.shape_cast %8 : vector<1x128x128xbf16> to vector<128x128xbf16>
    %c0_11 = arith.constant 0 : index
    %c0_12 = arith.constant 0 : index
    %c0_13 = arith.constant 0 : index
    %10 = vector.load %arg10[%c0_11, %c0_12, %c0_13] : memref<1x1x128xf32, #tpu.memory_space<vmem>>, vector<1x1x128xf32>
    %11 = vector.shape_cast %10 : vector<1x1x128xf32> to vector<1x128xf32>
    %12 = arith.truncf %3 : vector<32x128xf32> to vector<32x128xbf16>
    %cst = arith.constant dense<0.000000e+00> : vector<32x384xf32>
    %13 = tpu.matmul %12, %5, %cst {dimension_numbers = #tpu.dot_dimension_numbers<[1], [0], [0], [1], [0, 0, 1, 1], [], []>} : vector<32x128xbf16>, vector<128x384xbf16>, vector<32x384xf32> -> vector<32x384xf32>
    %14 = vector.broadcast %7 : vector<1x384xf32> to vector<32x384xf32>
    %15 = arith.addf %13, %14 : vector<32x384xf32>
    %16 = vector.extract_strided_slice %15 {offsets = [0, 0], sizes = [16, 128], strides = [1, 1]} : vector<32x384xf32> to vector<16x128xf32>
    %cst_14 = arith.constant 0.176776692 : f32
    %17 = vector.broadcast %cst_14 : f32 to vector<16x128xf32>
    %18 = arith.mulf %16, %17 : vector<16x128xf32>
    %19 = vector.extract_strided_slice %15 {offsets = [0, 128], sizes = [16, 128], strides = [1, 1]} : vector<32x384xf32> to vector<16x128xf32>
    %20 = vector.extract_strided_slice %15 {offsets = [0, 256], sizes = [16, 128], strides = [1, 1]} : vector<32x384xf32> to vector<16x128xf32>
    %21 = vector.extract_strided_slice %18 {offsets = [0, 0], sizes = [16, 32], strides = [1, 1]} : vector<16x128xf32> to vector<16x32xf32>
    %22 = arith.truncf %21 : vector<16x32xf32> to vector<16x32xbf16>
    %23 = vector.extract_strided_slice %19 {offsets = [0, 0], sizes = [16, 32], strides = [1, 1]} : vector<16x128xf32> to vector<16x32xf32>
    %24 = arith.truncf %23 : vector<16x32xf32> to vector<16x32xbf16>
    %25 = vector.extract_strided_slice %20 {offsets = [0, 0], sizes = [16, 32], strides = [1, 1]} : vector<16x128xf32> to vector<16x32xf32>
    %26 = arith.truncf %25 : vector<16x32xf32> to vector<16x32xbf16>
    %cst_15 = arith.constant dense<0.000000e+00> : vector<16x16xf32>
    %27 = tpu.matmul %22, %24, %cst_15 {dimension_numbers = #tpu.dot_dimension_numbers<[1], [1], [0], [0], [0, 0, 1, 0], [], []>} : vector<16x32xbf16>, vector<16x32xbf16>, vector<16x16xf32> -> vector<16x16xf32>
    %cst_16 = arith.constant dense<0xFF800000> : vector<16xf32>
    %28 = vector.multi_reduction <maximumf>, %27, %cst_16 [1] : vector<16x16xf32> to vector<16xf32>
    %29 = vector.shape_cast %28 : vector<16xf32> to vector<16x1xf32>
    %30 = vector.broadcast %29 : vector<16x1xf32> to vector<16x16xf32>
    %31 = arith.subf %27, %30 : vector<16x16xf32>
    %32 = math.exp %31 : vector<16x16xf32>
    %cst_17 = arith.constant dense<0.000000e+00> : vector<16xf32>
    %33 = vector.multi_reduction <add>, %32, %cst_17 [1] : vector<16x16xf32> to vector<16xf32>
    %34 = vector.shape_cast %33 : vector<16xf32> to vector<16x1xf32>
    %35 = tpu.reciprocal %34 {approx = true} : vector<16x1xf32> -> vector<16x1xf32>
    %36 = vector.broadcast %35 : vector<16x1xf32> to vector<16x16xf32>
    %37 = arith.mulf %32, %36 : vector<16x16xf32>
    %38 = arith.truncf %37 : vector<16x16xf32> to vector<16x16xbf16>
    %cst_18 = arith.constant dense<0.000000e+00> : vector<16x32xf32>
    %39 = tpu.matmul %38, %26, %cst_18 {dimension_numbers = #tpu.dot_dimension_numbers<[1], [0], [0], [1], [0, 0, 1, 1], [], []>} : vector<16x16xbf16>, vector<16x32xbf16>, vector<16x32xf32> -> vector<16x32xf32>
    %40 = vector.extract_strided_slice %18 {offsets = [0, 32], sizes = [16, 32], strides = [1, 1]} : vector<16x128xf32> to vector<16x32xf32>
    %41 = arith.truncf %40 : vector<16x32xf32> to vector<16x32xbf16>
    %42 = vector.extract_strided_slice %19 {offsets = [0, 32], sizes = [16, 32], strides = [1, 1]} : vector<16x128xf32> to vector<16x32xf32>
    %43 = arith.truncf %42 : vector<16x32xf32> to vector<16x32xbf16>
    %44 = vector.extract_strided_slice %20 {offsets = [0, 32], sizes = [16, 32], strides = [1, 1]} : vector<16x128xf32> to vector<16x32xf32>
    %45 = arith.truncf %44 : vector<16x32xf32> to vector<16x32xbf16>
    %cst_19 = arith.constant dense<0.000000e+00> : vector<16x16xf32>
    %46 = tpu.matmul %41, %43, %cst_19 {dimension_numbers = #tpu.dot_dimension_numbers<[1], [1], [0], [0], [0, 0, 1, 0], [], []>} : vector<16x32xbf16>, vector<16x32xbf16>, vector<16x16xf32> -> vector<16x16xf32>
    %cst_20 = arith.constant dense<0xFF800000> : vector<16xf32>
    %47 = vector.multi_reduction <maximumf>, %46, %cst_20 [1] : vector<16x16xf32> to vector<16xf32>
    %48 = vector.shape_cast %47 : vector<16xf32> to vector<16x1xf32>
    %49 = vector.broadcast %48 : vector<16x1xf32> to vector<16x16xf32>
    %50 = arith.subf %46, %49 : vector<16x16xf32>
    %51 = math.exp %50 : vector<16x16xf32>
    %cst_21 = arith.constant dense<0.000000e+00> : vector<16xf32>
    %52 = vector.multi_reduction <add>, %51, %cst_21 [1] : vector<16x16xf32> to vector<16xf32>
    %53 = vector.shape_cast %52 : vector<16xf32> to vector<16x1xf32>
    %54 = tpu.reciprocal %53 {approx = true} : vector<16x1xf32> -> vector<16x1xf32>
    %55 = vector.broadcast %54 : vector<16x1xf32> to vector<16x16xf32>
    %56 = arith.mulf %51, %55 : vector<16x16xf32>
    %57 = arith.truncf %56 : vector<16x16xf32> to vector<16x16xbf16>
    %cst_22 = arith.constant dense<0.000000e+00> : vector<16x32xf32>
    %58 = tpu.matmul %57, %45, %cst_22 {dimension_numbers = #tpu.dot_dimension_numbers<[1], [0], [0], [1], [0, 0, 1, 1], [], []>} : vector<16x16xbf16>, vector<16x32xbf16>, vector<16x32xf32> -> vector<16x32xf32>
    %59 = vector.extract_strided_slice %18 {offsets = [0, 64], sizes = [16, 32], strides = [1, 1]} : vector<16x128xf32> to vector<16x32xf32>
    %60 = arith.truncf %59 : vector<16x32xf32> to vector<16x32xbf16>
    %61 = vector.extract_strided_slice %19 {offsets = [0, 64], sizes = [16, 32], strides = [1, 1]} : vector<16x128xf32> to vector<16x32xf32>
    %62 = arith.truncf %61 : vector<16x32xf32> to vector<16x32xbf16>
    %63 = vector.extract_strided_slice %20 {offsets = [0, 64], sizes = [16, 32], strides = [1, 1]} : vector<16x128xf32> to vector<16x32xf32>
    %64 = arith.truncf %63 : vector<16x32xf32> to vector<16x32xbf16>
    %cst_23 = arith.constant dense<0.000000e+00> : vector<16x16xf32>
    %65 = tpu.matmul %60, %62, %cst_23 {dimension_numbers = #tpu.dot_dimension_numbers<[1], [1], [0], [0], [0, 0, 1, 0], [], []>} : vector<16x32xbf16>, vector<16x32xbf16>, vector<16x16xf32> -> vector<16x16xf32>
    %cst_24 = arith.constant dense<0xFF800000> : vector<16xf32>
    %66 = vector.multi_reduction <maximumf>, %65, %cst_24 [1] : vector<16x16xf32> to vector<16xf32>
    %67 = vector.shape_cast %66 : vector<16xf32> to vector<16x1xf32>
    %68 = vector.broadcast %67 : vector<16x1xf32> to vector<16x16xf32>
    %69 = arith.subf %65, %68 : vector<16x16xf32>
    %70 = math.exp %69 : vector<16x16xf32>
    %cst_25 = arith.constant dense<0.000000e+00> : vector<16xf32>
    %71 = vector.multi_reduction <add>, %70, %cst_25 [1] : vector<16x16xf32> to vector<16xf32>
    %72 = vector.shape_cast %71 : vector<16xf32> to vector<16x1xf32>
    %73 = tpu.reciprocal %72 {approx = true} : vector<16x1xf32> -> vector<16x1xf32>
    %74 = vector.broadcast %73 : vector<16x1xf32> to vector<16x16xf32>
    %75 = arith.mulf %70, %74 : vector<16x16xf32>
    %76 = arith.truncf %75 : vector<16x16xf32> to vector<16x16xbf16>
    %cst_26 = arith.constant dense<0.000000e+00> : vector<16x32xf32>
    %77 = tpu.matmul %76, %64, %cst_26 {dimension_numbers = #tpu.dot_dimension_numbers<[1], [0], [0], [1], [0, 0, 1, 1], [], []>} : vector<16x16xbf16>, vector<16x32xbf16>, vector<16x32xf32> -> vector<16x32xf32>
    %78 = vector.extract_strided_slice %18 {offsets = [0, 96], sizes = [16, 32], strides = [1, 1]} : vector<16x128xf32> to vector<16x32xf32>
    %79 = arith.truncf %78 : vector<16x32xf32> to vector<16x32xbf16>
    %80 = vector.extract_strided_slice %19 {offsets = [0, 96], sizes = [16, 32], strides = [1, 1]} : vector<16x128xf32> to vector<16x32xf32>
    %81 = arith.truncf %80 : vector<16x32xf32> to vector<16x32xbf16>
    %82 = vector.extract_strided_slice %20 {offsets = [0, 96], sizes = [16, 32], strides = [1, 1]} : vector<16x128xf32> to vector<16x32xf32>
    %83 = arith.truncf %82 : vector<16x32xf32> to vector<16x32xbf16>
    %cst_27 = arith.constant dense<0.000000e+00> : vector<16x16xf32>
    %84 = tpu.matmul %79, %81, %cst_27 {dimension_numbers = #tpu.dot_dimension_numbers<[1], [1], [0], [0], [0, 0, 1, 0], [], []>} : vector<16x32xbf16>, vector<16x32xbf16>, vector<16x16xf32> -> vector<16x16xf32>
    %cst_28 = arith.constant dense<0xFF800000> : vector<16xf32>
    %85 = vector.multi_reduction <maximumf>, %84, %cst_28 [1] : vector<16x16xf32> to vector<16xf32>
    %86 = vector.shape_cast %85 : vector<16xf32> to vector<16x1xf32>
    %87 = vector.broadcast %86 : vector<16x1xf32> to vector<16x16xf32>
    %88 = arith.subf %84, %87 : vector<16x16xf32>
    %89 = math.exp %88 : vector<16x16xf32>
    %cst_29 = arith.constant dense<0.000000e+00> : vector<16xf32>
    %90 = vector.multi_reduction <add>, %89, %cst_29 [1] : vector<16x16xf32> to vector<16xf32>
    %91 = vector.shape_cast %90 : vector<16xf32> to vector<16x1xf32>
    %92 = tpu.reciprocal %91 {approx = true} : vector<16x1xf32> -> vector<16x1xf32>
    %93 = vector.broadcast %92 : vector<16x1xf32> to vector<16x16xf32>
    %94 = arith.mulf %89, %93 : vector<16x16xf32>
    %95 = arith.truncf %94 : vector<16x16xf32> to vector<16x16xbf16>
    %cst_30 = arith.constant dense<0.000000e+00> : vector<16x32xf32>
    %96 = tpu.matmul %95, %83, %cst_30 {dimension_numbers = #tpu.dot_dimension_numbers<[1], [0], [0], [1], [0, 0, 1, 1], [], []>} : vector<16x16xbf16>, vector<16x32xbf16>, vector<16x32xf32> -> vector<16x32xf32>
    %97 = tpu.concatenate %39, %58, %77, %96 in 1 : vector<16x32xf32>, vector<16x32xf32>, vector<16x32xf32>, vector<16x32xf32> -> vector<16x128xf32>
    %98 = vector.extract_strided_slice %15 {offsets = [16, 0], sizes = [16, 128], strides = [1, 1]} : vector<32x384xf32> to vector<16x128xf32>
    %cst_31 = arith.constant 0.176776692 : f32
    %99 = vector.broadcast %cst_31 : f32 to vector<16x128xf32>
    %100 = arith.mulf %98, %99 : vector<16x128xf32>
    %101 = vector.extract_strided_slice %15 {offsets = [16, 128], sizes = [16, 128], strides = [1, 1]} : vector<32x384xf32> to vector<16x128xf32>
    %102 = vector.extract_strided_slice %15 {offsets = [16, 256], sizes = [16, 128], strides = [1, 1]} : vector<32x384xf32> to vector<16x128xf32>
    %103 = vector.extract_strided_slice %100 {offsets = [0, 0], sizes = [16, 32], strides = [1, 1]} : vector<16x128xf32> to vector<16x32xf32>
    %104 = arith.truncf %103 : vector<16x32xf32> to vector<16x32xbf16>
    %105 = vector.extract_strided_slice %101 {offsets = [0, 0], sizes = [16, 32], strides = [1, 1]} : vector<16x128xf32> to vector<16x32xf32>
    %106 = arith.truncf %105 : vector<16x32xf32> to vector<16x32xbf16>
    %107 = vector.extract_strided_slice %102 {offsets = [0, 0], sizes = [16, 32], strides = [1, 1]} : vector<16x128xf32> to vector<16x32xf32>
    %108 = arith.truncf %107 : vector<16x32xf32> to vector<16x32xbf16>
    %cst_32 = arith.constant dense<0.000000e+00> : vector<16x16xf32>
    %109 = tpu.matmul %104, %106, %cst_32 {dimension_numbers = #tpu.dot_dimension_numbers<[1], [1], [0], [0], [0, 0, 1, 0], [], []>} : vector<16x32xbf16>, vector<16x32xbf16>, vector<16x16xf32> -> vector<16x16xf32>
    %cst_33 = arith.constant dense<0xFF800000> : vector<16xf32>
    %110 = vector.multi_reduction <maximumf>, %109, %cst_33 [1] : vector<16x16xf32> to vector<16xf32>
    %111 = vector.shape_cast %110 : vector<16xf32> to vector<16x1xf32>
    %112 = vector.broadcast %111 : vector<16x1xf32> to vector<16x16xf32>
    %113 = arith.subf %109, %112 : vector<16x16xf32>
    %114 = math.exp %113 : vector<16x16xf32>
    %cst_34 = arith.constant dense<0.000000e+00> : vector<16xf32>
    %115 = vector.multi_reduction <add>, %114, %cst_34 [1] : vector<16x16xf32> to vector<16xf32>
    %116 = vector.shape_cast %115 : vector<16xf32> to vector<16x1xf32>
    %117 = tpu.reciprocal %116 {approx = true} : vector<16x1xf32> -> vector<16x1xf32>
    %118 = vector.broadcast %117 : vector<16x1xf32> to vector<16x16xf32>
    %119 = arith.mulf %114, %118 : vector<16x16xf32>
    %120 = arith.truncf %119 : vector<16x16xf32> to vector<16x16xbf16>
    %cst_35 = arith.constant dense<0.000000e+00> : vector<16x32xf32>
    %121 = tpu.matmul %120, %108, %cst_35 {dimension_numbers = #tpu.dot_dimension_numbers<[1], [0], [0], [1], [0, 0, 1, 1], [], []>} : vector<16x16xbf16>, vector<16x32xbf16>, vector<16x32xf32> -> vector<16x32xf32>
    %122 = vector.extract_strided_slice %100 {offsets = [0, 32], sizes = [16, 32], strides = [1, 1]} : vector<16x128xf32> to vector<16x32xf32>
    %123 = arith.truncf %122 : vector<16x32xf32> to vector<16x32xbf16>
    %124 = vector.extract_strided_slice %101 {offsets = [0, 32], sizes = [16, 32], strides = [1, 1]} : vector<16x128xf32> to vector<16x32xf32>
    %125 = arith.truncf %124 : vector<16x32xf32> to vector<16x32xbf16>
    %126 = vector.extract_strided_slice %102 {offsets = [0, 32], sizes = [16, 32], strides = [1, 1]} : vector<16x128xf32> to vector<16x32xf32>
    %127 = arith.truncf %126 : vector<16x32xf32> to vector<16x32xbf16>
    %cst_36 = arith.constant dense<0.000000e+00> : vector<16x16xf32>
    %128 = tpu.matmul %123, %125, %cst_36 {dimension_numbers = #tpu.dot_dimension_numbers<[1], [1], [0], [0], [0, 0, 1, 0], [], []>} : vector<16x32xbf16>, vector<16x32xbf16>, vector<16x16xf32> -> vector<16x16xf32>
    %cst_37 = arith.constant dense<0xFF800000> : vector<16xf32>
    %129 = vector.multi_reduction <maximumf>, %128, %cst_37 [1] : vector<16x16xf32> to vector<16xf32>
    %130 = vector.shape_cast %129 : vector<16xf32> to vector<16x1xf32>
    %131 = vector.broadcast %130 : vector<16x1xf32> to vector<16x16xf32>
    %132 = arith.subf %128, %131 : vector<16x16xf32>
    %133 = math.exp %132 : vector<16x16xf32>
    %cst_38 = arith.constant dense<0.000000e+00> : vector<16xf32>
    %134 = vector.multi_reduction <add>, %133, %cst_38 [1] : vector<16x16xf32> to vector<16xf32>
    %135 = vector.shape_cast %134 : vector<16xf32> to vector<16x1xf32>
    %136 = tpu.reciprocal %135 {approx = true} : vector<16x1xf32> -> vector<16x1xf32>
    %137 = vector.broadcast %136 : vector<16x1xf32> to vector<16x16xf32>
    %138 = arith.mulf %133, %137 : vector<16x16xf32>
    %139 = arith.truncf %138 : vector<16x16xf32> to vector<16x16xbf16>
    %cst_39 = arith.constant dense<0.000000e+00> : vector<16x32xf32>
    %140 = tpu.matmul %139, %127, %cst_39 {dimension_numbers = #tpu.dot_dimension_numbers<[1], [0], [0], [1], [0, 0, 1, 1], [], []>} : vector<16x16xbf16>, vector<16x32xbf16>, vector<16x32xf32> -> vector<16x32xf32>
    %141 = vector.extract_strided_slice %100 {offsets = [0, 64], sizes = [16, 32], strides = [1, 1]} : vector<16x128xf32> to vector<16x32xf32>
    %142 = arith.truncf %141 : vector<16x32xf32> to vector<16x32xbf16>
    %143 = vector.extract_strided_slice %101 {offsets = [0, 64], sizes = [16, 32], strides = [1, 1]} : vector<16x128xf32> to vector<16x32xf32>
    %144 = arith.truncf %143 : vector<16x32xf32> to vector<16x32xbf16>
    %145 = vector.extract_strided_slice %102 {offsets = [0, 64], sizes = [16, 32], strides = [1, 1]} : vector<16x128xf32> to vector<16x32xf32>
    %146 = arith.truncf %145 : vector<16x32xf32> to vector<16x32xbf16>
    %cst_40 = arith.constant dense<0.000000e+00> : vector<16x16xf32>
    %147 = tpu.matmul %142, %144, %cst_40 {dimension_numbers = #tpu.dot_dimension_numbers<[1], [1], [0], [0], [0, 0, 1, 0], [], []>} : vector<16x32xbf16>, vector<16x32xbf16>, vector<16x16xf32> -> vector<16x16xf32>
    %cst_41 = arith.constant dense<0xFF800000> : vector<16xf32>
    %148 = vector.multi_reduction <maximumf>, %147, %cst_41 [1] : vector<16x16xf32> to vector<16xf32>
    %149 = vector.shape_cast %148 : vector<16xf32> to vector<16x1xf32>
    %150 = vector.broadcast %149 : vector<16x1xf32> to vector<16x16xf32>
    %151 = arith.subf %147, %150 : vector<16x16xf32>
    %152 = math.exp %151 : vector<16x16xf32>
    %cst_42 = arith.constant dense<0.000000e+00> : vector<16xf32>
    %153 = vector.multi_reduction <add>, %152, %cst_42 [1] : vector<16x16xf32> to vector<16xf32>
    %154 = vector.shape_cast %153 : vector<16xf32> to vector<16x1xf32>
    %155 = tpu.reciprocal %154 {approx = true} : vector<16x1xf32> -> vector<16x1xf32>
    %156 = vector.broadcast %155 : vector<16x1xf32> to vector<16x16xf32>
    %157 = arith.mulf %152, %156 : vector<16x16xf32>
    %158 = arith.truncf %157 : vector<16x16xf32> to vector<16x16xbf16>
    %cst_43 = arith.constant dense<0.000000e+00> : vector<16x32xf32>
    %159 = tpu.matmul %158, %146, %cst_43 {dimension_numbers = #tpu.dot_dimension_numbers<[1], [0], [0], [1], [0, 0, 1, 1], [], []>} : vector<16x16xbf16>, vector<16x32xbf16>, vector<16x32xf32> -> vector<16x32xf32>
    %160 = vector.extract_strided_slice %100 {offsets = [0, 96], sizes = [16, 32], strides = [1, 1]} : vector<16x128xf32> to vector<16x32xf32>
    %161 = arith.truncf %160 : vector<16x32xf32> to vector<16x32xbf16>
    %162 = vector.extract_strided_slice %101 {offsets = [0, 96], sizes = [16, 32], strides = [1, 1]} : vector<16x128xf32> to vector<16x32xf32>
    %163 = arith.truncf %162 : vector<16x32xf32> to vector<16x32xbf16>
    %164 = vector.extract_strided_slice %102 {offsets = [0, 96], sizes = [16, 32], strides = [1, 1]} : vector<16x128xf32> to vector<16x32xf32>
    %165 = arith.truncf %164 : vector<16x32xf32> to vector<16x32xbf16>
    %cst_44 = arith.constant dense<0.000000e+00> : vector<16x16xf32>
    %166 = tpu.matmul %161, %163, %cst_44 {dimension_numbers = #tpu.dot_dimension_numbers<[1], [1], [0], [0], [0, 0, 1, 0], [], []>} : vector<16x32xbf16>, vector<16x32xbf16>, vector<16x16xf32> -> vector<16x16xf32>
    %cst_45 = arith.constant dense<0xFF800000> : vector<16xf32>
    %167 = vector.multi_reduction <maximumf>, %166, %cst_45 [1] : vector<16x16xf32> to vector<16xf32>
    %168 = vector.shape_cast %167 : vector<16xf32> to vector<16x1xf32>
    %169 = vector.broadcast %168 : vector<16x1xf32> to vector<16x16xf32>
    %170 = arith.subf %166, %169 : vector<16x16xf32>
    %171 = math.exp %170 : vector<16x16xf32>
    %cst_46 = arith.constant dense<0.000000e+00> : vector<16xf32>
    %172 = vector.multi_reduction <add>, %171, %cst_46 [1] : vector<16x16xf32> to vector<16xf32>
    %173 = vector.shape_cast %172 : vector<16xf32> to vector<16x1xf32>
    %174 = tpu.reciprocal %173 {approx = true} : vector<16x1xf32> -> vector<16x1xf32>
    %175 = vector.broadcast %174 : vector<16x1xf32> to vector<16x16xf32>
    %176 = arith.mulf %171, %175 : vector<16x16xf32>
    %177 = arith.truncf %176 : vector<16x16xf32> to vector<16x16xbf16>
    %cst_47 = arith.constant dense<0.000000e+00> : vector<16x32xf32>
    %178 = tpu.matmul %177, %165, %cst_47 {dimension_numbers = #tpu.dot_dimension_numbers<[1], [0], [0], [1], [0, 0, 1, 1], [], []>} : vector<16x16xbf16>, vector<16x32xbf16>, vector<16x32xf32> -> vector<16x32xf32>
    %179 = tpu.concatenate %121, %140, %159, %178 in 1 : vector<16x32xf32>, vector<16x32xf32>, vector<16x32xf32>, vector<16x32xf32> -> vector<16x128xf32>
    %180 = tpu.concatenate %97, %179 in 0 : vector<16x128xf32>, vector<16x128xf32> -> vector<32x128xf32>
    %181 = arith.truncf %180 : vector<32x128xf32> to vector<32x128xbf16>
    %cst_48 = arith.constant dense<0.000000e+00> : vector<32x128xf32>
    %182 = tpu.matmul %181, %9, %cst_48 {dimension_numbers = #tpu.dot_dimension_numbers<[1], [0], [0], [1], [0, 0, 1, 1], [], []>} : vector<32x128xbf16>, vector<128x128xbf16>, vector<32x128xf32> -> vector<32x128xf32>
    %183 = vector.broadcast %11 : vector<1x128xf32> to vector<32x128xf32>
    %184 = arith.addf %182, %183 : vector<32x128xf32>
    %185 = arith.addf %3, %184 : vector<32x128xf32>
    %c0_49 = arith.constant 0 : index
    %c0_50 = arith.constant 0 : index
    %c0_51 = arith.constant 0 : index
    %186 = vector.load %arg11[%c0_49, %c0_50, %c0_51] : memref<1x1x128xf32, #tpu.memory_space<vmem>>, vector<1x1x128xf32>
    %187 = vector.shape_cast %186 : vector<1x1x128xf32> to vector<1x128xf32>
    %c0_52 = arith.constant 0 : index
    %c0_53 = arith.constant 0 : index
    %c0_54 = arith.constant 0 : index
    %188 = vector.load %arg12[%c0_52, %c0_53, %c0_54] : memref<1x1x128xf32, #tpu.memory_space<vmem>>, vector<1x1x128xf32>
    %189 = vector.shape_cast %188 : vector<1x1x128xf32> to vector<1x128xf32>
    %cst_55 = arith.constant dense<0.000000e+00> : vector<32xf32>
    %190 = vector.multi_reduction <add>, %185, %cst_55 [1] : vector<32x128xf32> to vector<32xf32>
    %191 = vector.shape_cast %190 : vector<32xf32> to vector<32x1xf32>
    %cst_56 = arith.constant 1.280000e+02 : f32
    %192 = vector.broadcast %cst_56 : f32 to vector<32x1xf32>
    %193 = arith.divf %191, %192 : vector<32x1xf32>
    %194 = vector.broadcast %193 : vector<32x1xf32> to vector<32x128xf32>
    %195 = arith.subf %185, %194 : vector<32x128xf32>
    %196 = arith.mulf %195, %195 : vector<32x128xf32>
    %cst_57 = arith.constant dense<0.000000e+00> : vector<32xf32>
    %197 = vector.multi_reduction <add>, %196, %cst_57 [1] : vector<32x128xf32> to vector<32xf32>
    %198 = vector.shape_cast %197 : vector<32xf32> to vector<32x1xf32>
    %cst_58 = arith.constant 1.280000e+02 : f32
    %199 = vector.broadcast %cst_58 : f32 to vector<32x1xf32>
    %200 = arith.divf %198, %199 : vector<32x1xf32>
    %cst_59 = arith.constant 9.99999974E-6 : f32
    %201 = vector.broadcast %cst_59 : f32 to vector<32x1xf32>
    %202 = arith.addf %200, %201 : vector<32x1xf32>
    %203 = math.rsqrt %202 : vector<32x1xf32>
    %204 = vector.broadcast %203 : vector<32x1xf32> to vector<32x128xf32>
    %205 = arith.mulf %195, %204 : vector<32x128xf32>
    %206 = vector.broadcast %187 : vector<1x128xf32> to vector<32x128xf32>
    %207 = arith.mulf %205, %206 : vector<32x128xf32>
    %208 = vector.broadcast %189 : vector<1x128xf32> to vector<32x128xf32>
    %209 = arith.addf %207, %208 : vector<32x128xf32>
    %c0_60 = arith.constant 0 : index
    %c0_61 = arith.constant 0 : index
    %c0_62 = arith.constant 0 : index
    %210 = vector.load %arg13[%c0_60, %c0_61, %c0_62] : memref<1x128x256xbf16, #tpu.memory_space<vmem>>, vector<1x128x256xbf16>
    %211 = vector.shape_cast %210 : vector<1x128x256xbf16> to vector<128x256xbf16>
    %c0_63 = arith.constant 0 : index
    %c0_64 = arith.constant 0 : index
    %c0_65 = arith.constant 0 : index
    %212 = vector.load %arg14[%c0_63, %c0_64, %c0_65] : memref<1x1x256xf32, #tpu.memory_space<vmem>>, vector<1x1x256xf32>
    %213 = vector.shape_cast %212 : vector<1x1x256xf32> to vector<1x256xf32>
    %214 = arith.truncf %209 : vector<32x128xf32> to vector<32x128xbf16>
    %cst_66 = arith.constant dense<0.000000e+00> : vector<32x256xf32>
    %215 = tpu.matmul %214, %211, %cst_66 {dimension_numbers = #tpu.dot_dimension_numbers<[1], [0], [0], [1], [0, 0, 1, 1], [], []>} : vector<32x128xbf16>, vector<128x256xbf16>, vector<32x256xf32> -> vector<32x256xf32>
    %216 = vector.broadcast %213 : vector<1x256xf32> to vector<32x256xf32>
    %217 = arith.addf %215, %216 : vector<32x256xf32>
    %cst_67 = arith.constant 0.000000e+00 : f32
    %218 = vector.broadcast %cst_67 : f32 to vector<32x256xf32>
    %219 = arith.maximumf %217, %218 : vector<32x256xf32>
    %c0_68 = arith.constant 0 : index
    %c0_69 = arith.constant 0 : index
    %c0_70 = arith.constant 0 : index
    %220 = vector.load %arg15[%c0_68, %c0_69, %c0_70] : memref<1x256x128xbf16, #tpu.memory_space<vmem>>, vector<1x256x128xbf16>
    %221 = vector.shape_cast %220 : vector<1x256x128xbf16> to vector<256x128xbf16>
    %c0_71 = arith.constant 0 : index
    %c0_72 = arith.constant 0 : index
    %c0_73 = arith.constant 0 : index
    %222 = vector.load %arg16[%c0_71, %c0_72, %c0_73] : memref<1x1x128xf32, #tpu.memory_space<vmem>>, vector<1x1x128xf32>
    %223 = vector.shape_cast %222 : vector<1x1x128xf32> to vector<1x128xf32>
    %224 = arith.truncf %219 : vector<32x256xf32> to vector<32x256xbf16>
    %cst_74 = arith.constant dense<0.000000e+00> : vector<32x128xf32>
    %225 = tpu.matmul %224, %221, %cst_74 {dimension_numbers = #tpu.dot_dimension_numbers<[1], [0], [0], [1], [0, 0, 1, 1], [], []>} : vector<32x256xbf16>, vector<256x128xbf16>, vector<32x128xf32> -> vector<32x128xf32>
    %226 = vector.broadcast %223 : vector<1x128xf32> to vector<32x128xf32>
    %227 = arith.addf %225, %226 : vector<32x128xf32>
    %228 = arith.addf %209, %227 : vector<32x128xf32>
    %c0_75 = arith.constant 0 : index
    %c0_76 = arith.constant 0 : index
    %c0_77 = arith.constant 0 : index
    %229 = vector.load %arg17[%c0_75, %c0_76, %c0_77] : memref<1x1x128xf32, #tpu.memory_space<vmem>>, vector<1x1x128xf32>
    %230 = vector.shape_cast %229 : vector<1x1x128xf32> to vector<1x128xf32>
    %c0_78 = arith.constant 0 : index
    %c0_79 = arith.constant 0 : index
    %c0_80 = arith.constant 0 : index
    %231 = vector.load %arg18[%c0_78, %c0_79, %c0_80] : memref<1x1x128xf32, #tpu.memory_space<vmem>>, vector<1x1x128xf32>
    %232 = vector.shape_cast %231 : vector<1x1x128xf32> to vector<1x128xf32>
    %cst_81 = arith.constant dense<0.000000e+00> : vector<32xf32>
    %233 = vector.multi_reduction <add>, %228, %cst_81 [1] : vector<32x128xf32> to vector<32xf32>
    %234 = vector.shape_cast %233 : vector<32xf32> to vector<32x1xf32>
    %cst_82 = arith.constant 1.280000e+02 : f32
    %235 = vector.broadcast %cst_82 : f32 to vector<32x1xf32>
    %236 = arith.divf %234, %235 : vector<32x1xf32>
    %237 = vector.broadcast %236 : vector<32x1xf32> to vector<32x128xf32>
    %238 = arith.subf %228, %237 : vector<32x128xf32>
    %239 = arith.mulf %238, %238 : vector<32x128xf32>
    %cst_83 = arith.constant dense<0.000000e+00> : vector<32xf32>
    %240 = vector.multi_reduction <add>, %239, %cst_83 [1] : vector<32x128xf32> to vector<32xf32>
    %241 = vector.shape_cast %240 : vector<32xf32> to vector<32x1xf32>
    %cst_84 = arith.constant 1.280000e+02 : f32
    %242 = vector.broadcast %cst_84 : f32 to vector<32x1xf32>
    %243 = arith.divf %241, %242 : vector<32x1xf32>
    %cst_85 = arith.constant 9.99999974E-6 : f32
    %244 = vector.broadcast %cst_85 : f32 to vector<32x1xf32>
    %245 = arith.addf %243, %244 : vector<32x1xf32>
    %246 = math.rsqrt %245 : vector<32x1xf32>
    %247 = vector.broadcast %246 : vector<32x1xf32> to vector<32x128xf32>
    %248 = arith.mulf %238, %247 : vector<32x128xf32>
    %249 = vector.broadcast %230 : vector<1x128xf32> to vector<32x128xf32>
    %250 = arith.mulf %248, %249 : vector<32x128xf32>
    %251 = vector.broadcast %232 : vector<1x128xf32> to vector<32x128xf32>
    %252 = arith.addf %250, %251 : vector<32x128xf32>
    %c0_86 = arith.constant 0 : index
    %c0_87 = arith.constant 0 : index
    %253 = vector.load %arg19[%c0_86, %c0_87] : memref<32x128xf32, #tpu.memory_space<vmem>>, vector<32x128xf32>
    tpu.vector_store %arg19[%c0_86, %c0_87], %252 {strides = array<i32>} : memref<32x128xf32, #tpu.memory_space<vmem>>, vector<32x128xf32>,
    return
  }
  func.func @transform_0(%arg0: i32, %arg1: i32) -> (i32, i32) {
    %c0_i32 = arith.constant 0 : i32
    %c0_i32_0 = arith.constant 0 : i32
    return %arg0, %c0_i32 : i32, i32
  }
  func.func @transform_1(%arg0: i32, %arg1: i32) -> (i32, i32) {
    %c0_i32 = arith.constant 0 : i32
    %c0_i32_0 = arith.constant 0 : i32
    %c0_i32_1 = arith.constant 0 : i32
    return %c0_i32, %c0_i32_0 : i32, i32
  }
  func.func @transform_2(%arg0: i32, %arg1: i32) -> (i32, i32) {
    %c0_i32 = arith.constant 0 : i32
    %c0_i32_0 = arith.constant 0 : i32
    %c0_i32_1 = arith.constant 0 : i32
    return %c0_i32, %c0_i32_0 : i32, i32
  }
  func.func @transform_3(%arg0: i32, %arg1: i32) -> (i32, i32) {
    %c0_i32 = arith.constant 0 : i32
    %c0_i32_0 = arith.constant 0 : i32
    %c0_i32_1 = arith.constant 0 : i32
    return %c0_i32, %c0_i32_0 : i32, i32
  }
  func.func @transform_4(%arg0: i32, %arg1: i32) -> (i32, i32) {
    %c0_i32 = arith.constant 0 : i32
    %c0_i32_0 = arith.constant 0 : i32
    %c0_i32_1 = arith.constant 0 : i32
    return %c0_i32, %c0_i32_0 : i32, i32
  }
  func.func @transform_5(%arg0: i32, %arg1: i32) -> (i32, i32, i32) {
    %c0_i32 = arith.constant 0 : i32
    %c0_i32_0 = arith.constant 0 : i32
    %c0_i32_1 = arith.constant 0 : i32
    return %arg1, %c0_i32, %c0_i32_0 : i32, i32, i32
  }
  func.func @transform_6(%arg0: i32, %arg1: i32) -> (i32, i32, i32) {
    %c0_i32 = arith.constant 0 : i32
    %c0_i32_0 = arith.constant 0 : i32
    %c0_i32_1 = arith.constant 0 : i32
    return %arg1, %c0_i32, %c0_i32_0 : i32, i32, i32
  }
  func.func @transform_7(%arg0: i32, %arg1: i32) -> (i32, i32, i32) {
    %c0_i32 = arith.constant 0 : i32
    %c0_i32_0 = arith.constant 0 : i32
    %c0_i32_1 = arith.constant 0 : i32
    return %arg1, %c0_i32, %c0_i32_0 : i32, i32, i32
  }
  func.func @transform_8(%arg0: i32, %arg1: i32) -> (i32, i32, i32) {
    %c0_i32 = arith.constant 0 : i32
    %c0_i32_0 = arith.constant 0 : i32
    %c0_i32_1 = arith.constant 0 : i32
    return %arg1, %c0_i32, %c0_i32_0 : i32, i32, i32
  }
  func.func @transform_9(%arg0: i32, %arg1: i32) -> (i32, i32, i32) {
    %c0_i32 = arith.constant 0 : i32
    %c0_i32_0 = arith.constant 0 : i32
    %c0_i32_1 = arith.constant 0 : i32
    return %arg1, %c0_i32, %c0_i32_0 : i32, i32, i32
  }
  func.func @transform_10(%arg0: i32, %arg1: i32) -> (i32, i32, i32) {
    %c0_i32 = arith.constant 0 : i32
    %c0_i32_0 = arith.constant 0 : i32
    %c0_i32_1 = arith.constant 0 : i32
    return %arg1, %c0_i32, %c0_i32_0 : i32, i32, i32
  }
  func.func @transform_11(%arg0: i32, %arg1: i32) -> (i32, i32, i32) {
    %c0_i32 = arith.constant 0 : i32
    %c0_i32_0 = arith.constant 0 : i32
    %c0_i32_1 = arith.constant 0 : i32
    return %arg1, %c0_i32, %c0_i32_0 : i32, i32, i32
  }
  func.func @transform_12(%arg0: i32, %arg1: i32) -> (i32, i32, i32) {
    %c0_i32 = arith.constant 0 : i32
    %c0_i32_0 = arith.constant 0 : i32
    %c0_i32_1 = arith.constant 0 : i32
    return %arg1, %c0_i32, %c0_i32_0 : i32, i32, i32
  }
  func.func @transform_13(%arg0: i32, %arg1: i32) -> (i32, i32, i32) {
    %c0_i32 = arith.constant 0 : i32
    %c0_i32_0 = arith.constant 0 : i32
    %c0_i32_1 = arith.constant 0 : i32
    return %arg1, %c0_i32, %c0_i32_0 : i32, i32, i32
  }
  func.func @transform_14(%arg0: i32, %arg1: i32) -> (i32, i32, i32) {
    %c0_i32 = arith.constant 0 : i32
    %c0_i32_0 = arith.constant 0 : i32
    %c0_i32_1 = arith.constant 0 : i32
    return %arg1, %c0_i32, %c0_i32_0 : i32, i32, i32
  }
  func.func @transform_15(%arg0: i32, %arg1: i32) -> (i32, i32, i32) {
    %c0_i32 = arith.constant 0 : i32
    %c0_i32_0 = arith.constant 0 : i32
    %c0_i32_1 = arith.constant 0 : i32
    return %arg1, %c0_i32, %c0_i32_0 : i32, i32, i32
  }
  func.func @transform_16(%arg0: i32, %arg1: i32) -> (i32, i32, i32) {
    %c0_i32 = arith.constant 0 : i32
    %c0_i32_0 = arith.constant 0 : i32
    %c0_i32_1 = arith.constant 0 : i32
    return %arg1, %c0_i32, %c0_i32_0 : i32, i32, i32
  }
  func.func @transform_17(%arg0: i32, %arg1: i32) -> (i32, i32) {
    %c0_i32 = arith.constant 0 : i32
    %c0_i32_0 = arith.constant 0 : i32
    return %arg0, %c0_i32 : i32, i32
  }
  func.func @transform_18(%arg0: i32, %arg1: i32) -> (i32, i32) {
    %c0_i32 = arith.constant 0 : i32
    %c0_i32_0 = arith.constant 0 : i32
    return %arg0, %c0_i32 : i32, i32
  }
}

module attributes {stable_mosaic.version = 11 : i64} {
  func.func @_decoder_stack_kernel(%arg0: i32, %arg1: i32, %arg2: memref<32x128xf32, #tpu.memory_space<vmem>>, %arg3: memref<2x128xf32, #tpu.memory_space<vmem>>, %arg4: memref<1x128x384xbf16, #tpu.memory_space<vmem>>, %arg5: memref<1x1x384xf32, #tpu.memory_space<vmem>>, %arg6: memref<1x128x128xbf16, #tpu.memory_space<vmem>>, %arg7: memref<1x1x128xf32, #tpu.memory_space<vmem>>, %arg8: memref<1x1x128xf32, #tpu.memory_space<vmem>>, %arg9: memref<1x1x128xf32, #tpu.memory_space<vmem>>, %arg10: memref<1x128x128xbf16, #tpu.memory_space<vmem>>, %arg11: memref<1x1x128xf32, #tpu.memory_space<vmem>>, %arg12: memref<1x128x128xbf16, #tpu.memory_space<vmem>>, %arg13: memref<1x1x128xf32, #tpu.memory_space<vmem>>, %arg14: memref<1x1x128xf32, #tpu.memory_space<vmem>>, %arg15: memref<1x1x128xf32, #tpu.memory_space<vmem>>, %arg16: memref<1x128x256xbf16, #tpu.memory_space<vmem>>, %arg17: memref<1x1x256xf32, #tpu.memory_space<vmem>>, %arg18: memref<1x256x128xbf16, #tpu.memory_space<vmem>>, %arg19: memref<1x1x128xf32, #tpu.memory_space<vmem>>, %arg20: memref<1x1x128xf32, #tpu.memory_space<vmem>>, %arg21: memref<1x1x128xf32, #tpu.memory_space<vmem>>, %arg22: memref<128x128xbf16, #tpu.memory_space<vmem>>, %arg23: memref<1x128xf32, #tpu.memory_space<vmem>>, %arg24: memref<32x128xf32, #tpu.memory_space<vmem>>) attributes {dimension_semantics = [#tpu.dimension_semantics<parallel>, #tpu.dimension_semantics<arbitrary>], iteration_bounds = array<i64: 1, 2>, scalar_prefetch = 0 : i64, scratch_operands = 0 : i64, tpu.core_type = #tpu.core_type<tc>, window_params = [{transform_indices = @transform_0, window_bounds = array<i64: 32, 128>}, {transform_indices = @transform_1, window_bounds = array<i64: 2, 128>}, {transform_indices = @transform_2, window_bounds = array<i64: 1, 128, 384>}, {transform_indices = @transform_3, window_bounds = array<i64: 1, 1, 384>}, {transform_indices = @transform_4, window_bounds = array<i64: 1, 128, 128>}, {transform_indices = @transform_5, window_bounds = array<i64: 1, 1, 128>}, {transform_indices = @transform_6, window_bounds = array<i64: 1, 1, 128>}, {transform_indices = @transform_7, window_bounds = array<i64: 1, 1, 128>}, {transform_indices = @transform_8, window_bounds = array<i64: 1, 128, 128>}, {transform_indices = @transform_9, window_bounds = array<i64: 1, 1, 128>}, {transform_indices = @transform_10, window_bounds = array<i64: 1, 128, 128>}, {transform_indices = @transform_11, window_bounds = array<i64: 1, 1, 128>}, {transform_indices = @transform_12, window_bounds = array<i64: 1, 1, 128>}, {transform_indices = @transform_13, window_bounds = array<i64: 1, 1, 128>}, {transform_indices = @transform_14, window_bounds = array<i64: 1, 128, 256>}, {transform_indices = @transform_15, window_bounds = array<i64: 1, 1, 256>}, {transform_indices = @transform_16, window_bounds = array<i64: 1, 256, 128>}, {transform_indices = @transform_17, window_bounds = array<i64: 1, 1, 128>}, {transform_indices = @transform_18, window_bounds = array<i64: 1, 1, 128>}, {transform_indices = @transform_19, window_bounds = array<i64: 1, 1, 128>}, {pipeline_mode = #tpu.pipeline_mode<synchronous>, transform_indices = @transform_20, window_bounds = array<i64: 128, 128>}, {pipeline_mode = #tpu.pipeline_mode<synchronous>, transform_indices = @transform_21, window_bounds = array<i64: 1, 128>}, {transform_indices = @transform_22, window_bounds = array<i64: 32, 128>}]} {
    %c0_i32 = arith.constant 0 : i32
    %0 = arith.cmpi eq, %arg1, %c0_i32 : i32
    %1 = arith.extui %0 : i1 to i32
    %c0_i32_0 = arith.constant 0 : i32
    %2 = arith.cmpi ne, %1, %c0_i32_0 : i32
    scf.if %2 {
      %c0_116 = arith.constant 0 : index
      %c0_117 = arith.constant 0 : index
      %307 = vector.load %arg2[%c0_116, %c0_117] : memref<32x128xf32, #tpu.memory_space<vmem>>, vector<32x128xf32>
      %c0_118 = arith.constant 0 : index
      %c0_119 = arith.constant 0 : index
      %308 = vector.load %arg24[%c0_118, %c0_119] : memref<32x128xf32, #tpu.memory_space<vmem>>, vector<32x128xf32>
      tpu.vector_store %arg24[%c0_118, %c0_119], %307 {strides = array<i32>} : memref<32x128xf32, #tpu.memory_space<vmem>>, vector<32x128xf32>,
    } else {
    }
    %c0 = arith.constant 0 : index
    %c0_1 = arith.constant 0 : index
    %3 = vector.load %arg24[%c0, %c0_1] : memref<32x128xf32, #tpu.memory_space<vmem>>, vector<32x128xf32>
    %c0_2 = arith.constant 0 : index
    %c0_3 = arith.constant 0 : index
    %c0_4 = arith.constant 0 : index
    %4 = vector.load %arg4[%c0_2, %c0_3, %c0_4] : memref<1x128x384xbf16, #tpu.memory_space<vmem>>, vector<1x128x384xbf16>
    %5 = vector.shape_cast %4 : vector<1x128x384xbf16> to vector<128x384xbf16>
    %c0_5 = arith.constant 0 : index
    %c0_6 = arith.constant 0 : index
    %c0_7 = arith.constant 0 : index
    %6 = vector.load %arg5[%c0_5, %c0_6, %c0_7] : memref<1x1x384xf32, #tpu.memory_space<vmem>>, vector<1x1x384xf32>
    %7 = vector.shape_cast %6 : vector<1x1x384xf32> to vector<1x384xf32>
    %c0_8 = arith.constant 0 : index
    %c0_9 = arith.constant 0 : index
    %c0_10 = arith.constant 0 : index
    %8 = vector.load %arg6[%c0_8, %c0_9, %c0_10] : memref<1x128x128xbf16, #tpu.memory_space<vmem>>, vector<1x128x128xbf16>
    %9 = vector.shape_cast %8 : vector<1x128x128xbf16> to vector<128x128xbf16>
    %c0_11 = arith.constant 0 : index
    %c0_12 = arith.constant 0 : index
    %c0_13 = arith.constant 0 : index
    %10 = vector.load %arg7[%c0_11, %c0_12, %c0_13] : memref<1x1x128xf32, #tpu.memory_space<vmem>>, vector<1x1x128xf32>
    %11 = vector.shape_cast %10 : vector<1x1x128xf32> to vector<1x128xf32>
    %12 = arith.truncf %3 : vector<32x128xf32> to vector<32x128xbf16>
    %cst = arith.constant dense<0.000000e+00> : vector<32x384xf32>
    %13 = tpu.matmul %12, %5, %cst {dimension_numbers = #tpu.dot_dimension_numbers<[1], [0], [0], [1], [0, 0, 1, 1], [], []>} : vector<32x128xbf16>, vector<128x384xbf16>, vector<32x384xf32> -> vector<32x384xf32>
    %14 = vector.broadcast %7 : vector<1x384xf32> to vector<32x384xf32>
    %15 = arith.addf %13, %14 : vector<32x384xf32>
    %16 = vector.extract_strided_slice %15 {offsets = [0, 0], sizes = [16, 128], strides = [1, 1]} : vector<32x384xf32> to vector<16x128xf32>
    %cst_14 = arith.constant 0.176776692 : f32
    %17 = vector.broadcast %cst_14 : f32 to vector<16x128xf32>
    %18 = arith.mulf %16, %17 : vector<16x128xf32>
    %19 = vector.extract_strided_slice %15 {offsets = [0, 128], sizes = [16, 128], strides = [1, 1]} : vector<32x384xf32> to vector<16x128xf32>
    %20 = vector.extract_strided_slice %15 {offsets = [0, 256], sizes = [16, 128], strides = [1, 1]} : vector<32x384xf32> to vector<16x128xf32>
    %21 = vector.extract_strided_slice %18 {offsets = [0, 0], sizes = [16, 32], strides = [1, 1]} : vector<16x128xf32> to vector<16x32xf32>
    %22 = arith.truncf %21 : vector<16x32xf32> to vector<16x32xbf16>
    %23 = vector.extract_strided_slice %19 {offsets = [0, 0], sizes = [16, 32], strides = [1, 1]} : vector<16x128xf32> to vector<16x32xf32>
    %24 = arith.truncf %23 : vector<16x32xf32> to vector<16x32xbf16>
    %25 = vector.extract_strided_slice %20 {offsets = [0, 0], sizes = [16, 32], strides = [1, 1]} : vector<16x128xf32> to vector<16x32xf32>
    %26 = arith.truncf %25 : vector<16x32xf32> to vector<16x32xbf16>
    %cst_15 = arith.constant dense<0.000000e+00> : vector<16x16xf32>
    %27 = tpu.matmul %22, %24, %cst_15 {dimension_numbers = #tpu.dot_dimension_numbers<[1], [1], [0], [0], [0, 0, 1, 0], [], []>} : vector<16x32xbf16>, vector<16x32xbf16>, vector<16x16xf32> -> vector<16x16xf32>
    %cst_16 = arith.constant dense<0xFF800000> : vector<16xf32>
    %28 = vector.multi_reduction <maximumf>, %27, %cst_16 [1] : vector<16x16xf32> to vector<16xf32>
    %29 = vector.shape_cast %28 : vector<16xf32> to vector<16x1xf32>
    %30 = vector.broadcast %29 : vector<16x1xf32> to vector<16x16xf32>
    %31 = arith.subf %27, %30 : vector<16x16xf32>
    %32 = math.exp %31 : vector<16x16xf32>
    %cst_17 = arith.constant dense<0.000000e+00> : vector<16xf32>
    %33 = vector.multi_reduction <add>, %32, %cst_17 [1] : vector<16x16xf32> to vector<16xf32>
    %34 = vector.shape_cast %33 : vector<16xf32> to vector<16x1xf32>
    %35 = tpu.reciprocal %34 {approx = true} : vector<16x1xf32> -> vector<16x1xf32>
    %36 = vector.broadcast %35 : vector<16x1xf32> to vector<16x16xf32>
    %37 = arith.mulf %32, %36 : vector<16x16xf32>
    %38 = arith.truncf %37 : vector<16x16xf32> to vector<16x16xbf16>
    %cst_18 = arith.constant dense<0.000000e+00> : vector<16x32xf32>
    %39 = tpu.matmul %38, %26, %cst_18 {dimension_numbers = #tpu.dot_dimension_numbers<[1], [0], [0], [1], [0, 0, 1, 1], [], []>} : vector<16x16xbf16>, vector<16x32xbf16>, vector<16x32xf32> -> vector<16x32xf32>
    %40 = vector.extract_strided_slice %18 {offsets = [0, 32], sizes = [16, 32], strides = [1, 1]} : vector<16x128xf32> to vector<16x32xf32>
    %41 = arith.truncf %40 : vector<16x32xf32> to vector<16x32xbf16>
    %42 = vector.extract_strided_slice %19 {offsets = [0, 32], sizes = [16, 32], strides = [1, 1]} : vector<16x128xf32> to vector<16x32xf32>
    %43 = arith.truncf %42 : vector<16x32xf32> to vector<16x32xbf16>
    %44 = vector.extract_strided_slice %20 {offsets = [0, 32], sizes = [16, 32], strides = [1, 1]} : vector<16x128xf32> to vector<16x32xf32>
    %45 = arith.truncf %44 : vector<16x32xf32> to vector<16x32xbf16>
    %cst_19 = arith.constant dense<0.000000e+00> : vector<16x16xf32>
    %46 = tpu.matmul %41, %43, %cst_19 {dimension_numbers = #tpu.dot_dimension_numbers<[1], [1], [0], [0], [0, 0, 1, 0], [], []>} : vector<16x32xbf16>, vector<16x32xbf16>, vector<16x16xf32> -> vector<16x16xf32>
    %cst_20 = arith.constant dense<0xFF800000> : vector<16xf32>
    %47 = vector.multi_reduction <maximumf>, %46, %cst_20 [1] : vector<16x16xf32> to vector<16xf32>
    %48 = vector.shape_cast %47 : vector<16xf32> to vector<16x1xf32>
    %49 = vector.broadcast %48 : vector<16x1xf32> to vector<16x16xf32>
    %50 = arith.subf %46, %49 : vector<16x16xf32>
    %51 = math.exp %50 : vector<16x16xf32>
    %cst_21 = arith.constant dense<0.000000e+00> : vector<16xf32>
    %52 = vector.multi_reduction <add>, %51, %cst_21 [1] : vector<16x16xf32> to vector<16xf32>
    %53 = vector.shape_cast %52 : vector<16xf32> to vector<16x1xf32>
    %54 = tpu.reciprocal %53 {approx = true} : vector<16x1xf32> -> vector<16x1xf32>
    %55 = vector.broadcast %54 : vector<16x1xf32> to vector<16x16xf32>
    %56 = arith.mulf %51, %55 : vector<16x16xf32>
    %57 = arith.truncf %56 : vector<16x16xf32> to vector<16x16xbf16>
    %cst_22 = arith.constant dense<0.000000e+00> : vector<16x32xf32>
    %58 = tpu.matmul %57, %45, %cst_22 {dimension_numbers = #tpu.dot_dimension_numbers<[1], [0], [0], [1], [0, 0, 1, 1], [], []>} : vector<16x16xbf16>, vector<16x32xbf16>, vector<16x32xf32> -> vector<16x32xf32>
    %59 = vector.extract_strided_slice %18 {offsets = [0, 64], sizes = [16, 32], strides = [1, 1]} : vector<16x128xf32> to vector<16x32xf32>
    %60 = arith.truncf %59 : vector<16x32xf32> to vector<16x32xbf16>
    %61 = vector.extract_strided_slice %19 {offsets = [0, 64], sizes = [16, 32], strides = [1, 1]} : vector<16x128xf32> to vector<16x32xf32>
    %62 = arith.truncf %61 : vector<16x32xf32> to vector<16x32xbf16>
    %63 = vector.extract_strided_slice %20 {offsets = [0, 64], sizes = [16, 32], strides = [1, 1]} : vector<16x128xf32> to vector<16x32xf32>
    %64 = arith.truncf %63 : vector<16x32xf32> to vector<16x32xbf16>
    %cst_23 = arith.constant dense<0.000000e+00> : vector<16x16xf32>
    %65 = tpu.matmul %60, %62, %cst_23 {dimension_numbers = #tpu.dot_dimension_numbers<[1], [1], [0], [0], [0, 0, 1, 0], [], []>} : vector<16x32xbf16>, vector<16x32xbf16>, vector<16x16xf32> -> vector<16x16xf32>
    %cst_24 = arith.constant dense<0xFF800000> : vector<16xf32>
    %66 = vector.multi_reduction <maximumf>, %65, %cst_24 [1] : vector<16x16xf32> to vector<16xf32>
    %67 = vector.shape_cast %66 : vector<16xf32> to vector<16x1xf32>
    %68 = vector.broadcast %67 : vector<16x1xf32> to vector<16x16xf32>
    %69 = arith.subf %65, %68 : vector<16x16xf32>
    %70 = math.exp %69 : vector<16x16xf32>
    %cst_25 = arith.constant dense<0.000000e+00> : vector<16xf32>
    %71 = vector.multi_reduction <add>, %70, %cst_25 [1] : vector<16x16xf32> to vector<16xf32>
    %72 = vector.shape_cast %71 : vector<16xf32> to vector<16x1xf32>
    %73 = tpu.reciprocal %72 {approx = true} : vector<16x1xf32> -> vector<16x1xf32>
    %74 = vector.broadcast %73 : vector<16x1xf32> to vector<16x16xf32>
    %75 = arith.mulf %70, %74 : vector<16x16xf32>
    %76 = arith.truncf %75 : vector<16x16xf32> to vector<16x16xbf16>
    %cst_26 = arith.constant dense<0.000000e+00> : vector<16x32xf32>
    %77 = tpu.matmul %76, %64, %cst_26 {dimension_numbers = #tpu.dot_dimension_numbers<[1], [0], [0], [1], [0, 0, 1, 1], [], []>} : vector<16x16xbf16>, vector<16x32xbf16>, vector<16x32xf32> -> vector<16x32xf32>
    %78 = vector.extract_strided_slice %18 {offsets = [0, 96], sizes = [16, 32], strides = [1, 1]} : vector<16x128xf32> to vector<16x32xf32>
    %79 = arith.truncf %78 : vector<16x32xf32> to vector<16x32xbf16>
    %80 = vector.extract_strided_slice %19 {offsets = [0, 96], sizes = [16, 32], strides = [1, 1]} : vector<16x128xf32> to vector<16x32xf32>
    %81 = arith.truncf %80 : vector<16x32xf32> to vector<16x32xbf16>
    %82 = vector.extract_strided_slice %20 {offsets = [0, 96], sizes = [16, 32], strides = [1, 1]} : vector<16x128xf32> to vector<16x32xf32>
    %83 = arith.truncf %82 : vector<16x32xf32> to vector<16x32xbf16>
    %cst_27 = arith.constant dense<0.000000e+00> : vector<16x16xf32>
    %84 = tpu.matmul %79, %81, %cst_27 {dimension_numbers = #tpu.dot_dimension_numbers<[1], [1], [0], [0], [0, 0, 1, 0], [], []>} : vector<16x32xbf16>, vector<16x32xbf16>, vector<16x16xf32> -> vector<16x16xf32>
    %cst_28 = arith.constant dense<0xFF800000> : vector<16xf32>
    %85 = vector.multi_reduction <maximumf>, %84, %cst_28 [1] : vector<16x16xf32> to vector<16xf32>
    %86 = vector.shape_cast %85 : vector<16xf32> to vector<16x1xf32>
    %87 = vector.broadcast %86 : vector<16x1xf32> to vector<16x16xf32>
    %88 = arith.subf %84, %87 : vector<16x16xf32>
    %89 = math.exp %88 : vector<16x16xf32>
    %cst_29 = arith.constant dense<0.000000e+00> : vector<16xf32>
    %90 = vector.multi_reduction <add>, %89, %cst_29 [1] : vector<16x16xf32> to vector<16xf32>
    %91 = vector.shape_cast %90 : vector<16xf32> to vector<16x1xf32>
    %92 = tpu.reciprocal %91 {approx = true} : vector<16x1xf32> -> vector<16x1xf32>
    %93 = vector.broadcast %92 : vector<16x1xf32> to vector<16x16xf32>
    %94 = arith.mulf %89, %93 : vector<16x16xf32>
    %95 = arith.truncf %94 : vector<16x16xf32> to vector<16x16xbf16>
    %cst_30 = arith.constant dense<0.000000e+00> : vector<16x32xf32>
    %96 = tpu.matmul %95, %83, %cst_30 {dimension_numbers = #tpu.dot_dimension_numbers<[1], [0], [0], [1], [0, 0, 1, 1], [], []>} : vector<16x16xbf16>, vector<16x32xbf16>, vector<16x32xf32> -> vector<16x32xf32>
    %97 = tpu.concatenate %39, %58, %77, %96 in 1 : vector<16x32xf32>, vector<16x32xf32>, vector<16x32xf32>, vector<16x32xf32> -> vector<16x128xf32>
    %98 = vector.extract_strided_slice %15 {offsets = [16, 0], sizes = [16, 128], strides = [1, 1]} : vector<32x384xf32> to vector<16x128xf32>
    %cst_31 = arith.constant 0.176776692 : f32
    %99 = vector.broadcast %cst_31 : f32 to vector<16x128xf32>
    %100 = arith.mulf %98, %99 : vector<16x128xf32>
    %101 = vector.extract_strided_slice %15 {offsets = [16, 128], sizes = [16, 128], strides = [1, 1]} : vector<32x384xf32> to vector<16x128xf32>
    %102 = vector.extract_strided_slice %15 {offsets = [16, 256], sizes = [16, 128], strides = [1, 1]} : vector<32x384xf32> to vector<16x128xf32>
    %103 = vector.extract_strided_slice %100 {offsets = [0, 0], sizes = [16, 32], strides = [1, 1]} : vector<16x128xf32> to vector<16x32xf32>
    %104 = arith.truncf %103 : vector<16x32xf32> to vector<16x32xbf16>
    %105 = vector.extract_strided_slice %101 {offsets = [0, 0], sizes = [16, 32], strides = [1, 1]} : vector<16x128xf32> to vector<16x32xf32>
    %106 = arith.truncf %105 : vector<16x32xf32> to vector<16x32xbf16>
    %107 = vector.extract_strided_slice %102 {offsets = [0, 0], sizes = [16, 32], strides = [1, 1]} : vector<16x128xf32> to vector<16x32xf32>
    %108 = arith.truncf %107 : vector<16x32xf32> to vector<16x32xbf16>
    %cst_32 = arith.constant dense<0.000000e+00> : vector<16x16xf32>
    %109 = tpu.matmul %104, %106, %cst_32 {dimension_numbers = #tpu.dot_dimension_numbers<[1], [1], [0], [0], [0, 0, 1, 0], [], []>} : vector<16x32xbf16>, vector<16x32xbf16>, vector<16x16xf32> -> vector<16x16xf32>
    %cst_33 = arith.constant dense<0xFF800000> : vector<16xf32>
    %110 = vector.multi_reduction <maximumf>, %109, %cst_33 [1] : vector<16x16xf32> to vector<16xf32>
    %111 = vector.shape_cast %110 : vector<16xf32> to vector<16x1xf32>
    %112 = vector.broadcast %111 : vector<16x1xf32> to vector<16x16xf32>
    %113 = arith.subf %109, %112 : vector<16x16xf32>
    %114 = math.exp %113 : vector<16x16xf32>
    %cst_34 = arith.constant dense<0.000000e+00> : vector<16xf32>
    %115 = vector.multi_reduction <add>, %114, %cst_34 [1] : vector<16x16xf32> to vector<16xf32>
    %116 = vector.shape_cast %115 : vector<16xf32> to vector<16x1xf32>
    %117 = tpu.reciprocal %116 {approx = true} : vector<16x1xf32> -> vector<16x1xf32>
    %118 = vector.broadcast %117 : vector<16x1xf32> to vector<16x16xf32>
    %119 = arith.mulf %114, %118 : vector<16x16xf32>
    %120 = arith.truncf %119 : vector<16x16xf32> to vector<16x16xbf16>
    %cst_35 = arith.constant dense<0.000000e+00> : vector<16x32xf32>
    %121 = tpu.matmul %120, %108, %cst_35 {dimension_numbers = #tpu.dot_dimension_numbers<[1], [0], [0], [1], [0, 0, 1, 1], [], []>} : vector<16x16xbf16>, vector<16x32xbf16>, vector<16x32xf32> -> vector<16x32xf32>
    %122 = vector.extract_strided_slice %100 {offsets = [0, 32], sizes = [16, 32], strides = [1, 1]} : vector<16x128xf32> to vector<16x32xf32>
    %123 = arith.truncf %122 : vector<16x32xf32> to vector<16x32xbf16>
    %124 = vector.extract_strided_slice %101 {offsets = [0, 32], sizes = [16, 32], strides = [1, 1]} : vector<16x128xf32> to vector<16x32xf32>
    %125 = arith.truncf %124 : vector<16x32xf32> to vector<16x32xbf16>
    %126 = vector.extract_strided_slice %102 {offsets = [0, 32], sizes = [16, 32], strides = [1, 1]} : vector<16x128xf32> to vector<16x32xf32>
    %127 = arith.truncf %126 : vector<16x32xf32> to vector<16x32xbf16>
    %cst_36 = arith.constant dense<0.000000e+00> : vector<16x16xf32>
    %128 = tpu.matmul %123, %125, %cst_36 {dimension_numbers = #tpu.dot_dimension_numbers<[1], [1], [0], [0], [0, 0, 1, 0], [], []>} : vector<16x32xbf16>, vector<16x32xbf16>, vector<16x16xf32> -> vector<16x16xf32>
    %cst_37 = arith.constant dense<0xFF800000> : vector<16xf32>
    %129 = vector.multi_reduction <maximumf>, %128, %cst_37 [1] : vector<16x16xf32> to vector<16xf32>
    %130 = vector.shape_cast %129 : vector<16xf32> to vector<16x1xf32>
    %131 = vector.broadcast %130 : vector<16x1xf32> to vector<16x16xf32>
    %132 = arith.subf %128, %131 : vector<16x16xf32>
    %133 = math.exp %132 : vector<16x16xf32>
    %cst_38 = arith.constant dense<0.000000e+00> : vector<16xf32>
    %134 = vector.multi_reduction <add>, %133, %cst_38 [1] : vector<16x16xf32> to vector<16xf32>
    %135 = vector.shape_cast %134 : vector<16xf32> to vector<16x1xf32>
    %136 = tpu.reciprocal %135 {approx = true} : vector<16x1xf32> -> vector<16x1xf32>
    %137 = vector.broadcast %136 : vector<16x1xf32> to vector<16x16xf32>
    %138 = arith.mulf %133, %137 : vector<16x16xf32>
    %139 = arith.truncf %138 : vector<16x16xf32> to vector<16x16xbf16>
    %cst_39 = arith.constant dense<0.000000e+00> : vector<16x32xf32>
    %140 = tpu.matmul %139, %127, %cst_39 {dimension_numbers = #tpu.dot_dimension_numbers<[1], [0], [0], [1], [0, 0, 1, 1], [], []>} : vector<16x16xbf16>, vector<16x32xbf16>, vector<16x32xf32> -> vector<16x32xf32>
    %141 = vector.extract_strided_slice %100 {offsets = [0, 64], sizes = [16, 32], strides = [1, 1]} : vector<16x128xf32> to vector<16x32xf32>
    %142 = arith.truncf %141 : vector<16x32xf32> to vector<16x32xbf16>
    %143 = vector.extract_strided_slice %101 {offsets = [0, 64], sizes = [16, 32], strides = [1, 1]} : vector<16x128xf32> to vector<16x32xf32>
    %144 = arith.truncf %143 : vector<16x32xf32> to vector<16x32xbf16>
    %145 = vector.extract_strided_slice %102 {offsets = [0, 64], sizes = [16, 32], strides = [1, 1]} : vector<16x128xf32> to vector<16x32xf32>
    %146 = arith.truncf %145 : vector<16x32xf32> to vector<16x32xbf16>
    %cst_40 = arith.constant dense<0.000000e+00> : vector<16x16xf32>
    %147 = tpu.matmul %142, %144, %cst_40 {dimension_numbers = #tpu.dot_dimension_numbers<[1], [1], [0], [0], [0, 0, 1, 0], [], []>} : vector<16x32xbf16>, vector<16x32xbf16>, vector<16x16xf32> -> vector<16x16xf32>
    %cst_41 = arith.constant dense<0xFF800000> : vector<16xf32>
    %148 = vector.multi_reduction <maximumf>, %147, %cst_41 [1] : vector<16x16xf32> to vector<16xf32>
    %149 = vector.shape_cast %148 : vector<16xf32> to vector<16x1xf32>
    %150 = vector.broadcast %149 : vector<16x1xf32> to vector<16x16xf32>
    %151 = arith.subf %147, %150 : vector<16x16xf32>
    %152 = math.exp %151 : vector<16x16xf32>
    %cst_42 = arith.constant dense<0.000000e+00> : vector<16xf32>
    %153 = vector.multi_reduction <add>, %152, %cst_42 [1] : vector<16x16xf32> to vector<16xf32>
    %154 = vector.shape_cast %153 : vector<16xf32> to vector<16x1xf32>
    %155 = tpu.reciprocal %154 {approx = true} : vector<16x1xf32> -> vector<16x1xf32>
    %156 = vector.broadcast %155 : vector<16x1xf32> to vector<16x16xf32>
    %157 = arith.mulf %152, %156 : vector<16x16xf32>
    %158 = arith.truncf %157 : vector<16x16xf32> to vector<16x16xbf16>
    %cst_43 = arith.constant dense<0.000000e+00> : vector<16x32xf32>
    %159 = tpu.matmul %158, %146, %cst_43 {dimension_numbers = #tpu.dot_dimension_numbers<[1], [0], [0], [1], [0, 0, 1, 1], [], []>} : vector<16x16xbf16>, vector<16x32xbf16>, vector<16x32xf32> -> vector<16x32xf32>
    %160 = vector.extract_strided_slice %100 {offsets = [0, 96], sizes = [16, 32], strides = [1, 1]} : vector<16x128xf32> to vector<16x32xf32>
    %161 = arith.truncf %160 : vector<16x32xf32> to vector<16x32xbf16>
    %162 = vector.extract_strided_slice %101 {offsets = [0, 96], sizes = [16, 32], strides = [1, 1]} : vector<16x128xf32> to vector<16x32xf32>
    %163 = arith.truncf %162 : vector<16x32xf32> to vector<16x32xbf16>
    %164 = vector.extract_strided_slice %102 {offsets = [0, 96], sizes = [16, 32], strides = [1, 1]} : vector<16x128xf32> to vector<16x32xf32>
    %165 = arith.truncf %164 : vector<16x32xf32> to vector<16x32xbf16>
    %cst_44 = arith.constant dense<0.000000e+00> : vector<16x16xf32>
    %166 = tpu.matmul %161, %163, %cst_44 {dimension_numbers = #tpu.dot_dimension_numbers<[1], [1], [0], [0], [0, 0, 1, 0], [], []>} : vector<16x32xbf16>, vector<16x32xbf16>, vector<16x16xf32> -> vector<16x16xf32>
    %cst_45 = arith.constant dense<0xFF800000> : vector<16xf32>
    %167 = vector.multi_reduction <maximumf>, %166, %cst_45 [1] : vector<16x16xf32> to vector<16xf32>
    %168 = vector.shape_cast %167 : vector<16xf32> to vector<16x1xf32>
    %169 = vector.broadcast %168 : vector<16x1xf32> to vector<16x16xf32>
    %170 = arith.subf %166, %169 : vector<16x16xf32>
    %171 = math.exp %170 : vector<16x16xf32>
    %cst_46 = arith.constant dense<0.000000e+00> : vector<16xf32>
    %172 = vector.multi_reduction <add>, %171, %cst_46 [1] : vector<16x16xf32> to vector<16xf32>
    %173 = vector.shape_cast %172 : vector<16xf32> to vector<16x1xf32>
    %174 = tpu.reciprocal %173 {approx = true} : vector<16x1xf32> -> vector<16x1xf32>
    %175 = vector.broadcast %174 : vector<16x1xf32> to vector<16x16xf32>
    %176 = arith.mulf %171, %175 : vector<16x16xf32>
    %177 = arith.truncf %176 : vector<16x16xf32> to vector<16x16xbf16>
    %cst_47 = arith.constant dense<0.000000e+00> : vector<16x32xf32>
    %178 = tpu.matmul %177, %165, %cst_47 {dimension_numbers = #tpu.dot_dimension_numbers<[1], [0], [0], [1], [0, 0, 1, 1], [], []>} : vector<16x16xbf16>, vector<16x32xbf16>, vector<16x32xf32> -> vector<16x32xf32>
    %179 = tpu.concatenate %121, %140, %159, %178 in 1 : vector<16x32xf32>, vector<16x32xf32>, vector<16x32xf32>, vector<16x32xf32> -> vector<16x128xf32>
    %180 = tpu.concatenate %97, %179 in 0 : vector<16x128xf32>, vector<16x128xf32> -> vector<32x128xf32>
    %181 = arith.truncf %180 : vector<32x128xf32> to vector<32x128xbf16>
    %cst_48 = arith.constant dense<0.000000e+00> : vector<32x128xf32>
    %182 = tpu.matmul %181, %9, %cst_48 {dimension_numbers = #tpu.dot_dimension_numbers<[1], [0], [0], [1], [0, 0, 1, 1], [], []>} : vector<32x128xbf16>, vector<128x128xbf16>, vector<32x128xf32> -> vector<32x128xf32>
    %183 = vector.broadcast %11 : vector<1x128xf32> to vector<32x128xf32>
    %184 = arith.addf %182, %183 : vector<32x128xf32>
    %185 = arith.addf %3, %184 : vector<32x128xf32>
    %c0_49 = arith.constant 0 : index
    %c0_50 = arith.constant 0 : index
    %c0_51 = arith.constant 0 : index
    %186 = vector.load %arg8[%c0_49, %c0_50, %c0_51] : memref<1x1x128xf32, #tpu.memory_space<vmem>>, vector<1x1x128xf32>
    %187 = vector.shape_cast %186 : vector<1x1x128xf32> to vector<1x128xf32>
    %c0_52 = arith.constant 0 : index
    %c0_53 = arith.constant 0 : index
    %c0_54 = arith.constant 0 : index
    %188 = vector.load %arg9[%c0_52, %c0_53, %c0_54] : memref<1x1x128xf32, #tpu.memory_space<vmem>>, vector<1x1x128xf32>
    %189 = vector.shape_cast %188 : vector<1x1x128xf32> to vector<1x128xf32>
    %cst_55 = arith.constant dense<0.000000e+00> : vector<32xf32>
    %190 = vector.multi_reduction <add>, %185, %cst_55 [1] : vector<32x128xf32> to vector<32xf32>
    %191 = vector.shape_cast %190 : vector<32xf32> to vector<32x1xf32>
    %cst_56 = arith.constant 1.280000e+02 : f32
    %192 = vector.broadcast %cst_56 : f32 to vector<32x1xf32>
    %193 = arith.divf %191, %192 : vector<32x1xf32>
    %194 = vector.broadcast %193 : vector<32x1xf32> to vector<32x128xf32>
    %195 = arith.subf %185, %194 : vector<32x128xf32>
    %196 = arith.mulf %195, %195 : vector<32x128xf32>
    %cst_57 = arith.constant dense<0.000000e+00> : vector<32xf32>
    %197 = vector.multi_reduction <add>, %196, %cst_57 [1] : vector<32x128xf32> to vector<32xf32>
    %198 = vector.shape_cast %197 : vector<32xf32> to vector<32x1xf32>
    %cst_58 = arith.constant 1.280000e+02 : f32
    %199 = vector.broadcast %cst_58 : f32 to vector<32x1xf32>
    %200 = arith.divf %198, %199 : vector<32x1xf32>
    %cst_59 = arith.constant 9.99999974E-6 : f32
    %201 = vector.broadcast %cst_59 : f32 to vector<32x1xf32>
    %202 = arith.addf %200, %201 : vector<32x1xf32>
    %203 = math.rsqrt %202 : vector<32x1xf32>
    %204 = vector.broadcast %203 : vector<32x1xf32> to vector<32x128xf32>
    %205 = arith.mulf %195, %204 : vector<32x128xf32>
    %206 = vector.broadcast %187 : vector<1x128xf32> to vector<32x128xf32>
    %207 = arith.mulf %205, %206 : vector<32x128xf32>
    %208 = vector.broadcast %189 : vector<1x128xf32> to vector<32x128xf32>
    %209 = arith.addf %207, %208 : vector<32x128xf32>
    %c0_60 = arith.constant 0 : index
    %c0_61 = arith.constant 0 : index
    %210 = vector.load %arg3[%c0_60, %c0_61] : memref<2x128xf32, #tpu.memory_space<vmem>>, vector<2x128xf32>
    %c0_62 = arith.constant 0 : index
    %c0_63 = arith.constant 0 : index
    %c0_64 = arith.constant 0 : index
    %211 = vector.load %arg10[%c0_62, %c0_63, %c0_64] : memref<1x128x128xbf16, #tpu.memory_space<vmem>>, vector<1x128x128xbf16>
    %212 = vector.shape_cast %211 : vector<1x128x128xbf16> to vector<128x128xbf16>
    %c0_65 = arith.constant 0 : index
    %c0_66 = arith.constant 0 : index
    %c0_67 = arith.constant 0 : index
    %213 = vector.load %arg11[%c0_65, %c0_66, %c0_67] : memref<1x1x128xf32, #tpu.memory_space<vmem>>, vector<1x1x128xf32>
    %214 = vector.shape_cast %213 : vector<1x1x128xf32> to vector<1x128xf32>
    %215 = arith.truncf %210 : vector<2x128xf32> to vector<2x128xbf16>
    %cst_68 = arith.constant dense<0.000000e+00> : vector<2x128xf32>
    %216 = tpu.matmul %215, %212, %cst_68 {dimension_numbers = #tpu.dot_dimension_numbers<[1], [0], [0], [1], [0, 0, 1, 1], [], []>} : vector<2x128xbf16>, vector<128x128xbf16>, vector<2x128xf32> -> vector<2x128xf32>
    %217 = vector.broadcast %214 : vector<1x128xf32> to vector<2x128xf32>
    %218 = arith.addf %216, %217 : vector<2x128xf32>
    %c0_69 = arith.constant 0 : index
    %c0_70 = arith.constant 0 : index
    %c0_71 = arith.constant 0 : index
    %219 = vector.load %arg12[%c0_69, %c0_70, %c0_71] : memref<1x128x128xbf16, #tpu.memory_space<vmem>>, vector<1x128x128xbf16>
    %220 = vector.shape_cast %219 : vector<1x128x128xbf16> to vector<128x128xbf16>
    %c0_72 = arith.constant 0 : index
    %c0_73 = arith.constant 0 : index
    %c0_74 = arith.constant 0 : index
    %221 = vector.load %arg13[%c0_72, %c0_73, %c0_74] : memref<1x1x128xf32, #tpu.memory_space<vmem>>, vector<1x1x128xf32>
    %222 = vector.shape_cast %221 : vector<1x1x128xf32> to vector<1x128xf32>
    %223 = arith.truncf %218 : vector<2x128xf32> to vector<2x128xbf16>
    %cst_75 = arith.constant dense<0.000000e+00> : vector<2x128xf32>
    %224 = tpu.matmul %223, %220, %cst_75 {dimension_numbers = #tpu.dot_dimension_numbers<[1], [0], [0], [1], [0, 0, 1, 1], [], []>} : vector<2x128xbf16>, vector<128x128xbf16>, vector<2x128xf32> -> vector<2x128xf32>
    %225 = vector.broadcast %222 : vector<1x128xf32> to vector<2x128xf32>
    %226 = arith.addf %224, %225 : vector<2x128xf32>
    %227 = vector.extract_strided_slice %209 {offsets = [0, 0], sizes = [16, 128], strides = [1, 1]} : vector<32x128xf32> to vector<16x128xf32>
    %228 = vector.extract_strided_slice %226 {offsets = [0, 0], sizes = [1, 128], strides = [1, 1]} : vector<2x128xf32> to vector<1x128xf32>
    %229 = vector.broadcast %228 : vector<1x128xf32> to vector<16x128xf32>
    %230 = arith.addf %227, %229 : vector<16x128xf32>
    %231 = vector.extract_strided_slice %209 {offsets = [16, 0], sizes = [16, 128], strides = [1, 1]} : vector<32x128xf32> to vector<16x128xf32>
    %232 = vector.extract_strided_slice %226 {offsets = [1, 0], sizes = [1, 128], strides = [1, 1]} : vector<2x128xf32> to vector<1x128xf32>
    %233 = vector.broadcast %232 : vector<1x128xf32> to vector<16x128xf32>
    %234 = arith.addf %231, %233 : vector<16x128xf32>
    %235 = tpu.concatenate %230, %234 in 0 : vector<16x128xf32>, vector<16x128xf32> -> vector<32x128xf32>
    %c0_76 = arith.constant 0 : index
    %c0_77 = arith.constant 0 : index
    %c0_78 = arith.constant 0 : index
    %236 = vector.load %arg14[%c0_76, %c0_77, %c0_78] : memref<1x1x128xf32, #tpu.memory_space<vmem>>, vector<1x1x128xf32>
    %237 = vector.shape_cast %236 : vector<1x1x128xf32> to vector<1x128xf32>
    %c0_79 = arith.constant 0 : index
    %c0_80 = arith.constant 0 : index
    %c0_81 = arith.constant 0 : index
    %238 = vector.load %arg15[%c0_79, %c0_80, %c0_81] : memref<1x1x128xf32, #tpu.memory_space<vmem>>, vector<1x1x128xf32>
    %239 = vector.shape_cast %238 : vector<1x1x128xf32> to vector<1x128xf32>
    %cst_82 = arith.constant dense<0.000000e+00> : vector<32xf32>
    %240 = vector.multi_reduction <add>, %235, %cst_82 [1] : vector<32x128xf32> to vector<32xf32>
    %241 = vector.shape_cast %240 : vector<32xf32> to vector<32x1xf32>
    %cst_83 = arith.constant 1.280000e+02 : f32
    %242 = vector.broadcast %cst_83 : f32 to vector<32x1xf32>
    %243 = arith.divf %241, %242 : vector<32x1xf32>
    %244 = vector.broadcast %243 : vector<32x1xf32> to vector<32x128xf32>
    %245 = arith.subf %235, %244 : vector<32x128xf32>
    %246 = arith.mulf %245, %245 : vector<32x128xf32>
    %cst_84 = arith.constant dense<0.000000e+00> : vector<32xf32>
    %247 = vector.multi_reduction <add>, %246, %cst_84 [1] : vector<32x128xf32> to vector<32xf32>
    %248 = vector.shape_cast %247 : vector<32xf32> to vector<32x1xf32>
    %cst_85 = arith.constant 1.280000e+02 : f32
    %249 = vector.broadcast %cst_85 : f32 to vector<32x1xf32>
    %250 = arith.divf %248, %249 : vector<32x1xf32>
    %cst_86 = arith.constant 9.99999974E-6 : f32
    %251 = vector.broadcast %cst_86 : f32 to vector<32x1xf32>
    %252 = arith.addf %250, %251 : vector<32x1xf32>
    %253 = math.rsqrt %252 : vector<32x1xf32>
    %254 = vector.broadcast %253 : vector<32x1xf32> to vector<32x128xf32>
    %255 = arith.mulf %245, %254 : vector<32x128xf32>
    %256 = vector.broadcast %237 : vector<1x128xf32> to vector<32x128xf32>
    %257 = arith.mulf %255, %256 : vector<32x128xf32>
    %258 = vector.broadcast %239 : vector<1x128xf32> to vector<32x128xf32>
    %259 = arith.addf %257, %258 : vector<32x128xf32>
    %c0_87 = arith.constant 0 : index
    %c0_88 = arith.constant 0 : index
    %c0_89 = arith.constant 0 : index
    %260 = vector.load %arg16[%c0_87, %c0_88, %c0_89] : memref<1x128x256xbf16, #tpu.memory_space<vmem>>, vector<1x128x256xbf16>
    %261 = vector.shape_cast %260 : vector<1x128x256xbf16> to vector<128x256xbf16>
    %c0_90 = arith.constant 0 : index
    %c0_91 = arith.constant 0 : index
    %c0_92 = arith.constant 0 : index
    %262 = vector.load %arg17[%c0_90, %c0_91, %c0_92] : memref<1x1x256xf32, #tpu.memory_space<vmem>>, vector<1x1x256xf32>
    %263 = vector.shape_cast %262 : vector<1x1x256xf32> to vector<1x256xf32>
    %264 = arith.truncf %259 : vector<32x128xf32> to vector<32x128xbf16>
    %cst_93 = arith.constant dense<0.000000e+00> : vector<32x256xf32>
    %265 = tpu.matmul %264, %261, %cst_93 {dimension_numbers = #tpu.dot_dimension_numbers<[1], [0], [0], [1], [0, 0, 1, 1], [], []>} : vector<32x128xbf16>, vector<128x256xbf16>, vector<32x256xf32> -> vector<32x256xf32>
    %266 = vector.broadcast %263 : vector<1x256xf32> to vector<32x256xf32>
    %267 = arith.addf %265, %266 : vector<32x256xf32>
    %cst_94 = arith.constant 0.000000e+00 : f32
    %268 = vector.broadcast %cst_94 : f32 to vector<32x256xf32>
    %269 = arith.maximumf %267, %268 : vector<32x256xf32>
    %c0_95 = arith.constant 0 : index
    %c0_96 = arith.constant 0 : index
    %c0_97 = arith.constant 0 : index
    %270 = vector.load %arg18[%c0_95, %c0_96, %c0_97] : memref<1x256x128xbf16, #tpu.memory_space<vmem>>, vector<1x256x128xbf16>
    %271 = vector.shape_cast %270 : vector<1x256x128xbf16> to vector<256x128xbf16>
    %c0_98 = arith.constant 0 : index
    %c0_99 = arith.constant 0 : index
    %c0_100 = arith.constant 0 : index
    %272 = vector.load %arg19[%c0_98, %c0_99, %c0_100] : memref<1x1x128xf32, #tpu.memory_space<vmem>>, vector<1x1x128xf32>
    %273 = vector.shape_cast %272 : vector<1x1x128xf32> to vector<1x128xf32>
    %274 = arith.truncf %269 : vector<32x256xf32> to vector<32x256xbf16>
    %cst_101 = arith.constant dense<0.000000e+00> : vector<32x128xf32>
    %275 = tpu.matmul %274, %271, %cst_101 {dimension_numbers = #tpu.dot_dimension_numbers<[1], [0], [0], [1], [0, 0, 1, 1], [], []>} : vector<32x256xbf16>, vector<256x128xbf16>, vector<32x128xf32> -> vector<32x128xf32>
    %276 = vector.broadcast %273 : vector<1x128xf32> to vector<32x128xf32>
    %277 = arith.addf %275, %276 : vector<32x128xf32>
    %278 = arith.addf %259, %277 : vector<32x128xf32>
    %c0_102 = arith.constant 0 : index
    %c0_103 = arith.constant 0 : index
    %c0_104 = arith.constant 0 : index
    %279 = vector.load %arg20[%c0_102, %c0_103, %c0_104] : memref<1x1x128xf32, #tpu.memory_space<vmem>>, vector<1x1x128xf32>
    %280 = vector.shape_cast %279 : vector<1x1x128xf32> to vector<1x128xf32>
    %c0_105 = arith.constant 0 : index
    %c0_106 = arith.constant 0 : index
    %c0_107 = arith.constant 0 : index
    %281 = vector.load %arg21[%c0_105, %c0_106, %c0_107] : memref<1x1x128xf32, #tpu.memory_space<vmem>>, vector<1x1x128xf32>
    %282 = vector.shape_cast %281 : vector<1x1x128xf32> to vector<1x128xf32>
    %cst_108 = arith.constant dense<0.000000e+00> : vector<32xf32>
    %283 = vector.multi_reduction <add>, %278, %cst_108 [1] : vector<32x128xf32> to vector<32xf32>
    %284 = vector.shape_cast %283 : vector<32xf32> to vector<32x1xf32>
    %cst_109 = arith.constant 1.280000e+02 : f32
    %285 = vector.broadcast %cst_109 : f32 to vector<32x1xf32>
    %286 = arith.divf %284, %285 : vector<32x1xf32>
    %287 = vector.broadcast %286 : vector<32x1xf32> to vector<32x128xf32>
    %288 = arith.subf %278, %287 : vector<32x128xf32>
    %289 = arith.mulf %288, %288 : vector<32x128xf32>
    %cst_110 = arith.constant dense<0.000000e+00> : vector<32xf32>
    %290 = vector.multi_reduction <add>, %289, %cst_110 [1] : vector<32x128xf32> to vector<32xf32>
    %291 = vector.shape_cast %290 : vector<32xf32> to vector<32x1xf32>
    %cst_111 = arith.constant 1.280000e+02 : f32
    %292 = vector.broadcast %cst_111 : f32 to vector<32x1xf32>
    %293 = arith.divf %291, %292 : vector<32x1xf32>
    %cst_112 = arith.constant 9.99999974E-6 : f32
    %294 = vector.broadcast %cst_112 : f32 to vector<32x1xf32>
    %295 = arith.addf %293, %294 : vector<32x1xf32>
    %296 = math.rsqrt %295 : vector<32x1xf32>
    %297 = vector.broadcast %296 : vector<32x1xf32> to vector<32x128xf32>
    %298 = arith.mulf %288, %297 : vector<32x128xf32>
    %299 = vector.broadcast %280 : vector<1x128xf32> to vector<32x128xf32>
    %300 = arith.mulf %298, %299 : vector<32x128xf32>
    %301 = vector.broadcast %282 : vector<1x128xf32> to vector<32x128xf32>
    %302 = arith.addf %300, %301 : vector<32x128xf32>
    %c0_113 = arith.constant 0 : index
    %c0_114 = arith.constant 0 : index
    %303 = vector.load %arg24[%c0_113, %c0_114] : memref<32x128xf32, #tpu.memory_space<vmem>>, vector<32x128xf32>
    tpu.vector_store %arg24[%c0_113, %c0_114], %302 {strides = array<i32>} : memref<32x128xf32, #tpu.memory_space<vmem>>, vector<32x128xf32>,
    %c1_i32 = arith.constant 1 : i32
    %304 = arith.cmpi eq, %arg1, %c1_i32 : i32
    %305 = arith.extui %304 : i1 to i32
    %c0_i32_115 = arith.constant 0 : i32
    %306 = arith.cmpi ne, %305, %c0_i32_115 : i32
    scf.if %306 {
      %c0_116 = arith.constant 0 : index
      %c0_117 = arith.constant 0 : index
      %307 = vector.load %arg22[%c0_116, %c0_117] : memref<128x128xbf16, #tpu.memory_space<vmem>>, vector<128x128xbf16>
      %c0_118 = arith.constant 0 : index
      %c0_119 = arith.constant 0 : index
      %308 = vector.load %arg23[%c0_118, %c0_119] : memref<1x128xf32, #tpu.memory_space<vmem>>, vector<1x128xf32>
      %309 = arith.truncf %302 : vector<32x128xf32> to vector<32x128xbf16>
      %cst_120 = arith.constant dense<0.000000e+00> : vector<32x128xf32>
      %310 = tpu.matmul %309, %307, %cst_120 {dimension_numbers = #tpu.dot_dimension_numbers<[1], [0], [0], [1], [0, 0, 1, 1], [], []>} : vector<32x128xbf16>, vector<128x128xbf16>, vector<32x128xf32> -> vector<32x128xf32>
      %311 = vector.broadcast %308 : vector<1x128xf32> to vector<32x128xf32>
      %312 = arith.addf %310, %311 : vector<32x128xf32>
      %c0_121 = arith.constant 0 : index
      %c0_122 = arith.constant 0 : index
      %313 = vector.load %arg24[%c0_121, %c0_122] : memref<32x128xf32, #tpu.memory_space<vmem>>, vector<32x128xf32>
      tpu.vector_store %arg24[%c0_121, %c0_122], %312 {strides = array<i32>} : memref<32x128xf32, #tpu.memory_space<vmem>>, vector<32x128xf32>,
    } else {
    }
    return
  }
  func.func @transform_0(%arg0: i32, %arg1: i32) -> (i32, i32) {
    %c0_i32 = arith.constant 0 : i32
    %c0_i32_0 = arith.constant 0 : i32
    return %arg0, %c0_i32 : i32, i32
  }
  func.func @transform_1(%arg0: i32, %arg1: i32) -> (i32, i32) {
    %c0_i32 = arith.constant 0 : i32
    %c0_i32_0 = arith.constant 0 : i32
    return %arg0, %c0_i32 : i32, i32
  }
  func.func @transform_2(%arg0: i32, %arg1: i32) -> (i32, i32, i32) {
    %c0_i32 = arith.constant 0 : i32
    %c0_i32_0 = arith.constant 0 : i32
    %c0_i32_1 = arith.constant 0 : i32
    return %arg1, %c0_i32, %c0_i32_0 : i32, i32, i32
  }
  func.func @transform_3(%arg0: i32, %arg1: i32) -> (i32, i32, i32) {
    %c0_i32 = arith.constant 0 : i32
    %c0_i32_0 = arith.constant 0 : i32
    %c0_i32_1 = arith.constant 0 : i32
    return %arg1, %c0_i32, %c0_i32_0 : i32, i32, i32
  }
  func.func @transform_4(%arg0: i32, %arg1: i32) -> (i32, i32, i32) {
    %c0_i32 = arith.constant 0 : i32
    %c0_i32_0 = arith.constant 0 : i32
    %c0_i32_1 = arith.constant 0 : i32
    return %arg1, %c0_i32, %c0_i32_0 : i32, i32, i32
  }
  func.func @transform_5(%arg0: i32, %arg1: i32) -> (i32, i32, i32) {
    %c0_i32 = arith.constant 0 : i32
    %c0_i32_0 = arith.constant 0 : i32
    %c0_i32_1 = arith.constant 0 : i32
    return %arg1, %c0_i32, %c0_i32_0 : i32, i32, i32
  }
  func.func @transform_6(%arg0: i32, %arg1: i32) -> (i32, i32, i32) {
    %c0_i32 = arith.constant 0 : i32
    %c0_i32_0 = arith.constant 0 : i32
    %c0_i32_1 = arith.constant 0 : i32
    return %arg1, %c0_i32, %c0_i32_0 : i32, i32, i32
  }
  func.func @transform_7(%arg0: i32, %arg1: i32) -> (i32, i32, i32) {
    %c0_i32 = arith.constant 0 : i32
    %c0_i32_0 = arith.constant 0 : i32
    %c0_i32_1 = arith.constant 0 : i32
    return %arg1, %c0_i32, %c0_i32_0 : i32, i32, i32
  }
  func.func @transform_8(%arg0: i32, %arg1: i32) -> (i32, i32, i32) {
    %c0_i32 = arith.constant 0 : i32
    %c0_i32_0 = arith.constant 0 : i32
    %c0_i32_1 = arith.constant 0 : i32
    return %arg1, %c0_i32, %c0_i32_0 : i32, i32, i32
  }
  func.func @transform_9(%arg0: i32, %arg1: i32) -> (i32, i32, i32) {
    %c0_i32 = arith.constant 0 : i32
    %c0_i32_0 = arith.constant 0 : i32
    %c0_i32_1 = arith.constant 0 : i32
    return %arg1, %c0_i32, %c0_i32_0 : i32, i32, i32
  }
  func.func @transform_10(%arg0: i32, %arg1: i32) -> (i32, i32, i32) {
    %c0_i32 = arith.constant 0 : i32
    %c0_i32_0 = arith.constant 0 : i32
    %c0_i32_1 = arith.constant 0 : i32
    return %arg1, %c0_i32, %c0_i32_0 : i32, i32, i32
  }
  func.func @transform_11(%arg0: i32, %arg1: i32) -> (i32, i32, i32) {
    %c0_i32 = arith.constant 0 : i32
    %c0_i32_0 = arith.constant 0 : i32
    %c0_i32_1 = arith.constant 0 : i32
    return %arg1, %c0_i32, %c0_i32_0 : i32, i32, i32
  }
  func.func @transform_12(%arg0: i32, %arg1: i32) -> (i32, i32, i32) {
    %c0_i32 = arith.constant 0 : i32
    %c0_i32_0 = arith.constant 0 : i32
    %c0_i32_1 = arith.constant 0 : i32
    return %arg1, %c0_i32, %c0_i32_0 : i32, i32, i32
  }
  func.func @transform_13(%arg0: i32, %arg1: i32) -> (i32, i32, i32) {
    %c0_i32 = arith.constant 0 : i32
    %c0_i32_0 = arith.constant 0 : i32
    %c0_i32_1 = arith.constant 0 : i32
    return %arg1, %c0_i32, %c0_i32_0 : i32, i32, i32
  }
  func.func @transform_14(%arg0: i32, %arg1: i32) -> (i32, i32, i32) {
    %c0_i32 = arith.constant 0 : i32
    %c0_i32_0 = arith.constant 0 : i32
    %c0_i32_1 = arith.constant 0 : i32
    return %arg1, %c0_i32, %c0_i32_0 : i32, i32, i32
  }
  func.func @transform_15(%arg0: i32, %arg1: i32) -> (i32, i32, i32) {
    %c0_i32 = arith.constant 0 : i32
    %c0_i32_0 = arith.constant 0 : i32
    %c0_i32_1 = arith.constant 0 : i32
    return %arg1, %c0_i32, %c0_i32_0 : i32, i32, i32
  }
  func.func @transform_16(%arg0: i32, %arg1: i32) -> (i32, i32, i32) {
    %c0_i32 = arith.constant 0 : i32
    %c0_i32_0 = arith.constant 0 : i32
    %c0_i32_1 = arith.constant 0 : i32
    return %arg1, %c0_i32, %c0_i32_0 : i32, i32, i32
  }
  func.func @transform_17(%arg0: i32, %arg1: i32) -> (i32, i32, i32) {
    %c0_i32 = arith.constant 0 : i32
    %c0_i32_0 = arith.constant 0 : i32
    %c0_i32_1 = arith.constant 0 : i32
    return %arg1, %c0_i32, %c0_i32_0 : i32, i32, i32
  }
  func.func @transform_18(%arg0: i32, %arg1: i32) -> (i32, i32, i32) {
    %c0_i32 = arith.constant 0 : i32
    %c0_i32_0 = arith.constant 0 : i32
    %c0_i32_1 = arith.constant 0 : i32
    return %arg1, %c0_i32, %c0_i32_0 : i32, i32, i32
  }
  func.func @transform_19(%arg0: i32, %arg1: i32) -> (i32, i32, i32) {
    %c0_i32 = arith.constant 0 : i32
    %c0_i32_0 = arith.constant 0 : i32
    %c0_i32_1 = arith.constant 0 : i32
    return %arg1, %c0_i32, %c0_i32_0 : i32, i32, i32
  }
  func.func @transform_20(%arg0: i32, %arg1: i32) -> (i32, i32) {
    %c0_i32 = arith.constant 0 : i32
    %c0_i32_0 = arith.constant 0 : i32
    %c0_i32_1 = arith.constant 0 : i32
    return %c0_i32, %c0_i32_0 : i32, i32
  }
  func.func @transform_21(%arg0: i32, %arg1: i32) -> (i32, i32) {
    %c0_i32 = arith.constant 0 : i32
    %c0_i32_0 = arith.constant 0 : i32
    %c0_i32_1 = arith.constant 0 : i32
    return %c0_i32, %c0_i32_0 : i32, i32
  }
  func.func @transform_22(%arg0: i32, %arg1: i32) -> (i32, i32) {
    %c0_i32 = arith.constant 0 : i32
    %c0_i32_0 = arith.constant 0 : i32
    return %arg0, %c0_i32 : i32, i32
  }
}

</mosaic_0001>

<bundles_post_ra>
// kernel: enedina_forward.5
= control target key start
LH: loop header
LB: loop body
LE: loop exit
PB: predicated region body
PF: predicated region fallthrough
CT: control target
= control target key end

     0   :  { %s2341_s0 = inlined_call_operand.vmem [shape: f32[2,128], index: 0, kind: input, shape index: {}]   ;;  %s2342_s1 = inlined_call_operand.vmem [shape: bf16[2,128,384], index: 1, kind: input, shape index: {}]   ;;  %s2343_s2 = inlined_call_operand.vmem [shape: f32[2,1,384], index: 2, kind: input, shape index: {}]   ;;  %s2344_s3 = inlined_call_operand.vmem [shape: bf16[2,128,128], index: 3, kind: input, shape index: {}]   ;;  %s2345_s4 = inlined_call_operand.vmem [shape: f32[2,1,128], index: 4, kind: input, shape index: {}]   ;;  %s2346_s5 = inlined_call_operand.vmem [shape: f32[2,1,128], index: 5, kind: input, shape index: {}]   ;;  %s2347_s6 = inlined_call_operand.vmem [shape: f32[2,1,128], index: 6, kind: input, shape index: {}]   ;;  %s2348_s7 = inlined_call_operand.vmem [shape: bf16[2,128,256], index: 7, kind: input, shape index: {}]   ;;  %s2349_s8 = inlined_call_operand.vmem [shape: f32[2,1,256], index: 8, kind: input, shape index: {}]   ;;  %s2350_s9 = inlined_call_operand.vmem [shape: bf16[2,256,128], index: 9, kind: input, shape index: {}]   ;;  %s2351_s10 = inlined_call_operand.hbm [shape: f32[2,1,128], index: 10, kind: input, shape index: {}]   ;;  %s2352_s11 = inlined_call_operand.hbm [shape: f32[2,1,128], index: 11, kind: input, shape index: {}]   ;;  %s2353_s12 = inlined_call_operand.hbm [shape: f32[2,1,128], index: 12, kind: input, shape index: {}]   ;;  %s2354_s13 = inlined_call_operand.vmem [shape: f32[2,128], index: 13, kind: output, shape index: {}]  }
   0x1   :  { %2360 = sst [smem:[#allocation13_spill]] %s2341_s0 }
   0x2   :  { %2361 = sst [smem:[#allocation14_spill]] %s2342_s1 }
   0x3   :  { %2362 = sst [smem:[#allocation15_spill]] %s2343_s2 }
   0x4   :  { %2363 = sst [smem:[#allocation16_spill]] %s2344_s3 }
   0x5   :  { %2364 = sst [smem:[#allocation17_spill]] %s2348_s7 }
   0x6   :  { %2365 = sst [smem:[#allocation18_spill]] %s2349_s8 }
   0x7   :  { %2366 = sst [smem:[#allocation19_spill]] %s2350_s9 }
   0x8   :  { %2367 = sst [smem:[#allocation20_spill]] %s2352_s11 }
   0x9   :  { %2368 = sst [smem:[#allocation21_spill]] %s2354_s13 }
   0xa   :  { %18 = vsyncpa [#allocation3], 0 }
   0xb   :  { %20 = vsyncpa [#allocation3 + $0x1], 0 }
   0xc   :  { %21 = vsyncpa [#allocation5], 0 }
   0xd   :  { %23 = vsyncpa [#allocation5 + $0x1], 0  ;;  %s2048_s25 = smov 0   ;;  %s2050_s26 = smov 0  }
   0xe   :  { %s2052_s27 = smov 0   ;;  %s2054_s28 = smov 0  }
   0xf   :  { %s2056_s29 = smov 0   ;;  %s2058_s30 = smov 0  }
  0x10 LB: > { %2369 = sst [smem:[#allocation9_spill]] %s1958_s27  ;;  %s2355_s14 = sadd.s32 4294967295, %s1970_s30   ;;  %s1970_s30 = sphi %s2058_s30, %s29_s30   ;;  %s1966_s29 = sphi %s2056_s29, %s2395_s29   ;;  %s1962_s28 = sphi %s2054_s28, %s2394_s28   ;;  %s1958_s27 = sphi %s2052_s27, %s2393_s27   ;;  %s1954_s26 = sphi %s2050_s26, %s2397_s26   ;;  %s1950_s25 = sphi %s2048_s25, %s2396_s25  }
  0x11   : > { %2370 = sst [smem:[#allocation10_spill]] %s1966_s29  ;;  %s38_s15 = sadd.s32 1, %s1966_s29 }
  0x12   : > { %p39_p0 = scmp.ge.s32.totalorder %s38_s15, 2  ;;  %s308_s16 = sadd.s32 1, %s1958_s27 }
  0x13   : > { %p315_p1 = scmp.ne.s32.totalorder %s1958_s27, %s1954_s26  ;;  %p316_p2 = scmp.eq.s32.totalorder %s1970_s30, 0 }
  0x14   : > { %s2399_s15 = smov (%p39_p0, %s38_s15), 0  ;;  %p321_p4 = scmp.ne.s32.totalorder %s1954_s26, %s1950_s25 }
  0x15   : > { %2371 = sst [smem:[#allocation11_spill]] %s2399_s15  ;;  %p317_p3 = por %p316_p2, %p315_p1 }
  0x16   : > { %s305_s17 = ssub.s32 %s1966_s29, %s2399_s15  ;;  %p322_p5 = scmp.eq.s32.totalorder %s2355_s14, 0 }
  0x17   : > { %p306_p6 = scmp.eq.s32.totalorder %s305_s17, 0  ;;  %p1720_p8 = scmp.lt.s32.totalorder %s1970_s30, 2 }
  0x18   : > { %p2089_p7 = por %p322_p5, %p321_p4  ;;  %s2098_s20 = sand.u32 1, %s1958_s27  }
  0x19   : > { %s2095_s19 = scalar_select %p306_p6, %s1958_s27, %s308_s16  }
  0x1a   : > { %s2101_s21 = sshll.u32 %s1966_s29, 4  ;;  %p2103_p9 = pnand %p1720_p8, %p317_p3 }
  0x1b   : > { %2373 = sst [smem:[#allocation12_spill]] %s2095_s19  ;;  %s511_s23 = sand.u32 1, %s1970_s30  }
  0x1c   : > { %s2375_s11 = sld [smem:[#allocation20_spill]]  ;;  %s514_s14 = scalar_lea.vmem [#allocation4], %s2098_s20 }
  0x1d   : > { %s521_s16 = sshll.u32 %s514_s14, 4  ;;  %p1552_p10 = scmp.ge.s32.totalorder %s1970_s30, 1  ;;  %s522_s16 = int_to_ptr.vmem [resolvable:$true] %s521_s16 }
  0x1e   : > { %p543_p11 = scmp.lt.s32.totalorder %s1970_s30, 3  ;;  %s2115_s15 = scalar_lea.sflag [#allocation5], %s511_s23 }
  0x1f   : > { %p1834_p12 = pneg %p2103_p9  ;;  %s1845_s29 = scalar_lea.vmem %s522_s16, 16 }
  0x20   : > { %p1846_p13 = scmp.ne.s32.totalorder %s522_s16, %s1845_s29  ;;  %s1972_s19 = smov [#allocation4]  }
  0x21   : > { %s1850_s27 = sshll.u32 %s1972_s19, 4  ;;  %s1851_s27 = int_to_ptr.vmem [resolvable:$false] %s1850_s27 }
  0x22   : > { %s519_s17 = scalar_lea.hbm %s2375_s11, %s2101_s21  ;;  %p1848_p0 = pnand %p1846_p13, %p1834_p12 }
  0x23   : > { %s1852_s24 = scalar_lea.vmem %s1851_s27, 32  ;;  %p1853_p2 = scmp.lt.s32.totalorder %s522_s16, %s1851_s27 }
  0x24   : > { %p1849_p1 = pneg %p1848_p0  ;;  %p1854_p3 = scmp.lt.s32.totalorder %s1852_s24, %s1845_s29 }
  0x26   : > { %p1855_p4 = por %p1854_p3, %p1853_p2 }
  0x28   : > { %p1856_p5 = pnand %p1855_p4, %p1849_p1 }
  0x2a   : > { %1859 = shalt.err (!%p1856_p5)
}
  0x2b   : > { %1716 = dma.hbm_to_vmem [thread:$0]  (!%p2103_p9), %s519_s17, 16, %s522_s16, %s2115_s15  }
  0x2c   : > { %p2129_p6 = pnand %p1552_p10, %p543_p11  ;;  %s502_s19 = scalar_lea.hbm %s2351_s10, %s2101_s21 }
  0x2d   : > { %s497_s23 = scalar_lea.vmem [#allocation2], %s2098_s20  ;;  %s536_s13 = scalar_lea.hbm %s2353_s12, %s2101_s21 }
  0x2e   : > { %s504_s25 = sshll.u32 %s497_s23, 4  ;;  %s495_s0 = scalar_lea.sflag [#allocation3], %s2098_s20  ;;  %s505_s25 = int_to_ptr.vmem [resolvable:$true] %s504_s25 }
  0x2f   : > { %s1873_s9 = scalar_lea.vmem %s505_s25, 16  ;;  %s1973_s17 = smov [#allocation2]  }
  0x30   : > { %p1874_p8 = scmp.ne.s32.totalorder %s505_s25, %s1873_s9  ;;  %s1878_s16 = sshll.u32 %s1973_s17, 4  ;;  %s1879_s16 = int_to_ptr.vmem [resolvable:$false] %s1878_s16 }
  0x31   : > { %s1880_s8 = scalar_lea.vmem %s1879_s16, 32  ;;  %p1881_p13 = scmp.lt.s32.totalorder %s505_s25, %s1879_s16 }
  0x32   : > { %p1876_p10 = pnand %p1874_p8, %p1834_p12  ;;  %p1882_p0 = scmp.lt.s32.totalorder %s1880_s8, %s1873_s9 }
  0x34   : > { %p1877_p11 = pneg %p1876_p10  ;;  %p1883_p1 = por %p1882_p0, %p1881_p13 }
  0x36   : > { %p1884_p2 = pnand %p1883_p1, %p1877_p11 }
  0x38   : > { %1887 = shalt.err (!%p1884_p2)
}
  0x39   : > { %1713 = dma.hbm_to_vmem [thread:$0]  (!%p2103_p9), %s502_s19, 16, %s505_s25, %s495_s0  }
  0x3a   : > { %s531_s11 = scalar_lea.vmem [#allocation6], %s2098_s20  ;;  %s1974_s23 = smov [#allocation6]  }
  0x3b   : > { %s538_s27 = sshll.u32 %s531_s11, 4  ;;  %s1906_s24 = sshll.u32 %s1974_s23, 4  ;;  %s539_s27 = int_to_ptr.vmem [resolvable:$true] %s538_s27  ;;  %s1907_s24 = int_to_ptr.vmem [resolvable:$false] %s1906_s24 }
  0x3c   : > { %s1901_s29 = scalar_lea.vmem %s539_s27, 16  ;;  %s1908_s8 = scalar_lea.vmem %s1907_s24, 32 }
  0x3d   : > { %p1902_p3 = scmp.ne.s32.totalorder %s539_s27, %s1901_s29  ;;  %p1909_p8 = scmp.lt.s32.totalorder %s539_s27, %s1907_s24 }
  0x3e   : > { %p1910_p10 = scmp.lt.s32.totalorder %s1908_s8, %s1901_s29 }
  0x3f   : > { %p1904_p4 = pnand %p1902_p3, %p1834_p12 }
  0x40   : > { %p1911_p11 = por %p1910_p10, %p1909_p8 }
  0x41   : > { %p1905_p5 = pneg %p1904_p4 }
  0x43   : > { %p1912_p13 = pnand %p1911_p11, %p1905_p5 }
  0x45   : > { %1915 = shalt.err (!%p1912_p13)
}
  0x46   : > { %1719 = dma.hbm_to_vmem [thread:$0]  (!%p2103_p9), %s536_s13, 16, %s539_s27, %s2115_s15  }
  0x47   : > { %547 = sbr.rel (%p2129_p6) target bundleno = 1550 (0x60e), region = 72  ;;  %s2163_s20 = sand.u32 (!%p2129_p6), 1, %s1954_s26  }
  0x48   : > { %s550_s19 = scalar_lea.sflag (!%p2129_p6), [#allocation3], %s2163_s20 }
  0x4c   : > { %1941 = dma.done.wait (%p2089_p7), %s550_s19, 16  }
  0x4d   : > { %1943 = vsyncadd (%p2089_p7), %s550_s19, 4294967280  ;;  %s2377_s22 = sadd.s32 4294967295, %s1970_s30  }
  0x4e   : > { %s557_s13 = sand.u32 1, %s2377_s22  }
  0x4f   : > { %s558_s15 = scalar_lea.sflag [#allocation5], %s557_s13 }
  0x50   : > { %1945 = dma.done.wait (%p2089_p7), %s558_s15, 32  }
  0x51   : > { %1947 = vsyncadd (%p2089_p7), %s558_s15, 4294967264  ;;  %p662_p9 = scmp.lt.s32.totalorder %s1962_s28, 1  ;;  %s2378_s3 = sld [smem:[#allocation16_spill]] }
  0x52   : > { %s2379_s1 = sld [smem:[#allocation14_spill]]  ;;  %s568_s27 = scalar_lea.vmem [#allocation6], %s2163_s20 }
  0x53   : > { %s2180_s14 = scalar_select %p662_p9, %s1962_s28, 1 }
  0x54   : > { %s2380_s2 = sld [smem:[#allocation15_spill]]  ;;  %p1561_p7 = scmp.ne.s32.totalorder %s1962_s28, 0 }
  0x55   : > { %s1702_s17 = smul.u32 192, %s2180_s14  ;;  %s1619_s16 = sshll.u32 %s2180_s14, 6 }
  0x56   : > { %s1703_s11 = smul.u32 3, %s2180_s14  ;;  %s1620_s23 = sshll.u32 %s2180_s14, 7 }
  0x57   : > { %s2188_s29 = scalar_lea.vmem %s2378_s3, %s1619_s16  ;;  %s2381_s7 = sld [smem:[#allocation17_spill]] }
  0x58   : > { %s2193_s8 = scalar_lea.vmem %s2379_s1, %s1702_s17  ;;  %s1558_s0 = sshll.u32 %s2180_s14, 1 }
  0x59   : > { %s2382_s22 = sld [smem:[#allocation18_spill]] }
  0x5a   : > { %s2202_s15 = scalar_lea.vmem %s2380_s2, %s1703_s11  ;;  %s2383_s25 = sld [smem:[#allocation19_spill]] }
  0x5b   : > { %s2384_s17 = sld [smem:[#allocation13_spill]] (!%p1561_p7) }
  0x5c   : > { %707 = sbr.rel (%p1561_p7) target bundleno = 100 (0x64), region = 88 }
  0x5d   : > { %s2216_s1 = scalar_lea.vmem %s2381_s7, %s1620_s23  ;;  %s2385_s7 = sld [smem:[#allocation21_spill]] (!%p1561_p7) }
  0x5f   : > { %s2222_s11 = scalar_lea.vmem %s2382_s22, %s1558_s0 }
  0x60   : > { %s2227_s21 = scalar_lea.vmem %s2383_s25, %s1620_s23 }
  0x61   : > { %v708_v0 = vld [vmem:[%s2384_s17] sm:$0x3] }
  0x63   : > { %709 = vst [vmem:[%s2385_s7] sm:$0x3] %v708_v0 }
  0x64 PF: > { %v1975_v1 = vmov 0.0   ;;  %v1772_v2 = vld [vmem:[%s2193_s8 + $0xb0] ss:$12 sps:$4 sm:$0xff]   ;;  %vm1976_vm0 = vmmov 0   ;;  %v1773_v3 = vld [vmem:[%s2193_s8 + $0x98] ss:$12 sps:$4 sm:$0xff]   ;;  %v747_v20 = vlaneseq  ;;  %s2389_s9 = scalar_lea.vmem %s2347_s6, %s2180_s14 }
  0x65   : > { %1662 = vmatprep.subr.bf16.mxu0 %v1975_v1  ;;  %1678 = vmatprep.mubr.msk.bf16.mxu0 %vm1976_vm0, %v1975_v1  ;;  %v1774_v4 = vld [vmem:[%s2193_s8 + $0x80] ss:$12 sps:$4 sm:$0xff]   ;;  %v1780_v5 = vld [vmem:[%s2188_s29 + $0x38] sm:$0xff]   ;;  %v1775_v6 = vld [vmem:[%s2193_s8 + $0x68] ss:$12 sps:$4 sm:$0xff]   ;;  %s2386_s7 = sld [smem:[#allocation21_spill]] }
  0x66   : > { %1682 = vmatprep.subr.bf16.mxu1 %v1975_v1  ;;  %1698 = vmatprep.mubr.msk.bf16.mxu1 %vm1976_vm0, %v1975_v1  ;;  %v1781_v7 = vld [vmem:[%s2188_s29 + $0x30] sm:$0xff]   ;;  %v1782_v9 = vld [vmem:[%s2188_s29 + $0x28] sm:$0xff]   ;;  %v1777_v10 = vld [vmem:[%s2193_s8 + $0x38] ss:$12 sps:$4 sm:$0xff]   ;;  %v2256_v21 = vshrl.u32 %v747_v20, 7  ;;  %vm938_vm1 = vcmask 1041408  }
  0x67   : > { %1663 = vmatpush3.bf16.msra.mxu0 %v1772_v2  ;;  %1683 = vmatpush3.bf16.msra.mxu1 %v1780_v5  ;;  %v1776_v8 = vld [vmem:[%s2193_s8 + $0x50] ss:$12 sps:$4 sm:$0xff]   ;;  %v1783_v11 = vld [vmem:[%s2188_s29 + $0x20] sm:$0xff]   ;;  %v1779_v14 = vld [vmem:[%s2193_s8 + $0x8] ss:$12 sps:$4 sm:$0xff]   ;;  %v1977_v55 = vmov 0  }
  0x68   : > { %1664 = vmatprep.subr.bf16.mxu0 %v1975_v1  ;;  %1684 = vmatprep.subr.bf16.mxu1 %v1975_v1  ;;  %v1778_v12 = vld [vmem:[%s2193_s8 + $0x20] ss:$12 sps:$4 sm:$0xff]   ;;  %v1784_v13 = vld [vmem:[%s2188_s29 + $0x18] sm:$0xff]   ;;  %v1785_v16 = vld [vmem:[%s2188_s29 + $0x10] sm:$0xff]   ;;  %v749_v22 = vsub.s32 2, %v2256_v21  ;;  %s2387_s8 = scalar_lea.vmem %s2345_s4, %s2180_s14  ;;  %s2391_s22 = scalar_lea.vmem [#allocation4], %s2163_s20 }
  0x69   : > { %v1786_v17 = vld [vmem:[%s2188_s29 + $0x8] sm:$0xff]   ;;  %v1787_v19 = vld [vmem:[%s2188_s29] sm:$0xff]   ;;  %v1788_v39 = vld [vmem:[%s2216_s1 + $0x70] ss:$8 sps:$4 sm:$0xff]  }
  0x6a   : > { %v727_v23 = vld [vmem:[%s2202_s15] sm:$0x7]  ;;  %v1790_v40 = vld [vmem:[%s2216_s1 + $0x74] ss:$8 sps:$4 sm:$0xff]   ;;  %v1793_v41 = vld [vmem:[%s2216_s1 + $0x64] ss:$8 sps:$4 sm:$0xff]   ;;  %s2388_s15 = scalar_lea.vmem %s2346_s5, %s2180_s14 }
  0x6b   : > { %1665 = vmatpush3.bf16.msra.mxu0 %v1773_v3  ;;  %1685 = vmatpush3.bf16.msra.mxu1 %v1781_v7  ;;  %v710_v15 = vld [vmem:[%s2386_s7] sm:$0x3]  ;;  %v750_v24 = vrot.slane %v727_v23, %v749_v22  ;;  %v1796_v48 = vld [vmem:[%s2216_s1 + $0x54] ss:$8 sps:$4 sm:$0xff]   ;;  %v1794_v49 = vld [vmem:[%s2216_s1 + $0x50] ss:$8 sps:$4 sm:$0xff]  }
  0x6c   : > { %1666 = vmatprep.subr.bf16.mxu0 %v1975_v1  ;;  %1686 = vmatprep.subr.bf16.mxu1 %v1975_v1  ;;  %v745_v18 = vpack.c.bf16 %v710_v15, %v710_v15  ;;  %v1570_v31 = vld [vmem:[%s2387_s8] ss:$0 sm:$0xff]  ;;  %v1799_v51 = vld [vmem:[%s2216_s1 + $0x44] ss:$8 sps:$4 sm:$0xff]   ;;  %v1802_v52 = vld [vmem:[%s2216_s1 + $0x34] ss:$8 sps:$4 sm:$0xff]  }
  0x6d   : > { %v1791_v42 = vld [vmem:[%s2216_s1 + $0x60] ss:$8 sps:$4 sm:$0xff]   ;;  %v1800_v53 = vld [vmem:[%s2216_s1 + $0x30] ss:$8 sps:$4 sm:$0xff]   ;;  %v1805_v54 = vld [vmem:[%s2216_s1 + $0x24] ss:$8 sps:$4 sm:$0xff]  }
  0x6e   : > { %v1797_v50 = vld [vmem:[%s2216_s1 + $0x40] ss:$8 sps:$4 sm:$0xff]   ;;  %v1808_v57 = vld [vmem:[%s2216_s1 + $0x14] ss:$8 sps:$4 sm:$0xff]   ;;  %v1806_v58 = vld [vmem:[%s2216_s1 + $0x10] ss:$8 sps:$4 sm:$0xff]  }
  0x6f   : > { %1667 = vmatpush3.bf16.msra.mxu0 %v1774_v4  ;;  %1687 = vmatpush3.bf16.msra.mxu1 %v1782_v9  ;;  %v1803_v56 = vld [vmem:[%s2216_s1 + $0x20] ss:$8 sps:$4 sm:$0xff]   ;;  %v1811_v59 = vld [vmem:[%s2216_s1 + $0x4] ss:$8 sps:$4 sm:$0xff]   ;;  %v1812_v61 = vld [vmem:[%s2227_s21 + $0x78] sm:$0xff]   ;;  %s2390_s14 = scalar_lea.vmem [#allocation2], %s2163_s20 }
  0x70   : > { %1668 = vmatprep.subr.bf16.mxu0 %v1975_v1  ;;  %1688 = vmatprep.subr.bf16.mxu1 %v1975_v1  ;;  %v1809_v60 = vld [vmem:[%s2216_s1] ss:$8 sps:$4 sm:$0xff]   ;;  %v1813_v62 = vld [vmem:[%s2227_s21 + $0x38] sm:$0xff]   ;;  %v1814_v63 = vld [vmem:[%s2227_s21 + $0x70] sm:$0xff]  }
  0x71   : > { %v1815_v0 = vld [vmem:[%s2227_s21 + $0x30] sm:$0xff]   ;;  %v1817_v2 = vld [vmem:[%s2227_s21 + $0x28] sm:$0xff]   ;;  %v1818_v3 = vld [vmem:[%s2227_s21 + $0x60] sm:$0xff]  }
  0x72   : > { %v1819_v4 = vld [vmem:[%s2227_s21 + $0x20] sm:$0xff]   ;;  %v1820_v5 = vld [vmem:[%s2227_s21 + $0x58] sm:$0xff]   ;;  %v1822_v7 = vld [vmem:[%s2227_s21 + $0x50] sm:$0xff]  }
  0x73   : > { %1669 = vmatpush3.bf16.msra.mxu0 %v1775_v6  ;;  %1689 = vmatpush3.bf16.msra.mxu1 %v1783_v11  ;;  %v1821_v6 = vld [vmem:[%s2227_s21 + $0x18] sm:$0xff]   ;;  %v1825_v20 = vld [vmem:[%s2227_s21 + $0x8] sm:$0xff]   ;;  %v1826_v22 = vld [vmem:[%s2227_s21 + $0x40] sm:$0xff]  }
  0x74   : > { %1670 = vmatprep.subr.bf16.mxu0 %v1975_v1  ;;  %1690 = vmatprep.subr.bf16.mxu1 %v1975_v1  ;;  %v1827_v23 = vld [vmem:[%s2227_s21] sm:$0xff]  }
  0x77   : > { %1671 = vmatpush3.bf16.msra.mxu0 %v1776_v8  ;;  %1691 = vmatpush3.bf16.msra.mxu1 %v1784_v13  ;;  %v1823_v8 = vld [vmem:[%s2227_s21 + $0x10] sm:$0xff]   ;;  %v1579_v13 = vld [vmem:[%s2388_s15] ss:$0 sm:$0xff] }
  0x78   : > { %1672 = vmatprep.subr.bf16.mxu0 %v1975_v1  ;;  %1692 = vmatprep.subr.bf16.mxu1 %v1975_v1 }
  0x7b   : > { %1673 = vmatpush3.bf16.msra.mxu0 %v1777_v10  ;;  %1693 = vmatpush3.bf16.msra.mxu1 %v1785_v16 }
  0x7c   : > { %1674 = vmatprep.subr.bf16.mxu0 %v1975_v1  ;;  %1694 = vmatprep.subr.bf16.mxu1 %v1975_v1 }
  0x7f   : > { %1675 = vmatpush3.bf16.msra.mxu0 %v1778_v12  ;;  %1695 = vmatpush3.bf16.msra.mxu1 %v1786_v17 }
  0x80   : > { %1676 = vmatprep.subr.bf16.mxu0 %v1975_v1  ;;  %1696 = vmatprep.subr.bf16.mxu1 %v1975_v1  ;;  %v1816_v1 = vld [vmem:[%s2227_s21 + $0x68] sm:$0xff]  }
  0x83   : > { %1677 = vmatpush3.bf16.msra.mxu0 %v1779_v14  ;;  %1697 = vmatpush3.bf16.msra.mxu1 %v1787_v19  ;;  %v1824_v19 = vld [vmem:[%s2227_s21 + $0x48] sm:$0xff]  }
  0x84   : > { %1076 = vmatprep.subr.bf16.mxu0 %v1790_v40  ;;  %1640 = vmatprep.subr.bf16.mxu1 %v1812_v61  ;;  %v1597_v40 = vld [vmem:[%s2390_s14] ss:$0 sm:$0xff] }
  0x86   : > { %1679 = vmatmul.mubr.bf16.vlgmr.msra.gmra.mxu0 %v745_v18 }
  0x87   : > { %1077 = vmatpush1.bf16.msra.mxu0 %v1788_v39  ;;  %1108 = vmatprep.mubr.bf16.mxu0 %v1977_v55 }
  0x88   : > { %1078 = vmatprep.subr.bf16.mxu0 %v1793_v41 }
  0x8b   : > { %1079 = vmatpush1.bf16.msra.mxu0 %v1791_v42 }
  0x8c   : > { %1080 = vmatprep.subr.bf16.mxu0 %v1796_v48 }
  0x8f   : > { %1081 = vmatpush1.bf16.msra.mxu0 %v1794_v49 }
  0x90   : > { %1082 = vmatprep.subr.bf16.mxu0 %v1799_v51 }
  0x93   : > { %1083 = vmatpush1.bf16.msra.mxu0 %v1797_v50 }
  0x94   : > { %1084 = vmatprep.subr.bf16.mxu0 %v1802_v52 }
  0x97   : > { %1085 = vmatpush1.bf16.msra.mxu0 %v1800_v53 }
  0x98   : > { %1086 = vmatprep.subr.bf16.mxu0 %v1805_v54 }
  0x9b   : > { %1087 = vmatpush1.bf16.msra.mxu0 %v1803_v56  ;;  %v1614_v56 = vld [vmem:[%s2391_s22] ss:$0 sm:$0xff] }
  0x9c   : > { %1088 = vmatprep.subr.bf16.mxu0 %v1808_v57 }
  0x9f   : > { %1089 = vmatpush1.bf16.msra.mxu0 %v1806_v58  ;;  %v1615_v58 = vld [vmem:[%s568_s27] ss:$0 sm:$0xff] }
  0xa0   : > { %1090 = vmatprep.subr.bf16.mxu0 %v1811_v59 }
  0xa3   : > { %1091 = vmatpush1.bf16.msra.mxu0 %v1809_v60 }
 0x146   : > { %v834_v25 = vpop.f32.mrf.mxu0 }
 0x147   : > { %v835_v26 = vadd.f32 %v834_v25, %v750_v24  ;;  %v988_v24 = vsub.s32 0, %v2256_v21  ;;  %v983_v25 = vld [vmem:[%s2222_s11] sm:$0x3] }
 0x148   : > { %v1680_v27 = vpop.f32.mrf.mxu0 }
 0x149   : > { %v840_v28 = vpack.c.bf16 %v835_v26, %v835_v26  ;;  %v992_v26 = vsub.s32 1, %v2256_v21  ;;  %v989_v27 = vrot.slane %v983_v25, %v988_v24 }
 0x14a   : > { %v837_v29 = vpop.f32.mrf.mxu0 }
 0x14b   : > { %1699 = vmatmul.mubr.bf16.vlgmr.msra.gmra.mxu1 %v840_v28  ;;  %v993_v28 = vrot.slane %v983_v25, %v992_v26 }
 0x14c   : > { %v1681_v30 = vpop.f32.mrf.mxu0  ;;  %1641 = vmatpush3.bf16.msra.mxu1 %v1813_v62 }
 0x14d   : > { %1642 = vmatprep.subr.bf16.mxu1 %v1814_v63 }
 0x150   : > { %1643 = vmatpush3.bf16.msra.mxu1 %v1815_v0 }
 0x151   : > { %1644 = vmatprep.subr.bf16.mxu1 %v1816_v1 }
 0x154   : > { %1645 = vmatpush3.bf16.msra.mxu1 %v1817_v2 }
 0x155   : > { %1646 = vmatprep.subr.bf16.mxu1 %v1818_v3 }
 0x158   : > { %1647 = vmatpush3.bf16.msra.mxu1 %v1819_v4 }
 0x159   : > { %1648 = vmatprep.subr.bf16.mxu1 %v1820_v5 }
 0x15c   : > { %1649 = vmatpush3.bf16.msra.mxu1 %v1821_v6 }
 0x15d   : > { %1650 = vmatprep.subr.bf16.mxu1 %v1822_v7 }
 0x160   : > { %1651 = vmatpush3.bf16.msra.mxu1 %v1823_v8 }
 0x161   : > { %1652 = vmatprep.subr.bf16.mxu1 %v1824_v19 }
 0x164   : > { %1653 = vmatpush3.bf16.msra.mxu1 %v1825_v20 }
 0x165   : > { %1654 = vmatprep.subr.bf16.mxu1 %v1826_v22 }
 0x168   : > { %1655 = vmatpush3.bf16.msra.mxu1 %v1827_v23 }
 0x20b   : > { %v929_v32 = vpop.f32.mrf.mxu1 }
 0x20c   : > { %v930_v33 = vadd.f32 %v1570_v31, %v929_v32 }
 0x20d   : > { %v1700_v34 = vpop.f32.mrf.mxu1 }
 0x20e   : > { %v935_v35 = vadd.f32 %v930_v33, %v710_v15  ;;  %v1580_v15 = vld [vmem:[%s2389_s9] ss:$0 sm:$0xff] }
 0x20f   : > { %v932_v36 = vpop.f32.mrf.mxu1 }
 0x210   : > { %v939_v37 = vsel %vm938_vm1, %v935_v35, 0.0 }
 0x211   : > { %940 = vadd.xlane.f32.xlu0 %v939_v37  ;;  %v1701_v38 = vpop.f32.mrf.mxu1 }
 0x29a   : > { %v941_v43 = vpop.xlane.xlu0 %940 }
 0x29b   : > { %v943_v44 = vmul.f32 0.0078125, %v941_v43 }
 0x29d   : > { %v944_v45 = vsub.f32 %v935_v35, %v943_v44 }
 0x29f   : > { %v945_v46 = vmul.f32 %v944_v45, %v944_v45 }
 0x2a1   : > { %v946_v47 = vsel %vm938_vm1, %v945_v46, 0.0 }
 0x2a2   : > { %947 = vadd.xlane.f32.xlu0 %v946_v47 }
 0x32b   : > { %v948_v9 = vpop.xlane.xlu0 %947 }
 0x32c   : > { %v949_v10 = vmul.f32 0.0078125, %v948_v9 }
 0x32e   : > { %v950_v11 = vadd.f32 1e-05, %v949_v10 }
 0x330   : > { %1828 = vrsqrt.f32 %v950_v11 }
 0x33d   : > { %v1829_v12 = vpop.eup %1828 }
 0x33e   : > { %v952_v14 = vmul.f32 %v1829_v12, %v944_v45 }
 0x340   : > { %v959_v16 = vmul.f32 %v1579_v13, %v952_v14 }
 0x342   : > { %v966_v17 = vadd.f32 %v1580_v15, %v959_v16 }
 0x344   : > { %v984_v18 = vpack.c.bf16 %v966_v17, %v966_v17 }
 0x346   : > { %1109 = vmatmul.mubr.bf16.vlgmr.msra.gmra.mxu0 %v984_v18 }
 0x406   : > { %v1110_v29 = vpop.f32.mrf.mxu0 }
 0x407   : > { %v1111_v30 = vadd.f32 %v1110_v29, %v989_v27 }
 0x408   : > { %v1112_v31 = vpop.f32.mrf.mxu0 }
 0x409   : > { %v1113_v32 = vadd.f32 %v1112_v31, %v993_v28  ;;  %v1117_v33 = vmax.f32 %v1111_v30, 0.0 }
 0x40a   : > { %v1114_v34 = vpop.f32.mrf.mxu0 }
 0x40b   : > { %v1118_v35 = vmax.f32 %v1113_v32, 0.0  ;;  %v1152_v38 = vpack.c.bf16 %v1117_v33, %v1117_v33 }
 0x40c   : > { %v1115_v36 = vpop.f32.mrf.mxu0 }
 0x40d   : > { %v1153_v37 = vpack.c.bf16 %v1118_v35, %v1118_v35 }
 0x40f   : > { %1288 = vmatprep.mubr.bf16.mxu1 %v1153_v37 }
 0x410   : > { %1289 = vmatmul.mubr.bf16.vlgmr.msra.gmra.mxu1 %v1152_v38 }
 0x4d0   : > { %v1656_v39 = vpop.f32.mrf.mxu1 }
 0x4d2   : > { %v1657_v41 = vpop.f32.mrf.mxu1 }
 0x4d3   : > { %v1658_v21 = vadd.f32 %v1657_v41, %v1656_v39 }
 0x4d4   : > { %v1659_v42 = vpop.f32.mrf.mxu1 }
 0x4d5   : > { %v1291_v43 = vadd.f32 %v1658_v21, %v1597_v40 }
 0x4d6   : > { %v1660_v44 = vpop.f32.mrf.mxu1 }
 0x4d7   : > { %v1296_v45 = vadd.f32 %v1291_v43, %v966_v17 }
 0x4d9   : > { %v1299_v46 = vsel %vm938_vm1, %v1296_v45, 0.0 }
 0x4da   : > { %1300 = vadd.xlane.f32.xlu1 %v1299_v46 }
 0x563   : > { %v1301_v47 = vpop.xlane.xlu1 %1300 }
 0x564   : > { %v1302_v48 = vmul.f32 0.0078125, %v1301_v47 }
 0x566   : > { %v1303_v49 = vsub.f32 %v1296_v45, %v1302_v48 }
 0x568   : > { %v1304_v50 = vmul.f32 %v1303_v49, %v1303_v49 }
 0x56a   : > { %v1305_v51 = vsel %vm938_vm1, %v1304_v50, 0.0 }
 0x56b   : > { %1306 = vadd.xlane.f32.xlu1 %v1305_v51 }
 0x5f4   : > { %v1307_v52 = vpop.xlane.xlu1 %1306 }
 0x5f5   : > { %v1308_v53 = vmul.f32 0.0078125, %v1307_v52 }
 0x5f7   : > { %v1309_v54 = vadd.f32 1e-05, %v1308_v53 }
 0x5f9   : > { %1830 = vrsqrt.f32 %v1309_v54 }
 0x606   : > { %v1831_v55 = vpop.eup %1830 }
 0x607   : > { %v1311_v57 = vmul.f32 %v1831_v55, %v1303_v49 }
 0x609   : > { %v1318_v59 = vmul.f32 %v1614_v56, %v1311_v57 }
 0x60b   : > { %v1325_v60 = vadd.f32 %v1615_v58, %v1318_v59 }
 0x60d   : > { %1326 = vst [vmem:[%s2386_s7] sm:$0x3] %v1325_v60 }
 0x60e PF: > { %s29_s30 = sadd.s32 1, %s1970_s30   ;;  %s2392_s21 = sld [smem:[#allocation9_spill]] }
 0x60f   : > { %p26_p12 = scmp.ge.s32.totalorder %s29_s30, 4   ;;  %s2393_s27 = sld [smem:[#allocation12_spill]] }
 0x610   : > { %s2394_s28 = sld [smem:[#allocation10_spill]]  ;;  %s2396_s25 = smov %s1954_s26 }
 0x611   : > { %s2395_s29 = sld [smem:[#allocation11_spill]]  ;;  %28 = sbr.rel (!%p26_p12) target bundleno = 16 (0x10), region = 170 }
 0x614   : > { %s2397_s26 = smov %s2392_s21 }
 0x616   :  { %1346 = vsyncpa [#allocation3], 1 }
 0x617   :  { %1348 = vsyncpa [#allocation3 + $0x1], 1 }
 0x618   :  { %1349 = vsyncpa [#allocation5], 1 }
 0x619   :  { %1351 = vsyncpa [#allocation5 + $0x1], 1 }

// kernel: enedina_forward.6
= control target key start
LH: loop header
LB: loop body
LE: loop exit
PB: predicated region body
PF: predicated region fallthrough
CT: control target
= control target key end

     0   :  { %s2553_s0 = inlined_call_operand.vmem [shape: f32[2,128], index: 0, kind: input, shape index: {}]   ;;  %s2554_s1 = inlined_call_operand.vmem [shape: bf16[2,128,384], index: 1, kind: input, shape index: {}]   ;;  %s2555_s2 = inlined_call_operand.vmem [shape: f32[2,1,384], index: 2, kind: input, shape index: {}]   ;;  %s2556_s3 = inlined_call_operand.vmem [shape: bf16[2,128,128], index: 3, kind: input, shape index: {}]   ;;  %s2557_s4 = inlined_call_operand.hbm [shape: f32[2,1,128], index: 4, kind: input, shape index: {}]   ;;  %s2558_s5 = inlined_call_operand.hbm [shape: f32[2,1,128], index: 5, kind: input, shape index: {}]   ;;  %s2559_s6 = inlined_call_operand.hbm [shape: f32[2,1,128], index: 6, kind: input, shape index: {}]   ;;  %s2560_s7 = inlined_call_operand.vmem [shape: bf16[2,128,256], index: 7, kind: input, shape index: {}]   ;;  %s2561_s8 = inlined_call_operand.vmem [shape: f32[2,1,256], index: 8, kind: input, shape index: {}]   ;;  %s2562_s9 = inlined_call_operand.vmem [shape: bf16[2,256,128], index: 9, kind: input, shape index: {}]   ;;  %s2563_s10 = inlined_call_operand.hbm [shape: f32[2,1,128], index: 10, kind: input, shape index: {}]   ;;  %s2564_s11 = inlined_call_operand.hbm [shape: f32[2,1,128], index: 11, kind: input, shape index: {}]   ;;  %s2565_s12 = inlined_call_operand.hbm [shape: f32[2,1,128], index: 12, kind: input, shape index: {}]   ;;  %s2566_s13 = inlined_call_operand.vmem [shape: f32[2,128], index: 13, kind: output, shape index: {}]  }
   0x1   :  { %2572 = sst [smem:[#allocation20_spill]] %s2553_s0 }
   0x2   :  { %2573 = sst [smem:[#allocation21_spill]] %s2554_s1 }
   0x3   :  { %2574 = sst [smem:[#allocation22_spill]] %s2558_s5 }
   0x4   :  { %2575 = sst [smem:[#allocation23_spill]] %s2561_s8 }
   0x5   :  { %2576 = sst [smem:[#allocation24_spill]] %s2562_s9 }
   0x6   :  { %2577 = sst [smem:[#allocation25_spill]] %s2563_s10 }
   0x7   :  { %2578 = sst [smem:[#allocation26_spill]] %s2566_s13 }
   0x8   :  { %18 = vsyncpa [#allocation3], 0 }
   0x9   :  { %20 = vsyncpa [#allocation3 + $0x1], 0 }
   0xa   :  { %21 = vsyncpa [#allocation5], 0 }
   0xb   :  { %23 = vsyncpa [#allocation5 + $0x1], 0 }
   0xc   :  { %24 = vsyncpa [#allocation8], 0 }
   0xd   :  { %26 = vsyncpa [#allocation8 + $0x1], 0 }
   0xe   :  { %27 = vsyncpa [#allocation11], 0 }
   0xf   :  { %29 = vsyncpa [#allocation11 + $0x1], 0  ;;  %s2248_s25 = smov 0   ;;  %s2250_s26 = smov 0  }
  0x10   :  { %s2252_s27 = smov 0   ;;  %s2254_s28 = smov 0  }
  0x11   :  { %s2256_s29 = smov 0   ;;  %s2258_s30 = smov 0  }
  0x12 LB: > { %2579 = sst [smem:[#allocation16_spill]] %s2155_s27  ;;  %s2567_s14 = sadd.s32 4294967295, %s2167_s30   ;;  %s2167_s30 = sphi %s2258_s30, %s35_s30   ;;  %s2163_s29 = sphi %s2256_s29, %s2605_s29   ;;  %s2159_s28 = sphi %s2254_s28, %s2604_s28   ;;  %s2155_s27 = sphi %s2252_s27, %s2603_s27   ;;  %s2151_s26 = sphi %s2250_s26, %s2607_s26   ;;  %s2147_s25 = sphi %s2248_s25, %s2606_s25  }
  0x13   : > { %2580 = sst [smem:[#allocation17_spill]] %s2163_s29  ;;  %s44_s15 = sadd.s32 1, %s2163_s29 }
  0x14   : > { %p45_p0 = scmp.ge.s32.totalorder %s44_s15, 2  ;;  %s158_s16 = sadd.s32 1, %s2155_s27 }
  0x15   : > { %p165_p1 = scmp.ne.s32.totalorder %s2155_s27, %s2151_s26  ;;  %p166_p2 = scmp.eq.s32.totalorder %s2167_s30, 0 }
  0x16   : > { %s2609_s15 = smov (%p45_p0, %s44_s15), 0  ;;  %p171_p4 = scmp.ne.s32.totalorder %s2151_s26, %s2147_s25 }
  0x17   : > { %2581 = sst [smem:[#allocation18_spill]] %s2609_s15  ;;  %p167_p3 = por %p166_p2, %p165_p1 }
  0x18   : > { %s155_s17 = ssub.s32 %s2163_s29, %s2609_s15  ;;  %p172_p5 = scmp.eq.s32.totalorder %s2567_s14, 0 }
  0x19   : > { %p156_p6 = scmp.eq.s32.totalorder %s155_s17, 0  ;;  %p1825_p8 = scmp.lt.s32.totalorder %s2167_s30, 2 }
  0x1a   : > { %p2289_p7 = por %p172_p5, %p171_p4  ;;  %s2298_s20 = sand.u32 1, %s2155_s27  }
  0x1b   : > { %s2295_s19 = scalar_select %p156_p6, %s2155_s27, %s158_s16  }
  0x1c   : > { %s2301_s21 = sshll.u32 %s2163_s29, 4  ;;  %p2303_p9 = pnand %p1825_p8, %p167_p3 }
  0x1d   : > { %2583 = sst [smem:[#allocation19_spill]] %s2295_s19  ;;  %s476_s23 = sand.u32 1, %s2167_s30  }
  0x1e   : > { %s2585_s5 = sld [smem:[#allocation22_spill]]  ;;  %s479_s14 = scalar_lea.vmem [#allocation4], %s2298_s20 }
  0x1f   : > { %s486_s15 = sshll.u32 %s479_s14, 4  ;;  %p1642_p10 = scmp.ge.s32.totalorder %s2167_s30, 1  ;;  %s487_s15 = int_to_ptr.vmem [resolvable:$true] %s486_s15 }
  0x20   : > { %p582_p11 = scmp.lt.s32.totalorder %s2167_s30, 3  ;;  %s2315_s16 = scalar_lea.sflag [#allocation5], %s476_s23 }
  0x21   : > { %p2319_p12 = pneg %p2303_p9  ;;  %s1950_s19 = scalar_lea.vmem %s487_s15, 16 }
  0x22   : > { %p1951_p13 = scmp.ne.s32.totalorder %s487_s15, %s1950_s19  ;;  %s2169_s24 = smov [#allocation4]  }
  0x23   : > { %s1955_s25 = sshll.u32 %s2169_s24, 4  ;;  %s1956_s25 = int_to_ptr.vmem [resolvable:$false] %s1955_s25 }
  0x24   : > { %s484_s17 = scalar_lea.hbm %s2585_s5, %s2301_s21  ;;  %p1953_p0 = pnand %p1951_p13, %p2319_p12 }
  0x25   : > { %s1957_s14 = scalar_lea.vmem %s1956_s25, 32  ;;  %p1958_p2 = scmp.lt.s32.totalorder %s487_s15, %s1956_s25 }
  0x26   : > { %p1954_p1 = pneg %p1953_p0  ;;  %p1959_p3 = scmp.lt.s32.totalorder %s1957_s14, %s1950_s19 }
  0x28   : > { %p1960_p4 = por %p1959_p3, %p1958_p2 }
  0x2a   : > { %p1961_p5 = pnand %p1960_p4, %p1954_p1 }
  0x2c   : > { %1964 = shalt.err (!%p1961_p5)
}
  0x2d   : > { %1812 = dma.hbm_to_vmem [thread:$0]  (!%p2303_p9), %s484_s17, 16, %s487_s15, %s2315_s16  }
  0x2e   : > { %p2332_p6 = pnand %p1642_p10, %p582_p11  ;;  %s2588_s10 = sld [smem:[#allocation25_spill]] }
  0x2f   : > { %s536_s5 = scalar_lea.vmem [#allocation7], %s2298_s20  ;;  %s2341_s13 = scalar_lea.sflag [#allocation8], %s476_s23 }
  0x30   : > { %s543_s27 = sshll.u32 %s536_s5, 4  ;;  %s2170_s15 = smov [#allocation7]   ;;  %s544_s27 = int_to_ptr.vmem [resolvable:$true] %s543_s27 }
  0x31   : > { %s1978_s0 = scalar_lea.vmem %s544_s27, 16  ;;  %s1983_s17 = sshll.u32 %s2170_s15, 4  ;;  %s1984_s17 = int_to_ptr.vmem [resolvable:$false] %s1983_s17 }
  0x32   : > { %p1979_p8 = scmp.ne.s32.totalorder %s544_s27, %s1978_s0  ;;  %s1985_s8 = scalar_lea.vmem %s1984_s17, 32 }
  0x33   : > { %p1986_p10 = scmp.lt.s32.totalorder %s544_s27, %s1984_s17  ;;  %p1987_p11 = scmp.lt.s32.totalorder %s1985_s8, %s1978_s0 }
  0x34   : > { %s541_s14 = scalar_lea.hbm %s2588_s10, %s2301_s21  ;;  %p1981_p13 = pnand %p1979_p8, %p2319_p12 }
  0x35   : > { %p1988_p1 = por %p1987_p11, %p1986_p10 }
  0x36   : > { %p1982_p0 = pneg %p1981_p13 }
  0x38   : > { %p1989_p2 = pnand %p1988_p1, %p1982_p0 }
  0x3a   : > { %1992 = shalt.err (!%p1989_p2)
}
  0x3b   : > { %1818 = dma.hbm_to_vmem [thread:$0]  (!%p2303_p9), %s541_s14, 16, %s544_s27, %s2341_s13  }
  0x3c   : > { %s467_s25 = scalar_lea.hbm %s2557_s4, %s2301_s21  ;;  %s462_s19 = scalar_lea.vmem [#allocation2], %s2298_s20 }
  0x3d   : > { %s469_s15 = sshll.u32 %s462_s19, 4  ;;  %s460_s17 = scalar_lea.sflag [#allocation3], %s2298_s20  ;;  %s470_s15 = int_to_ptr.vmem [resolvable:$true] %s469_s15 }
  0x3e   : > { %s2006_s0 = scalar_lea.vmem %s470_s15, 16  ;;  %s2171_s8 = smov [#allocation2]  }
  0x3f   : > { %p2007_p3 = scmp.ne.s32.totalorder %s470_s15, %s2006_s0  ;;  %s2011_s10 = sshll.u32 %s2171_s8, 4  ;;  %s2012_s10 = int_to_ptr.vmem [resolvable:$false] %s2011_s10 }
  0x40   : > { %s2013_s9 = scalar_lea.vmem %s2012_s10, 32  ;;  %p2014_p8 = scmp.lt.s32.totalorder %s470_s15, %s2012_s10 }
  0x41   : > { %p2009_p4 = pnand %p2007_p3, %p2319_p12  ;;  %p2015_p13 = scmp.lt.s32.totalorder %s2013_s9, %s2006_s0 }
  0x43   : > { %p2010_p5 = pneg %p2009_p4  ;;  %p2016_p0 = por %p2015_p13, %p2014_p8 }
  0x45   : > { %p2017_p10 = pnand %p2016_p0, %p2010_p5 }
  0x47   : > { %2020 = shalt.err (!%p2017_p10)
}
  0x48   : > { %1809 = dma.hbm_to_vmem [thread:$0]  (!%p2303_p9), %s467_s25, 16, %s470_s15, %s460_s17  }
  0x49   : > { %s501_s5 = scalar_lea.hbm %s2559_s6, %s2301_s21  ;;  %s496_s23 = scalar_lea.vmem [#allocation6], %s2298_s20 }
  0x4a   : > { %s503_s19 = sshll.u32 %s496_s23, 4  ;;  %s2172_s9 = smov [#allocation6]   ;;  %s504_s19 = int_to_ptr.vmem [resolvable:$true] %s503_s19 }
  0x4b   : > { %s2034_s8 = scalar_lea.vmem %s504_s19, 16  ;;  %s2039_s10 = sshll.u32 %s2172_s9, 4  ;;  %s2040_s10 = int_to_ptr.vmem [resolvable:$false] %s2039_s10 }
  0x4c   : > { %p2035_p11 = scmp.ne.s32.totalorder %s504_s19, %s2034_s8  ;;  %s2041_s0 = scalar_lea.vmem %s2040_s10, 32 }
  0x4d   : > { %p2042_p3 = scmp.lt.s32.totalorder %s504_s19, %s2040_s10  ;;  %p2043_p4 = scmp.lt.s32.totalorder %s2041_s0, %s2034_s8 }
  0x4e   : > { %p2037_p1 = pnand %p2035_p11, %p2319_p12 }
  0x4f   : > { %p2044_p5 = por %p2043_p4, %p2042_p3 }
  0x50   : > { %p2038_p2 = pneg %p2037_p1 }
  0x52   : > { %p2045_p8 = pnand %p2044_p5, %p2038_p2 }
  0x54   : > { %2048 = shalt.err (!%p2045_p8)
}
  0x55   : > { %1815 = dma.hbm_to_vmem [thread:$0]  (!%p2303_p9), %s501_s5, 16, %s504_s19, %s2315_s16  }
  0x56   : > { %s558_s17 = scalar_lea.hbm %s2564_s11, %s2301_s21  ;;  %s553_s27 = scalar_lea.vmem [#allocation9], %s2298_s20 }
  0x57   : > { %s560_s14 = sshll.u32 %s553_s27, 4  ;;  %s2173_s8 = smov [#allocation9]   ;;  %s561_s14 = int_to_ptr.vmem [resolvable:$true] %s560_s14 }
  0x58   : > { %s2062_s23 = scalar_lea.vmem %s561_s14, 16  ;;  %s2067_s9 = sshll.u32 %s2173_s8, 4  ;;  %s2068_s9 = int_to_ptr.vmem [resolvable:$false] %s2067_s9 }
  0x59   : > { %p2063_p13 = scmp.ne.s32.totalorder %s561_s14, %s2062_s23  ;;  %s2069_s10 = scalar_lea.vmem %s2068_s9, 32 }
  0x5a   : > { %p2070_p11 = scmp.lt.s32.totalorder %s561_s14, %s2068_s9  ;;  %p2071_p1 = scmp.lt.s32.totalorder %s2069_s10, %s2062_s23 }
  0x5b   : > { %p2065_p0 = pnand %p2063_p13, %p2319_p12 }
  0x5c   : > { %p2072_p2 = por %p2071_p1, %p2070_p11 }
  0x5d   : > { %p2066_p10 = pneg %p2065_p0 }
  0x5f   : > { %p2073_p3 = pnand %p2072_p2, %p2066_p10 }
  0x61   : > { %2076 = shalt.err (!%p2073_p3)
}
  0x62   : > { %1821 = dma.hbm_to_vmem [thread:$0]  (!%p2303_p9), %s558_s17, 16, %s561_s14, %s2341_s13  }
  0x63   : > { %s575_s19 = scalar_lea.hbm %s2565_s12, %s2301_s21  ;;  %s570_s0 = scalar_lea.vmem [#allocation10], %s2298_s20 }
  0x64   : > { %s577_s25 = sshll.u32 %s570_s0, 4  ;;  %s568_s15 = scalar_lea.sflag [#allocation11], %s2298_s20  ;;  %s578_s25 = int_to_ptr.vmem [resolvable:$true] %s577_s25 }
  0x65   : > { %s2090_s27 = scalar_lea.vmem %s578_s25, 16  ;;  %s2174_s23 = smov [#allocation10]  }
  0x66   : > { %p2091_p4 = scmp.ne.s32.totalorder %s578_s25, %s2090_s27  ;;  %s2095_s8 = sshll.u32 %s2174_s23, 4  ;;  %s2096_s8 = int_to_ptr.vmem [resolvable:$false] %s2095_s8 }
  0x67   : > { %s2097_s9 = scalar_lea.vmem %s2096_s8, 32  ;;  %p2098_p13 = scmp.lt.s32.totalorder %s578_s25, %s2096_s8 }
  0x68   : > { %p2093_p5 = pnand %p2091_p4, %p2319_p12  ;;  %p2099_p0 = scmp.lt.s32.totalorder %s2097_s9, %s2090_s27 }
  0x6a   : > { %p2094_p8 = pneg %p2093_p5  ;;  %p2100_p10 = por %p2099_p0, %p2098_p13 }
  0x6c   : > { %p2101_p11 = pnand %p2100_p10, %p2094_p8 }
  0x6e   : > { %2104 = shalt.err (!%p2101_p11)
}
  0x6f   : > { %1824 = dma.hbm_to_vmem [thread:$0]  (!%p2303_p9), %s575_s19, 16, %s578_s25, %s568_s15  }
  0x70   : > { %586 = sbr.rel (%p2332_p6) target bundleno = 1594 (0x63a), region = 72  ;;  %s2391_s13 = sand.u32 (!%p2332_p6), 1, %s2151_s26  }
  0x71   : > { %s589_s29 = scalar_lea.sflag (!%p2332_p6), [#allocation3], %s2391_s13 }
  0x75   : > { %2130 = dma.done.wait (%p2289_p7), %s589_s29, 16  }
  0x76   : > { %2132 = vsyncadd (%p2289_p7), %s589_s29, 4294967280  ;;  %s2589_s21 = sadd.s32 4294967295, %s2167_s30  }
  0x77   : > { %s596_s22 = sand.u32 1, %s2589_s21  }
  0x78   : > { %s597_s24 = scalar_lea.sflag [#allocation5], %s596_s22 }
  0x79   : > { %2134 = dma.done.wait (%p2289_p7), %s597_s24, 32  }
  0x7a   : > { %2136 = vsyncadd (%p2289_p7), %s597_s24, 4294967264  ;;  %s613_s10 = scalar_lea.sflag [#allocation8], %s596_s22 }
  0x7b   : > { %2138 = dma.done.wait (%p2289_p7), %s613_s10, 32  }
  0x7c   : > { %2140 = vsyncadd (%p2289_p7), %s613_s10, 4294967264  ;;  %s629_s19 = scalar_lea.sflag [#allocation11], %s2391_s13 }
  0x7d   : > { %2142 = dma.done.wait (%p2289_p7), %s629_s19, 16  }
  0x7e   : > { %2144 = vsyncadd (%p2289_p7), %s629_s19, 4294967280  ;;  %p728_p9 = scmp.lt.s32.totalorder %s2159_s28, 1  ;;  %s2590_s1 = sld [smem:[#allocation21_spill]] }
  0x7f   : > { %s2591_s9 = sld [smem:[#allocation24_spill]]  ;;  %p1651_p7 = scmp.ne.s32.totalorder %s2159_s28, 0 }
  0x80   : > { %s729_s25 = scalar_select %p728_p9, %s2159_s28, 1 }
  0x81   : > { %s2592_s22 = sld [smem:[#allocation23_spill]] }
  0x82   : > { %s1792_s15 = smul.u32 192, %s729_s25  ;;  %s1709_s27 = sshll.u32 %s729_s25, 6 }
  0x83   : > { %s1793_s23 = smul.u32 3, %s729_s25  ;;  %s2424_s29 = scalar_lea.vmem %s2556_s3, %s1709_s27 }
  0x84   : > { %s2429_s24 = scalar_lea.vmem %s2590_s1, %s1792_s15  ;;  %s1710_s10 = sshll.u32 %s729_s25, 7 }
  0x85   : > { %s2434_s0 = scalar_lea.vmem %s2555_s2, %s1793_s23  ;;  %s2439_s14 = scalar_lea.vmem %s2560_s7, %s1710_s10 }
  0x86   : > { %s1648_s17 = sshll.u32 %s729_s25, 1  ;;  %s2444_s20 = scalar_lea.vmem %s2591_s9, %s1710_s10 }
  0x87   : > { %s2449_s1 = scalar_lea.vmem %s2592_s22, %s1648_s17  ;;  %764 = sbr.rel (%p1651_p7) target bundleno = 144 (0x90), region = 100 }
  0x88   : > { %s2593_s19 = sld [smem:[#allocation20_spill]] (!%p1651_p7) }
  0x89   : > { %s2594_s25 = sld [smem:[#allocation26_spill]] (!%p1651_p7) }
  0x8e   : > { %v765_v0 = vld [vmem:[%s2593_s19] sm:$0x3] }
  0x8f   : > { %766 = vst [vmem:[%s2594_s25] sm:$0x3] %v765_v0 }
  0x90 PF: > { %v2175_v1 = vmov 0.0   ;;  %v1877_v2 = vld [vmem:[%s2429_s24 + $0xb0] ss:$12 sps:$4 sm:$0xff]   ;;  %vm2176_vm0 = vmmov 0   ;;  %v1878_v3 = vld [vmem:[%s2429_s24 + $0x98] ss:$12 sps:$4 sm:$0xff]   ;;  %v804_v20 = vlaneseq }
  0x91   : > { %1752 = vmatprep.subr.bf16.mxu0 %v2175_v1  ;;  %1768 = vmatprep.mubr.msk.bf16.mxu0 %vm2176_vm0, %v2175_v1  ;;  %v1879_v4 = vld [vmem:[%s2429_s24 + $0x80] ss:$12 sps:$4 sm:$0xff]   ;;  %v1885_v5 = vld [vmem:[%s2424_s29 + $0x38] sm:$0xff]   ;;  %v1880_v6 = vld [vmem:[%s2429_s24 + $0x68] ss:$12 sps:$4 sm:$0xff]   ;;  %s2595_s10 = sld [smem:[#allocation26_spill]] }
  0x92   : > { %1772 = vmatprep.subr.bf16.mxu1 %v2175_v1  ;;  %1788 = vmatprep.mubr.msk.bf16.mxu1 %vm2176_vm0, %v2175_v1  ;;  %v1886_v7 = vld [vmem:[%s2424_s29 + $0x30] sm:$0xff]   ;;  %v1887_v9 = vld [vmem:[%s2424_s29 + $0x28] sm:$0xff]   ;;  %v1882_v10 = vld [vmem:[%s2429_s24 + $0x38] ss:$12 sps:$4 sm:$0xff]   ;;  %v2477_v21 = vshrl.u32 %v804_v20, 7  ;;  %vm995_vm1 = vcmask 1041408  }
  0x93   : > { %1753 = vmatpush3.bf16.msra.mxu0 %v1877_v2  ;;  %1773 = vmatpush3.bf16.msra.mxu1 %v1885_v5  ;;  %v1881_v8 = vld [vmem:[%s2429_s24 + $0x50] ss:$12 sps:$4 sm:$0xff]   ;;  %v1888_v11 = vld [vmem:[%s2424_s29 + $0x20] sm:$0xff]   ;;  %v1884_v14 = vld [vmem:[%s2429_s24 + $0x8] ss:$12 sps:$4 sm:$0xff]   ;;  %v2177_v55 = vmov 0  }
  0x94   : > { %1754 = vmatprep.subr.bf16.mxu0 %v2175_v1  ;;  %1774 = vmatprep.subr.bf16.mxu1 %v2175_v1  ;;  %v1883_v12 = vld [vmem:[%s2429_s24 + $0x20] ss:$12 sps:$4 sm:$0xff]   ;;  %v1889_v13 = vld [vmem:[%s2424_s29 + $0x18] sm:$0xff]   ;;  %v1890_v16 = vld [vmem:[%s2424_s29 + $0x10] sm:$0xff]   ;;  %v806_v22 = vsub.s32 2, %v2477_v21  ;;  %s2596_s24 = scalar_lea.vmem [#allocation2], %s2391_s13 }
  0x95   : > { %v1891_v17 = vld [vmem:[%s2424_s29 + $0x8] sm:$0xff]   ;;  %v1892_v19 = vld [vmem:[%s2424_s29] sm:$0xff]   ;;  %v1893_v39 = vld [vmem:[%s2439_s14 + $0x70] ss:$8 sps:$4 sm:$0xff]   ;;  %s2601_s29 = scalar_lea.vmem [#allocation10], %s2391_s13 }
  0x96   : > { %v784_v23 = vld [vmem:[%s2434_s0] sm:$0x7]  ;;  %v1895_v40 = vld [vmem:[%s2439_s14 + $0x74] ss:$8 sps:$4 sm:$0xff]   ;;  %v1898_v41 = vld [vmem:[%s2439_s14 + $0x64] ss:$8 sps:$4 sm:$0xff]  }
  0x97   : > { %1755 = vmatpush3.bf16.msra.mxu0 %v1878_v3  ;;  %1775 = vmatpush3.bf16.msra.mxu1 %v1886_v7  ;;  %v767_v15 = vld [vmem:[%s2595_s10] sm:$0x3]  ;;  %v807_v24 = vrot.slane %v784_v23, %v806_v22  ;;  %v1901_v48 = vld [vmem:[%s2439_s14 + $0x54] ss:$8 sps:$4 sm:$0xff]   ;;  %v1899_v49 = vld [vmem:[%s2439_s14 + $0x50] ss:$8 sps:$4 sm:$0xff]  }
  0x98   : > { %1756 = vmatprep.subr.bf16.mxu0 %v2175_v1  ;;  %1776 = vmatprep.subr.bf16.mxu1 %v2175_v1  ;;  %v802_v18 = vpack.c.bf16 %v767_v15, %v767_v15  ;;  %v1660_v31 = vld [vmem:[%s2596_s24] ss:$0 sm:$0xff]  ;;  %v1904_v51 = vld [vmem:[%s2439_s14 + $0x44] ss:$8 sps:$4 sm:$0xff]   ;;  %v1907_v52 = vld [vmem:[%s2439_s14 + $0x34] ss:$8 sps:$4 sm:$0xff]  }
  0x99   : > { %v1896_v42 = vld [vmem:[%s2439_s14 + $0x60] ss:$8 sps:$4 sm:$0xff]   ;;  %v1905_v53 = vld [vmem:[%s2439_s14 + $0x30] ss:$8 sps:$4 sm:$0xff]   ;;  %v1910_v54 = vld [vmem:[%s2439_s14 + $0x24] ss:$8 sps:$4 sm:$0xff]  }
  0x9a   : > { %v1902_v50 = vld [vmem:[%s2439_s14 + $0x40] ss:$8 sps:$4 sm:$0xff]   ;;  %v1913_v57 = vld [vmem:[%s2439_s14 + $0x14] ss:$8 sps:$4 sm:$0xff]   ;;  %v1911_v58 = vld [vmem:[%s2439_s14 + $0x10] ss:$8 sps:$4 sm:$0xff]  }
  0x9b   : > { %1757 = vmatpush3.bf16.msra.mxu0 %v1879_v4  ;;  %1777 = vmatpush3.bf16.msra.mxu1 %v1887_v9  ;;  %v1908_v56 = vld [vmem:[%s2439_s14 + $0x20] ss:$8 sps:$4 sm:$0xff]   ;;  %v1916_v59 = vld [vmem:[%s2439_s14 + $0x4] ss:$8 sps:$4 sm:$0xff]   ;;  %v1917_v61 = vld [vmem:[%s2444_s20 + $0x78] sm:$0xff]   ;;  %s2598_s0 = scalar_lea.vmem [#allocation6], %s2391_s13 }
  0x9c   : > { %1758 = vmatprep.subr.bf16.mxu0 %v2175_v1  ;;  %1778 = vmatprep.subr.bf16.mxu1 %v2175_v1  ;;  %v1914_v60 = vld [vmem:[%s2439_s14] ss:$8 sps:$4 sm:$0xff]   ;;  %v1918_v62 = vld [vmem:[%s2444_s20 + $0x38] sm:$0xff]   ;;  %v1919_v63 = vld [vmem:[%s2444_s20 + $0x70] sm:$0xff]   ;;  %s2597_s14 = scalar_lea.vmem [#allocation4], %s2391_s13 }
  0x9d   : > { %v1920_v0 = vld [vmem:[%s2444_s20 + $0x30] sm:$0xff]   ;;  %v1922_v2 = vld [vmem:[%s2444_s20 + $0x28] sm:$0xff]   ;;  %v1923_v3 = vld [vmem:[%s2444_s20 + $0x60] sm:$0xff]  }
  0x9e   : > { %v1924_v4 = vld [vmem:[%s2444_s20 + $0x20] sm:$0xff]   ;;  %v1925_v5 = vld [vmem:[%s2444_s20 + $0x58] sm:$0xff]   ;;  %v1927_v7 = vld [vmem:[%s2444_s20 + $0x50] sm:$0xff]  }
  0x9f   : > { %1759 = vmatpush3.bf16.msra.mxu0 %v1880_v6  ;;  %1779 = vmatpush3.bf16.msra.mxu1 %v1888_v11  ;;  %v1926_v6 = vld [vmem:[%s2444_s20 + $0x18] sm:$0xff]   ;;  %v1930_v20 = vld [vmem:[%s2444_s20 + $0x8] sm:$0xff]   ;;  %v1931_v22 = vld [vmem:[%s2444_s20 + $0x40] sm:$0xff]  }
  0xa0   : > { %1760 = vmatprep.subr.bf16.mxu0 %v2175_v1  ;;  %1780 = vmatprep.subr.bf16.mxu1 %v2175_v1  ;;  %v1932_v23 = vld [vmem:[%s2444_s20] sm:$0xff]  }
  0xa3   : > { %1761 = vmatpush3.bf16.msra.mxu0 %v1881_v8  ;;  %1781 = vmatpush3.bf16.msra.mxu1 %v1889_v13  ;;  %v1928_v8 = vld [vmem:[%s2444_s20 + $0x10] sm:$0xff]   ;;  %v1669_v13 = vld [vmem:[%s2597_s14] ss:$0 sm:$0xff] }
  0xa4   : > { %1762 = vmatprep.subr.bf16.mxu0 %v2175_v1  ;;  %1782 = vmatprep.subr.bf16.mxu1 %v2175_v1 }
  0xa7   : > { %1763 = vmatpush3.bf16.msra.mxu0 %v1882_v10  ;;  %1783 = vmatpush3.bf16.msra.mxu1 %v1890_v16 }
  0xa8   : > { %1764 = vmatprep.subr.bf16.mxu0 %v2175_v1  ;;  %1784 = vmatprep.subr.bf16.mxu1 %v2175_v1 }
  0xab   : > { %1765 = vmatpush3.bf16.msra.mxu0 %v1883_v12  ;;  %1785 = vmatpush3.bf16.msra.mxu1 %v1891_v17 }
  0xac   : > { %1766 = vmatprep.subr.bf16.mxu0 %v2175_v1  ;;  %1786 = vmatprep.subr.bf16.mxu1 %v2175_v1  ;;  %v1921_v1 = vld [vmem:[%s2444_s20 + $0x68] sm:$0xff]  }
  0xaf   : > { %1767 = vmatpush3.bf16.msra.mxu0 %v1884_v14  ;;  %1787 = vmatpush3.bf16.msra.mxu1 %v1892_v19  ;;  %v1929_v19 = vld [vmem:[%s2444_s20 + $0x48] sm:$0xff]   ;;  %s2599_s20 = scalar_lea.vmem [#allocation7], %s2391_s13 }
  0xb0   : > { %1133 = vmatprep.subr.bf16.mxu0 %v1895_v40  ;;  %1730 = vmatprep.subr.bf16.mxu1 %v1917_v61  ;;  %v1687_v40 = vld [vmem:[%s2599_s20] ss:$0 sm:$0xff] }
  0xb2   : > { %1769 = vmatmul.mubr.bf16.vlgmr.msra.gmra.mxu0 %v802_v18 }
  0xb3   : > { %1134 = vmatpush1.bf16.msra.mxu0 %v1893_v39  ;;  %1165 = vmatprep.mubr.bf16.mxu0 %v2177_v55 }
  0xb4   : > { %1135 = vmatprep.subr.bf16.mxu0 %v1898_v41 }
  0xb7   : > { %1136 = vmatpush1.bf16.msra.mxu0 %v1896_v42 }
  0xb8   : > { %1137 = vmatprep.subr.bf16.mxu0 %v1901_v48 }
  0xbb   : > { %1138 = vmatpush1.bf16.msra.mxu0 %v1899_v49 }
  0xbc   : > { %1139 = vmatprep.subr.bf16.mxu0 %v1904_v51 }
  0xbf   : > { %1140 = vmatpush1.bf16.msra.mxu0 %v1902_v50 }
  0xc0   : > { %1141 = vmatprep.subr.bf16.mxu0 %v1907_v52 }
  0xc3   : > { %1142 = vmatpush1.bf16.msra.mxu0 %v1905_v53 }
  0xc4   : > { %1143 = vmatprep.subr.bf16.mxu0 %v1910_v54 }
  0xc7   : > { %1144 = vmatpush1.bf16.msra.mxu0 %v1908_v56 }
  0xc8   : > { %1145 = vmatprep.subr.bf16.mxu0 %v1913_v57 }
  0xcb   : > { %1146 = vmatpush1.bf16.msra.mxu0 %v1911_v58  ;;  %v1705_v58 = vld [vmem:[%s2601_s29] ss:$0 sm:$0xff] }
  0xcc   : > { %1147 = vmatprep.subr.bf16.mxu0 %v1916_v59 }
  0xcf   : > { %1148 = vmatpush1.bf16.msra.mxu0 %v1914_v60 }
 0x172   : > { %v891_v25 = vpop.f32.mrf.mxu0 }
 0x173   : > { %v892_v26 = vadd.f32 %v891_v25, %v807_v24  ;;  %v1045_v24 = vsub.s32 0, %v2477_v21  ;;  %v1040_v25 = vld [vmem:[%s2449_s1] sm:$0x3]  ;;  %s2600_s1 = scalar_lea.vmem [#allocation9], %s2391_s13 }
 0x174   : > { %v1770_v27 = vpop.f32.mrf.mxu0  ;;  %v1704_v56 = vld [vmem:[%s2600_s1] ss:$0 sm:$0xff] }
 0x175   : > { %v897_v28 = vpack.c.bf16 %v892_v26, %v892_v26  ;;  %v1049_v26 = vsub.s32 1, %v2477_v21  ;;  %v1046_v27 = vrot.slane %v1040_v25, %v1045_v24 }
 0x176   : > { %v894_v29 = vpop.f32.mrf.mxu0 }
 0x177   : > { %1789 = vmatmul.mubr.bf16.vlgmr.msra.gmra.mxu1 %v897_v28  ;;  %v1050_v28 = vrot.slane %v1040_v25, %v1049_v26 }
 0x178   : > { %v1771_v30 = vpop.f32.mrf.mxu0  ;;  %1731 = vmatpush3.bf16.msra.mxu1 %v1918_v62 }
 0x179   : > { %1732 = vmatprep.subr.bf16.mxu1 %v1919_v63 }
 0x17c   : > { %1733 = vmatpush3.bf16.msra.mxu1 %v1920_v0 }
 0x17d   : > { %1734 = vmatprep.subr.bf16.mxu1 %v1921_v1 }
 0x180   : > { %1735 = vmatpush3.bf16.msra.mxu1 %v1922_v2 }
 0x181   : > { %1736 = vmatprep.subr.bf16.mxu1 %v1923_v3 }
 0x184   : > { %1737 = vmatpush3.bf16.msra.mxu1 %v1924_v4 }
 0x185   : > { %1738 = vmatprep.subr.bf16.mxu1 %v1925_v5 }
 0x188   : > { %1739 = vmatpush3.bf16.msra.mxu1 %v1926_v6 }
 0x189   : > { %1740 = vmatprep.subr.bf16.mxu1 %v1927_v7 }
 0x18c   : > { %1741 = vmatpush3.bf16.msra.mxu1 %v1928_v8 }
 0x18d   : > { %1742 = vmatprep.subr.bf16.mxu1 %v1929_v19 }
 0x190   : > { %1743 = vmatpush3.bf16.msra.mxu1 %v1930_v20 }
 0x191   : > { %1744 = vmatprep.subr.bf16.mxu1 %v1931_v22 }
 0x194   : > { %1745 = vmatpush3.bf16.msra.mxu1 %v1932_v23 }
 0x237   : > { %v986_v32 = vpop.f32.mrf.mxu1 }
 0x238   : > { %v987_v33 = vadd.f32 %v1660_v31, %v986_v32 }
 0x239   : > { %v1790_v34 = vpop.f32.mrf.mxu1 }
 0x23a   : > { %v992_v35 = vadd.f32 %v987_v33, %v767_v15  ;;  %v1670_v15 = vld [vmem:[%s2598_s0] ss:$0 sm:$0xff] }
 0x23b   : > { %v989_v36 = vpop.f32.mrf.mxu1 }
 0x23c   : > { %v996_v37 = vsel %vm995_vm1, %v992_v35, 0.0 }
 0x23d   : > { %997 = vadd.xlane.f32.xlu0 %v996_v37  ;;  %v1791_v38 = vpop.f32.mrf.mxu1 }
 0x2c6   : > { %v998_v43 = vpop.xlane.xlu0 %997 }
 0x2c7   : > { %v1000_v44 = vmul.f32 0.0078125, %v998_v43 }
 0x2c9   : > { %v1001_v45 = vsub.f32 %v992_v35, %v1000_v44 }
 0x2cb   : > { %v1002_v46 = vmul.f32 %v1001_v45, %v1001_v45 }
 0x2cd   : > { %v1003_v47 = vsel %vm995_vm1, %v1002_v46, 0.0 }
 0x2ce   : > { %1004 = vadd.xlane.f32.xlu0 %v1003_v47 }
 0x357   : > { %v1005_v9 = vpop.xlane.xlu0 %1004 }
 0x358   : > { %v1006_v10 = vmul.f32 0.0078125, %v1005_v9 }
 0x35a   : > { %v1007_v11 = vadd.f32 1e-05, %v1006_v10 }
 0x35c   : > { %1933 = vrsqrt.f32 %v1007_v11 }
 0x369   : > { %v1934_v12 = vpop.eup %1933 }
 0x36a   : > { %v1009_v14 = vmul.f32 %v1934_v12, %v1001_v45 }
 0x36c   : > { %v1016_v16 = vmul.f32 %v1669_v13, %v1009_v14 }
 0x36e   : > { %v1023_v17 = vadd.f32 %v1670_v15, %v1016_v16 }
 0x370   : > { %v1041_v18 = vpack.c.bf16 %v1023_v17, %v1023_v17 }
 0x372   : > { %1166 = vmatmul.mubr.bf16.vlgmr.msra.gmra.mxu0 %v1041_v18 }
 0x432   : > { %v1167_v29 = vpop.f32.mrf.mxu0 }
 0x433   : > { %v1168_v30 = vadd.f32 %v1167_v29, %v1046_v27 }
 0x434   : > { %v1169_v31 = vpop.f32.mrf.mxu0 }
 0x435   : > { %v1170_v32 = vadd.f32 %v1169_v31, %v1050_v28  ;;  %v1174_v33 = vmax.f32 %v1168_v30, 0.0 }
 0x436   : > { %v1171_v34 = vpop.f32.mrf.mxu0 }
 0x437   : > { %v1175_v35 = vmax.f32 %v1170_v32, 0.0  ;;  %v1209_v38 = vpack.c.bf16 %v1174_v33, %v1174_v33 }
 0x438   : > { %v1172_v36 = vpop.f32.mrf.mxu0 }
 0x439   : > { %v1210_v37 = vpack.c.bf16 %v1175_v35, %v1175_v35 }
 0x43b   : > { %1345 = vmatprep.mubr.bf16.mxu1 %v1210_v37 }
 0x43c   : > { %1346 = vmatmul.mubr.bf16.vlgmr.msra.gmra.mxu1 %v1209_v38 }
 0x4fc   : > { %v1746_v39 = vpop.f32.mrf.mxu1 }
 0x4fe   : > { %v1747_v41 = vpop.f32.mrf.mxu1 }
 0x4ff   : > { %v1748_v21 = vadd.f32 %v1747_v41, %v1746_v39 }
 0x500   : > { %v1749_v42 = vpop.f32.mrf.mxu1 }
 0x501   : > { %v1348_v43 = vadd.f32 %v1748_v21, %v1687_v40 }
 0x502   : > { %v1750_v44 = vpop.f32.mrf.mxu1 }
 0x503   : > { %v1353_v45 = vadd.f32 %v1348_v43, %v1023_v17 }
 0x505   : > { %v1356_v46 = vsel %vm995_vm1, %v1353_v45, 0.0 }
 0x506   : > { %1357 = vadd.xlane.f32.xlu1 %v1356_v46 }
 0x58f   : > { %v1358_v47 = vpop.xlane.xlu1 %1357 }
 0x590   : > { %v1359_v48 = vmul.f32 0.0078125, %v1358_v47 }
 0x592   : > { %v1360_v49 = vsub.f32 %v1353_v45, %v1359_v48 }
 0x594   : > { %v1361_v50 = vmul.f32 %v1360_v49, %v1360_v49 }
 0x596   : > { %v1362_v51 = vsel %vm995_vm1, %v1361_v50, 0.0 }
 0x597   : > { %1363 = vadd.xlane.f32.xlu1 %v1362_v51 }
 0x620   : > { %v1364_v52 = vpop.xlane.xlu1 %1363 }
 0x621   : > { %v1365_v53 = vmul.f32 0.0078125, %v1364_v52 }
 0x623   : > { %v1366_v54 = vadd.f32 1e-05, %v1365_v53 }
 0x625   : > { %1935 = vrsqrt.f32 %v1366_v54 }
 0x632   : > { %v1936_v55 = vpop.eup %1935 }
 0x633   : > { %v1368_v57 = vmul.f32 %v1936_v55, %v1360_v49 }
 0x635   : > { %v1375_v59 = vmul.f32 %v1704_v56, %v1368_v57 }
 0x637   : > { %v1382_v60 = vadd.f32 %v1705_v58, %v1375_v59 }
 0x639   : > { %1383 = vst [vmem:[%s2595_s10] sm:$0x3] %v1382_v60 }
 0x63a PF: > { %s35_s30 = sadd.s32 1, %s2167_s30   ;;  %s2602_s9 = sld [smem:[#allocation16_spill]] }
 0x63b   : > { %p32_p12 = scmp.ge.s32.totalorder %s35_s30, 4   ;;  %s2603_s27 = sld [smem:[#allocation19_spill]] }
 0x63c   : > { %s2604_s28 = sld [smem:[#allocation17_spill]]  ;;  %s2606_s25 = smov %s2151_s26 }
 0x63d   : > { %s2605_s29 = sld [smem:[#allocation18_spill]]  ;;  %34 = sbr.rel (!%p32_p12) target bundleno = 18 (0x12), region = 198 }
 0x640   : > { %s2607_s26 = smov %s2602_s9 }
 0x642   :  { %1403 = vsyncpa [#allocation3], 1 }
 0x643   :  { %1405 = vsyncpa [#allocation3 + $0x1], 1 }
 0x644   :  { %1406 = vsyncpa [#allocation5], 1 }
 0x645   :  { %1408 = vsyncpa [#allocation5 + $0x1], 1 }
 0x646   :  { %1409 = vsyncpa [#allocation8], 1 }
 0x647   :  { %1411 = vsyncpa [#allocation8 + $0x1], 1 }
 0x648   :  { %1412 = vsyncpa [#allocation11], 1 }
 0x649   :  { %1414 = vsyncpa [#allocation11 + $0x1], 1 }

// kernel: enedina_forward.7
= control target key start
LH: loop header
LB: loop body
LE: loop exit
PB: predicated region body
PF: predicated region fallthrough
CT: control target
= control target key end

     0   :  { %s5321_s0 = inlined_call_operand.vmem [shape: f32[32,128], index: 0, kind: input, shape index: {}]   ;;  %s5322_s1 = inlined_call_operand.vmem [shape: f32[2,128], index: 1, kind: input, shape index: {}]   ;;  %s5323_s2 = inlined_call_operand.vmem [shape: bf16[2,128,384], index: 2, kind: input, shape index: {}]   ;;  %s5324_s3 = inlined_call_operand.vmem [shape: f32[2,1,384], index: 3, kind: input, shape index: {}]   ;;  %s5325_s4 = inlined_call_operand.vmem [shape: bf16[2,128,128], index: 4, kind: input, shape index: {}]   ;;  %s5326_s5 = inlined_call_operand.vmem [shape: f32[2,1,128], index: 5, kind: input, shape index: {}]   ;;  %s5327_s6 = inlined_call_operand.vmem [shape: f32[2,1,128], index: 6, kind: input, shape index: {}]   ;;  %s5328_s7 = inlined_call_operand.vmem [shape: f32[2,1,128], index: 7, kind: input, shape index: {}]   ;;  %s5329_s8 = inlined_call_operand.vmem [shape: bf16[2,128,128], index: 8, kind: input, shape index: {}]   ;;  %s5330_s9 = inlined_call_operand.vmem [shape: f32[2,1,128], index: 9, kind: input, shape index: {}]   ;;  %s5331_s10 = inlined_call_operand.vmem [shape: bf16[2,128,128], index: 10, kind: input, shape index: {}]   ;;  %s5332_s11 = inlined_call_operand.vmem [shape: f32[2,1,128], index: 11, kind: input, shape index: {}]   ;;  %s5333_s12 = inlined_call_operand.vmem [shape: f32[2,1,128], index: 12, kind: input, shape index: {}]   ;;  %s5334_s13 = inlined_call_operand.vmem [shape: f32[2,1,128], index: 13, kind: input, shape index: {}]   ;;  %s5335_s14 = inlined_call_operand.vmem [shape: bf16[2,128,256], index: 14, kind: input, shape index: {}]   ;;  %s5336_s15 = inlined_call_operand.vmem [shape: f32[2,1,256], index: 15, kind: input, shape index: {}]   ;;  %s5337_s16 = inlined_call_operand.vmem [shape: bf16[2,256,128], index: 16, kind: input, shape index: {}]   ;;  %s5338_s17 = inlined_call_operand.vmem [shape: f32[2,1,128], index: 17, kind: input, shape index: {}]   ;;  %s5339_s18 = inlined_call_operand.vmem [shape: f32[2,1,128], index: 18, kind: input, shape index: {}]   ;;  %s5340_s19 = inlined_call_operand.vmem [shape: f32[2,1,128], index: 19, kind: input, shape index: {}]   ;;  %s5341_s20 = inlined_call_operand.vmem [shape: bf16[128,128], index: 20, kind: input, shape index: {}]   ;;  %s5342_s21 = inlined_call_operand.hbm [shape: f32[1,128], index: 21, kind: input, shape index: {}]   ;;  %s5343_s22 = inlined_call_operand.vmem [shape: f32[32,128], index: 22, kind: output, shape index: {}]  }
   0x1   :  { %5353 = sst [smem:[#allocation10_spill]] %s5321_s0 }
   0x2   :  { %5354 = sst [smem:[#allocation11_spill]] %s5322_s1 }
   0x3   :  { %5355 = sst [smem:[#allocation12_spill]] %s5323_s2 }
   0x4   :  { %5356 = sst [smem:[#allocation13_spill]] %s5324_s3 }
   0x5   :  { %5357 = sst [smem:[#allocation14_spill]] %s5325_s4 }
   0x6   :  { %5358 = sst [smem:[#allocation15_spill]] %s5326_s5 }
   0x7   :  { %5359 = sst [smem:[#allocation16_spill]] %s5327_s6 }
   0x8   :  { %5360 = sst [smem:[#allocation17_spill]] %s5329_s8 }
   0x9   :  { %5361 = sst [smem:[#allocation18_spill]] %s5331_s10 }
   0xa   :  { %5362 = sst [smem:[#allocation19_spill]] %s5333_s12 }
   0xb   :  { %5363 = sst [smem:[#allocation20_spill]] %s5334_s13 }
   0xc   :  { %5364 = sst [smem:[#allocation21_spill]] %s5335_s14 }
   0xd   :  { %5365 = sst [smem:[#allocation22_spill]] %s5338_s17 }
   0xe   :  { %5366 = sst [smem:[#allocation23_spill]] %s5339_s18 }
   0xf   :  { %5367 = sst [smem:[#allocation24_spill]] %s5340_s19 }
  0x10   :  { %5368 = sst [smem:[#allocation25_spill]] %s5341_s20 }
  0x11   :  { %5369 = sst [smem:[#allocation26_spill]] %s5342_s21 }
  0x12   :  { %5370 = sst [smem:[#allocation27_spill]] %s5343_s22 }
  0x13   :  { %27 = vsyncpa [#allocation3], 0  ;;  %s4587_s3 = smov 0   ;;  %s4589_s28 = smov 0  }
  0x14   :  { %s4591_s29 = smov 0  }
  0x15 LB: > { %5371 = sst [smem:[#allocation5_spill]] %s4455_s3  ;;  %s3692_s30 = sadd.s32 4294967295, %s4463_s29   ;;  %s4463_s29 = sphi %s4591_s29, %s33_s29   ;;  %s4459_s28 = sphi %s4589_s28, %s5417_s28   ;;  %s4455_s3 = sphi %s4587_s3, %s5416_s3  }
  0x16   : > { %5372 = sst [smem:[#allocation6_spill]] %s4459_s28  ;;  %s42_s4 = sadd.s32 1, %s4459_s28 }
  0x17   : > { %5373 = sst [smem:[#allocation7_spill]] %s4463_s29  ;;  %p43_p0 = scmp.ge.s32.totalorder %s42_s4, 2 }
  0x18   : > { %p3693_p1 = scmp.ge.s32.totalorder %s4463_s29, 1  ;;  %p638_p2 = scmp.lt.s32.totalorder %s4463_s29, 3 }
  0x19   : > { %s5419_s4 = smov (%p43_p0, %s42_s4), 0  ;;  %p4612_p4 = scmp.eq.s32.totalorder %s3692_s30, 0 }
  0x1a   : > { %5374 = sst [smem:[#allocation8_spill]] %s5419_s4  ;;  %p4608_p3 = pnand %p3693_p1, %p638_p2 }
  0x1b   : > { %s4465_s1 = smov [#allocation2]  }
  0x1c   : > { %p4148_p5 = pneg %p4608_p3  ;;  %s670_s5 = sshll.u32 %s4465_s1, 4  ;;  %s671_s5 = int_to_ptr.vmem [resolvable:$true] %s670_s5 }
  0x1d   : > { %s4422_s24 = scalar_lea.vmem %s671_s5, 16  ;;  %s4429_s6 = scalar_lea.vmem %s671_s5, 32 }
  0x1e   : > { %p4149_p6 = pnand %p4612_p4, %p4148_p5  ;;  %p4423_p8 = scmp.ne.s32.totalorder %s671_s5, %s4422_s24 }
  0x1f   : > { %p4430_p11 = scmp.lt.s32.totalorder %s671_s5, %s671_s5  ;;  %p4431_p12 = scmp.lt.s32.totalorder %s4429_s6, %s4422_s24 }
  0x20   : > { %p4413_p7 = pneg %p4149_p6 }
  0x21   : > { %p4432_p13 = por %p4431_p12, %p4430_p11 }
  0x22   : > { %p4425_p9 = pnand %p4423_p8, %p4413_p7 }
  0x24   : > { %p4426_p10 = pneg %p4425_p9 }
  0x26   : > { %p4433_p0 = pnand %p4432_p13, %p4426_p10 }
  0x28   : > { %4436 = shalt.err (!%p4433_p0)
}
  0x29   : > { %s5377_s21 = sld [smem:[#allocation26_spill]] }
  0x2b   : > { %805 = sbr.rel (%p4608_p3) target bundleno = 3175 (0xc67), region = 108 }
  0x2f   : > { %4151 = dma.hbm_to_vmem [thread:$0]  (!%p4149_p6), %s5377_s21, 16, %s671_s5, [#allocation3]  }
  0x30   : > { %4450 = dma.done.wait (%p4612_p4), [#allocation3], 16  }
  0x31   : > { %4452 = vsyncadd (%p4612_p4), [#allocation3], 4294967280  ;;  %p949_p1 = scmp.lt.s32.totalorder %s4455_s3, 1  ;;  %s5378_s5 = sld [smem:[#allocation14_spill]] }
  0x32   : > { %s5380_s26 = sld [smem:[#allocation12_spill]] }
  0x33   : > { %s4631_s2 = scalar_select %p949_p1, %s4455_s3, 1 }
  0x34   : > { %s5382_s19 = sld [smem:[#allocation13_spill]] }
  0x35   : > { %s4142_s27 = smul.u32 192, %s4631_s2  ;;  %s3833_s30 = sshll.u32 %s4631_s2, 6 }
  0x36   : > { %s4143_s0 = smul.u32 3, %s4631_s2  ;;  %s5384_s8 = sld [smem:[#allocation17_spill]] }
  0x37   : > { %s4639_s24 = scalar_lea.vmem %s5378_s5, %s3833_s30  ;;  %s5385_s10 = sld [smem:[#allocation18_spill]] }
  0x38   : > { %5379 = sst [smem:[#allocation9_spill]] %s4639_s24  ;;  %s4644_s21 = scalar_lea.vmem %s5380_s26, %s4142_s27 }
  0x39   : > { %s3836_s20 = sshll.u32 %s4631_s2, 7  ;;  %s5388_s14 = sld [smem:[#allocation21_spill]] }
  0x3a   : > { %s4653_s18 = scalar_lea.vmem %s5382_s19, %s4143_s0  ;;  %s4704_s24 = scalar_lea.vmem %s5337_s16, %s3836_s20 }
  0x3b   : > { %s5389_s26 = sld [smem:[#allocation22_spill]] }
  0x3c   : > { %s4666_s28 = scalar_lea.vmem %s5384_s8, %s3833_s30  ;;  %s5390_s29 = sld [smem:[#allocation23_spill]] }
  0x3d   : > { %s4675_s0 = scalar_lea.vmem %s5385_s10, %s3833_s30  ;;  %s3709_s30 = sshll.u32 %s4631_s2, 1 }
  0x3e   : > { %s4699_s17 = scalar_lea.vmem %s5336_s15, %s3709_s30  ;;  %s5391_s13 = sld [smem:[#allocation24_spill]] }
  0x3f   : > { %s4693_s22 = scalar_lea.vmem %s5388_s14, %s3836_s20  ;;  %s5392_s19 = sld [smem:[#allocation5_spill]] }
  0x41   : > { %s1010_s5 = scalar_lea.vmem %s5389_s26, %s4631_s2 }
  0x42   : > { %s1013_s4 = scalar_lea.vmem %s5390_s29, %s4631_s2 }
  0x44   : > { %s1016_s12 = scalar_lea.vmem %s5391_s13, %s4631_s2 }
  0x45   : > { %p3712_p2 = scmp.ne.s32.totalorder %s5392_s19, 0 }
  0x46   : > { %s5393_s1 = sld [smem:[#allocation10_spill]] (!%p3712_p2) }
  0x47   : > { %1027 = sbr.rel (%p3712_p2) target bundleno = 79 (0x4f), region = 116  ;;  %s5394_s26 = sld [smem:[#allocation27_spill]] (!%p3712_p2) }
  0x4c   : > { %v1028_v0 = vld [vmem:[%s5393_s1] sm:$0xff]  ;;  %v1029_v1 = vld [vmem:[%s5393_s1 + $0x8] sm:$0xff]  ;;  %v1030_v2 = vld [vmem:[%s5393_s1 + $0x10] sm:$0xff] }
  0x4d   : > { %1032 = vst [vmem:[%s5394_s26] sm:$0xff] %v1028_v0  ;;  %1033 = vst [vmem:[%s5394_s26 + $0x8] sm:$0xff] %v1029_v1  ;;  %v1031_v3 = vld [vmem:[%s5393_s1 + $0x18] sm:$0xff] }
  0x4e   : > { %1034 = vst [vmem:[%s5394_s26 + $0x10] sm:$0xff] %v1030_v2  ;;  %1035 = vst [vmem:[%s5394_s26 + $0x18] sm:$0xff] %v1031_v3 }
  0x4f PF: > { %v4215_v4 = vld [vmem:[%s4644_s21 + $0xac] ss:$12 sps:$4 sm:$0xff]   ;;  %v4217_v5 = vld [vmem:[%s4644_s21 + $0xa8] ss:$12 sps:$4 sm:$0xff]   ;;  %v4466_v6 = vmov 0   ;;  %s5395_s25 = sld [smem:[#allocation27_spill]]  ;;  %v1093_v36 = vlaneseq  ;;  %s5398_s6 = scalar_lea.vmem %s5330_s9, %s4631_s2 }
  0x50   : > { %1268 = vmatprep.mubr.bf16.mxu0 %v4466_v6  ;;  %1236 = vmatprep.subr.bf16.mxu0 %v4215_v4  ;;  %v4218_v7 = vld [vmem:[%s4644_s21 + $0x94] ss:$12 sps:$4 sm:$0xff]   ;;  %v4220_v8 = vld [vmem:[%s4644_s21 + $0x90] ss:$12 sps:$4 sm:$0xff]   ;;  %v4223_v10 = vld [vmem:[%s4644_s21 + $0x78] ss:$12 sps:$4 sm:$0xff]   ;;  %s5404_s13 = scalar_lea.vmem %s5328_s7, %s4631_s2 }
  0x51   : > { %1237 = vmatpush1.bf16.msra.mxu0 %v4217_v5  ;;  %v4221_v9 = vld [vmem:[%s4644_s21 + $0x7c] ss:$12 sps:$4 sm:$0xff]   ;;  %v4224_v11 = vld [vmem:[%s4644_s21 + $0x64] ss:$12 sps:$4 sm:$0xff]   ;;  %v4226_v13 = vld [vmem:[%s4644_s21 + $0x60] ss:$12 sps:$4 sm:$0xff]  }
  0x52   : > { %1238 = vmatprep.subr.bf16.mxu0 %v4218_v7  ;;  %v4227_v15 = vld [vmem:[%s4644_s21 + $0x4c] ss:$12 sps:$4 sm:$0xff]   ;;  %v4229_v17 = vld [vmem:[%s4644_s21 + $0x48] ss:$12 sps:$4 sm:$0xff]   ;;  %v4232_v19 = vld [vmem:[%s4644_s21 + $0x30] ss:$12 sps:$4 sm:$0xff]  }
  0x53   : > { %v4230_v18 = vld [vmem:[%s4644_s21 + $0x34] ss:$12 sps:$4 sm:$0xff]   ;;  %v4233_v20 = vld [vmem:[%s4644_s21 + $0x1c] ss:$12 sps:$4 sm:$0xff]   ;;  %v4235_v21 = vld [vmem:[%s4644_s21 + $0x18] ss:$12 sps:$4 sm:$0xff]  }
  0x54   : > { %v4236_v22 = vld [vmem:[%s4644_s21 + $0x4] ss:$12 sps:$4 sm:$0xff]   ;;  %v4238_v23 = vld [vmem:[%s4644_s21] ss:$12 sps:$4 sm:$0xff]   ;;  %v4467_v27 = vmov 0.0   ;;  %vm4468_vm0 = vmmov 0  }
  0x55   : > { %1239 = vmatpush1.bf16.msra.mxu0 %v4220_v8  ;;  %v1036_v12 = vld [vmem:[%s5395_s25] sm:$0xff]  ;;  %v1037_v14 = vld [vmem:[%s5395_s25 + $0x8] sm:$0xff]  ;;  %v1038_v24 = vld [vmem:[%s5395_s25 + $0x10] sm:$0xff]  ;;  %v1094_v37 = vshrl.u32 %v1093_v36, 7  ;;  %vm1343_vm1 = vcmask 261120   ;;  %s4471_s29 = smov 32  }
  0x56   : > { %1240 = vmatprep.subr.bf16.mxu0 %v4221_v9  ;;  %v1090_v16 = vpack.c.bf16 %v1037_v14, %v1036_v12  ;;  %v1039_v25 = vld [vmem:[%s5395_s25 + $0x18] sm:$0xff]  ;;  %v4241_v30 = vld [vmem:[%s4644_s21 + $0x80] ss:$12 sps:$4 sm:$0xff]   ;;  %v4242_v31 = vld [vmem:[%s4644_s21 + $0x68] ss:$12 sps:$4 sm:$0xff]   ;;  %vm1391_vm2 = vcmask 130048  }
  0x57   : > { %v1091_v26 = vpack.c.bf16 %v1039_v25, %v1038_v24  ;;  %v4239_v28 = vld [vmem:[%s4644_s21 + $0xb0] ss:$12 sps:$4 sm:$0xff]   ;;  %v4240_v29 = vld [vmem:[%s4644_s21 + $0x98] ss:$12 sps:$4 sm:$0xff]   ;;  %v4245_v34 = vld [vmem:[%s4644_s21 + $0x20] ss:$12 sps:$4 sm:$0xff]  }
  0x58   : > { %3962 = vmatprep.mubr.bf16.mxu1 %v1090_v16  ;;  %3946 = vmatprep.subr.bf16.mxu1 %v4239_v28  ;;  %v4243_v32 = vld [vmem:[%s4644_s21 + $0x50] ss:$12 sps:$4 sm:$0xff]   ;;  %v4244_v33 = vld [vmem:[%s4644_s21 + $0x38] ss:$12 sps:$4 sm:$0xff]   ;;  %v4246_v35 = vld [vmem:[%s4644_s21 + $0x8] ss:$12 sps:$4 sm:$0xff]  }
  0x59   : > { %1241 = vmatpush1.bf16.msra.mxu0 %v4223_v10  ;;  %3947 = vmatpush3.bf16.msra.mxu1 %v4239_v28  ;;  %v4787_v38 = vsub.s32 0, %v1094_v37  ;;  %v4789_v39 = vsub.s32 1, %v1094_v37  ;;  %v1072_v40 = vld [vmem:[%s4653_s18] sm:$0x7]  ;;  %s4469_s21 = smov 64   ;;  %s4470_s18 = smov 96  }
  0x5a   : > { %1242 = vmatprep.subr.bf16.mxu0 %v4224_v11  ;;  %3948 = vmatprep.subr.bf16.mxu1 %v4240_v29  ;;  %v1103_v4 = vsub.s32 2, %v1094_v37  ;;  %s5396_s19 = sld [smem:[#allocation9_spill]]  ;;  %vm1851_vm3 = vcmask 523264   ;;  %vm1854_vm4 = vcmask 785408  }
  0x5b   : > { %v1096_v43 = vrot.slane %v1072_v40, %v4787_v38  ;;  %v1100_v44 = vrot.slane %v1072_v40, %v4789_v39  ;;  %s5397_s20 = sld [smem:[#allocation11_spill]] }
  0x5c   : > { %v1104_v8 = vrot.slane %v1072_v40, %v1103_v4  ;;  %s5399_s26 = sld [smem:[#allocation15_spill]] }
  0x5d   : > { %1243 = vmatpush1.bf16.msra.mxu0 %v4226_v13  ;;  %3949 = vmatpush3.bf16.msra.mxu1 %v4240_v29  ;;  %s5402_s8 = sld [smem:[#allocation16_spill]] }
  0x5e   : > { %1244 = vmatprep.subr.bf16.mxu0 %v4227_v15  ;;  %3950 = vmatprep.subr.bf16.mxu1 %v4241_v30  ;;  %s5412_s14 = sld [smem:[#allocation5_spill]] }
  0x61   : > { %1245 = vmatpush1.bf16.msra.mxu0 %v4229_v17  ;;  %3951 = vmatpush3.bf16.msra.mxu1 %v4241_v30 }
  0x62   : > { %1246 = vmatprep.subr.bf16.mxu0 %v4230_v18  ;;  %3952 = vmatprep.subr.bf16.mxu1 %v4242_v31  ;;  %s5400_s10 = scalar_lea.vmem %s5399_s26, %s4631_s2 }
  0x63   : > { %s5403_s27 = scalar_lea.vmem %s5402_s8, %s4631_s2 }
  0x64   : > { %p3819_p3 = scmp.ne.s32.totalorder %s5412_s14, 1 }
  0x65   : > { %1247 = vmatpush1.bf16.msra.mxu0 %v4232_v19  ;;  %3953 = vmatpush3.bf16.msra.mxu1 %v4242_v31 }
  0x66   : > { %1248 = vmatprep.subr.bf16.mxu0 %v4233_v20  ;;  %3954 = vmatprep.subr.bf16.mxu1 %v4243_v32 }
  0x69   : > { %1249 = vmatpush1.bf16.msra.mxu0 %v4235_v21  ;;  %3955 = vmatpush3.bf16.msra.mxu1 %v4243_v32 }
  0x6a   : > { %1250 = vmatprep.subr.bf16.mxu0 %v4236_v22  ;;  %3956 = vmatprep.subr.bf16.mxu1 %v4244_v33 }
  0x6d   : > { %1251 = vmatpush1.bf16.msra.mxu0 %v4238_v23  ;;  %3957 = vmatpush3.bf16.msra.mxu1 %v4244_v33 }
  0x6e   : > { %3966 = vmatprep.subr.bf16.mxu0 %v4467_v27  ;;  %3958 = vmatprep.subr.bf16.mxu1 %v4245_v34 }
  0x70   : > { %1269 = vmatmul.mubr.bf16.vlgmr.msra.gmra.mxu0 %v1090_v16 }
  0x71   : > { %1278 = vmatprep.mubr.bf16.mxu0 %v4466_v6  ;;  %3959 = vmatpush3.bf16.msra.mxu1 %v4245_v34 }
  0x72   : > { %3960 = vmatprep.subr.bf16.mxu1 %v4246_v35 }
  0x75   : > { %3961 = vmatpush3.bf16.msra.mxu1 %v4246_v35 }
  0x76   : > { %3978 = vmatprep.subr.bf16.mxu1 %v4467_v27 }
  0x78   : > { %1279 = vmatmul.mubr.bf16.gmra.mxu0 %v1091_v26  ;;  %3963 = vmatmul.mubr.bf16.vlgmr.msra.gmra.mxu1 %v1091_v26 }
  0x79   : > { %3968 = vmatprep.mubr.msk.bf16.mxu0 %vm4468_vm0, %v4467_v27  ;;  %3980 = vmatprep.mubr.msk.bf16.mxu1 %vm4468_vm0, %v4467_v27 }
 0x130   : > { %v1270_v41 = vpop.f32.mrf.mxu0 }
 0x131   : > { %v1271_v48 = vadd.f32 %v1270_v41, %v1096_v43 }
 0x132   : > { %v1272_v42 = vpop.f32.mrf.mxu0 }
 0x133   : > { %v1273_v49 = vadd.f32 %v1272_v42, %v1100_v44  ;;  %v1338_v55 = vmul.f32 0.17677669, %v1271_v48 }
 0x134   : > { %v1274_v45 = vpop.f32.mrf.mxu0 }
 0x135   : > { %v1275_v46 = vadd.f32 %v1274_v45, %v1096_v43 }
 0x136   : > { %v1276_v47 = vpop.f32.mrf.mxu0 }
 0x137   : > { %v1277_v50 = vadd.f32 %v1276_v47, %v1100_v44  ;;  %v1339_v52 = vmul.f32 0.17677669, %v1275_v46 }
 0x138   : > { %v1280_v51 = vpop.f32.mrf.mxu0  ;;  %v3964_v9 = vpop.f32.mrf.mxu1 }
 0x139   : > { %v1341_v53 = vpack.c.bf16 %v1277_v50, %v1273_v49  ;;  %v1281_v57 = vadd.f32 %v1280_v51, %v1096_v43  ;;  %v1340_v59 = vpack.c.bf16 %v1339_v52, %v1338_v55  ;;  %v1332_v11 = vadd.f32 %v3964_v9, %v1104_v8 }
 0x13a   : > { %v1282_v54 = vpop.f32.mrf.mxu0  ;;  %v1323_v12 = vpop.f32.mrf.mxu1 }
 0x13b   : > { %1585 = vrot.lane.b32.xlu1 %v1341_v53, %s4469_s21  ;;  %1463 = vrot.lane.b32.xlu0 %v1341_v53, %s4470_s18  ;;  %v1348_v56 = vsel %vm1343_vm1, %v1341_v53, 0  ;;  %v1857_v62 = vmul.f32 0.17677669, %v1281_v57  ;;  %v1283_v63 = vadd.f32 %v1282_v54, %v1100_v44  ;;  %v1324_v16 = vadd.f32 %v1323_v12, %v1104_v8 }
 0x13c   : > { %3967 = vmatpush3.bf16.xpose.msra.mxu0 %v1348_v56  ;;  %v1284_v58 = vpop.f32.mrf.mxu0  ;;  %v3965_v15 = vpop.f32.mrf.mxu1 }
 0x13d   : > { %v1285_v60 = vadd.f32 %v1284_v58, %v1096_v43  ;;  %3972 = vmatprep.subr.bf16.mxu0 %v4467_v27  ;;  %v1335_v17 = vadd.f32 %v3965_v15, %v1104_v8 }
 0x13e   : > { %v1286_v61 = vpop.f32.mrf.mxu0  ;;  %v1326_v18 = vpop.f32.mrf.mxu1 }
 0x13f   : > { %1583 = vrot.lane.b32.xlu1 %v1340_v59, %s4469_s21  ;;  %1460 = vrot.lane.b32.xlu0 %v1340_v59, %s4470_s18  ;;  %v1858_v0 = vmul.f32 0.17677669, %v1285_v60  ;;  %v1287_v1 = vadd.f32 %v1286_v61, %v1100_v44  ;;  %v4818_v19 = vpack.c.bf16 %v1335_v17, %v1332_v11  ;;  %v1327_v20 = vadd.f32 %v1326_v18, %v1104_v8 }
 0x141   : > { %v1859_v2 = vpack.c.bf16 %v1858_v0, %v1857_v62  ;;  %v1860_v3 = vpack.c.bf16 %v1287_v1, %v1283_v63  ;;  %v4820_v22 = vpack.c.bf16 %v1327_v20, %v1324_v16 }
 0x143   : > { %1704 = vrot.lane.b32.xlu1 %v1340_v59, %s4471_s29  ;;  %1706 = vrot.lane.b32.xlu0 %v1341_v53, %s4471_s29  ;;  %v1866_v26 = vsel %vm1343_vm1, %v1860_v3, 0 }
 0x144   : > { %3969 = vmatmul.mubr.msk.bf16.vlgmr.msra.gmra.mxu0 %vm1343_vm1, %v1340_v59 }
 0x145   : > { %3974 = vmatprep.mubr.msk.bf16.mxu0 %vm4468_vm0, %v4467_v27  ;;  %3973 = vmatpush3.bf16.msra.mxu0 %v4820_v22 }
 0x146   : > { %3984 = vmatprep.subr.bf16.mxu0 %v4467_v27 }
 0x147   : > { %1980 = vrot.lane.b32.xlu0 %v1860_v3, %s4470_s18  ;;  %1977 = vrot.lane.b32.xlu1 %v1859_v2, %s4470_s18 }
 0x14b   : > { %2102 = vrot.lane.b32.xlu0 %v1860_v3, %s4469_s21  ;;  %2100 = vrot.lane.b32.xlu1 %v1859_v2, %s4469_s21 }
 0x14f   : > { %2223 = vrot.lane.b32.xlu0 %v1860_v3, %s4471_s29  ;;  %2221 = vrot.lane.b32.xlu1 %v1859_v2, %s4471_s29 }
 0x1ad   : > { %v1464_v5 = vpop.permute.xlu0 %1463  ;;  %v1586_v10 = vpop.permute.xlu1 %1585 }
 0x1ae   : > { %v1469_v7 = vsel %vm1343_vm1, %v1464_v5, 0  ;;  %v1591_v14 = vsel %vm1343_vm1, %v1586_v10, 0 }
 0x1af   : > { %3979 = vmatpush3.bf16.xpose.msra.mxu1 %v1469_v7 }
 0x1b0   : > { %3990 = vmatprep.subr.bf16.mxu1 %v4467_v27 }
 0x1b1   : > { %v1461_v13 = vpop.permute.xlu0 %1460  ;;  %v1584_v23 = vpop.permute.xlu1 %1583 }
 0x1b5   : > { %v1707_v21 = vpop.permute.xlu0 %1706  ;;  %v1705_v25 = vpop.permute.xlu1 %1704 }
 0x1b6   : > { %3981 = vmatmul.mubr.msk.bf16.vlgmr.msra.gmra.mxu1 %vm1343_vm1, %v1461_v13  ;;  %v1712_v24 = vsel %vm1343_vm1, %v1707_v21, 0 }
 0x1b7   : > { %3991 = vmatpush3.bf16.xpose.msra.mxu1 %v1591_v14  ;;  %3992 = vmatprep.mubr.msk.bf16.mxu1 %vm4468_vm0, %v4467_v27 }
 0x1b8   : > { %4002 = vmatprep.subr.bf16.mxu1 %v4467_v27 }
 0x1b9   : > { %v1981_v28 = vpop.permute.xlu0 %1980  ;;  %v1978_v31 = vpop.permute.xlu1 %1977 }
 0x1ba   : > { %v1986_v29 = vsel %vm1343_vm1, %v1981_v28, 0 }
 0x1bd   : > { %v2103_v30 = vpop.permute.xlu0 %2102  ;;  %v2101_v34 = vpop.permute.xlu1 %2100 }
 0x1be   : > { %3993 = vmatmul.mubr.msk.bf16.vlgmr.msra.gmra.mxu1 %vm1343_vm1, %v1584_v23  ;;  %v2108_v32 = vsel %vm1343_vm1, %v2103_v30, 0 }
 0x1bf   : > { %4003 = vmatpush3.bf16.xpose.msra.mxu1 %v1712_v24  ;;  %4004 = vmatprep.mubr.msk.bf16.mxu1 %vm4468_vm0, %v4467_v27 }
 0x1c0   : > { %4014 = vmatprep.subr.bf16.mxu1 %v4467_v27 }
 0x1c1   : > { %v2224_v33 = vpop.permute.xlu0 %2223  ;;  %v2222_v36 = vpop.permute.xlu1 %2221 }
 0x1c2   : > { %v2229_v35 = vsel %vm1343_vm1, %v2224_v33, 0 }
 0x1c6   : > { %4005 = vmatmul.mubr.msk.bf16.vlgmr.msra.gmra.mxu1 %vm1343_vm1, %v1705_v25 }
 0x1c7   : > { %4015 = vmatpush3.bf16.xpose.msra.mxu1 %v1866_v26  ;;  %4016 = vmatprep.mubr.msk.bf16.mxu1 %vm4468_vm0, %v4467_v27 }
 0x1c8   : > { %4026 = vmatprep.subr.bf16.mxu1 %v4467_v27 }
 0x1ce   : > { %4017 = vmatmul.mubr.msk.bf16.vlgmr.msra.gmra.mxu1 %vm1343_vm1, %v1859_v2 }
 0x1cf   : > { %4027 = vmatpush3.bf16.xpose.msra.mxu1 %v1986_v29  ;;  %4028 = vmatprep.mubr.msk.bf16.mxu1 %vm4468_vm0, %v4467_v27 }
 0x1d0   : > { %4038 = vmatprep.subr.bf16.mxu1 %v4467_v27 }
 0x1d6   : > { %4029 = vmatmul.mubr.msk.bf16.vlgmr.msra.gmra.mxu1 %vm1343_vm1, %v1978_v31 }
 0x1d7   : > { %4039 = vmatpush3.bf16.xpose.msra.mxu1 %v2108_v32  ;;  %4040 = vmatprep.mubr.msk.bf16.mxu1 %vm4468_vm0, %v4467_v27 }
 0x1d8   : > { %4050 = vmatprep.subr.bf16.mxu1 %v4467_v27 }
 0x1de   : > { %4041 = vmatmul.mubr.msk.bf16.vlgmr.msra.gmra.mxu1 %vm1343_vm1, %v2101_v34 }
 0x1df   : > { %4051 = vmatpush3.bf16.xpose.msra.mxu1 %v2229_v35  ;;  %4052 = vmatprep.mubr.msk.bf16.mxu1 %vm4468_vm0, %v4467_v27 }
 0x1e6   : > { %4053 = vmatmul.mubr.msk.bf16.vlgmr.msra.gmra.mxu1 %vm1343_vm1, %v2222_v36 }
 0x204   : > { %v4849_v37 = vpop.f32.mrf.mxu0 }
 0x205   : > { %v1392_v40 = vsel %vm1391_vm2, %v4849_v37, -inf }
 0x206   : > { %1393 = vmax.xlane.f32.xlu0 %v1392_v40  ;;  %v3970_v41 = vpop.f32.mrf.mxu0 }
 0x208   : > { %v1387_v42 = vpop.f32.mrf.mxu0 }
 0x209   : > { %v1395_v43 = vsel %vm1391_vm2, %v1387_v42, -inf }
 0x20a   : > { %1396 = vmax.xlane.f32.xlu1 %v1395_v43  ;;  %v3971_v44 = vpop.f32.mrf.mxu0 }
 0x276   : > { %v4854_v45 = vpop.f32.mrf.mxu1 }
 0x277   : > { %v1512_v46 = vsel %vm1391_vm2, %v4854_v45, -inf }
 0x278   : > { %v3982_v47 = vpop.f32.mrf.mxu1  ;;  %1513 = vmax.xlane.f32.xlu0 %v1512_v46 }
 0x27a   : > { %v4858_v48 = vpop.f32.mrf.mxu1 }
 0x27b   : > { %v1515_v49 = vsel %vm1391_vm2, %v4858_v48, -inf }
 0x27c   : > { %v3983_v50 = vpop.f32.mrf.mxu1  ;;  %1516 = vmax.xlane.f32.xlu0 %v1515_v49 }
 0x27e   : > { %v4862_v51 = vpop.f32.mrf.mxu1 }
 0x27f   : > { %v1634_v52 = vsel %vm1391_vm2, %v4862_v51, -inf }
 0x280   : > { %v3994_v53 = vpop.f32.mrf.mxu1  ;;  %1635 = vmax.xlane.f32.xlu1 %v1634_v52 }
 0x282   : > { %v4866_v54 = vpop.f32.mrf.mxu1 }
 0x283   : > { %v1637_v55 = vsel %vm1391_vm2, %v4866_v54, -inf }
 0x284   : > { %v3995_v56 = vpop.f32.mrf.mxu1  ;;  %1638 = vmax.xlane.f32.xlu0 %v1637_v55 }
 0x286   : > { %v4870_v57 = vpop.f32.mrf.mxu1 }
 0x287   : > { %v1755_v58 = vsel %vm1391_vm2, %v4870_v57, -inf }
 0x288   : > { %v4006_v59 = vpop.f32.mrf.mxu1  ;;  %1756 = vmax.xlane.f32.xlu1 %v1755_v58 }
 0x28a   : > { %v4874_v60 = vpop.f32.mrf.mxu1 }
 0x28b   : > { %v1758_v61 = vsel %vm1391_vm2, %v4874_v60, -inf }
 0x28c   : > { %v4007_v62 = vpop.f32.mrf.mxu1  ;;  %1759 = vmax.xlane.f32.xlu0 %v1758_v61 }
 0x28e   : > { %v4878_v63 = vpop.f32.mrf.mxu1 }
 0x28f   : > { %v1394_v28 = vpop.xlane.xlu0 %1393  ;;  %v1909_v31 = vsel %vm1391_vm2, %v4878_v63, -inf }
 0x290   : > { %v4018_v0 = vpop.f32.mrf.mxu1  ;;  %v1398_v29 = vsub.f32 %v4849_v37, %v1394_v28 }
 0x292   : > { %v4880_v1 = vpop.f32.mrf.mxu1  ;;  %v1400_v30 = vmul.f32 1.442695, %v1398_v29 }
 0x293   : > { %v1397_v2 = vpop.xlane.xlu1 %1396  ;;  %v1912_v3 = vsel %vm1391_vm2, %v4880_v1, -inf }
 0x294   : > { %v1399_v4 = vsub.f32 %v1387_v42, %v1397_v2  ;;  %v4019_v5 = vpop.f32.mrf.mxu1  ;;  %1913 = vmax.xlane.f32.xlu0 %v1912_v3 }
 0x296   : > { %v1402_v7 = vmul.f32 1.442695, %v1399_v4  ;;  %v4884_v8 = vpop.f32.mrf.mxu1 }
 0x297   : > { %v2029_v32 = vsel %vm1391_vm2, %v4884_v8, -inf }
 0x298   : > { %4311 = vpow2.f32 %v1402_v7  ;;  %v4030_v9 = vpop.f32.mrf.mxu1 }
 0x299   : > { %1536 = vrot.lane.b32.xlu1 %v4820_v22, %s4470_s18  ;;  %4313 = vpow2.f32 %v1400_v30 }
 0x29a   : > { %v4888_v10 = vpop.f32.mrf.mxu1 }
 0x29b   : > { %v2032_v11 = vsel %vm1391_vm2, %v4888_v10, -inf }
 0x29c   : > { %v4031_v12 = vpop.f32.mrf.mxu1  ;;  %2033 = vmax.xlane.f32.xlu0 %v2032_v11 }
 0x29e   : > { %v4892_v13 = vpop.f32.mrf.mxu1 }
 0x29f   : > { %v2151_v33 = vsel %vm1391_vm2, %v4892_v13, -inf }
 0x2a0   : > { %v4042_v14 = vpop.f32.mrf.mxu1 }
 0x2a2   : > { %v4894_v15 = vpop.f32.mrf.mxu1 }
 0x2a3   : > { %v2154_v16 = vsel %vm1391_vm2, %v4894_v15, -inf }
 0x2a4   : > { %v4043_v17 = vpop.f32.mrf.mxu1  ;;  %2155 = vmax.xlane.f32.xlu0 %v2154_v16 }
 0x2a5   : > { %v4898_v18 = vpop.eup %4311 }
 0x2a6   : > { %v4900_v20 = vpop.f32.mrf.mxu1  ;;  %v1407_v21 = vsel %vm1391_vm2, %v4898_v18, 0.0  ;;  %v4915_v34 = vpop.eup %4313 }
 0x2a7   : > { %v1404_v35 = vsel %vm1391_vm2, %v4915_v34, 0.0  ;;  %v2272_v36 = vsel %vm1391_vm2, %v4900_v20, -inf }
 0x2a8   : > { %v4054_v23 = vpop.f32.mrf.mxu1  ;;  %1408 = vadd.xlane.f32.xlu0 %v1407_v21 }
 0x2aa   : > { %v4904_v24 = vpop.f32.mrf.mxu1 }
 0x2ab   : > { %v2275_v25 = vsel %vm1391_vm2, %v4904_v24, -inf }
 0x2ac   : > { %2276 = vmax.xlane.f32.xlu0 %v2275_v25  ;;  %v4055_v26 = vpop.f32.mrf.mxu1 }
 0x2bd   : > { %1910 = vmax.xlane.f32.xlu1 %v1909_v31 }
 0x2c1   : > { %2030 = vmax.xlane.f32.xlu1 %v2029_v32 }
 0x2c5   : > { %2152 = vmax.xlane.f32.xlu1 %v2151_v33 }
 0x2c9   : > { %1405 = vadd.xlane.f32.xlu1 %v1404_v35 }
 0x2cd   : > { %2273 = vmax.xlane.f32.xlu1 %v2272_v36 }
 0x301   : > { %v1514_v37 = vpop.xlane.xlu0 %1513 }
 0x302   : > { %v1518_v40 = vsub.f32 %v4854_v45, %v1514_v37 }
 0x304   : > { %v1520_v41 = vmul.f32 1.442695, %v1518_v40 }
 0x305   : > { %v1517_v42 = vpop.xlane.xlu0 %1516 }
 0x306   : > { %4315 = vpow2.f32 %v1520_v41  ;;  %v1519_v43 = vsub.f32 %v4858_v48, %v1517_v42 }
 0x308   : > { %v1522_v44 = vmul.f32 1.442695, %v1519_v43 }
 0x309   : > { %v1636_v45 = vpop.xlane.xlu1 %1635 }
 0x30a   : > { %4317 = vpow2.f32 %v1522_v44  ;;  %v1640_v48 = vsub.f32 %v4862_v51, %v1636_v45 }
 0x30c   : > { %v1642_v56 = vmul.f32 1.442695, %v1640_v48 }
 0x30d   : > { %v1639_v52 = vpop.xlane.xlu0 %1638 }
 0x30e   : > { %v1641_v55 = vsub.f32 %v4866_v54, %v1639_v52  ;;  %4319 = vpow2.f32 %v1642_v56 }
 0x310   : > { %v1644_v61 = vmul.f32 1.442695, %v1641_v55 }
 0x311   : > { %v1757_v53 = vpop.xlane.xlu1 %1756 }
 0x312   : > { %v1761_v58 = vsub.f32 %v4870_v57, %v1757_v53  ;;  %4321 = vpow2.f32 %v1644_v61 }
 0x313   : > { %v4923_v46 = vpop.eup %4315 }
 0x314   : > { %v1524_v47 = vsel %vm1391_vm2, %v4923_v46, 0.0  ;;  %v1763_v62 = vmul.f32 1.442695, %v1761_v58 }
 0x315   : > { %1525 = vadd.xlane.f32.xlu1 %v1524_v47  ;;  %v1760_v59 = vpop.xlane.xlu0 %1759  ;;  %v4940_v4 = vpop.permute.xlu1 %1536 }
 0x316   : > { %v1762_v0 = vsub.f32 %v4874_v60, %v1760_v59  ;;  %4323 = vpow2.f32 %v1763_v62 }
 0x317   : > { %v4927_v49 = vpop.eup %4317 }
 0x318   : > { %v1527_v50 = vsel %vm1391_vm2, %v4927_v49, 0.0  ;;  %v1765_v3 = vmul.f32 1.442695, %v1762_v0 }
 0x319   : > { %1528 = vadd.xlane.f32.xlu0 %v1527_v50 }
 0x31a   : > { %4325 = vpow2.f32 %v1765_v3 }
 0x31b   : > { %v4942_v5 = vpop.eup %4319 }
 0x31d   : > { %v1914_v2 = vpop.xlane.xlu0 %1913 }
 0x31f   : > { %v4945_v11 = vpop.eup %4321 }
 0x320   : > { %v1649_v23 = vsel %vm1391_vm2, %v4945_v11, 0.0 }
 0x323   : > { %v4950_v14 = vpop.eup %4323 }
 0x325   : > { %v2034_v54 = vpop.xlane.xlu0 %2033 }
 0x326   : > { %1778 = vrot.lane.b32.xlu1 %v4820_v22, %s4471_s29  ;;  %v2036_v60 = vsub.f32 %v4888_v10, %v2034_v54  ;;  %v1767_v10 = vsel %vm1391_vm2, %v4950_v14, 0.0 }
 0x327   : > { %v4958_v28 = vpop.eup %4325 }
 0x32d   : > { %v2156_v57 = vpop.xlane.xlu0 %2155 }
 0x32e   : > { %v2158_v25 = vsub.f32 %v4894_v15, %v2156_v57 }
 0x32f   : > { %1657 = vrot.lane.b32.xlu0 %v4820_v22, %s4469_s21  ;;  %v1916_v22 = vsub.f32 %v4880_v1, %v1914_v2  ;;  %v1646_v1 = vsel %vm1391_vm2, %v4942_v5, 0.0 }
 0x330   : > { %v2161_v30 = vmul.f32 1.442695, %v2158_v25 }
 0x331   : > { %v1919_v51 = vmul.f32 1.442695, %v1916_v22  ;;  %v1409_v21 = vpop.xlane.xlu0 %1408 }
 0x333   : > { %4327 = vpow2.f32 %v1919_v51 }
 0x335   : > { %v2277_v32 = vpop.xlane.xlu0 %2276 }
 0x336   : > { %v2279_v33 = vsub.f32 %v4904_v24, %v2277_v32 }
 0x338   : > { %v2282_v41 = vmul.f32 1.442695, %v2279_v33 }
 0x340   : > { %v4962_v31 = vpop.eup %4327 }
 0x341   : > { %v1924_v35 = vsel %vm1391_vm2, %v4962_v31, 0.0 }
 0x346   : > { %v1911_v7 = vpop.xlane.xlu1 %1910 }
 0x347   : > { %v1915_v9 = vsub.f32 %v4878_v63, %v1911_v7  ;;  %v2039_v63 = vmul.f32 1.442695, %v2036_v60 }
 0x349   : > { %v1917_v12 = vmul.f32 1.442695, %v1915_v9 }
 0x34a   : > { %1647 = vadd.xlane.f32.xlu1 %v1646_v1  ;;  %v2031_v16 = vpop.xlane.xlu1 %2030 }
 0x34b   : > { %4329 = vpow2.f32 %v1917_v12  ;;  %v2035_v17 = vsub.f32 %v4884_v8, %v2031_v16  ;;  %v1770_v8 = vsel %vm1391_vm2, %v4958_v28, 0.0 }
 0x34d   : > { %v2037_v26 = vmul.f32 1.442695, %v2035_v17 }
 0x34e   : > { %1650 = vadd.xlane.f32.xlu0 %v1649_v23  ;;  %1768 = vadd.xlane.f32.xlu1 %v1767_v10  ;;  %v2153_v29 = vpop.xlane.xlu1 %2152 }
 0x34f   : > { %4331 = vpow2.f32 %v2037_v26  ;;  %v2157_v61 = vsub.f32 %v4892_v13, %v2153_v29 }
 0x350   : > { %4333 = vpow2.f32 %v2039_v63 }
 0x351   : > { %4335 = vrcp.f32 %v1409_v21  ;;  %v2159_v62 = vmul.f32 1.442695, %v2157_v61 }
 0x352   : > { %1771 = vadd.xlane.f32.xlu0 %v1770_v8  ;;  %v1406_v15 = vpop.xlane.xlu1 %1405 }
 0x353   : > { %4337 = vrcp.f32 %v1406_v15 }
 0x354   : > { %4339 = vpow2.f32 %v2161_v30 }
 0x356   : > { %1925 = vadd.xlane.f32.xlu0 %v1924_v35  ;;  %v2274_v36 = vpop.xlane.xlu1 %2273 }
 0x357   : > { %v2278_v37 = vsub.f32 %v4900_v20, %v2274_v36 }
 0x358   : > { %v4968_v40 = vpop.eup %4329 }
 0x359   : > { %v2280_v42 = vmul.f32 1.442695, %v2278_v37  ;;  %v1921_v43 = vsel %vm1391_vm2, %v4968_v40, 0.0 }
 0x35a   : > { %1922 = vadd.xlane.f32.xlu1 %v1921_v43 }
 0x35b   : > { %4341 = vpow2.f32 %v2280_v42 }
 0x35c   : > { %v4972_v44 = vpop.eup %4331  ;;  %4343 = vpow2.f32 %v2282_v41 }
 0x35d   : > { %v2041_v24 = vsel %vm1391_vm2, %v4972_v44, 0.0  ;;  %v4976_v47 = vpop.eup %4333  ;;  %4345 = vpow2.f32 %v2159_v62 }
 0x35e   : > { %2042 = vadd.xlane.f32.xlu0 %v2041_v24  ;;  %v4336_v50 = vpop.eup %4335  ;;  %v2044_v45 = vsel %vm1391_vm2, %v4976_v47, 0.0 }
 0x35f   : > { %v1413_v53 = vmul.f32 %v4336_v50, %v4898_v18 }
 0x360   : > { %v4338_v20 = vpop.eup %4337 }
 0x361   : > { %v4980_v48 = vpop.eup %4339  ;;  %v1412_v52 = vmul.f32 %v4338_v20, %v4915_v34 }
 0x362   : > { %2045 = vadd.xlane.f32.xlu0 %v2044_v45  ;;  %v2166_v56 = vsel %vm1391_vm2, %v4980_v48, 0.0 }
 0x363   : > { %v1414_v55 = vpack.c.bf16 %v1413_v53, %v1412_v52 }
 0x365   : > { %3975 = vmatmul.mubr.msk.bf16.vlgmr.msra.gmra.mxu0 %vm1391_vm2, %v1414_v55 }
 0x366   : > { %2167 = vadd.xlane.f32.xlu0 %v2166_v56  ;;  %3985 = vmatpush3.bf16.msra.mxu0 %v4940_v4 }
 0x367   : > { %3986 = vmatprep.mubr.msk.bf16.mxu0 %vm4468_vm0, %v4467_v27  ;;  %3996 = vmatprep.subr.bf16.mxu0 %v4467_v27 }
 0x368   : > { %v4990_v58 = vpop.eup %4341 }
 0x369   : > { %v2284_v34 = vsel %vm1391_vm2, %v4990_v58, 0.0  ;;  %v4995_v18 = vpop.eup %4343 }
 0x36a   : > { %2285 = vadd.xlane.f32.xlu0 %v2284_v34  ;;  %v2287_v59 = vsel %vm1391_vm2, %v4995_v18, 0.0  ;;  %v5004_v0 = vpop.eup %4345 }
 0x36b   : > { %2053 = vrot.lane.b32.xlu1 %v4818_v19, %s4470_s18  ;;  %v2163_v2 = vsel %vm1391_vm2, %v5004_v0, 0.0 }
 0x36e   : > { %2288 = vadd.xlane.f32.xlu0 %v2287_v59 }
 0x384   : > { %2174 = vrot.lane.b32.xlu0 %v4818_v19, %s4469_s21 }
 0x38f   : > { %2164 = vadd.xlane.f32.xlu1 %v2163_v2 }
 0x39e   : > { %v1526_v3 = vpop.xlane.xlu1 %1525 }
 0x39f   : > { %4347 = vrcp.f32 %v1526_v3 }
 0x3a0   : > { %2295 = vrot.lane.b32.xlu1 %v4818_v19, %s4471_s29 }
 0x3a2   : > { %v1529_v22 = vpop.xlane.xlu0 %1528  ;;  %v1779_v9 = vpop.permute.xlu1 %1778 }
 0x3a3   : > { %4349 = vrcp.f32 %v1529_v22 }
 0x3a6   : > { %v1658_v7 = vpop.permute.xlu0 %1657 }
 0x3ac   : > { %v4348_v51 = vpop.eup %4347 }
 0x3ad   : > { %v1532_v4 = vmul.f32 %v4348_v51, %v4923_v46 }
 0x3b0   : > { %v4350_v13 = vpop.eup %4349 }
 0x3b1   : > { %v1533_v54 = vmul.f32 %v4350_v13, %v4927_v49 }
 0x3b3   : > { %v1534_v57 = vpack.c.bf16 %v1533_v54, %v1532_v4 }
 0x3b5   : > { %3987 = vmatmul.mubr.msk.bf16.vlgmr.msra.gmra.mxu0 %vm1391_vm2, %v1534_v57 }
 0x3b6   : > { %3997 = vmatpush3.bf16.msra.mxu0 %v1658_v7  ;;  %3998 = vmatprep.mubr.msk.bf16.mxu0 %vm4468_vm0, %v4467_v27 }
 0x3b7   : > { %4008 = vmatprep.subr.bf16.mxu0 %v4467_v27 }
 0x3d3   : > { %v1648_v60 = vpop.xlane.xlu1 %1647 }
 0x3d4   : > { %4351 = vrcp.f32 %v1648_v60 }
 0x3d7   : > { %v1651_v12 = vpop.xlane.xlu0 %1650  ;;  %v1769_v1 = vpop.xlane.xlu1 %1768 }
 0x3d8   : > { %4353 = vrcp.f32 %v1651_v12 }
 0x3db   : > { %v1772_v16 = vpop.xlane.xlu0 %1771 }
 0x3dc   : > { %4355 = vrcp.f32 %v1772_v16 }
 0x3dd   : > { %4357 = vrcp.f32 %v1769_v1 }
 0x3df   : > { %v1926_v49 = vpop.xlane.xlu0 %1925 }
 0x3e1   : > { %v4352_v46 = vpop.eup %4351 }
 0x3e2   : > { %v1654_v23 = vmul.f32 %v4352_v46, %v4942_v5 }
 0x3e3   : > { %v1923_v17 = vpop.xlane.xlu1 %1922 }
 0x3e4   : > { %4359 = vrcp.f32 %v1923_v17 }
 0x3e5   : > { %v4354_v21 = vpop.eup %4353  ;;  %4361 = vrcp.f32 %v1926_v49 }
 0x3e6   : > { %v1655_v63 = vmul.f32 %v4354_v21, %v4945_v11  ;;  %v4247_v21 = vld [vmem:[%s5396_s19 + $0x38] sm:$0xff]  }
 0x3e7   : > { %v2043_v25 = vpop.xlane.xlu0 %2042  ;;  %v2054_v41 = vpop.permute.xlu1 %2053  ;;  %4062 = vmatprep.subr.bf16.mxu1 %v4247_v21 }
 0x3e8   : > { %v1656_v26 = vpack.c.bf16 %v1655_v63, %v1654_v23  ;;  %v4248_v23 = vld [vmem:[%s5396_s19 + $0x30] sm:$0xff]   ;;  %4063 = vmatpush3.bf16.msra.mxu1 %v4247_v21 }
 0x3e9   : > { %v4356_v10 = vpop.eup %4355  ;;  %4064 = vmatprep.subr.bf16.mxu1 %v4248_v23 }
 0x3ea   : > { %3999 = vmatmul.mubr.msk.bf16.vlgmr.msra.gmra.mxu0 %vm1391_vm2, %v1656_v26  ;;  %v4358_v29 = vpop.eup %4357  ;;  %v1776_v8 = vmul.f32 %v4356_v10, %v4958_v28  ;;  %v4249_v26 = vld [vmem:[%s5396_s19 + $0x28] sm:$0xff]  }
 0x3eb   : > { %4009 = vmatpush3.bf16.msra.mxu0 %v1779_v9  ;;  %v2046_v30 = vpop.xlane.xlu0 %2045  ;;  %4010 = vmatprep.mubr.msk.bf16.mxu0 %vm4468_vm0, %v4467_v27  ;;  %v1775_v5 = vmul.f32 %v4358_v29, %v4950_v14 }
 0x3ec   : > { %4363 = vrcp.f32 %v2046_v30  ;;  %4020 = vmatprep.subr.bf16.mxu0 %v4467_v27  ;;  %4065 = vmatpush3.bf16.msra.mxu1 %v4248_v23  ;;  %v4250_v30 = vld [vmem:[%s5396_s19 + $0x20] sm:$0xff]  }
 0x3ed   : > { %4365 = vrcp.f32 %v2043_v25  ;;  %v1777_v32 = vpack.c.bf16 %v1776_v8, %v1775_v5  ;;  %4066 = vmatprep.subr.bf16.mxu1 %v4249_v26 }
 0x3ef   : > { %v2168_v11 = vpop.xlane.xlu0 %2167 }
 0x3f0   : > { %4367 = vrcp.f32 %v2168_v11  ;;  %4067 = vmatpush3.bf16.msra.mxu1 %v4249_v26  ;;  %v4251_v11 = vld [vmem:[%s5396_s19 + $0x18] sm:$0xff]  }
 0x3f1   : > { %v4360_v15 = vpop.eup %4359  ;;  %4068 = vmatprep.subr.bf16.mxu1 %v4250_v30 }
 0x3f2   : > { %4011 = vmatmul.mubr.msk.bf16.vlgmr.msra.gmra.mxu0 %vm1391_vm2, %v1777_v32  ;;  %v4362_v33 = vpop.eup %4361  ;;  %v1929_v35 = vmul.f32 %v4360_v15, %v4968_v40  ;;  %v4252_v32 = vld [vmem:[%s5396_s19 + $0x10] sm:$0xff]   ;;  %v4253_v15 = vld [vmem:[%s5396_s19 + $0x8] sm:$0xff]  }
 0x3f3   : > { %4021 = vmatpush3.bf16.msra.mxu0 %v4818_v19  ;;  %4022 = vmatprep.mubr.msk.bf16.mxu0 %vm4468_vm0, %v4467_v27  ;;  %v2286_v36 = vpop.xlane.xlu0 %2285  ;;  %v1930_v28 = vmul.f32 %v4362_v33, %v4962_v31 }
 0x3f4   : > { %4032 = vmatprep.subr.bf16.mxu0 %v4467_v27  ;;  %4069 = vmatpush3.bf16.msra.mxu1 %v4250_v30 }
 0x3f5   : > { %v1931_v37 = vpack.c.bf16 %v1930_v28, %v1929_v35  ;;  %4070 = vmatprep.subr.bf16.mxu1 %v4251_v11 }
 0x3f7   : > { %v2289_v19 = vpop.xlane.xlu0 %2288 }
 0x3f8   : > { %4071 = vmatpush3.bf16.msra.mxu1 %v4251_v11  ;;  %v4267_v11 = vld [vmem:[%s4675_s0 + $0x18] sm:$0xff]  }
 0x3f9   : > { %v4364_v14 = vpop.eup %4363  ;;  %4072 = vmatprep.subr.bf16.mxu1 %v4252_v32 }
 0x3fa   : > { %4023 = vmatmul.mubr.msk.bf16.vlgmr.msra.gmra.mxu0 %vm1391_vm2, %v1931_v37  ;;  %v4366_v42 = vpop.eup %4365  ;;  %v2050_v43 = vmul.f32 %v4364_v14, %v4976_v47 }
 0x3fb   : > { %4033 = vmatpush3.bf16.msra.mxu0 %v2054_v41  ;;  %4034 = vmatprep.mubr.msk.bf16.mxu0 %vm4468_vm0, %v4467_v27  ;;  %v2049_v40 = vmul.f32 %v4366_v42, %v4972_v44  ;;  %v2175_v50 = vpop.permute.xlu0 %2174  ;;  %v4255_v41 = vld [vmem:[%s4666_s28 + $0x38] sm:$0xff]  }
 0x3fc   : > { %4044 = vmatprep.subr.bf16.mxu0 %v4467_v27  ;;  %4073 = vmatpush3.bf16.msra.mxu1 %v4252_v32  ;;  %v4268_v32 = vld [vmem:[%s4675_s0 + $0x10] sm:$0xff]  }
 0x3fd   : > { %v2051_v24 = vpack.c.bf16 %v2050_v43, %v2049_v40  ;;  %v4368_v20 = vpop.eup %4367  ;;  %4074 = vmatprep.subr.bf16.mxu1 %v4253_v15 }
 0x3fe   : > { %v2172_v52 = vmul.f32 %v4368_v20, %v4980_v48  ;;  %v4258_v20 = vld [vmem:[%s4666_s28 + $0x20] sm:$0xff]  }
 0x400   : > { %4075 = vmatpush3.bf16.msra.mxu1 %v4253_v15 }
 0x402   : > { %4035 = vmatmul.mubr.msk.bf16.vlgmr.msra.gmra.mxu0 %vm1391_vm2, %v2051_v24 }
 0x403   : > { %4045 = vmatpush3.bf16.msra.mxu0 %v2175_v50  ;;  %4046 = vmatprep.mubr.msk.bf16.mxu0 %vm4468_vm0, %v4467_v27  ;;  %v4257_v50 = vld [vmem:[%s4666_s28 + $0x28] sm:$0xff]  }
 0x404   : > { %4056 = vmatprep.subr.bf16.mxu0 %v4467_v27 }
 0x418   : > { %v2165_v31 = vpop.xlane.xlu1 %2164 }
 0x419   : > { %4369 = vrcp.f32 %v2165_v31 }
 0x41a   : > { %4371 = vrcp.f32 %v2289_v19  ;;  %v4256_v19 = vld [vmem:[%s4666_s28 + $0x30] sm:$0xff]  }
 0x41b   : > { %4373 = vrcp.f32 %v2286_v36  ;;  %v4254_v36 = vld [vmem:[%s5396_s19] sm:$0xff]   ;;  %s5407_s19 = sld [smem:[#allocation20_spill]] }
 0x41c   : > { %v2296_v59 = vpop.permute.xlu1 %2295  ;;  %4076 = vmatprep.subr.bf16.mxu1 %v4254_v36 }
 0x41d   : > { %4077 = vmatpush3.bf16.msra.mxu1 %v4254_v36  ;;  %v3764_v36 = vld [vmem:[%s5398_s6] ss:$0 sm:$0xff] }
 0x41e   : > { %4102 = vmatprep.subr.bf16.mxu1 %v4467_v27 }
 0x421   : > { %s5408_s30 = scalar_lea.vmem %s5407_s19, %s4631_s2 }
 0x425   : > { %v5041_v47 = vpop.f32.mrf.mxu0 }
 0x426   : > { %v4370_v45 = vpop.eup %4369 }
 0x427   : > { %v2171_v44 = vmul.f32 %v4370_v45, %v5004_v0  ;;  %v3976_v53 = vpop.f32.mrf.mxu0  ;;  %v4372_v56 = vpop.eup %4371  ;;  %v4259_v45 = vld [vmem:[%s4666_s28 + $0x18] sm:$0xff]  }
 0x428   : > { %v4374_v61 = vpop.eup %4373  ;;  %v2293_v2 = vmul.f32 %v4372_v56, %v4995_v18  ;;  %v4262_v53 = vld [vmem:[%s4666_s28] sm:$0xff]  }
 0x429   : > { %v2173_v55 = vpack.c.bf16 %v2172_v52, %v2171_v44  ;;  %v5045_v34 = vpop.f32.mrf.mxu0  ;;  %v2292_v48 = vmul.f32 %v4374_v61, %v4990_v58  ;;  %v4260_v44 = vld [vmem:[%s4666_s28 + $0x10] sm:$0xff]   ;;  %v4261_v52 = vld [vmem:[%s4666_s28 + $0x8] sm:$0xff]   ;;  %s5401_s28 = scalar_lea.vmem %s5332_s11, %s4631_s2 }
 0x42b   : > { %4047 = vmatmul.mubr.msk.bf16.vlgmr.msra.gmra.mxu0 %vm1391_vm2, %v2173_v55  ;;  %v3977_v62 = vpop.f32.mrf.mxu0  ;;  %v2294_v0 = vpack.c.bf16 %v2293_v2, %v2292_v48  ;;  %v2548_v55 = vld [vmem:[%s5397_s20] sm:$0x3] }
 0x42c   : > { %4057 = vmatpush3.bf16.msra.mxu0 %v2296_v59  ;;  %4058 = vmatprep.mubr.msk.bf16.mxu0 %vm4468_vm0, %v4467_v27  ;;  %v2566_v56 = vpack.c.bf16 %v2548_v55, %v2548_v55 }
 0x42d   : > { %4082 = vmatprep.subr.bf16.mxu0 %v4467_v27 }
 0x433   : > { %4059 = vmatmul.mubr.msk.bf16.vlgmr.msra.gmra.mxu0 %vm1391_vm2, %v2294_v0 }
 0x434   : > { %4098 = vmatprep.mubr.msk.bf16.mxu0 %vm4468_vm0, %v4467_v27  ;;  %4083 = vmatpush3.bf16.msra.mxu0 %v4255_v41  ;;  %v4270_v41 = vld [vmem:[%s4675_s0] sm:$0xff]  }
 0x435   : > { %4084 = vmatprep.subr.bf16.mxu0 %v4467_v27 }
 0x438   : > { %4085 = vmatpush3.bf16.msra.mxu0 %v4256_v19 }
 0x439   : > { %4086 = vmatprep.subr.bf16.mxu0 %v4467_v27 }
 0x43c   : > { %4087 = vmatpush3.bf16.msra.mxu0 %v4257_v50 }
 0x43d   : > { %4088 = vmatprep.subr.bf16.mxu0 %v4467_v27 }
 0x440   : > { %4089 = vmatpush3.bf16.msra.mxu0 %v4258_v20  ;;  %v4399_v20 = vld [vmem:[%s5395_s25] sm:$0xff] }
 0x441   : > { %4090 = vmatprep.subr.bf16.mxu0 %v4467_v27 }
 0x444   : > { %4091 = vmatpush3.bf16.msra.mxu0 %v4259_v45 }
 0x445   : > { %4092 = vmatprep.subr.bf16.mxu0 %v4467_v27 }
 0x448   : > { %4093 = vmatpush3.bf16.msra.mxu0 %v4260_v44 }
 0x449   : > { %4094 = vmatprep.subr.bf16.mxu0 %v4467_v27 }
 0x44c   : > { %4095 = vmatpush3.bf16.msra.mxu0 %v4261_v52 }
 0x44d   : > { %4096 = vmatprep.subr.bf16.mxu0 %v4467_v27 }
 0x450   : > { %4097 = vmatpush3.bf16.msra.mxu0 %v4262_v53  ;;  %v4400_v53 = vld [vmem:[%s5395_s25 + $0x8] sm:$0xff] }
 0x453   : > { %4099 = vmatmul.mubr.bf16.vlgmr.msra.gmra.mxu0 %v2566_v56  ;;  %v4401_v56 = vld [vmem:[%s5395_s25 + $0x10] sm:$0xff] }
 0x454   : > { %2993 = vmatprep.mubr.bf16.mxu0 %v4466_v6 }
 0x475   : > { %v1576_v3 = vpop.f32.mrf.mxu0 }
 0x477   : > { %v3988_v22 = vpop.f32.mrf.mxu0 }
 0x479   : > { %v1579_v51 = vpop.f32.mrf.mxu0 }
 0x47a   : > { %v4185_v13 = vpack.i.bf16 %v1579_v51, %v1576_v3 }
 0x47b   : > { %v3989_v4 = vpop.f32.mrf.mxu0 }
 0x47c   : > { %4186 = vrot.lane.b32.xlu1 %v4185_v13, %s4471_s29 }
 0x4aa   : > { %v1697_v54 = vpop.f32.mrf.mxu0 }
 0x4ac   : > { %v4000_v18 = vpop.f32.mrf.mxu0 }
 0x4ae   : > { %v1700_v57 = vpop.f32.mrf.mxu0 }
 0x4af   : > { %v4190_v7 = vpack.i.bf16 %v1700_v57, %v1697_v54 }
 0x4b0   : > { %v4001_v58 = vpop.f32.mrf.mxu0 }
 0x4b1   : > { %4191 = vrot.lane.b32.xlu1 %v4190_v7, %s4469_s21 }
 0x4b2   : > { %v1818_v9 = vpop.f32.mrf.mxu0 }
 0x4b4   : > { %v4012_v60 = vpop.f32.mrf.mxu0 }
 0x4b6   : > { %v1821_v12 = vpop.f32.mrf.mxu0 }
 0x4b7   : > { %v4195_v1 = vpack.i.bf16 %v1821_v12, %v1818_v9 }
 0x4b8   : > { %v4013_v16 = vpop.f32.mrf.mxu0 }
 0x4b9   : > { %4196 = vrot.lane.b32.xlu1 %v4195_v1, %s4470_s18 }
 0x4ba   : > { %v5059_v46 = vpop.f32.mrf.mxu0 }
 0x4bc   : > { %v4024_v49 = vpop.f32.mrf.mxu0 }
 0x4be   : > { %v5061_v17 = vpop.f32.mrf.mxu0 }
 0x4c0   : > { %v4025_v63 = vpop.f32.mrf.mxu0 }
 0x4c2   : > { %v2093_v25 = vpop.f32.mrf.mxu0 }
 0x4c4   : > { %v4036_v10 = vpop.f32.mrf.mxu0 }
 0x4c6   : > { %v2096_v29 = vpop.f32.mrf.mxu0 }
 0x4c7   : > { %v4200_v8 = vpack.i.bf16 %v2096_v29, %v2093_v25 }
 0x4c8   : > { %v4037_v5 = vpop.f32.mrf.mxu0 }
 0x4c9   : > { %4201 = vrot.lane.b32.xlu1 %v4200_v8, %s4471_s29  ;;  %v4265_v8 = vld [vmem:[%s4675_s0 + $0x28] sm:$0xff]   ;;  %v4266_v5 = vld [vmem:[%s4675_s0 + $0x20] sm:$0xff]  }
 0x4eb   : > { %v2214_v33 = vpop.f32.mrf.mxu0 }
 0x4ed   : > { %v4048_v35 = vpop.f32.mrf.mxu0 }
 0x4ee   : > { %v4187_v59 = vpop.permute.xlu1 %4186  ;;  %v4269_v35 = vld [vmem:[%s4675_s0 + $0x8] sm:$0xff]  }
 0x4ef   : > { %v2217_v28 = vpop.f32.mrf.mxu0  ;;  %v4189_v62 = vunpack.i.h.bf16 %v4187_v59  ;;  %v4188_v2 = vunpack.i.l.bf16 %v4187_v59 }
 0x4f0   : > { %v4205_v37 = vpack.i.bf16 %v2217_v28, %v2214_v33 }
 0x4f1   : > { %v4049_v14 = vpop.f32.mrf.mxu0  ;;  %v1850_v22 = vsel %vm1343_vm1, %v5045_v34, %v4189_v62  ;;  %v1849_v51 = vsel %vm1343_vm1, %v5041_v47, %v4188_v2 }
 0x4f2   : > { %4206 = vrot.lane.b32.xlu0 %v4205_v37, %s4469_s21 }
 0x4f3   : > { %v2335_v42 = vpop.f32.mrf.mxu0 }
 0x4f5   : > { %v4060_v43 = vpop.f32.mrf.mxu0 }
 0x4f6   : > { %v3753_v43 = vld [vmem:[%s5400_s10] ss:$0 sm:$0xff] }
 0x4f7   : > { %v2338_v40 = vpop.f32.mrf.mxu0 }
 0x4f8   : > { %v4210_v24 = vpack.i.bf16 %v2338_v40, %v2335_v42 }
 0x4f9   : > { %v4061_v31 = vpop.f32.mrf.mxu0 }
 0x4fa   : > { %4211 = vrot.lane.b32.xlu1 %v4210_v24, %s4470_s18  ;;  %s5413_s18 = sld [smem:[#allocation25_spill]] (!%p3819_p3) }
 0x513   : > { %v2655_v15 = vpop.f32.mrf.mxu0 }
 0x514   : > { %v2656_v14 = vadd.f32 %v3764_v36, %v2655_v15  ;;  %v3762_v15 = vld [vmem:[%s5403_s27] ss:$0 sm:$0xff] }
 0x515   : > { %v4100_v33 = vpop.f32.mrf.mxu0 }
 0x516   : > { %v2678_v42 = vpack.c.bf16 %v2656_v14, %v2656_v14 }
 0x517   : > { %v2658_v28 = vpop.f32.mrf.mxu0 }
 0x519   : > { %v4101_v37 = vpop.f32.mrf.mxu0 }
 0x523   : > { %v4192_v61 = vpop.permute.xlu1 %4191 }
 0x524   : > { %v4194_v48 = vunpack.i.h.bf16 %v4192_v61  ;;  %v4193_v0 = vunpack.i.l.bf16 %v4192_v61  ;;  %v4402_v61 = vld [vmem:[%s5395_s25 + $0x18] sm:$0xff] }
 0x526   : > { %v1853_v54 = vsel %vm1851_vm3, %v1850_v22, %v4194_v48  ;;  %v1852_v18 = vsel %vm1851_vm3, %v1849_v51, %v4193_v0 }
 0x52b   : > { %v4197_v3 = vpop.permute.xlu1 %4196 }
 0x52c   : > { %v4199_v13 = vunpack.i.h.bf16 %v4197_v3  ;;  %v4198_v4 = vunpack.i.l.bf16 %v4197_v3 }
 0x52e   : > { %v1855_v57 = vsel %vm1854_vm4, %v1852_v18, %v4198_v4  ;;  %v1856_v7 = vsel %vm1854_vm4, %v1853_v54, %v4199_v13 }
 0x52f   : > { %v2372_v58 = vpack.c.bf16 %v1856_v7, %v1855_v57 }
 0x531   : > { %4078 = vmatprep.mubr.bf16.mxu1 %v2372_v58 }
 0x53b   : > { %v4202_v9 = vpop.permute.xlu1 %4201 }
 0x53c   : > { %v4204_v12 = vunpack.i.h.bf16 %v4202_v9  ;;  %v4203_v34 = vunpack.i.l.bf16 %v4202_v9 }
 0x53e   : > { %v2367_v49 = vsel %vm1343_vm1, %v5061_v17, %v4204_v12  ;;  %v2366_v21 = vsel %vm1343_vm1, %v5059_v46, %v4203_v34  ;;  %v4263_v17 = vld [vmem:[%s4675_s0 + $0x38] sm:$0xff]   ;;  %v4264_v46 = vld [vmem:[%s4675_s0 + $0x30] sm:$0xff]   ;;  %s5405_s0 = sld [smem:[#allocation19_spill]] }
 0x544   : > { %s5406_s21 = scalar_lea.vmem %s5405_s0, %s4631_s2 }
 0x564   : > { %v4207_v60 = vpop.permute.xlu0 %4206 }
 0x565   : > { %v4209_v1 = vunpack.i.h.bf16 %v4207_v60  ;;  %v4208_v47 = vunpack.i.l.bf16 %v4207_v60 }
 0x567   : > { %v2369_v25 = vsel %vm1851_vm3, %v2367_v49, %v4209_v1  ;;  %v2368_v26 = vsel %vm1851_vm3, %v2366_v21, %v4208_v47 }
 0x56c   : > { %v4212_v16 = vpop.permute.xlu1 %4211 }
 0x56d   : > { %v4214_v23 = vunpack.i.h.bf16 %v4212_v16  ;;  %v4213_v63 = vunpack.i.l.bf16 %v4212_v16 }
 0x56f   : > { %v2371_v10 = vsel %vm1854_vm4, %v2369_v25, %v4214_v23  ;;  %v2370_v29 = vsel %vm1854_vm4, %v2368_v26, %v4213_v63 }
 0x570   : > { %v2373_v30 = vpack.c.bf16 %v2371_v10, %v2370_v29 }
 0x572   : > { %4079 = vmatmul.mubr.bf16.vlgmr.msra.gmra.mxu1 %v2373_v30 }
 0x573   : > { %4118 = vmatprep.mubr.msk.bf16.mxu1 %vm4468_vm0, %v4467_v27  ;;  %4103 = vmatpush3.bf16.msra.mxu1 %v4263_v17 }
 0x574   : > { %4104 = vmatprep.subr.bf16.mxu1 %v4467_v27 }
 0x577   : > { %4105 = vmatpush3.bf16.msra.mxu1 %v4264_v46 }
 0x578   : > { %4106 = vmatprep.subr.bf16.mxu1 %v4467_v27 }
 0x57b   : > { %4107 = vmatpush3.bf16.msra.mxu1 %v4265_v8 }
 0x57c   : > { %4108 = vmatprep.subr.bf16.mxu1 %v4467_v27 }
 0x57f   : > { %4109 = vmatpush3.bf16.msra.mxu1 %v4266_v5  ;;  %v3773_v5 = vld [vmem:[%s5401_s28] ss:$0 sm:$0xff] }
 0x580   : > { %4110 = vmatprep.subr.bf16.mxu1 %v4467_v27 }
 0x583   : > { %4111 = vmatpush3.bf16.msra.mxu1 %v4267_v11 }
 0x584   : > { %4112 = vmatprep.subr.bf16.mxu1 %v4467_v27 }
 0x587   : > { %4113 = vmatpush3.bf16.msra.mxu1 %v4268_v32 }
 0x588   : > { %4114 = vmatprep.subr.bf16.mxu1 %v4467_v27 }
 0x58b   : > { %4115 = vmatpush3.bf16.msra.mxu1 %v4269_v35  ;;  %v3763_v35 = vld [vmem:[%s5404_s13] ss:$0 sm:$0xff] }
 0x58c   : > { %4116 = vmatprep.subr.bf16.mxu1 %v4467_v27 }
 0x58f   : > { %4117 = vmatpush3.bf16.msra.mxu1 %v4270_v41 }
 0x592   : > { %4119 = vmatmul.mubr.bf16.vlgmr.msra.gmra.mxu1 %v2678_v42 }
 0x632   : > { %v4080_v19 = vpop.f32.mrf.mxu1 }
 0x633   : > { %v2471_v31 = vadd.f32 %v4080_v19, %v3753_v43 }
 0x634   : > { %v2462_v40 = vpop.f32.mrf.mxu1 }
 0x635   : > { %v2463_v24 = vadd.f32 %v3753_v43, %v2462_v40  ;;  %v2479_v59 = vadd.f32 %v4401_v56, %v2471_v31 }
 0x636   : > { %v4081_v50 = vpop.f32.mrf.mxu1 }
 0x637   : > { %v2477_v45 = vadd.f32 %v4399_v20, %v2463_v24  ;;  %v2474_v52 = vadd.f32 %v4081_v50, %v3753_v43 }
 0x638   : > { %v2465_v44 = vpop.f32.mrf.mxu1 }
 0x639   : > { %v2466_v27 = vadd.f32 %v3753_v43, %v2465_v44  ;;  %2483 = vadd.xlane.f32.xlu0 %v2477_v45  ;;  %v2480_v62 = vadd.f32 %v4402_v61, %v2474_v52  ;;  %v4273_v61 = vld [vmem:[%s4693_s22 + $0x74] ss:$8 sps:$4 sm:$0xff]  }
 0x63a   : > { %2961 = vmatprep.subr.bf16.mxu0 %v4273_v61 }
 0x63b   : > { %v2478_v55 = vadd.f32 %v4400_v53, %v2466_v27 }
 0x63d   : > { %2485 = vadd.xlane.f32.xlu1 %v2478_v55  ;;  %2487 = vadd.xlane.f32.xlu0 %v2479_v59 }
 0x641   : > { %2489 = vadd.xlane.f32.xlu0 %v2480_v62 }
 0x652   : > { %v2767_v34 = vpop.f32.mrf.mxu1 }
 0x653   : > { %v2768_v11 = vadd.f32 %v3773_v5, %v2767_v34  ;;  %v4274_v34 = vld [vmem:[%s4693_s22 + $0x60] ss:$8 sps:$4 sm:$0xff]   ;;  %v4298_v5 = vld [vmem:[%s4704_s24 + $0x30] sm:$0xff]  }
 0x654   : > { %v4120_v1 = vpop.f32.mrf.mxu1 }
 0x655   : > { %v2776_v36 = vrot.slane %v2768_v11, %v4787_v38  ;;  %v2782_v43 = vrot.slane %v2768_v11, %v4789_v39  ;;  %v4279_v1 = vld [vmem:[%s4693_s22 + $0x54] ss:$8 sps:$4 sm:$0xff]   ;;  %v4299_v11 = vld [vmem:[%s4704_s24 + $0x68] sm:$0xff]  }
 0x656   : > { %v2770_v47 = vpop.f32.mrf.mxu1 }
 0x657   : > { %v4277_v47 = vld [vmem:[%s4693_s22 + $0x50] ss:$8 sps:$4 sm:$0xff]  }
 0x658   : > { %v4121_v16 = vpop.f32.mrf.mxu1 }
 0x659   : > { %v4282_v16 = vld [vmem:[%s4693_s22 + $0x44] ss:$8 sps:$4 sm:$0xff]  }
 0x6c2   : > { %v2484_v2 = vpop.xlane.xlu0 %2483 }
 0x6c3   : > { %v2492_v48 = vmul.f32 0.0078125, %v2484_v2 }
 0x6c5   : > { %v2496_v0 = vsub.f32 %v2477_v45, %v2492_v48 }
 0x6c6   : > { %v2486_v3 = vpop.xlane.xlu1 %2485  ;;  %v2488_v22 = vpop.xlane.xlu0 %2487 }
 0x6c7   : > { %v2493_v51 = vmul.f32 0.0078125, %v2486_v3  ;;  %v2494_v13 = vmul.f32 0.0078125, %v2488_v22  ;;  %v2500_v4 = vmul.f32 %v2496_v0, %v2496_v0 }
 0x6c9   : > { %v2497_v54 = vsub.f32 %v2478_v55, %v2493_v51  ;;  %v2498_v18 = vsub.f32 %v2479_v59, %v2494_v13  ;;  %2504 = vadd.xlane.f32.xlu1 %v2500_v4  ;;  %v4271_v59 = vld [vmem:[%s4693_s22 + $0x70] ss:$8 sps:$4 sm:$0xff]  }
 0x6ca   : > { %v2490_v57 = vpop.xlane.xlu0 %2489  ;;  %2962 = vmatpush1.bf16.msra.mxu0 %v4271_v59  ;;  %v3783_v59 = vld [vmem:[%s5408_s30] ss:$0 sm:$0xff] }
 0x6cb   : > { %v2495_v7 = vmul.f32 0.0078125, %v2490_v57  ;;  %v2501_v58 = vmul.f32 %v2497_v54, %v2497_v54  ;;  %v2502_v9 = vmul.f32 %v2498_v18, %v2498_v18 }
 0x6cd   : > { %v2499_v60 = vsub.f32 %v2480_v62, %v2495_v7  ;;  %2506 = vadd.xlane.f32.xlu0 %v2501_v58  ;;  %2508 = vadd.xlane.f32.xlu1 %v2502_v9 }
 0x6cf   : > { %v2503_v12 = vmul.f32 %v2499_v60, %v2499_v60 }
 0x6d1   : > { %2510 = vadd.xlane.f32.xlu0 %v2503_v12  ;;  %v4276_v12 = vld [vmem:[%s4693_s22 + $0x64] ss:$8 sps:$4 sm:$0xff]  }
 0x6d2   : > { %2963 = vmatprep.subr.bf16.mxu0 %v4276_v12  ;;  %v4310_v12 = vld [vmem:[%s4704_s24] sm:$0xff]  }
 0x6d3   : > { %2964 = vmatpush1.bf16.msra.mxu0 %v4274_v34 }
 0x6d4   : > { %2965 = vmatprep.subr.bf16.mxu0 %v4279_v1 }
 0x6d7   : > { %2966 = vmatpush1.bf16.msra.mxu0 %v4277_v47 }
 0x6d8   : > { %2967 = vmatprep.subr.bf16.mxu0 %v4282_v16 }
 0x752   : > { %v2505_v49 = vpop.xlane.xlu1 %2504 }
 0x753   : > { %v2512_v21 = vmul.f32 0.0078125, %v2505_v49  ;;  %v4280_v49 = vld [vmem:[%s4693_s22 + $0x40] ss:$8 sps:$4 sm:$0xff]  }
 0x754   : > { %2968 = vmatpush1.bf16.msra.mxu0 %v4280_v49 }
 0x755   : > { %v2516_v23 = vadd.f32 1e-05, %v2512_v21  ;;  %v4283_v21 = vld [vmem:[%s4693_s22 + $0x30] ss:$8 sps:$4 sm:$0xff]  }
 0x756   : > { %v2509_v63 = vpop.xlane.xlu1 %2508  ;;  %v2507_v25 = vpop.xlane.xlu0 %2506 }
 0x757   : > { %4375 = vrsqrt.f32 %v2516_v23  ;;  %v2514_v26 = vmul.f32 0.0078125, %v2509_v63  ;;  %v2513_v10 = vmul.f32 0.0078125, %v2507_v25  ;;  %v4285_v23 = vld [vmem:[%s4693_s22 + $0x34] ss:$8 sps:$4 sm:$0xff]   ;;  %v4288_v63 = vld [vmem:[%s4693_s22 + $0x24] ss:$8 sps:$4 sm:$0xff]  }
 0x758   : > { %2969 = vmatprep.subr.bf16.mxu0 %v4285_v23  ;;  %v4286_v25 = vld [vmem:[%s4693_s22 + $0x20] ss:$8 sps:$4 sm:$0xff]  }
 0x759   : > { %v2518_v29 = vadd.f32 1e-05, %v2514_v26  ;;  %v2517_v30 = vadd.f32 1e-05, %v2513_v10  ;;  %2970 = vmatpush1.bf16.msra.mxu0 %v4283_v21  ;;  %v4291_v26 = vld [vmem:[%s4693_s22 + $0x14] ss:$8 sps:$4 sm:$0xff]  }
 0x75a   : > { %v2511_v17 = vpop.xlane.xlu0 %2510  ;;  %2971 = vmatprep.subr.bf16.mxu0 %v4288_v63  ;;  %v4289_v10 = vld [vmem:[%s4693_s22 + $0x10] ss:$8 sps:$4 sm:$0xff]  }
 0x75b   : > { %4377 = vrsqrt.f32 %v2518_v29  ;;  %v2515_v46 = vmul.f32 0.0078125, %v2511_v17  ;;  %v4294_v29 = vld [vmem:[%s4693_s22 + $0x4] ss:$8 sps:$4 sm:$0xff]   ;;  %v4295_v17 = vld [vmem:[%s4704_s24 + $0x78] sm:$0xff]  }
 0x75c   : > { %4379 = vrsqrt.f32 %v2517_v30  ;;  %v4292_v30 = vld [vmem:[%s4693_s22] ss:$8 sps:$4 sm:$0xff]   ;;  %3908 = vmatprep.subr.bf16.mxu1 %v4295_v17 }
 0x75d   : > { %v2519_v8 = vadd.f32 1e-05, %v2515_v46  ;;  %2972 = vmatpush1.bf16.msra.mxu0 %v4286_v25  ;;  %v4296_v46 = vld [vmem:[%s4704_s24 + $0x38] sm:$0xff]  }
 0x75e   : > { %2973 = vmatprep.subr.bf16.mxu0 %v4291_v26  ;;  %3909 = vmatpush3.bf16.msra.mxu1 %v4296_v46 }
 0x75f   : > { %4381 = vrsqrt.f32 %v2519_v8  ;;  %v4297_v8 = vld [vmem:[%s4704_s24 + $0x70] sm:$0xff]  }
 0x760   : > { %3910 = vmatprep.subr.bf16.mxu1 %v4297_v8 }
 0x761   : > { %2974 = vmatpush1.bf16.msra.mxu0 %v4289_v10 }
 0x762   : > { %2975 = vmatprep.subr.bf16.mxu0 %v4294_v29  ;;  %3911 = vmatpush3.bf16.msra.mxu1 %v4298_v5 }
 0x763   : > { %3912 = vmatprep.subr.bf16.mxu1 %v4299_v11 }
 0x764   : > { %v4376_v32 = vpop.eup %4375 }
 0x765   : > { %v2524_v33 = vmul.f32 %v4376_v32, %v2496_v0  ;;  %2976 = vmatpush1.bf16.msra.mxu0 %v4292_v30  ;;  %v4300_v32 = vld [vmem:[%s4704_s24 + $0x28] sm:$0xff]  }
 0x766   : > { %3913 = vmatpush3.bf16.msra.mxu1 %v4300_v32 }
 0x767   : > { %v2534_v28 = vmul.f32 %v3762_v15, %v2524_v33  ;;  %v4302_v33 = vld [vmem:[%s4704_s24 + $0x20] sm:$0xff]  }
 0x768   : > { %v4378_v37 = vpop.eup %4377 }
 0x769   : > { %v4380_v14 = vpop.eup %4379  ;;  %v2544_v41 = vadd.f32 %v3763_v35, %v2534_v28  ;;  %v2526_v42 = vmul.f32 %v4378_v37, %v2498_v18 }
 0x76a   : > { %v2525_v19 = vmul.f32 %v4380_v14, %v2497_v54 }
 0x76b   : > { %v2777_v40 = vadd.f32 %v2776_v36, %v2544_v41  ;;  %v2536_v24 = vmul.f32 %v3762_v15, %v2526_v42 }
 0x76c   : > { %v4382_v50 = vpop.eup %4381  ;;  %v2535_v31 = vmul.f32 %v3762_v15, %v2525_v19 }
 0x76d   : > { %2787 = vadd.xlane.f32.xlu1 %v2777_v40  ;;  %v2546_v20 = vadd.f32 %v3763_v35, %v2536_v24  ;;  %v2527_v45 = vmul.f32 %v4382_v50, %v2499_v60 }
 0x76e   : > { %v2545_v44 = vadd.f32 %v3763_v35, %v2535_v31 }
 0x76f   : > { %v2783_v27 = vadd.f32 %v2782_v43, %v2546_v20  ;;  %v2537_v52 = vmul.f32 %v3762_v15, %v2527_v45  ;;  %v4301_v15 = vld [vmem:[%s4704_s24 + $0x60] sm:$0xff]  }
 0x770   : > { %v2778_v53 = vadd.f32 %v2776_v36, %v2545_v44  ;;  %3914 = vmatprep.subr.bf16.mxu1 %v4301_v15  ;;  %v4304_v36 = vld [vmem:[%s4704_s24 + $0x18] sm:$0xff]  }
 0x771   : > { %2791 = vadd.xlane.f32.xlu1 %v2783_v27  ;;  %v2547_v55 = vadd.f32 %v3763_v35, %v2537_v52  ;;  %v4303_v35 = vld [vmem:[%s4704_s24 + $0x58] sm:$0xff]   ;;  %3915 = vmatpush3.bf16.msra.mxu1 %v4302_v33 }
 0x772   : > { %2789 = vadd.xlane.f32.xlu0 %v2778_v53  ;;  %3916 = vmatprep.subr.bf16.mxu1 %v4303_v35 }
 0x773   : > { %v2784_v56 = vadd.f32 %v2782_v43, %v2547_v55 }
 0x775   : > { %3917 = vmatpush3.bf16.msra.mxu1 %v4304_v36 }
 0x776   : > { %2793 = vadd.xlane.f32.xlu0 %v2784_v56 }
 0x7f6   : > { %v2788_v62 = vpop.xlane.xlu1 %2787 }
 0x7f7   : > { %v2795_v2 = vmul.f32 0.0078125, %v2788_v62 }
 0x7f9   : > { %v5168_v48 = vsub.f32 %v2777_v40, %v2795_v2 }
 0x7fa   : > { %v2792_v0 = vpop.xlane.xlu1 %2791 }
 0x7fb   : > { %v2790_v3 = vpop.xlane.xlu0 %2789  ;;  %v2797_v22 = vmul.f32 0.0078125, %v2792_v0  ;;  %v2803_v51 = vmul.f32 %v5168_v48, %v5168_v48 }
 0x7fc   : > { %v2796_v13 = vmul.f32 0.0078125, %v2790_v3 }
 0x7fd   : > { %v5172_v4 = vsub.f32 %v2783_v27, %v2797_v22  ;;  %2807 = vadd.xlane.f32.xlu1 %v2803_v51  ;;  %v3782_v27 = vld [vmem:[%s5406_s21] ss:$0 sm:$0xff] }
 0x7fe   : > { %v5174_v54 = vsub.f32 %v2778_v53, %v2796_v13 }
 0x7ff   : > { %v2794_v18 = vpop.xlane.xlu0 %2793  ;;  %v2805_v57 = vmul.f32 %v5172_v4, %v5172_v4 }
 0x800   : > { %v2798_v7 = vmul.f32 0.0078125, %v2794_v18  ;;  %v2804_v58 = vmul.f32 %v5174_v54, %v5174_v54 }
 0x801   : > { %2811 = vadd.xlane.f32.xlu1 %v2805_v57  ;;  %v4305_v57 = vld [vmem:[%s4704_s24 + $0x50] sm:$0xff]  }
 0x802   : > { %v5180_v9 = vsub.f32 %v2784_v56, %v2798_v7  ;;  %2809 = vadd.xlane.f32.xlu0 %v2804_v58  ;;  %v4306_v7 = vld [vmem:[%s4704_s24 + $0x10] sm:$0xff]   ;;  %3918 = vmatprep.subr.bf16.mxu1 %v4305_v57  ;;  %v4307_v58 = vld [vmem:[%s4704_s24 + $0x48] sm:$0xff]  }
 0x803   : > { %3919 = vmatpush3.bf16.msra.mxu1 %v4306_v7 }
 0x804   : > { %v2806_v60 = vmul.f32 %v5180_v9, %v5180_v9  ;;  %3920 = vmatprep.subr.bf16.mxu1 %v4307_v58 }
 0x806   : > { %2813 = vadd.xlane.f32.xlu0 %v2806_v60  ;;  %v4309_v60 = vld [vmem:[%s4704_s24 + $0x40] sm:$0xff]  }
 0x886   : > { %v2808_v28 = vpop.xlane.xlu1 %2807 }
 0x887   : > { %v2815_v37 = vmul.f32 0.0078125, %v2808_v28 }
 0x889   : > { %v2819_v14 = vadd.f32 1e-05, %v2815_v37 }
 0x88a   : > { %v2812_v41 = vpop.xlane.xlu1 %2811 }
 0x88b   : > { %4383 = vrsqrt.f32 %v2819_v14  ;;  %v2810_v42 = vpop.xlane.xlu0 %2809  ;;  %v2817_v19 = vmul.f32 0.0078125, %v2812_v41 }
 0x88c   : > { %v2816_v43 = vmul.f32 0.0078125, %v2810_v42 }
 0x88d   : > { %v2821_v24 = vadd.f32 1e-05, %v2817_v19 }
 0x88e   : > { %v2820_v40 = vadd.f32 1e-05, %v2816_v43  ;;  %v3800_v43 = vld [vmem:[%s1010_s5] ss:$0 sm:$0xff] }
 0x88f   : > { %v2814_v50 = vpop.xlane.xlu0 %2813 }
 0x890   : > { %4385 = vrsqrt.f32 %v2820_v40  ;;  %v2818_v31 = vmul.f32 0.0078125, %v2814_v50 }
 0x891   : > { %4387 = vrsqrt.f32 %v2821_v24 }
 0x892   : > { %v2822_v20 = vadd.f32 1e-05, %v2818_v31 }
 0x894   : > { %4389 = vrsqrt.f32 %v2822_v20 }
 0x898   : > { %v4384_v45 = vpop.eup %4383 }
 0x899   : > { %v2827_v44 = vmul.f32 %v4384_v45, %v5168_v48 }
 0x89b   : > { %v2837_v55 = vmul.f32 %v3782_v27, %v2827_v44 }
 0x89d   : > { %v4386_v52 = vpop.eup %4385  ;;  %v5220_v2 = vadd.f32 %v3783_v59, %v2837_v55 }
 0x89e   : > { %v2828_v53 = vmul.f32 %v4386_v52, %v5174_v54  ;;  %v4388_v56 = vpop.eup %4387 }
 0x89f   : > { %v2829_v0 = vmul.f32 %v4388_v56, %v5172_v4 }
 0x8a0   : > { %v2838_v61 = vmul.f32 %v3782_v27, %v2828_v53 }
 0x8a1   : > { %v4390_v62 = vpop.eup %4389  ;;  %v2839_v13 = vmul.f32 %v3782_v27, %v2829_v0 }
 0x8a2   : > { %v5222_v48 = vadd.f32 %v3783_v59, %v2838_v61  ;;  %v2830_v3 = vmul.f32 %v4390_v62, %v5180_v9  ;;  %v4308_v9 = vld [vmem:[%s4704_s24 + $0x8] sm:$0xff]  }
 0x8a3   : > { %v5231_v18 = vadd.f32 %v3783_v59, %v2839_v13  ;;  %3921 = vmatpush3.bf16.msra.mxu1 %v4308_v9 }
 0x8a4   : > { %v2868_v22 = vpack.c.bf16 %v5222_v48, %v5220_v2  ;;  %v2840_v51 = vmul.f32 %v3782_v27, %v2830_v3  ;;  %3922 = vmatprep.subr.bf16.mxu1 %v4309_v60 }
 0x8a6   : > { %2994 = vmatmul.mubr.bf16.vlgmr.msra.gmra.mxu0 %v2868_v22  ;;  %v5229_v54 = vadd.f32 %v3783_v59, %v2840_v51 }
 0x8a7   : > { %3003 = vmatprep.mubr.bf16.mxu0 %v4466_v6  ;;  %3923 = vmatpush3.bf16.msra.mxu1 %v4310_v12  ;;  %v2867_v6 = vld [vmem:[%s4699_s17] sm:$0x3] }
 0x8a8   : > { %v2869_v4 = vpack.c.bf16 %v5229_v54, %v5231_v18  ;;  %v2878_v1 = vrot.slane %v2867_v6, %v4789_v39  ;;  %v2874_v47 = vrot.slane %v2867_v6, %v4787_v38 }
 0x8ae   : > { %3004 = vmatmul.mubr.bf16.gmra.mxu0 %v2869_v4 }
 0x966   : > { %v2995_v34 = vpop.f32.mrf.mxu0 }
 0x967   : > { %v2996_v63 = vadd.f32 %v2995_v34, %v2874_v47 }
 0x968   : > { %v2997_v16 = vpop.f32.mrf.mxu0 }
 0x969   : > { %v2998_v21 = vadd.f32 %v2997_v16, %v2878_v1  ;;  %v3014_v46 = vmax.f32 %v2996_v63, 0.0 }
 0x96a   : > { %v2999_v49 = vpop.f32.mrf.mxu0 }
 0x96b   : > { %v3000_v23 = vadd.f32 %v2999_v49, %v2874_v47  ;;  %v3015_v30 = vmax.f32 %v2998_v21, 0.0 }
 0x96c   : > { %v3001_v25 = vpop.f32.mrf.mxu0 }
 0x96d   : > { %v3002_v26 = vadd.f32 %v3001_v25, %v2878_v1  ;;  %v3016_v10 = vmax.f32 %v3000_v23, 0.0 }
 0x96e   : > { %v3005_v29 = vpop.f32.mrf.mxu0 }
 0x96f   : > { %v3017_v17 = vmax.f32 %v3002_v26, 0.0  ;;  %v3055_v11 = vpack.c.bf16 %v3016_v10, %v3014_v46  ;;  %v3006_v38 = vadd.f32 %v3005_v29, %v2874_v47 }
 0x970   : > { %v3007_v8 = vpop.f32.mrf.mxu0 }
 0x971   : > { %v3056_v5 = vpack.c.bf16 %v3017_v17, %v3015_v30  ;;  %v3008_v15 = vadd.f32 %v3007_v8, %v2878_v1  ;;  %v3018_v14 = vmax.f32 %v3006_v38, 0.0 }
 0x972   : > { %v3009_v32 = vpop.f32.mrf.mxu0 }
 0x973   : > { %v3010_v39 = vadd.f32 %v3009_v32, %v2874_v47  ;;  %3193 = vmatprep.mubr.bf16.mxu1 %v3056_v5  ;;  %v3019_v28 = vmax.f32 %v3008_v15, 0.0  ;;  %v3817_v5 = vld [vmem:[%s1013_s4] ss:$0 sm:$0xff]  ;;  %s5414_s4 = sld [smem:[#allocation27_spill]] (!%p3819_p3) }
 0x974   : > { %v3011_v33 = vpop.f32.mrf.mxu0  ;;  %3194 = vmatmul.mubr.bf16.vlgmr.msra.gmra.mxu1 %v3055_v11  ;;  %v3818_v32 = vld [vmem:[%s1016_s12] ss:$0 sm:$0xff] }
 0x975   : > { %v3012_v35 = vadd.f32 %v3011_v33, %v2878_v1  ;;  %v3020_v36 = vmax.f32 %v3010_v39, 0.0 }
 0x977   : > { %v3021_v37 = vmax.f32 %v3012_v35, 0.0  ;;  %v3057_v42 = vpack.c.bf16 %v3020_v36, %v3018_v14 }
 0x979   : > { %v3058_v41 = vpack.c.bf16 %v3021_v37, %v3019_v28 }
 0x97b   : > { %3201 = vmatprep.mubr.bf16.mxu1 %v3058_v41 }
 0x97c   : > { %3202 = vmatmul.mubr.bf16.gmra.mxu1 %v3057_v42 }
 0xa34   : > { %v3924_v19 = vpop.f32.mrf.mxu1 }
 0xa36   : > { %v3925_v40 = vpop.f32.mrf.mxu1 }
 0xa37   : > { %v3926_v24 = vadd.f32 %v3925_v40, %v3924_v19 }
 0xa38   : > { %v3927_v50 = vpop.f32.mrf.mxu1 }
 0xa39   : > { %v3196_v31 = vadd.f32 %v3926_v24, %v3800_v43 }
 0xa3a   : > { %v3928_v20 = vpop.f32.mrf.mxu1 }
 0xa3b   : > { %v3929_v45 = vadd.f32 %v3928_v20, %v3927_v50  ;;  %v3210_v44 = vadd.f32 %v3196_v31, %v5220_v2 }
 0xa3c   : > { %v3930_v27 = vpop.f32.mrf.mxu1 }
 0xa3d   : > { %v3199_v52 = vadd.f32 %v3929_v45, %v3800_v43  ;;  %3216 = vadd.xlane.f32.xlu1 %v3210_v44 }
 0xa3e   : > { %v3931_v53 = vpop.f32.mrf.mxu1 }
 0xa3f   : > { %v3932_v55 = vadd.f32 %v3931_v53, %v3930_v27  ;;  %v3211_v56 = vadd.f32 %v3199_v52, %v5222_v48 }
 0xa40   : > { %v3933_v59 = vpop.f32.mrf.mxu1 }
 0xa41   : > { %v3204_v61 = vadd.f32 %v3932_v55, %v3800_v43  ;;  %3218 = vadd.xlane.f32.xlu0 %v3211_v56 }
 0xa42   : > { %v3934_v62 = vpop.f32.mrf.mxu1 }
 0xa43   : > { %v3935_v0 = vadd.f32 %v3934_v62, %v3933_v59  ;;  %v3212_v3 = vadd.f32 %v3204_v61, %v5231_v18 }
 0xa45   : > { %v3207_v22 = vadd.f32 %v3935_v0, %v3800_v43  ;;  %3220 = vadd.xlane.f32.xlu1 %v3212_v3 }
 0xa47   : > { %v3213_v51 = vadd.f32 %v3207_v22, %v5229_v54 }
 0xa49   : > { %3222 = vadd.xlane.f32.xlu0 %v3213_v51 }
 0xac6   : > { %v3217_v2 = vpop.xlane.xlu1 %3216 }
 0xac7   : > { %v3224_v13 = vmul.f32 0.0078125, %v3217_v2 }
 0xac9   : > { %v3228_v4 = vsub.f32 %v3210_v44, %v3224_v13 }
 0xaca   : > { %v3219_v57 = vpop.xlane.xlu0 %3218 }
 0xacb   : > { %v3225_v7 = vmul.f32 0.0078125, %v3219_v57  ;;  %v3232_v58 = vmul.f32 %v3228_v4, %v3228_v4 }
 0xacd   : > { %v3229_v9 = vsub.f32 %v3211_v56, %v3225_v7  ;;  %3236 = vadd.xlane.f32.xlu1 %v3232_v58 }
 0xace   : > { %v3221_v48 = vpop.xlane.xlu1 %3220 }
 0xacf   : > { %v3226_v60 = vmul.f32 0.0078125, %v3221_v48  ;;  %v3233_v12 = vmul.f32 %v3229_v9, %v3229_v9 }
 0xad1   : > { %v3230_v6 = vsub.f32 %v3212_v3, %v3226_v60  ;;  %3238 = vadd.xlane.f32.xlu0 %v3233_v12 }
 0xad2   : > { %v3223_v34 = vpop.xlane.xlu0 %3222 }
 0xad3   : > { %v3227_v18 = vmul.f32 0.0078125, %v3223_v34  ;;  %v3234_v1 = vmul.f32 %v3230_v6, %v3230_v6 }
 0xad5   : > { %v3231_v47 = vsub.f32 %v3213_v51, %v3227_v18  ;;  %3240 = vadd.xlane.f32.xlu1 %v3234_v1 }
 0xad7   : > { %v3235_v54 = vmul.f32 %v3231_v47, %v3231_v47 }
 0xad9   : > { %3242 = vadd.xlane.f32.xlu0 %v3235_v54 }
 0xb56   : > { %v3237_v16 = vpop.xlane.xlu1 %3236 }
 0xb57   : > { %v3244_v49 = vmul.f32 0.0078125, %v3237_v16 }
 0xb59   : > { %v3248_v21 = vadd.f32 1e-05, %v3244_v49 }
 0xb5a   : > { %v3239_v23 = vpop.xlane.xlu0 %3238 }
 0xb5b   : > { %4391 = vrsqrt.f32 %v3248_v21  ;;  %v3245_v63 = vmul.f32 0.0078125, %v3239_v23 }
 0xb5d   : > { %v3249_v25 = vadd.f32 1e-05, %v3245_v63 }
 0xb5e   : > { %v3241_v26 = vpop.xlane.xlu1 %3240 }
 0xb5f   : > { %4393 = vrsqrt.f32 %v3249_v25  ;;  %v3246_v10 = vmul.f32 0.0078125, %v3241_v26 }
 0xb61   : > { %v3250_v29 = vadd.f32 1e-05, %v3246_v10 }
 0xb62   : > { %v3243_v30 = vpop.xlane.xlu0 %3242 }
 0xb63   : > { %4395 = vrsqrt.f32 %v3250_v29  ;;  %v3247_v17 = vmul.f32 0.0078125, %v3243_v30 }
 0xb65   : > { %v3251_v46 = vadd.f32 1e-05, %v3247_v17 }
 0xb67   : > { %4397 = vrsqrt.f32 %v3251_v46 }
 0xb68   : > { %v4392_v8 = vpop.eup %4391 }
 0xb69   : > { %v3256_v11 = vmul.f32 %v4392_v8, %v3228_v4 }
 0xb6b   : > { %v3266_v15 = vmul.f32 %v3817_v5, %v3256_v11 }
 0xb6c   : > { %v4394_v39 = vpop.eup %4393 }
 0xb6d   : > { %v3276_v38 = vadd.f32 %v3818_v32, %v3266_v15  ;;  %v3257_v33 = vmul.f32 %v4394_v39, %v3229_v9 }
 0xb6f   : > { %3280 = vst [vmem:[%s5395_s25] sm:$0xff] %v3276_v38  ;;  %v3267_v35 = vmul.f32 %v3817_v5, %v3257_v33 }
 0xb70   : > { %v4396_v36 = vpop.eup %4395 }
 0xb71   : > { %v3277_v28 = vadd.f32 %v3818_v32, %v3267_v35  ;;  %v3258_v37 = vmul.f32 %v4396_v36, %v3230_v6 }
 0xb73   : > { %3281 = vst [vmem:[%s5395_s25 + $0x8] sm:$0xff] %v3277_v28  ;;  %v3268_v14 = vmul.f32 %v3817_v5, %v3258_v37 }
 0xb74   : > { %v4398_v41 = vpop.eup %4397 }
 0xb75   : > { %v3278_v42 = vadd.f32 %v3818_v32, %v3268_v14  ;;  %v3259_v19 = vmul.f32 %v4398_v41, %v3231_v47 }
 0xb77   : > { %3282 = vst [vmem:[%s5395_s25 + $0x10] sm:$0xff] %v3278_v42  ;;  %v3269_v43 = vmul.f32 %v3817_v5, %v3259_v19  ;;  %3287 = sbr.rel (%p3819_p3) target bundleno = 3175 (0xc67), region = 120 }
 0xb79   : > { %v3279_v40 = vadd.f32 %v3818_v32, %v3269_v43 }
 0xb7b   : > { %3283 = vst [vmem:[%s5395_s25 + $0x18] sm:$0xff] %v3279_v40 }
 0xb7c   : > { %v4403_v24 = vld [vmem:[%s5413_s18 + $0x38] sm:$0xff]   ;;  %v3305_v50 = vpack.c.bf16 %v3277_v28, %v3276_v38  ;;  %v4404_v31 = vld [vmem:[%s5413_s18 + $0x30] sm:$0xff]   ;;  %v4405_v20 = vld [vmem:[%s5413_s18 + $0x28] sm:$0xff]   ;;  %v3306_v55 = vpack.c.bf16 %v3279_v40, %v3278_v42 }
 0xb7d   : > { %4122 = vmatprep.subr.bf16.mxu0 %v4403_v24  ;;  %v4406_v45 = vld [vmem:[%s5413_s18 + $0x20] sm:$0xff]   ;;  %v4407_v44 = vld [vmem:[%s5413_s18 + $0x18] sm:$0xff]   ;;  %v4408_v27 = vld [vmem:[%s5413_s18 + $0x10] sm:$0xff]  }
 0xb7e   : > { %4138 = vmatprep.mubr.bf16.mxu0 %v3305_v50  ;;  %4123 = vmatpush3.bf16.msra.mxu0 %v4403_v24  ;;  %v4409_v52 = vld [vmem:[%s5413_s18 + $0x8] sm:$0xff]   ;;  %v4410_v53 = vld [vmem:[%s5413_s18] sm:$0xff]  }
 0xb7f   : > { %4124 = vmatprep.subr.bf16.mxu0 %v4404_v31  ;;  %v3820_v56 = vld [vmem:[#allocation2] ss:$0 sm:$0xff] }
 0xb82   : > { %4125 = vmatpush3.bf16.msra.mxu0 %v4404_v31 }
 0xb83   : > { %4126 = vmatprep.subr.bf16.mxu0 %v4405_v20 }
 0xb86   : > { %4127 = vmatpush3.bf16.msra.mxu0 %v4405_v20 }
 0xb87   : > { %4128 = vmatprep.subr.bf16.mxu0 %v4406_v45 }
 0xb8a   : > { %4129 = vmatpush3.bf16.msra.mxu0 %v4406_v45 }
 0xb8b   : > { %4130 = vmatprep.subr.bf16.mxu0 %v4407_v44 }
 0xb8e   : > { %4131 = vmatpush3.bf16.msra.mxu0 %v4407_v44 }
 0xb8f   : > { %4132 = vmatprep.subr.bf16.mxu0 %v4408_v27 }
 0xb92   : > { %4133 = vmatpush3.bf16.msra.mxu0 %v4408_v27 }
 0xb93   : > { %4134 = vmatprep.subr.bf16.mxu0 %v4409_v52 }
 0xb96   : > { %4135 = vmatpush3.bf16.msra.mxu0 %v4409_v52 }
 0xb97   : > { %4136 = vmatprep.subr.bf16.mxu0 %v4410_v53 }
 0xb9a   : > { %4137 = vmatpush3.bf16.msra.mxu0 %v4410_v53 }
 0xb9d   : > { %4139 = vmatmul.mubr.bf16.vlgmr.msra.gmra.mxu0 %v3306_v55 }
 0xc5d   : > { %v4140_v59 = vpop.f32.mrf.mxu0 }
 0xc5e   : > { %v3404_v61 = vadd.f32 %v4140_v59, %v3820_v56 }
 0xc5f   : > { %v3395_v62 = vpop.f32.mrf.mxu0 }
 0xc60   : > { %3412 = vst [vmem:[%s5414_s4 + $0x10] sm:$0xff] %v3404_v61  ;;  %v3396_v0 = vadd.f32 %v3820_v56, %v3395_v62 }
 0xc61   : > { %v4141_v3 = vpop.f32.mrf.mxu0 }
 0xc62   : > { %3410 = vst [vmem:[%s5414_s4] sm:$0xff] %v3396_v0  ;;  %v3407_v22 = vadd.f32 %v4141_v3, %v3820_v56 }
 0xc63   : > { %v3398_v51 = vpop.f32.mrf.mxu0 }
 0xc64   : > { %3413 = vst [vmem:[%s5414_s4 + $0x18] sm:$0xff] %v3407_v22  ;;  %v3399_v2 = vadd.f32 %v3820_v56, %v3398_v51 }
 0xc66   : > { %3411 = vst [vmem:[%s5414_s4 + $0x8] sm:$0xff] %v3399_v2 }
 0xc67 PF: > { %s5415_s21 = sld [smem:[#allocation7_spill]] }
 0xc68   : > { %s5416_s3 = sld [smem:[#allocation6_spill]] }
 0xc69   : > { %s5417_s28 = sld [smem:[#allocation8_spill]] }
 0xc6d   : > { %s33_s29 = sadd.s32 1, %s5415_s21  }
 0xc6e   : > { %p30_p4 = scmp.ge.s32.totalorder %s33_s29, 4  }
 0xc70   :  { %32 = sbr.rel (!%p30_p4) target bundleno = 21 (0x15), region = 208 }
 0xc75   :  { %3436 = vsyncpa [#allocation3], 1 }
 0xc76   :  { %3438 = vsyncpa [#allocation3 + $0x1], 1 }

// kernel: enedina_forward.4
= control target key start
LH: loop header
LB: loop body
LE: loop exit
PB: predicated region body
PF: predicated region fallthrough
CT: control target
= control target key end

     0   :  { %s8506_s0 = inlined_call_operand.vmem [shape: f32[32,128], index: 0, kind: input, shape index: {}]   ;;  %s8507_s1 = inlined_call_operand.hbm [shape: bf16[128,384], index: 1, kind: input, shape index: {}]   ;;  %s8508_s2 = inlined_call_operand.vmem [shape: f32[1,384], index: 2, kind: input, shape index: {}]   ;;  %s8509_s3 = inlined_call_operand.vmem [shape: bf16[128,128], index: 3, kind: input, shape index: {}]   ;;  %s8510_s4 = inlined_call_operand.vmem [shape: f32[1,128], index: 4, kind: input, shape index: {}]   ;;  %s8511_s5 = inlined_call_operand.vmem [shape: bf16[2,128,384], index: 5, kind: input, shape index: {}]   ;;  %s8512_s6 = inlined_call_operand.vmem [shape: f32[2,1,384], index: 6, kind: input, shape index: {}]   ;;  %s8513_s7 = inlined_call_operand.hbm [shape: bf16[2,128,128], index: 7, kind: input, shape index: {}]   ;;  %s8514_s8 = inlined_call_operand.vmem [shape: f32[2,1,128], index: 8, kind: input, shape index: {}]   ;;  %s8515_s9 = inlined_call_operand.vmem [shape: f32[2,1,128], index: 9, kind: input, shape index: {}]   ;;  %s8516_s10 = inlined_call_operand.vmem [shape: f32[2,1,128], index: 10, kind: input, shape index: {}]   ;;  %s8517_s11 = inlined_call_operand.hbm [shape: bf16[2,128,256], index: 11, kind: input, shape index: {}]   ;;  %s8518_s12 = inlined_call_operand.vmem [shape: f32[2,1,256], index: 12, kind: input, shape index: {}]   ;;  %s8519_s13 = inlined_call_operand.hbm [shape: bf16[2,256,128], index: 13, kind: input, shape index: {}]   ;;  %s8520_s14 = inlined_call_operand.vmem [shape: f32[2,1,128], index: 14, kind: input, shape index: {}]   ;;  %s8521_s15 = inlined_call_operand.vmem [shape: f32[2,1,128], index: 15, kind: input, shape index: {}]   ;;  %s8522_s16 = inlined_call_operand.vmem [shape: f32[2,1,128], index: 16, kind: input, shape index: {}]   ;;  %s8523_s17 = inlined_call_operand.vmem [shape: f32[32,128], index: 17, kind: output, shape index: {0}]   ;;  %s8524_s18 = inlined_call_operand.vmem [shape: f32[32,128], index: 18, kind: output, shape index: {1}]  }
   0x1   :  { %8540 = sst [smem:[#allocation17_spill]] %s8506_s0 }
   0x2   :  { %8541 = sst [smem:[#allocation18_spill]] %s8507_s1 }
   0x3   :  { %8542 = sst [smem:[#allocation19_spill]] %s8508_s2 }
   0x4   :  { %8543 = sst [smem:[#allocation20_spill]] %s8509_s3 }
   0x5   :  { %8544 = sst [smem:[#allocation21_spill]] %s8510_s4 }
   0x6   :  { %8545 = sst [smem:[#allocation22_spill]] %s8511_s5 }
   0x7   :  { %8546 = sst [smem:[#allocation23_spill]] %s8513_s7 }
   0x8   :  { %8547 = sst [smem:[#allocation24_spill]] %s8517_s11 }
   0x9   :  { %8548 = sst [smem:[#allocation25_spill]] %s8518_s12 }
   0xa   :  { %8549 = sst [smem:[#allocation26_spill]] %s8519_s13 }
   0xb   :  { %8550 = sst [smem:[#allocation27_spill]] %s8520_s14 }
   0xc   :  { %8551 = sst [smem:[#allocation28_spill]] %s8521_s15 }
   0xd   :  { %8552 = sst [smem:[#allocation29_spill]] %s8522_s16 }
   0xe   :  { %8553 = sst [smem:[#allocation30_spill]] %s8523_s17 }
   0xf   :  { %8554 = sst [smem:[#allocation31_spill]] %s8524_s18 }
  0x10   :  { %24 = vsyncpa [#allocation3], 0 }
  0x11   :  { %25 = vsyncpa [#allocation5], 0 }
  0x12   :  { %27 = vsyncpa [#allocation5 + $0x1], 0 }
  0x13   :  { %28 = vsyncpa [#allocation8], 0 }
  0x14   :  { %30 = vsyncpa [#allocation8 + $0x1], 0  ;;  %s7126_s27 = smov 0   ;;  %s7128_s28 = smov 0  }
  0x15   :  { %s7130_s29 = smov 0   ;;  %s7132_s30 = smov 0  }
  0x16   :  { %s7134_s0 = smov 0   ;;  %s7136_s19 = smov 0  }
  0x17 LB: > { %8555 = sst [smem:[#allocation12_spill]] %s6987_s28  ;;  %s45_s1 = sadd.s32 1, %s6999_s0  ;;  %s7003_s19 = sphi %s7136_s19, %s36_s19   ;;  %s6999_s0 = sphi %s7134_s0, %s8601_s0   ;;  %s6995_s30 = sphi %s7132_s30, %s8600_s30   ;;  %s6991_s29 = sphi %s7130_s29, %s8599_s29   ;;  %s6987_s28 = sphi %s7128_s28, %s8598_s28   ;;  %s6983_s27 = sphi %s7126_s27, %s8597_s27  }
  0x18   : > { %8556 = sst [smem:[#allocation13_spill]] %s6991_s29  ;;  %s217_s20 = sadd.s32 1, %s6991_s29 }
  0x19   : > { %8557 = sst [smem:[#allocation14_spill]] %s6999_s0  ;;  %p46_p0 = scmp.ge.s32.totalorder %s45_s1, 2 }
  0x1a   : > { %p224_p1 = scmp.ne.s32.totalorder %s6991_s29, %s6987_s28  ;;  %p225_p2 = scmp.eq.s32.totalorder %s7003_s19, 0 }
  0x1b   : > { %s8603_s1 = smov (%p46_p0, %s45_s1), 0  ;;  %p6330_p4 = scmp.lt.s32.totalorder %s7003_s19, 2 }
  0x1c   : > { %8558 = sst [smem:[#allocation15_spill]] %s8603_s1  ;;  %p226_p3 = por %p225_p2, %p224_p1 }
  0x1d   : > { %s214_s21 = ssub.s32 %s6999_s0, %s8603_s1  ;;  %s586_s22 = sand.u32 1, %s7003_s19  }
  0x1e   : > { %p215_p5 = scmp.eq.s32.totalorder %s214_s21, 0  ;;  %s7168_s2 = sand.u32 1, %s6991_s29  }
  0x1f   : > { %s5768_s23 = sshll.u32 %s6999_s0, 10  ;;  %s5594_s25 = sshll.u32 %s7168_s2, 6 }
  0x20   : > { %s7172_s24 = scalar_select %p215_p5, %s6991_s29, %s217_s20  }
  0x21   : > { %s8560_s7 = sld [smem:[#allocation23_spill]]  ;;  %p7178_p6 = pnand %p6330_p4, %p226_p3 }
  0x22   : > { %8559 = sst [smem:[#allocation16_spill]] %s7172_s24  ;;  %s590_s1 = scalar_lea.vmem [#allocation4], %s5594_s25 }
  0x23   : > { %s597_s3 = sshll.u32 %s590_s1, 4  ;;  %s7182_s21 = scalar_lea.sflag [#allocation5], %s586_s22  ;;  %s598_s3 = int_to_ptr.vmem [resolvable:$true] %s597_s3 }
  0x24   : > { %p8537_p7 = pneg %p7178_p6  ;;  %s6848_s20 = scalar_lea.vmem %s598_s3, 1024 }
  0x25   : > { %p6849_p8 = scmp.ne.s32.totalorder %s598_s3, %s6848_s20  ;;  %s7005_s17 = smov [#allocation4]  }
  0x27   : > { %s596_s18 = scalar_lea.hbm %s8560_s7, %s5768_s23  ;;  %p6851_p9 = pnand %p6849_p8, %p8537_p7 }
  0x28   : > { %s6853_s23 = sshll.u32 %s7005_s17, 4  ;;  %s6854_s23 = int_to_ptr.vmem [resolvable:$false] %s6853_s23 }
  0x29   : > { %p6852_p10 = pneg %p6851_p9  ;;  %s6855_s26 = scalar_lea.vmem %s6854_s23, 2048 }
  0x2a   : > { %p6856_p11 = scmp.lt.s32.totalorder %s598_s3, %s6854_s23  ;;  %p6857_p12 = scmp.lt.s32.totalorder %s6855_s26, %s6848_s20 }
  0x2c   : > { %p6858_p13 = por %p6857_p12, %p6856_p11 }
  0x2e   : > { %p6859_p0 = pnand %p6858_p13, %p6852_p10 }
  0x30   : > { %6862 = shalt.err (!%p6859_p0)
}
  0x31   : > { %s8532_s1 = smov 64   ;;  %s8533_s22 = smov 4  }
  0x32   : > { %6322 = dma.hbm_to_vmem [thread:$0]  (!%p7178_p6), %s596_s18, 1024, %s598_s3, %s7182_s21, %s8532_s1, %s8532_s1, %s8533_s22  }
  0x33   : > { %s8531_s25 = sadd.s32 4294967295, %s7003_s19   ;;  %p230_p1 = scmp.ne.s32.totalorder %s6987_s28, %s6983_s27 }
  0x34   : > { %p7200_p2 = scmp.eq.s32.totalorder %s8531_s25, 0  ;;  %p5590_p3 = scmp.ge.s32.totalorder %s7003_s19, 1 }
  0x35   : > { %p527_p4 = scmp.lt.s32.totalorder %s7003_s19, 3  ;;  %s7008_s3 = smov [#allocation2]  }
  0x36   : > { %p7208_p5 = por %p7200_p2, %p230_p1  ;;  %s548_s18 = sshll.u32 %s7008_s3, 4  ;;  %s549_s18 = int_to_ptr.vmem [resolvable:$true] %s548_s18 }
  0x37   : > { %p7212_p8 = pnand %p5590_p3, %p527_p4  ;;  %s8535_s27 = sshll.u32 %s7168_s2, 7 }
  0x38   : > { %s8536_s25 = sshll.u32 %s6999_s0, 11  ;;  %s629_s1 = scalar_lea.vmem [#allocation6], %s8535_s27 }
  0x39   : > { %p6315_p9 = pneg %p7212_p8  ;;  %s636_s22 = sshll.u32 %s629_s1, 4  ;;  %s637_s22 = int_to_ptr.vmem [resolvable:$true] %s636_s22 }
  0x3a   : > { %s8566_s11 = sld [smem:[#allocation24_spill]]  ;;  %s6874_s3 = scalar_lea.vmem %s549_s18, 3072 }
  0x3b   : > { %p7221_p10 = pnand %p6315_p9, %p7200_p2  ;;  %p6875_p12 = scmp.ne.s32.totalorder %s549_s18, %s6874_s3 }
  0x3c   : > { %p6882_p1 = scmp.lt.s32.totalorder %s549_s18, %s549_s18  ;;  %p6883_p3 = scmp.lt.s32.totalorder %s6874_s3, %s6874_s3 }
  0x3d   : > { %p6865_p11 = pneg %p7221_p10 }
  0x3e   : > { %p6884_p4 = por %p6883_p3, %p6882_p1 }
  0x3f   : > { %p6877_p13 = pnand %p6875_p12, %p6865_p11 }
  0x40   : > { %s7233_s29 = scalar_lea.hbm %s8566_s11, %s8536_s25 }
  0x41   : > { %p6878_p0 = pneg %p6877_p13 }
  0x43   : > { %p6885_p9 = pnand %p6884_p4, %p6878_p0 }
  0x45   : > { %6888 = shalt.err (!%p6885_p9)
}
  0x46   : > { %s7009_s16 = smov 192   ;;  %s7010_s1 = smov 12  }
  0x47   : > { %s8567_s24 = sld [smem:[#allocation18_spill]]  ;;  %s6902_s25 = scalar_lea.vmem %s637_s22, 2048 }
  0x48   : > { %p6903_p7 = scmp.ne.s32.totalorder %s637_s22, %s6902_s25  ;;  %p8568_p11 = pneg %p7178_p6 }
  0x49   : > { %s7011_s3 = smov [#allocation6]  }
  0x4a   : > { %p6905_p12 = pnand %p6903_p7, %p8568_p11  ;;  %s6907_s11 = sshll.u32 %s7011_s3, 4  ;;  %s6908_s11 = int_to_ptr.vmem [resolvable:$false] %s6907_s11 }
  0x4b   : > { %s6909_s15 = scalar_lea.vmem %s6908_s11, 4096  ;;  %p6910_p0 = scmp.lt.s32.totalorder %s637_s22, %s6908_s11 }
  0x4c   : > { %p6906_p13 = pneg %p6905_p12  ;;  %p6911_p1 = scmp.lt.s32.totalorder %s6909_s15, %s6902_s25 }
  0x4d   : > { %6318 = dma.hbm_to_vmem [thread:$0]  (!%p7221_p10), %s8567_s24, 3072, %s549_s18, [#allocation3], %s7009_s16, %s7009_s16, %s7010_s1  }
  0x4e   : > { %p6912_p3 = por %p6911_p1, %p6910_p0 }
  0x50   : > { %p6913_p4 = pnand %p6912_p3, %p6906_p13 }
  0x52   : > { %6916 = shalt.err (!%p6913_p4)
}
  0x53   : > { %s7012_s26 = smov 128   ;;  %s7013_s16 = smov 8  }
  0x54   : > { %6325 = dma.hbm_to_vmem [thread:$0]  (!%p7178_p6), %s7233_s29, 2048, %s637_s22, %s7182_s21, %s7012_s26, %s7012_s26, %s7013_s16  }
  0x55   : > { %s8569_s18 = sshll.u32 %s6999_s0, 11  ;;  %s8570_s13 = sld [smem:[#allocation26_spill]] }
  0x56   : > { %s8571_s15 = sshll.u32 %s7168_s2, 7  ;;  %s654_s24 = scalar_lea.sflag [#allocation8], %s7168_s2 }
  0x57   : > { %s657_s25 = scalar_lea.vmem [#allocation7], %s8571_s15  ;;  %p8572_p10 = pmov %p8568_p11 }
  0x58   : > { %s664_s7 = sshll.u32 %s657_s25, 4  ;;  %s7014_s14 = smov [#allocation7]   ;;  %s665_s7 = int_to_ptr.vmem [resolvable:$true] %s664_s7 }
  0x59   : > { %s6930_s3 = scalar_lea.vmem %s665_s7, 2048  ;;  %s6935_s12 = sshll.u32 %s7014_s14, 4  ;;  %s6936_s12 = int_to_ptr.vmem [resolvable:$false] %s6935_s12 }
  0x5a   : > { %p6931_p7 = scmp.ne.s32.totalorder %s665_s7, %s6930_s3  ;;  %s6937_s29 = scalar_lea.vmem %s6936_s12, 4096 }
  0x5b   : > { %s663_s11 = scalar_lea.hbm %s8570_s13, %s8569_s18  ;;  %p6938_p12 = scmp.lt.s32.totalorder %s665_s7, %s6936_s12 }
  0x5c   : > { %p6933_p9 = pnand %p6931_p7, %p8572_p10  ;;  %p6939_p13 = scmp.lt.s32.totalorder %s6937_s29, %s6930_s3 }
  0x5e   : > { %p6934_p11 = pneg %p6933_p9  ;;  %p6940_p0 = por %p6939_p13, %p6938_p12 }
  0x60   : > { %p6941_p1 = pnand %p6940_p0, %p6934_p11 }
  0x62   : > { %6944 = shalt.err (!%p6941_p1)
}
  0x63   : > { %s8573_s21 = smov 4   ;;  %s8574_s22 = smov 64  }
  0x64   : > { %6328 = dma.hbm_to_vmem [thread:$0]  (!%p7178_p6), %s663_s11, 2048, %s665_s7, %s654_s24, %s8574_s22, %s8574_s22, %s8573_s21  }
  0x65   : > { %694 = sbr.rel (%p7212_p8) target bundleno = 4227 (0x1083), region = 88 }
  0x6a   : > { %6970 = dma.done.wait (%p7200_p2), [#allocation3], 3072  }
  0x6b   : > { %6972 = vsyncadd (%p7200_p2), [#allocation3], 4294964224  ;;  %s8575_s12 = sadd.s32 4294967295, %s7003_s19   ;;  %s702_s2 = sand.u32 1, %s6987_s28  }
  0x6c   : > { %s700_s14 = sand.u32 1, %s8575_s12   ;;  %s5605_s4 = sshll.u32 %s702_s2, 6 }
  0x6d   : > { %s701_s26 = scalar_lea.sflag [#allocation5], %s700_s14  ;;  %s7274_s16 = scalar_lea.vmem [#allocation4], %s5605_s4 }
  0x6e   : > { %6974 = dma.done.wait (%p7208_p5), %s701_s26, 3072  }
  0x6f   : > { %6976 = vsyncadd (%p7208_p5), %s701_s26, 4294964224  ;;  %s5606_s23 = sshll.u32 %s702_s2, 7  ;;  %s719_s20 = scalar_lea.sflag [#allocation8], %s702_s2 }
  0x70   : > { %s7280_s18 = scalar_lea.vmem [#allocation6], %s5606_s23  ;;  %s7282_s27 = scalar_lea.vmem [#allocation7], %s5606_s23 }
  0x71   : > { %6978 = dma.done.wait (%p7208_p5), %s719_s20, 2048  }
  0x72   : > { %6980 = vsyncadd (%p7208_p5), %s719_s20, 4294965248  ;;  %p832_p6 = scmp.lt.s32.totalorder %s6995_s30, 1  ;;  %s8576_s5 = sld [smem:[#allocation22_spill]] }
  0x73   : > { %s8577_s13 = sld [smem:[#allocation25_spill]]  ;;  %p5610_p2 = scmp.ne.s32.totalorder %s6995_s30, 0 }
  0x74   : > { %s7290_s1 = scalar_select %p832_p6, %s6995_s30, 1 }
  0x75   : > { %s8578_s21 = sld [smem:[#allocation27_spill]]  ;;  %s7019_s22 = smov (!%p5610_p2), 112  }
  0x76   : > { %s6303_s11 = smul.u32 192, %s7290_s1  ;;  %s5609_s15 = sshll.u32 %s7290_s1, 1 }
  0x77   : > { %s6304_s7 = smul.u32 3, %s7290_s1  ;;  %s8579_s0 = sld [smem:[#allocation28_spill]] }
  0x78   : > { %s7305_s12 = scalar_lea.vmem %s8576_s5, %s6303_s11  ;;  %s8580_s28 = sld [smem:[#allocation29_spill]] }
  0x79   : > { %s7314_s20 = scalar_lea.vmem %s8512_s6, %s6304_s7  ;;  %s7320_s24 = scalar_lea.vmem %s8577_s13, %s5609_s15 }
  0x7a   : > { %879 = sbr.rel (%p5610_p2) target bundleno = 1675 (0x68b), region = 108  ;;  %s8583_s3 = sld [smem:[#allocation19_spill]] (!%p5610_p2) }
  0x7b   : > { %s856_s11 = scalar_lea.vmem %s8578_s21, %s7290_s1  ;;  %s7018_s21 = smov (!%p5610_p2), 96  }
  0x7c   : > { %s7020_s2 = smov (!%p5610_p2), 80   ;;  %s7021_s5 = smov (!%p5610_p2), 64  }
  0x7d   : > { %s859_s14 = scalar_lea.vmem %s8579_s0, %s7290_s1  ;;  %s7022_s13 = smov (!%p5610_p2), 48  }
  0x7e   : > { %s862_s26 = scalar_lea.vmem %s8580_s28, %s7290_s1  ;;  %s8581_s28 = sld [smem:[#allocation17_spill]] (!%p5610_p2) }
  0x7f   : > { %v6473_v0 = vld [vmem:[#allocation2 + $0xac] ss:$12 sps:$4 sm:$0xff]   ;;  %v6475_v1 = vld [vmem:[#allocation2 + $0xa8] ss:$12 sps:$4 sm:$0xff]   ;;  %v7015_v2 = vmov 0   ;;  %v7016_v31 = vmov 0.0   ;;  %v937_v32 = vlaneseq }
  0x80   : > { %1112 = vmatprep.mubr.bf16.mxu0 %v7015_v2  ;;  %1080 = vmatprep.subr.bf16.mxu0 %v6473_v0  ;;  %v6476_v3 = vld [vmem:[#allocation2 + $0x94] ss:$12 sps:$4 sm:$0xff]   ;;  %v6478_v4 = vld [vmem:[#allocation2 + $0x90] ss:$12 sps:$4 sm:$0xff]   ;;  %v6481_v6 = vld [vmem:[#allocation2 + $0x78] ss:$12 sps:$4 sm:$0xff]  }
  0x81   : > { %1081 = vmatpush1.bf16.msra.mxu0 %v6475_v1  ;;  %v6479_v5 = vld [vmem:[#allocation2 + $0x7c] ss:$12 sps:$4 sm:$0xff]   ;;  %v6482_v7 = vld [vmem:[#allocation2 + $0x64] ss:$12 sps:$4 sm:$0xff]   ;;  %v6484_v9 = vld [vmem:[#allocation2 + $0x60] ss:$12 sps:$4 sm:$0xff]  }
  0x82   : > { %1082 = vmatprep.subr.bf16.mxu0 %v6476_v3  ;;  %v6485_v10 = vld [vmem:[#allocation2 + $0x4c] ss:$12 sps:$4 sm:$0xff]   ;;  %v6497_v13 = vld [vmem:[#allocation2 + $0xb0] ss:$12 sps:$4 sm:$0xff]   ;;  %v6487_v15 = vld [vmem:[#allocation2 + $0x48] ss:$12 sps:$4 sm:$0xff]  }
  0x83   : > { %v6498_v14 = vld [vmem:[#allocation2 + $0x98] ss:$12 sps:$4 sm:$0xff]   ;;  %5935 = vmatprep.subr.bf16.mxu1 %v6497_v13  ;;  %v6488_v16 = vld [vmem:[#allocation2 + $0x34] ss:$12 sps:$4 sm:$0xff]   ;;  %v6490_v18 = vld [vmem:[#allocation2 + $0x30] ss:$12 sps:$4 sm:$0xff]  }
  0x84   : > { %s8582_s17 = smov %s8581_s28  ;;  %v880_v8 = vld [vmem:[%s8581_s28] sm:$0xff]  ;;  %5936 = vmatpush3.bf16.msra.mxu1 %v6497_v13  ;;  %v6491_v19 = vld [vmem:[#allocation2 + $0x1c] ss:$12 sps:$4 sm:$0xff]   ;;  %vm7017_vm0 = vmmov 0   ;;  %v938_v33 = vshrl.u32 %v937_v32, 7  ;;  %vm1187_vm1 = vcmask 130048  }
  0x85   : > { %1083 = vmatpush1.bf16.msra.mxu0 %v6478_v4  ;;  %v881_v11 = vld [vmem:[%s8582_s17 + $0x8] sm:$0xff]  ;;  %5937 = vmatprep.subr.bf16.mxu1 %v6498_v14  ;;  %v6493_v21 = vld [vmem:[#allocation2 + $0x18] ss:$12 sps:$4 sm:$0xff]   ;;  %v6501_v23 = vld [vmem:[#allocation2 + $0x50] ss:$12 sps:$4 sm:$0xff]   ;;  %s7023_s28 = smov 32  }
  0x86   : > { %1084 = vmatprep.subr.bf16.mxu0 %v6479_v5  ;;  %v934_v12 = vpack.c.bf16 %v881_v11, %v880_v8  ;;  %v6499_v17 = vld [vmem:[#allocation2 + $0x80] ss:$12 sps:$4 sm:$0xff]   ;;  %v6500_v20 = vld [vmem:[#allocation2 + $0x68] ss:$12 sps:$4 sm:$0xff]   ;;  %v6494_v22 = vld [vmem:[#allocation2 + $0x4] ss:$12 sps:$4 sm:$0xff]  }
  0x87   : > { %v6496_v24 = vld [vmem:[#allocation2] ss:$12 sps:$4 sm:$0xff]   ;;  %v6502_v25 = vld [vmem:[#allocation2 + $0x38] ss:$12 sps:$4 sm:$0xff]   ;;  %v882_v27 = vld [vmem:[%s8582_s17 + $0x10] sm:$0xff]  ;;  %v939_v34 = vsub.s32 0, %v938_v33 }
  0x88   : > { %5951 = vmatprep.mubr.bf16.mxu1 %v934_v12  ;;  %5938 = vmatpush3.bf16.msra.mxu1 %v6498_v14  ;;  %v6503_v26 = vld [vmem:[#allocation2 + $0x20] ss:$12 sps:$4 sm:$0xff]   ;;  %v883_v28 = vld [vmem:[%s8582_s17 + $0x18] sm:$0xff]  ;;  %v6504_v29 = vld [vmem:[#allocation2 + $0x8] ss:$12 sps:$4 sm:$0xff]   ;;  %v943_v35 = vsub.s32 1, %v938_v33 }
  0x89   : > { %1085 = vmatpush1.bf16.msra.mxu0 %v6481_v6  ;;  %5939 = vmatprep.subr.bf16.mxu1 %v6499_v17  ;;  %v935_v30 = vpack.c.bf16 %v883_v28, %v882_v27  ;;  %v916_v36 = vld [vmem:[%s8583_s3] sm:$0x7]  ;;  %v947_v55 = vsub.s32 2, %v938_v33  ;;  %s7024_s30 = smov 16   ;;  %s8584_s29 = sld [smem:[#allocation20_spill]]  ;;  %vm2210_vm2 = vcmask 261120  }
  0x8a   : > { %1086 = vmatprep.subr.bf16.mxu0 %v6482_v7  ;;  %v940_v39 = vrot.slane %v916_v36, %v939_v34  ;;  %v944_v40 = vrot.slane %v916_v36, %v943_v35  ;;  %vm2213_vm3 = vcmask 392192   ;;  %vm2216_vm4 = vcmask 523264  }
  0x8b   : > { %v948_v58 = vrot.slane %v916_v36, %v947_v55  ;;  %vm2219_vm5 = vcmask 654336   ;;  %vm2222_vm6 = vcmask 785408   ;;  %vm2225_vm7 = vcmask 916480  }
  0x8c   : > { %5940 = vmatpush3.bf16.msra.mxu1 %v6499_v17 }
  0x8d   : > { %1087 = vmatpush1.bf16.msra.mxu0 %v6484_v9  ;;  %5941 = vmatprep.subr.bf16.mxu1 %v6500_v20 }
  0x8e   : > { %1088 = vmatprep.subr.bf16.mxu0 %v6485_v10 }
  0x8f   : > { %s8585_s4 = smov %s8584_s29 }
  0x90   : > { %5942 = vmatpush3.bf16.msra.mxu1 %v6500_v20 }
  0x91   : > { %1089 = vmatpush1.bf16.msra.mxu0 %v6487_v15  ;;  %5943 = vmatprep.subr.bf16.mxu1 %v6501_v23 }
  0x92   : > { %1090 = vmatprep.subr.bf16.mxu0 %v6488_v16 }
  0x94   : > { %5944 = vmatpush3.bf16.msra.mxu1 %v6501_v23 }
  0x95   : > { %1091 = vmatpush1.bf16.msra.mxu0 %v6490_v18  ;;  %5945 = vmatprep.subr.bf16.mxu1 %v6502_v25 }
  0x96   : > { %1092 = vmatprep.subr.bf16.mxu0 %v6491_v19 }
  0x98   : > { %5946 = vmatpush3.bf16.msra.mxu1 %v6502_v25 }
  0x99   : > { %1093 = vmatpush1.bf16.msra.mxu0 %v6493_v21  ;;  %5947 = vmatprep.subr.bf16.mxu1 %v6503_v26 }
  0x9a   : > { %1094 = vmatprep.subr.bf16.mxu0 %v6494_v22 }
  0x9c   : > { %5948 = vmatpush3.bf16.msra.mxu1 %v6503_v26 }
  0x9d   : > { %1095 = vmatpush1.bf16.msra.mxu0 %v6496_v24  ;;  %5949 = vmatprep.subr.bf16.mxu1 %v6504_v29 }
  0x9e   : > { %5955 = vmatprep.subr.bf16.mxu0 %v7016_v31 }
  0xa0   : > { %1113 = vmatmul.mubr.bf16.vlgmr.msra.gmra.mxu0 %v934_v12  ;;  %5950 = vmatpush3.bf16.msra.mxu1 %v6504_v29 }
  0xa1   : > { %1122 = vmatprep.mubr.bf16.mxu0 %v7015_v2  ;;  %5967 = vmatprep.subr.bf16.mxu1 %v7016_v31 }
  0xa3   : > { %5952 = vmatmul.mubr.bf16.vlgmr.msra.gmra.mxu1 %v935_v30 }
  0xa4   : > { %5969 = vmatprep.mubr.msk.bf16.mxu1 %vm7017_vm0, %v7016_v31 }
  0xa8   : > { %1123 = vmatmul.mubr.bf16.gmra.mxu0 %v935_v30 }
  0xa9   : > { %5957 = vmatprep.mubr.msk.bf16.mxu0 %vm7017_vm0, %v7016_v31 }
 0x160   : > { %v1114_v37 = vpop.f32.mrf.mxu0 }
 0x161   : > { %v1115_v44 = vadd.f32 %v1114_v37, %v940_v39 }
 0x162   : > { %v1116_v38 = vpop.f32.mrf.mxu0 }
 0x163   : > { %v1117_v45 = vadd.f32 %v1116_v38, %v944_v40  ;;  %v1182_v49 = vmul.f32 0.25, %v1115_v44  ;;  %v5953_v52 = vpop.f32.mrf.mxu1 }
 0x164   : > { %v1118_v41 = vpop.f32.mrf.mxu0  ;;  %v1176_v60 = vadd.f32 %v5953_v52, %v948_v58 }
 0x165   : > { %v1119_v42 = vadd.f32 %v1118_v41, %v940_v39  ;;  %v1167_v54 = vpop.f32.mrf.mxu1 }
 0x166   : > { %v1120_v43 = vpop.f32.mrf.mxu0  ;;  %v1168_v61 = vadd.f32 %v1167_v54, %v948_v58 }
 0x167   : > { %v1121_v46 = vadd.f32 %v1120_v43, %v944_v40  ;;  %v1183_v47 = vmul.f32 0.25, %v1119_v42  ;;  %v5954_v56 = vpop.f32.mrf.mxu1 }
 0x168   : > { %v1124_v53 = vpop.f32.mrf.mxu0  ;;  %v1179_v63 = vadd.f32 %v5954_v56, %v948_v58 }
 0x169   : > { %v1185_v48 = vpack.c.bf16 %v1121_v46, %v1117_v45  ;;  %v1184_v51 = vpack.c.bf16 %v1183_v47, %v1182_v49  ;;  %v1170_v59 = vpop.f32.mrf.mxu1  ;;  %v1125_v3 = vadd.f32 %v1124_v53, %v940_v39 }
 0x16a   : > { %v1126_v57 = vpop.f32.mrf.mxu0  ;;  %v1171_v62 = vadd.f32 %v1170_v59, %v948_v58  ;;  %v7369_v2 = vpack.c.bf16 %v1179_v63, %v1176_v60 }
 0x16b   : > { %1428 = vrot.lane.b32.xlu1 %v1185_v48, %s7018_s21  ;;  %1306 = vrot.lane.b32.xlu0 %v1185_v48, %s7019_s22  ;;  %v1192_v50 = vsel %vm1187_vm1, %v1185_v48, 0  ;;  %v2228_v6 = vmul.f32 0.25, %v1125_v3  ;;  %v1127_v7 = vadd.f32 %v1126_v57, %v944_v40 }
 0x16c   : > { %5956 = vmatpush3.bf16.xpose.msra.mxu0 %v1192_v50  ;;  %v1128_v0 = vpop.f32.mrf.mxu0  ;;  %v1186_v1 = vpack.c.bf16 %v1171_v62, %v1168_v61 }
 0x16d   : > { %5961 = vmatprep.subr.bf16.mxu0 %v7016_v31  ;;  %v1129_v4 = vadd.f32 %v1128_v0, %v940_v39 }
 0x16e   : > { %v1130_v5 = vpop.f32.mrf.mxu0 }
 0x16f   : > { %1426 = vrot.lane.b32.xlu1 %v1184_v51, %s7018_s21  ;;  %1303 = vrot.lane.b32.xlu0 %v1184_v51, %s7019_s22  ;;  %v2229_v8 = vmul.f32 0.25, %v1129_v4  ;;  %v1131_v9 = vadd.f32 %v1130_v5, %v944_v40 }
 0x171   : > { %v7378_v10 = vpack.c.bf16 %v2229_v8, %v2228_v6  ;;  %v7380_v11 = vpack.c.bf16 %v1131_v9, %v1127_v7 }
 0x173   : > { %1547 = vrot.lane.b32.xlu1 %v1184_v51, %s7020_s2  ;;  %1549 = vrot.lane.b32.xlu0 %v1185_v48, %s7020_s2  ;;  %v2237_v34 = vsel %vm1187_vm1, %v7380_v11, 0 }
 0x174   : > { %5958 = vmatmul.mubr.msk.bf16.vlgmr.msra.gmra.mxu0 %vm1187_vm1, %v1184_v51 }
 0x175   : > { %5963 = vmatprep.mubr.msk.bf16.mxu0 %vm7017_vm0, %v7016_v31  ;;  %5962 = vmatpush3.bf16.msra.mxu0 %v1186_v1 }
 0x176   : > { %5973 = vmatprep.subr.bf16.mxu0 %v7016_v31 }
 0x177   : > { %1668 = vrot.lane.b32.xlu1 %v1184_v51, %s7021_s5  ;;  %1670 = vrot.lane.b32.xlu0 %v1185_v48, %s7021_s5 }
 0x17b   : > { %1789 = vrot.lane.b32.xlu1 %v1184_v51, %s7022_s13  ;;  %1791 = vrot.lane.b32.xlu0 %v1185_v48, %s7022_s13 }
 0x17f   : > { %1910 = vrot.lane.b32.xlu1 %v1184_v51, %s7023_s28  ;;  %1912 = vrot.lane.b32.xlu0 %v1185_v48, %s7023_s28 }
 0x183   : > { %2031 = vrot.lane.b32.xlu1 %v1184_v51, %s7024_s30  ;;  %2033 = vrot.lane.b32.xlu0 %v1185_v48, %s7024_s30 }
 0x187   : > { %2351 = vrot.lane.b32.xlu0 %v7380_v11, %s7019_s22  ;;  %2348 = vrot.lane.b32.xlu1 %v7378_v10, %s7019_s22 }
 0x18b   : > { %2473 = vrot.lane.b32.xlu0 %v7380_v11, %s7018_s21  ;;  %2471 = vrot.lane.b32.xlu1 %v7378_v10, %s7018_s21 }
 0x18f   : > { %2594 = vrot.lane.b32.xlu0 %v7380_v11, %s7020_s2  ;;  %2592 = vrot.lane.b32.xlu1 %v7378_v10, %s7020_s2 }
 0x193   : > { %2715 = vrot.lane.b32.xlu0 %v7380_v11, %s7021_s5  ;;  %2713 = vrot.lane.b32.xlu1 %v7378_v10, %s7021_s5 }
 0x197   : > { %2836 = vrot.lane.b32.xlu0 %v7380_v11, %s7022_s13  ;;  %2834 = vrot.lane.b32.xlu1 %v7378_v10, %s7022_s13 }
 0x19b   : > { %2957 = vrot.lane.b32.xlu0 %v7380_v11, %s7023_s28  ;;  %2955 = vrot.lane.b32.xlu1 %v7378_v10, %s7023_s28 }
 0x19f   : > { %3078 = vrot.lane.b32.xlu0 %v7380_v11, %s7024_s30  ;;  %3076 = vrot.lane.b32.xlu1 %v7378_v10, %s7024_s30 }
 0x1a3   : > { %1379 = vrot.lane.b32.xlu1 %v1186_v1, %s7019_s22  ;;  %1500 = vrot.lane.b32.xlu0 %v1186_v1, %s7018_s21 }
 0x1a7   : > { %1621 = vrot.lane.b32.xlu1 %v1186_v1, %s7020_s2  ;;  %1863 = vrot.lane.b32.xlu0 %v1186_v1, %s7022_s13 }
 0x1ab   : > { %1742 = vrot.lane.b32.xlu1 %v1186_v1, %s7021_s5  ;;  %2105 = vrot.lane.b32.xlu0 %v1186_v1, %s7024_s30 }
 0x1af   : > { %1984 = vrot.lane.b32.xlu1 %v1186_v1, %s7023_s28 }
 0x1dd   : > { %v1307_v12 = vpop.permute.xlu0 %1306  ;;  %v1429_v14 = vpop.permute.xlu1 %1428 }
 0x1de   : > { %v1312_v13 = vsel %vm1187_vm1, %v1307_v12, 0  ;;  %v1434_v16 = vsel %vm1187_vm1, %v1429_v14, 0 }
 0x1df   : > { %5968 = vmatpush3.bf16.xpose.msra.mxu1 %v1312_v13 }
 0x1e0   : > { %5979 = vmatprep.subr.bf16.mxu1 %v7016_v31 }
 0x1e1   : > { %v1304_v15 = vpop.permute.xlu0 %1303  ;;  %v1427_v18 = vpop.permute.xlu1 %1426 }
 0x1e5   : > { %v1550_v17 = vpop.permute.xlu0 %1549  ;;  %v1548_v21 = vpop.permute.xlu1 %1547 }
 0x1e6   : > { %5970 = vmatmul.mubr.msk.bf16.vlgmr.msra.gmra.mxu1 %vm1187_vm1, %v1304_v15  ;;  %v1555_v19 = vsel %vm1187_vm1, %v1550_v17, 0 }
 0x1e7   : > { %5980 = vmatpush3.bf16.xpose.msra.mxu1 %v1434_v16  ;;  %5981 = vmatprep.mubr.msk.bf16.mxu1 %vm7017_vm0, %v7016_v31 }
 0x1e8   : > { %5991 = vmatprep.subr.bf16.mxu1 %v7016_v31 }
 0x1e9   : > { %v1671_v20 = vpop.permute.xlu0 %1670  ;;  %v1669_v24 = vpop.permute.xlu1 %1668 }
 0x1ea   : > { %v1676_v22 = vsel %vm1187_vm1, %v1671_v20, 0 }
 0x1ed   : > { %v1792_v23 = vpop.permute.xlu0 %1791  ;;  %v1790_v27 = vpop.permute.xlu1 %1789 }
 0x1ee   : > { %5982 = vmatmul.mubr.msk.bf16.vlgmr.msra.gmra.mxu1 %vm1187_vm1, %v1427_v18  ;;  %v1797_v25 = vsel %vm1187_vm1, %v1792_v23, 0 }
 0x1ef   : > { %5992 = vmatpush3.bf16.xpose.msra.mxu1 %v1555_v19  ;;  %5993 = vmatprep.mubr.msk.bf16.mxu1 %vm7017_vm0, %v7016_v31 }
 0x1f0   : > { %6003 = vmatprep.subr.bf16.mxu1 %v7016_v31 }
 0x1f1   : > { %v1913_v26 = vpop.permute.xlu0 %1912  ;;  %v1911_v30 = vpop.permute.xlu1 %1910 }
 0x1f2   : > { %v1918_v28 = vsel %vm1187_vm1, %v1913_v26, 0 }
 0x1f5   : > { %v2034_v29 = vpop.permute.xlu0 %2033  ;;  %v2032_v33 = vpop.permute.xlu1 %2031 }
 0x1f6   : > { %5994 = vmatmul.mubr.msk.bf16.vlgmr.msra.gmra.mxu1 %vm1187_vm1, %v1548_v21  ;;  %v2039_v32 = vsel %vm1187_vm1, %v2034_v29, 0 }
 0x1f7   : > { %6004 = vmatpush3.bf16.xpose.msra.mxu1 %v1676_v22  ;;  %6005 = vmatprep.mubr.msk.bf16.mxu1 %vm7017_vm0, %v7016_v31 }
 0x1f8   : > { %6015 = vmatprep.subr.bf16.mxu1 %v7016_v31 }
 0x1f9   : > { %v2352_v35 = vpop.permute.xlu0 %2351  ;;  %v2349_v37 = vpop.permute.xlu1 %2348 }
 0x1fa   : > { %v2357_v36 = vsel %vm1187_vm1, %v2352_v35, 0 }
 0x1fd   : > { %v2474_v38 = vpop.permute.xlu0 %2473  ;;  %v2472_v40 = vpop.permute.xlu1 %2471 }
 0x1fe   : > { %6006 = vmatmul.mubr.msk.bf16.vlgmr.msra.gmra.mxu1 %vm1187_vm1, %v1669_v24  ;;  %v2479_v39 = vsel %vm1187_vm1, %v2474_v38, 0 }
 0x1ff   : > { %6016 = vmatpush3.bf16.xpose.msra.mxu1 %v1797_v25  ;;  %6017 = vmatprep.mubr.msk.bf16.mxu1 %vm7017_vm0, %v7016_v31 }
 0x200   : > { %6027 = vmatprep.subr.bf16.mxu1 %v7016_v31 }
 0x201   : > { %v2595_v41 = vpop.permute.xlu0 %2594  ;;  %v2593_v44 = vpop.permute.xlu1 %2592 }
 0x202   : > { %v2600_v42 = vsel %vm1187_vm1, %v2595_v41, 0 }
 0x205   : > { %v2716_v45 = vpop.permute.xlu0 %2715  ;;  %v2714_v52 = vpop.permute.xlu1 %2713 }
 0x206   : > { %6018 = vmatmul.mubr.msk.bf16.vlgmr.msra.gmra.mxu1 %vm1187_vm1, %v1790_v27  ;;  %v2721_v47 = vsel %vm1187_vm1, %v2716_v45, 0 }
 0x207   : > { %6028 = vmatpush3.bf16.xpose.msra.mxu1 %v1918_v28  ;;  %6029 = vmatprep.mubr.msk.bf16.mxu1 %vm7017_vm0, %v7016_v31 }
 0x208   : > { %6039 = vmatprep.subr.bf16.mxu1 %v7016_v31 }
 0x209   : > { %v2837_v53 = vpop.permute.xlu0 %2836  ;;  %v2835_v55 = vpop.permute.xlu1 %2834 }
 0x20a   : > { %v2842_v54 = vsel %vm1187_vm1, %v2837_v53, 0 }
 0x20d   : > { %v2958_v56 = vpop.permute.xlu0 %2957  ;;  %v2956_v59 = vpop.permute.xlu1 %2955 }
 0x20e   : > { %6030 = vmatmul.mubr.msk.bf16.vlgmr.msra.gmra.mxu1 %vm1187_vm1, %v1911_v30  ;;  %v2963_v57 = vsel %vm1187_vm1, %v2958_v56, 0 }
 0x20f   : > { %6040 = vmatpush3.bf16.xpose.msra.mxu1 %v2039_v32  ;;  %6041 = vmatprep.mubr.msk.bf16.mxu1 %vm7017_vm0, %v7016_v31 }
 0x210   : > { %6051 = vmatprep.subr.bf16.mxu1 %v7016_v31 }
 0x211   : > { %v3079_v58 = vpop.permute.xlu0 %3078  ;;  %v3077_v61 = vpop.permute.xlu1 %3076 }
 0x212   : > { %v3084_v60 = vsel %vm1187_vm1, %v3079_v58, 0 }
 0x215   : > { %v7507_v5 = vpop.permute.xlu1 %1379  ;;  %v7511_v7 = vpop.permute.xlu0 %1500 }
 0x216   : > { %6042 = vmatmul.mubr.msk.bf16.vlgmr.msra.gmra.mxu1 %vm1187_vm1, %v2032_v33 }
 0x217   : > { %6052 = vmatpush3.bf16.xpose.msra.mxu1 %v2237_v34  ;;  %6053 = vmatprep.mubr.msk.bf16.mxu1 %vm7017_vm0, %v7016_v31 }
 0x218   : > { %6063 = vmatprep.subr.bf16.mxu1 %v7016_v31 }
 0x219   : > { %v7517_v11 = vpop.permute.xlu1 %1621  ;;  %v7521_v14 = vpop.permute.xlu0 %1863 }
 0x21d   : > { %v7527_v18 = vpop.permute.xlu1 %1742  ;;  %v7531_v20 = vpop.permute.xlu0 %2105 }
 0x21e   : > { %6054 = vmatmul.mubr.msk.bf16.vlgmr.msra.gmra.mxu1 %vm1187_vm1, %v7378_v10 }
 0x21f   : > { %6064 = vmatpush3.bf16.xpose.msra.mxu1 %v2357_v36  ;;  %6065 = vmatprep.mubr.msk.bf16.mxu1 %vm7017_vm0, %v7016_v31 }
 0x220   : > { %6075 = vmatprep.subr.bf16.mxu1 %v7016_v31 }
 0x221   : > { %v7537_v24 = vpop.permute.xlu1 %1984 }
 0x226   : > { %6066 = vmatmul.mubr.msk.bf16.vlgmr.msra.gmra.mxu1 %vm1187_vm1, %v2349_v37 }
 0x227   : > { %6076 = vmatpush3.bf16.xpose.msra.mxu1 %v2479_v39  ;;  %6077 = vmatprep.mubr.msk.bf16.mxu1 %vm7017_vm0, %v7016_v31 }
 0x228   : > { %6087 = vmatprep.subr.bf16.mxu1 %v7016_v31 }
 0x22e   : > { %6078 = vmatmul.mubr.msk.bf16.vlgmr.msra.gmra.mxu1 %vm1187_vm1, %v2472_v40 }
 0x22f   : > { %6088 = vmatpush3.bf16.xpose.msra.mxu1 %v2600_v42  ;;  %6089 = vmatprep.mubr.msk.bf16.mxu1 %vm7017_vm0, %v7016_v31 }
 0x230   : > { %6099 = vmatprep.subr.bf16.mxu1 %v7016_v31 }
 0x234   : > { %v7471_v43 = vpop.f32.mrf.mxu0 }
 0x235   : > { %v1235_v46 = vsel %vm1187_vm1, %v7471_v43, -inf }
 0x236   : > { %1236 = vmax.xlane.f32.xlu0 %v1235_v46  ;;  %v5959_v48 = vpop.f32.mrf.mxu0  ;;  %6090 = vmatmul.mubr.msk.bf16.vlgmr.msra.gmra.mxu1 %vm1187_vm1, %v2593_v44 }
 0x237   : > { %6100 = vmatpush3.bf16.xpose.msra.mxu1 %v2721_v47  ;;  %6101 = vmatprep.mubr.msk.bf16.mxu1 %vm7017_vm0, %v7016_v31 }
 0x238   : > { %v7479_v49 = vpop.f32.mrf.mxu0  ;;  %6111 = vmatprep.subr.bf16.mxu1 %v7016_v31 }
 0x239   : > { %v1238_v50 = vsel %vm1187_vm1, %v7479_v49, -inf }
 0x23a   : > { %1239 = vmax.xlane.f32.xlu1 %v1238_v50  ;;  %v5960_v51 = vpop.f32.mrf.mxu0 }
 0x23e   : > { %6102 = vmatmul.mubr.msk.bf16.vlgmr.msra.gmra.mxu1 %vm1187_vm1, %v2714_v52 }
 0x23f   : > { %6112 = vmatpush3.bf16.xpose.msra.mxu1 %v2842_v54  ;;  %6113 = vmatprep.mubr.msk.bf16.mxu1 %vm7017_vm0, %v7016_v31 }
 0x240   : > { %6123 = vmatprep.subr.bf16.mxu1 %v7016_v31 }
 0x246   : > { %6114 = vmatmul.mubr.msk.bf16.vlgmr.msra.gmra.mxu1 %vm1187_vm1, %v2835_v55 }
 0x247   : > { %6124 = vmatpush3.bf16.xpose.msra.mxu1 %v2963_v57  ;;  %6125 = vmatprep.mubr.msk.bf16.mxu1 %vm7017_vm0, %v7016_v31 }
 0x248   : > { %6135 = vmatprep.subr.bf16.mxu1 %v7016_v31 }
 0x24e   : > { %6126 = vmatmul.mubr.msk.bf16.vlgmr.msra.gmra.mxu1 %vm1187_vm1, %v2956_v59 }
 0x24f   : > { %6136 = vmatpush3.bf16.xpose.msra.mxu1 %v3084_v60  ;;  %6137 = vmatprep.mubr.msk.bf16.mxu1 %vm7017_vm0, %v7016_v31 }
 0x256   : > { %6138 = vmatmul.mubr.msk.bf16.vlgmr.msra.gmra.mxu1 %vm1187_vm1, %v3077_v61 }
 0x2a6   : > { %v7499_v62 = vpop.f32.mrf.mxu1 }
 0x2a7   : > { %v1355_v63 = vsel %vm1187_vm1, %v7499_v62, -inf }
 0x2a8   : > { %v5971_v0 = vpop.f32.mrf.mxu1  ;;  %1356 = vmax.xlane.f32.xlu0 %v1355_v63 }
 0x2aa   : > { %v7503_v1 = vpop.f32.mrf.mxu1 }
 0x2ab   : > { %v1358_v3 = vsel %vm1187_vm1, %v7503_v1, -inf }
 0x2ac   : > { %v5972_v4 = vpop.f32.mrf.mxu1  ;;  %1359 = vmax.xlane.f32.xlu0 %v1358_v3 }
 0x2ae   : > { %v7509_v6 = vpop.f32.mrf.mxu1 }
 0x2af   : > { %v1477_v8 = vsel %vm1187_vm1, %v7509_v6, -inf }
 0x2b0   : > { %v5983_v9 = vpop.f32.mrf.mxu1  ;;  %1478 = vmax.xlane.f32.xlu1 %v1477_v8 }
 0x2b2   : > { %v7515_v10 = vpop.f32.mrf.mxu1 }
 0x2b3   : > { %v1480_v12 = vsel %vm1187_vm1, %v7515_v10, -inf }
 0x2b4   : > { %v5984_v13 = vpop.f32.mrf.mxu1  ;;  %1481 = vmax.xlane.f32.xlu0 %v1480_v12 }
 0x2b6   : > { %v7523_v15 = vpop.f32.mrf.mxu1 }
 0x2b7   : > { %v1598_v16 = vsel %vm1187_vm1, %v7523_v15, -inf }
 0x2b8   : > { %v5995_v17 = vpop.f32.mrf.mxu1  ;;  %1599 = vmax.xlane.f32.xlu1 %v1598_v16 }
 0x2ba   : > { %v7529_v19 = vpop.f32.mrf.mxu1 }
 0x2bb   : > { %v1601_v21 = vsel %vm1187_vm1, %v7529_v19, -inf }
 0x2bc   : > { %v5996_v22 = vpop.f32.mrf.mxu1  ;;  %1602 = vmax.xlane.f32.xlu0 %v1601_v21 }
 0x2be   : > { %v7535_v23 = vpop.f32.mrf.mxu1 }
 0x2bf   : > { %v1237_v25 = vpop.xlane.xlu0 %1236  ;;  %v1719_v26 = vsel %vm1187_vm1, %v7535_v23, -inf }
 0x2c0   : > { %v1241_v27 = vsub.f32 %v7471_v43, %v1237_v25  ;;  %v6007_v28 = vpop.f32.mrf.mxu1  ;;  %1720 = vmax.xlane.f32.xlu1 %v1719_v26 }
 0x2c2   : > { %v1243_v29 = vmul.f32 1.442695, %v1241_v27  ;;  %v7542_v30 = vpop.f32.mrf.mxu1 }
 0x2c3   : > { %v1240_v32 = vpop.xlane.xlu1 %1239  ;;  %v1722_v33 = vsel %vm1187_vm1, %v7542_v30, -inf }
 0x2c4   : > { %6513 = vpow2.f32 %v1243_v29  ;;  %v1242_v34 = vsub.f32 %v7479_v49, %v1240_v32  ;;  %v6008_v35 = vpop.f32.mrf.mxu1  ;;  %1723 = vmax.xlane.f32.xlu0 %v1722_v33 }
 0x2c6   : > { %v1245_v36 = vmul.f32 1.442695, %v1242_v34  ;;  %v7547_v37 = vpop.f32.mrf.mxu1 }
 0x2c7   : > { %v1840_v38 = vsel %vm1187_vm1, %v7547_v37, -inf }
 0x2c8   : > { %6515 = vpow2.f32 %v1245_v36  ;;  %v6019_v39 = vpop.f32.mrf.mxu1  ;;  %1841 = vmax.xlane.f32.xlu1 %v1840_v38 }
 0x2ca   : > { %v7551_v40 = vpop.f32.mrf.mxu1 }
 0x2cb   : > { %v1843_v41 = vsel %vm1187_vm1, %v7551_v40, -inf }
 0x2cc   : > { %v6020_v42 = vpop.f32.mrf.mxu1  ;;  %1844 = vmax.xlane.f32.xlu0 %v1843_v41 }
 0x2ce   : > { %v7555_v43 = vpop.f32.mrf.mxu1 }
 0x2cf   : > { %v1961_v44 = vsel %vm1187_vm1, %v7555_v43, -inf }
 0x2d0   : > { %v6031_v45 = vpop.f32.mrf.mxu1  ;;  %1962 = vmax.xlane.f32.xlu1 %v1961_v44 }
 0x2d1   : > { %v7559_v46 = vpop.eup %6513 }
 0x2d2   : > { %v7561_v47 = vpop.f32.mrf.mxu1  ;;  %v1247_v49 = vsel %vm1187_vm1, %v7559_v46, 0.0 }
 0x2d3   : > { %v1964_v48 = vsel %vm1187_vm1, %v7561_v47, -inf }
 0x2d4   : > { %v6032_v50 = vpop.f32.mrf.mxu1  ;;  %1965 = vmax.xlane.f32.xlu0 %v1964_v48  ;;  %1248 = vadd.xlane.f32.xlu1 %v1247_v49 }
 0x2d5   : > { %v7567_v51 = vpop.eup %6515 }
 0x2d6   : > { %v7569_v52 = vpop.f32.mrf.mxu1  ;;  %v1250_v54 = vsel %vm1187_vm1, %v7567_v51, 0.0 }
 0x2d7   : > { %v2082_v53 = vsel %vm1187_vm1, %v7569_v52, -inf }
 0x2d8   : > { %v6043_v55 = vpop.f32.mrf.mxu1  ;;  %2083 = vmax.xlane.f32.xlu1 %v2082_v53  ;;  %1251 = vadd.xlane.f32.xlu0 %v1250_v54 }
 0x2da   : > { %v7575_v56 = vpop.f32.mrf.mxu1 }
 0x2db   : > { %v2085_v57 = vsel %vm1187_vm1, %v7575_v56, -inf }
 0x2dc   : > { %v6044_v58 = vpop.f32.mrf.mxu1  ;;  %2086 = vmax.xlane.f32.xlu0 %v2085_v57 }
 0x2de   : > { %v7579_v59 = vpop.f32.mrf.mxu1 }
 0x2df   : > { %v2280_v60 = vsel %vm1187_vm1, %v7579_v59, -inf }
 0x2e0   : > { %v6055_v61 = vpop.f32.mrf.mxu1  ;;  %2281 = vmax.xlane.f32.xlu1 %v2280_v60 }
 0x2e2   : > { %v7583_v63 = vpop.f32.mrf.mxu1 }
 0x2e3   : > { %v2283_v0 = vsel %vm1187_vm1, %v7583_v63, -inf }
 0x2e4   : > { %v6056_v3 = vpop.f32.mrf.mxu1  ;;  %2284 = vmax.xlane.f32.xlu0 %v2283_v0 }
 0x2e6   : > { %v7587_v4 = vpop.f32.mrf.mxu1 }
 0x2e7   : > { %v2400_v8 = vsel %vm1187_vm1, %v7587_v4, -inf }
 0x2e8   : > { %v6067_v9 = vpop.f32.mrf.mxu1  ;;  %2401 = vmax.xlane.f32.xlu1 %v2400_v8 }
 0x2ea   : > { %v7591_v12 = vpop.f32.mrf.mxu1 }
 0x2eb   : > { %v2403_v13 = vsel %vm1187_vm1, %v7591_v12, -inf }
 0x2ec   : > { %v6068_v16 = vpop.f32.mrf.mxu1  ;;  %2404 = vmax.xlane.f32.xlu0 %v2403_v13 }
 0x2ee   : > { %v7595_v17 = vpop.f32.mrf.mxu1 }
 0x2ef   : > { %v2522_v21 = vsel %vm1187_vm1, %v7595_v17, -inf }
 0x2f0   : > { %v6079_v22 = vpop.f32.mrf.mxu1  ;;  %2523 = vmax.xlane.f32.xlu1 %v2522_v21 }
 0x2f2   : > { %v7599_v25 = vpop.f32.mrf.mxu1 }
 0x2f3   : > { %v2525_v26 = vsel %vm1187_vm1, %v7599_v25, -inf }
 0x2f4   : > { %v6080_v27 = vpop.f32.mrf.mxu1  ;;  %2526 = vmax.xlane.f32.xlu0 %v2525_v26 }
 0x2f6   : > { %v7603_v28 = vpop.f32.mrf.mxu1 }
 0x2f7   : > { %v2643_v29 = vsel %vm1187_vm1, %v7603_v28, -inf }
 0x2f8   : > { %v6091_v32 = vpop.f32.mrf.mxu1  ;;  %2644 = vmax.xlane.f32.xlu1 %v2643_v29 }
 0x2fa   : > { %v7607_v33 = vpop.f32.mrf.mxu1 }
 0x2fb   : > { %v2646_v34 = vsel %vm1187_vm1, %v7607_v33, -inf }
 0x2fc   : > { %v6092_v35 = vpop.f32.mrf.mxu1  ;;  %2647 = vmax.xlane.f32.xlu0 %v2646_v34 }
 0x2fe   : > { %v7611_v36 = vpop.f32.mrf.mxu1 }
 0x2ff   : > { %v2764_v38 = vsel %vm1187_vm1, %v7611_v36, -inf }
 0x300   : > { %v6103_v39 = vpop.f32.mrf.mxu1  ;;  %2765 = vmax.xlane.f32.xlu1 %v2764_v38 }
 0x302   : > { %v7615_v41 = vpop.f32.mrf.mxu1 }
 0x303   : > { %v2767_v42 = vsel %vm1187_vm1, %v7615_v41, -inf }
 0x304   : > { %v6104_v44 = vpop.f32.mrf.mxu1  ;;  %2768 = vmax.xlane.f32.xlu0 %v2767_v42 }
 0x306   : > { %v7619_v45 = vpop.f32.mrf.mxu1 }
 0x307   : > { %v2885_v48 = vsel %vm1187_vm1, %v7619_v45, -inf }
 0x308   : > { %v6115_v49 = vpop.f32.mrf.mxu1  ;;  %2886 = vmax.xlane.f32.xlu1 %v2885_v48 }
 0x30a   : > { %v7623_v50 = vpop.f32.mrf.mxu1 }
 0x30b   : > { %v2888_v53 = vsel %vm1187_vm1, %v7623_v50, -inf }
 0x30c   : > { %v6116_v54 = vpop.f32.mrf.mxu1  ;;  %2889 = vmax.xlane.f32.xlu0 %v2888_v53 }
 0x30e   : > { %v7627_v55 = vpop.f32.mrf.mxu1 }
 0x30f   : > { %v3006_v57 = vsel %vm1187_vm1, %v7627_v55, -inf }
 0x310   : > { %v6127_v58 = vpop.f32.mrf.mxu1  ;;  %3007 = vmax.xlane.f32.xlu1 %v3006_v57 }
 0x312   : > { %v7631_v60 = vpop.f32.mrf.mxu1 }
 0x313   : > { %v3009_v61 = vsel %vm1187_vm1, %v7631_v60, -inf }
 0x314   : > { %v6128_v0 = vpop.f32.mrf.mxu1  ;;  %3010 = vmax.xlane.f32.xlu0 %v3009_v61 }
 0x316   : > { %v7635_v3 = vpop.f32.mrf.mxu1 }
 0x317   : > { %v3127_v8 = vsel %vm1187_vm1, %v7635_v3, -inf }
 0x318   : > { %v6139_v9 = vpop.f32.mrf.mxu1  ;;  %3128 = vmax.xlane.f32.xlu1 %v3127_v8 }
 0x31a   : > { %v7639_v13 = vpop.f32.mrf.mxu1 }
 0x31b   : > { %v3130_v16 = vsel %vm1187_vm1, %v7639_v13, -inf }
 0x31c   : > { %v6140_v21 = vpop.f32.mrf.mxu1  ;;  %3131 = vmax.xlane.f32.xlu0 %v3130_v16 }
 0x331   : > { %v1357_v22 = vpop.xlane.xlu0 %1356 }
 0x332   : > { %v1361_v26 = vsub.f32 %v7499_v62, %v1357_v22 }
 0x334   : > { %v1363_v27 = vmul.f32 1.442695, %v1361_v26 }
 0x335   : > { %v1360_v29 = vpop.xlane.xlu0 %1359 }
 0x336   : > { %6517 = vpow2.f32 %v1363_v27  ;;  %v1362_v32 = vsub.f32 %v7503_v1, %v1360_v29 }
 0x338   : > { %v1365_v34 = vmul.f32 1.442695, %v1362_v32 }
 0x339   : > { %v1479_v35 = vpop.xlane.xlu1 %1478 }
 0x33a   : > { %6519 = vpow2.f32 %v1365_v34  ;;  %v1483_v38 = vsub.f32 %v7509_v6, %v1479_v35 }
 0x33c   : > { %v1485_v39 = vmul.f32 1.442695, %v1483_v38 }
 0x33d   : > { %v1482_v42 = vpop.xlane.xlu0 %1481 }
 0x33e   : > { %6521 = vpow2.f32 %v1485_v39  ;;  %v1484_v44 = vsub.f32 %v7515_v10, %v1482_v42 }
 0x340   : > { %v1487_v48 = vmul.f32 1.442695, %v1484_v44 }
 0x341   : > { %v1600_v49 = vpop.xlane.xlu1 %1599 }
 0x342   : > { %6523 = vpow2.f32 %v1487_v48  ;;  %v1604_v62 = vsub.f32 %v7523_v15, %v1600_v49 }
 0x343   : > { %v7648_v53 = vpop.eup %6517 }
 0x344   : > { %v1606_v54 = vmul.f32 1.442695, %v1604_v62  ;;  %v1367_v1 = vsel %vm1187_vm1, %v7648_v53, 0.0 }
 0x345   : > { %v1603_v57 = vpop.xlane.xlu0 %1602  ;;  %1368 = vadd.xlane.f32.xlu1 %v1367_v1 }
 0x346   : > { %6525 = vpow2.f32 %v1606_v54  ;;  %v1605_v6 = vsub.f32 %v7529_v19, %v1603_v57 }
 0x347   : > { %v7653_v58 = vpop.eup %6519 }
 0x348   : > { %v1608_v61 = vmul.f32 1.442695, %v1605_v6  ;;  %v1370_v10 = vsel %vm1187_vm1, %v7653_v58, 0.0 }
 0x349   : > { %1371 = vadd.xlane.f32.xlu0 %v1370_v10  ;;  %v1721_v0 = vpop.xlane.xlu1 %1720 }
 0x34a   : > { %6527 = vpow2.f32 %v1608_v61  ;;  %v1725_v15 = vsub.f32 %v7535_v23, %v1721_v0 }
 0x34b   : > { %v7658_v8 = vpop.eup %6521 }
 0x34c   : > { %v1727_v9 = vmul.f32 1.442695, %v1725_v15  ;;  %v1489_v16 = vsel %vm1187_vm1, %v7658_v8, 0.0 }
 0x34d   : > { %v1724_v21 = vpop.xlane.xlu0 %1723  ;;  %1490 = vadd.xlane.f32.xlu1 %v1489_v16 }
 0x34e   : > { %6529 = vpow2.f32 %v1727_v9  ;;  %v1726_v19 = vsub.f32 %v7542_v30, %v1724_v21 }
 0x34f   : > { %v7663_v22 = vpop.eup %6523 }
 0x350   : > { %v1729_v26 = vmul.f32 1.442695, %v1726_v19  ;;  %v1492_v27 = vsel %vm1187_vm1, %v7663_v22, 0.0 }
 0x351   : > { %1493 = vadd.xlane.f32.xlu0 %v1492_v27  ;;  %v1842_v29 = vpop.xlane.xlu1 %1841 }
 0x352   : > { %6531 = vpow2.f32 %v1729_v26  ;;  %v1846_v23 = vsub.f32 %v7547_v37, %v1842_v29 }
 0x353   : > { %v7668_v32 = vpop.eup %6525 }
 0x354   : > { %v1848_v34 = vmul.f32 1.442695, %v1846_v23  ;;  %v1610_v35 = vsel %vm1187_vm1, %v7668_v32, 0.0 }
 0x355   : > { %v1845_v38 = vpop.xlane.xlu0 %1844  ;;  %1611 = vadd.xlane.f32.xlu1 %v1610_v35 }
 0x356   : > { %6533 = vpow2.f32 %v1848_v34  ;;  %v1847_v30 = vsub.f32 %v7551_v40, %v1845_v38 }
 0x357   : > { %v7673_v39 = vpop.eup %6527 }
 0x358   : > { %v1850_v42 = vmul.f32 1.442695, %v1847_v30  ;;  %v1613_v44 = vsel %vm1187_vm1, %v7673_v39, 0.0 }
 0x359   : > { %1614 = vadd.xlane.f32.xlu0 %v1613_v44  ;;  %v1963_v48 = vpop.xlane.xlu1 %1962 }
 0x35a   : > { %6535 = vpow2.f32 %v1850_v42 }
 0x35b   : > { %v7677_v37 = vpop.eup %6529 }
 0x35c   : > { %v1731_v49 = vsel %vm1187_vm1, %v7677_v37, 0.0 }
 0x35d   : > { %v1966_v62 = vpop.xlane.xlu0 %1965  ;;  %1732 = vadd.xlane.f32.xlu1 %v1731_v49  ;;  %v1249_v54 = vpop.xlane.xlu1 %1248 }
 0x35e   : > { %v1968_v1 = vsub.f32 %v7561_v47, %v1966_v62  ;;  %6537 = vrcp.f32 %v1249_v54 }
 0x35f   : > { %v7682_v40 = vpop.eup %6531 }
 0x360   : > { %v1971_v57 = vmul.f32 1.442695, %v1968_v1  ;;  %v1734_v6 = vsel %vm1187_vm1, %v7682_v40, 0.0 }
 0x361   : > { %1735 = vadd.xlane.f32.xlu0 %v1734_v6  ;;  %v1252_v61 = vpop.xlane.xlu0 %1251  ;;  %v2084_v10 = vpop.xlane.xlu1 %2083 }
 0x362   : > { %6539 = vpow2.f32 %v1971_v57  ;;  %v2088_v0 = vsub.f32 %v7569_v52, %v2084_v10 }
 0x363   : > { %v7687_v15 = vpop.eup %6533  ;;  %6541 = vrcp.f32 %v1252_v61 }
 0x364   : > { %v2090_v9 = vmul.f32 1.442695, %v2088_v0  ;;  %v1852_v47 = vsel %vm1187_vm1, %v7687_v15, 0.0 }
 0x365   : > { %v2087_v16 = vpop.xlane.xlu0 %2086  ;;  %1853 = vadd.xlane.f32.xlu0 %v1852_v47 }
 0x366   : > { %6543 = vpow2.f32 %v2090_v9  ;;  %v2089_v21 = vsub.f32 %v7575_v56, %v2087_v16 }
 0x367   : > { %v7692_v19 = vpop.eup %6535 }
 0x368   : > { %v2092_v26 = vmul.f32 1.442695, %v2089_v21  ;;  %v1855_v27 = vsel %vm1187_vm1, %v7692_v19, 0.0 }
 0x369   : > { %1856 = vadd.xlane.f32.xlu0 %v1855_v27  ;;  %v2282_v49 = vpop.xlane.xlu1 %2281 }
 0x36a   : > { %6545 = vpow2.f32 %v2092_v26 }
 0x36b   : > { %v6538_v52 = vpop.eup %6537 }
 0x36c   : > { %v1255_v56 = vmul.f32 %v6538_v52, %v7559_v46 }
 0x36d   : > { %v2285_v62 = vpop.xlane.xlu0 %2284 }
 0x36e   : > { %2424 = vrot.lane.b32.xlu1 %v7369_v2, %s7019_s22  ;;  %v2287_v1 = vsub.f32 %v7583_v63, %v2285_v62 }
 0x36f   : > { %v7698_v29 = vpop.eup %6539 }
 0x370   : > { %v6542_v23 = vpop.eup %6541  ;;  %v1976_v34 = vsel %vm1187_vm1, %v7698_v29, 0.0  ;;  %v2290_v6 = vmul.f32 1.442695, %v2287_v1 }
 0x371   : > { %1977 = vadd.xlane.f32.xlu0 %v1976_v34  ;;  %v1256_v35 = vmul.f32 %v6542_v23, %v7567_v51  ;;  %v1967_v51 = vsub.f32 %v7555_v43, %v1963_v48  ;;  %v2402_v57 = vpop.xlane.xlu1 %2401 }
 0x373   : > { %v7704_v38 = vpop.eup %6543  ;;  %v1257_v30 = vpack.c.bf16 %v1256_v35, %v1255_v56  ;;  %v1969_v54 = vmul.f32 1.442695, %v1967_v51 }
 0x374   : > { %v2094_v42 = vsel %vm1187_vm1, %v7704_v38, 0.0 }
 0x375   : > { %5964 = vmatmul.mubr.msk.bf16.vlgmr.msra.gmra.mxu0 %vm1187_vm1, %v1257_v30  ;;  %2095 = vadd.xlane.f32.xlu0 %v2094_v42  ;;  %6547 = vpow2.f32 %v1969_v54 }
 0x376   : > { %5974 = vmatpush3.bf16.msra.mxu0 %v7507_v5  ;;  %5975 = vmatprep.mubr.msk.bf16.mxu0 %vm7017_vm0, %v7016_v31  ;;  %v2405_v5 = vpop.xlane.xlu0 %2404  ;;  %6549 = vpow2.f32 %v2290_v6 }
 0x377   : > { %v7712_v44 = vpop.eup %6545  ;;  %5985 = vmatprep.subr.bf16.mxu0 %v7016_v31  ;;  %v2407_v61 = vsub.f32 %v7591_v12, %v2405_v5 }
 0x378   : > { %v2097_v46 = vsel %vm1187_vm1, %v7712_v44, 0.0 }
 0x379   : > { %2098 = vadd.xlane.f32.xlu0 %v2097_v46  ;;  %v2524_v10 = vpop.xlane.xlu1 %2523  ;;  %v2410_v9 = vmul.f32 1.442695, %v2407_v61 }
 0x37a   : > { %v2528_v5 = vsub.f32 %v7595_v17, %v2524_v10 }
 0x37b   : > { %6551 = vpow2.f32 %v2410_v9 }
 0x37d   : > { %v2527_v0 = vpop.xlane.xlu0 %2526 }
 0x37e   : > { %v2529_v47 = vsub.f32 %v7599_v25, %v2527_v0 }
 0x380   : > { %v2532_v48 = vmul.f32 1.442695, %v2529_v47 }
 0x381   : > { %v2645_v16 = vpop.xlane.xlu1 %2644 }
 0x382   : > { %6553 = vpow2.f32 %v2532_v48  ;;  %v7723_v52 = vpop.eup %6547 }
 0x383   : > { %v1973_v34 = vsel %vm1187_vm1, %v7723_v52, 0.0  ;;  %v7730_v56 = vpop.eup %6549 }
 0x384   : > { %v2295_v30 = vsel %vm1187_vm1, %v7730_v56, 0.0 }
 0x385   : > { %v2648_v43 = vpop.xlane.xlu0 %2647 }
 0x386   : > { %v2650_v21 = vsub.f32 %v7607_v33, %v2648_v43  ;;  %v2286_v33 = vsub.f32 %v7579_v59, %v2282_v49 }
 0x388   : > { %v2653_v63 = vmul.f32 1.442695, %v2650_v21  ;;  %v7735_v42 = vpop.eup %6551  ;;  %v2288_v46 = vmul.f32 1.442695, %v2286_v33 }
 0x389   : > { %v2766_v26 = vpop.xlane.xlu1 %2765  ;;  %v2415_v62 = vsel %vm1187_vm1, %v7735_v42, 0.0 }
 0x38a   : > { %v2770_v27 = vsub.f32 %v7611_v36, %v2766_v26  ;;  %6555 = vpow2.f32 %v2653_v63 }
 0x38c   : > { %v2772_v23 = vmul.f32 1.442695, %v2770_v27 }
 0x38d   : > { %v2769_v12 = vpop.xlane.xlu0 %2768 }
 0x38e   : > { %v2771_v25 = vsub.f32 %v7615_v41, %v2769_v12  ;;  %6557 = vpow2.f32 %v2772_v23  ;;  %v2406_v41 = vsub.f32 %v7587_v4, %v2402_v57  ;;  %v2530_v4 = vmul.f32 1.442695, %v2528_v5 }
 0x38f   : > { %2545 = vrot.lane.b32.xlu0 %v7369_v2, %s7018_s21  ;;  %v7740_v54 = vpop.eup %6553  ;;  %v2649_v57 = vsub.f32 %v7603_v28, %v2645_v16 }
 0x390   : > { %v2774_v36 = vmul.f32 1.442695, %v2771_v25  ;;  %v2408_v1 = vmul.f32 1.442695, %v2406_v41  ;;  %v2537_v6 = vsel %vm1187_vm1, %v7740_v54, 0.0 }
 0x391   : > { %v2887_v35 = vpop.xlane.xlu1 %2886  ;;  %v2651_v9 = vmul.f32 1.442695, %v2649_v57 }
 0x392   : > { %1974 = vadd.xlane.f32.xlu1 %v1973_v34  ;;  %6559 = vpow2.f32 %v2774_v36  ;;  %v2891_v17 = vsub.f32 %v7619_v45, %v2887_v35 }
 0x393   : > { %6561 = vpow2.f32 %v2288_v46 }
 0x394   : > { %v2893_v48 = vmul.f32 1.442695, %v2891_v17 }
 0x395   : > { %v2890_v43 = vpop.xlane.xlu0 %2889 }
 0x396   : > { %2296 = vadd.xlane.f32.xlu1 %v2295_v30  ;;  %v2892_v28 = vsub.f32 %v7623_v50, %v2890_v43 }
 0x397   : > { %v7746_v61 = vpop.eup %6555 }
 0x398   : > { %v2895_v27 = vmul.f32 1.442695, %v2892_v28 }
 0x399   : > { %v3008_v51 = vpop.xlane.xlu1 %3007 }
 0x39a   : > { %v3012_v59 = vsub.f32 %v7627_v55, %v3008_v51  ;;  %2416 = vadd.xlane.f32.xlu1 %v2415_v62  ;;  %v2658_v55 = vsel %vm1187_vm1, %v7746_v61, 0.0 }
 0x39b   : > { %v7751_v0 = vpop.eup %6557 }
 0x39c   : > { %v3014_v49 = vmul.f32 1.442695, %v3012_v59  ;;  %v2776_v10 = vsel %vm1187_vm1, %v7751_v0, 0.0 }
 0x39d   : > { %v3011_v26 = vpop.xlane.xlu0 %3010 }
 0x39e   : > { %6563 = vpow2.f32 %v3014_v49  ;;  %2538 = vadd.xlane.f32.xlu1 %v2537_v6  ;;  %v3013_v12 = vsub.f32 %v7631_v60, %v3011_v26 }
 0x39f   : > { %6565 = vpow2.f32 %v2408_v1  ;;  %v7756_v47 = vpop.eup %6559 }
 0x3a0   : > { %6567 = vpow2.f32 %v2530_v4  ;;  %v2779_v16 = vsel %vm1187_vm1, %v7756_v47, 0.0  ;;  %v7761_v21 = vpop.eup %6561  ;;  %v3016_v34 = vmul.f32 1.442695, %v3013_v12 }
 0x3a1   : > { %6569 = vpow2.f32 %v2651_v9  ;;  %v2292_v23 = vsel %vm1187_vm1, %v7761_v21, 0.0  ;;  %v3129_v25 = vpop.xlane.xlu1 %3128 }
 0x3a2   : > { %2659 = vadd.xlane.f32.xlu1 %v2658_v55  ;;  %6571 = vpow2.f32 %v2893_v48  ;;  %v3133_v33 = vsub.f32 %v7635_v3, %v3129_v25 }
 0x3a3   : > { %6573 = vpow2.f32 %v2895_v27 }
 0x3a4   : > { %6575 = vpow2.f32 %v3016_v34  ;;  %v3135_v60 = vmul.f32 1.442695, %v3133_v33 }
 0x3a5   : > { %v3132_v6 = vpop.xlane.xlu0 %3131 }
 0x3a6   : > { %2777 = vadd.xlane.f32.xlu1 %v2776_v10  ;;  %6577 = vpow2.f32 %v3135_v60  ;;  %v3134_v57 = vsub.f32 %v7639_v13, %v3132_v6 }
 0x3a8   : > { %v3137_v55 = vmul.f32 1.442695, %v3134_v57 }
 0x3aa   : > { %2780 = vadd.xlane.f32.xlu1 %v2779_v16 }
 0x3ab   : > { %v7763_v63 = vpop.eup %6563 }
 0x3ac   : > { %v3018_v45 = vsel %vm1187_vm1, %v7763_v63, 0.0  ;;  %v7770_v50 = vpop.eup %6565 }
 0x3ad   : > { %v2412_v36 = vsel %vm1187_vm1, %v7770_v50, 0.0  ;;  %v7775_v35 = vpop.eup %6567 }
 0x3ae   : > { %2293 = vadd.xlane.f32.xlu0 %v2292_v23  ;;  %3019 = vadd.xlane.f32.xlu1 %v3018_v45  ;;  %v2534_v30 = vsel %vm1187_vm1, %v7775_v35, 0.0  ;;  %v7779_v46 = vpop.eup %6569 }
 0x3af   : > { %v2655_v41 = vsel %vm1187_vm1, %v7779_v46, 0.0  ;;  %v7783_v51 = vpop.eup %6571 }
 0x3b0   : > { %v2897_v3 = vsel %vm1187_vm1, %v7783_v51, 0.0  ;;  %v7787_v62 = vpop.eup %6573 }
 0x3b1   : > { %v2900_v59 = vsel %vm1187_vm1, %v7787_v62, 0.0  ;;  %v7793_v49 = vpop.eup %6575 }
 0x3b2   : > { %2413 = vadd.xlane.f32.xlu0 %v2412_v36  ;;  %v3021_v1 = vsel %vm1187_vm1, %v7793_v49, 0.0 }
 0x3b3   : > { %v7797_v5 = vpop.eup %6577 }
 0x3b4   : > { %v3139_v4 = vsel %vm1187_vm1, %v7797_v5, 0.0 }
 0x3b6   : > { %2535 = vadd.xlane.f32.xlu0 %v2534_v30 }
 0x3ba   : > { %2656 = vadd.xlane.f32.xlu0 %v2655_v41 }
 0x3be   : > { %2898 = vadd.xlane.f32.xlu0 %v2897_v3 }
 0x3bf   : > { %2666 = vrot.lane.b32.xlu1 %v7369_v2, %s7020_s2 }
 0x3c2   : > { %2901 = vadd.xlane.f32.xlu0 %v2900_v59 }
 0x3c6   : > { %3022 = vadd.xlane.f32.xlu0 %v3021_v1 }
 0x3ca   : > { %3140 = vadd.xlane.f32.xlu0 %v3139_v4 }
 0x3ce   : > { %v1369_v9 = vpop.xlane.xlu1 %1368 }
 0x3cf   : > { %6579 = vrcp.f32 %v1369_v9 }
 0x3d0   : > { %6581 = vpow2.f32 %v3137_v55 }
 0x3d2   : > { %v1372_v17 = vpop.xlane.xlu0 %1371 }
 0x3d3   : > { %6583 = vrcp.f32 %v1372_v17 }
 0x3d6   : > { %v1491_v10 = vpop.xlane.xlu1 %1490 }
 0x3d7   : > { %6585 = vrcp.f32 %v1491_v10 }
 0x3da   : > { %v1494_v43 = vpop.xlane.xlu0 %1493 }
 0x3db   : > { %6587 = vrcp.f32 %v1494_v43 }
 0x3dc   : > { %v6580_v48 = vpop.eup %6579 }
 0x3dd   : > { %v7802_v16 = vpop.eup %6581  ;;  %v1375_v13 = vmul.f32 %v6580_v48, %v7648_v53 }
 0x3de   : > { %v1612_v28 = vpop.xlane.xlu1 %1611  ;;  %v3142_v12 = vsel %vm1187_vm1, %v7802_v16, 0.0 }
 0x3df   : > { %6589 = vrcp.f32 %v1612_v28 }
 0x3e0   : > { %v6584_v26 = vpop.eup %6583  ;;  %2787 = vrot.lane.b32.xlu0 %v7369_v2, %s7021_s5 }
 0x3e1   : > { %v1376_v45 = vmul.f32 %v6584_v26, %v7653_v58 }
 0x3e2   : > { %v1615_v27 = vpop.xlane.xlu0 %1614 }
 0x3e3   : > { %6591 = vrcp.f32 %v1615_v27  ;;  %3143 = vadd.xlane.f32.xlu1 %v3142_v12  ;;  %v1377_v23 = vpack.c.bf16 %v1376_v45, %v1375_v13 }
 0x3e4   : > { %2908 = vrot.lane.b32.xlu0 %v7369_v2, %s7022_s13  ;;  %v6586_v25 = vpop.eup %6585 }
 0x3e5   : > { %5976 = vmatmul.mubr.msk.bf16.vlgmr.msra.gmra.mxu0 %vm1187_vm1, %v1377_v23  ;;  %v1497_v58 = vmul.f32 %v6586_v25, %v7658_v8 }
 0x3e6   : > { %5986 = vmatpush3.bf16.msra.mxu0 %v7511_v7  ;;  %v1733_v34 = vpop.xlane.xlu1 %1732  ;;  %5987 = vmatprep.mubr.msk.bf16.mxu0 %vm7017_vm0, %v7016_v31 }
 0x3e7   : > { %5997 = vmatprep.subr.bf16.mxu0 %v7016_v31  ;;  %6593 = vrcp.f32 %v1733_v34 }
 0x3e8   : > { %v6588_v53 = vpop.eup %6587  ;;  %3029 = vrot.lane.b32.xlu0 %v7369_v2, %s7023_s28 }
 0x3e9   : > { %v1498_v33 = vmul.f32 %v6588_v53, %v7663_v22 }
 0x3ea   : > { %v1736_v36 = vpop.xlane.xlu0 %1735 }
 0x3eb   : > { %6595 = vrcp.f32 %v1736_v36  ;;  %v1499_v60 = vpack.c.bf16 %v1498_v33, %v1497_v58 }
 0x3ec   : > { %3150 = vrot.lane.b32.xlu0 %v7369_v2, %s7024_s30  ;;  %v6590_v7 = vpop.eup %6589 }
 0x3ed   : > { %5988 = vmatmul.mubr.msk.bf16.vlgmr.msra.gmra.mxu0 %vm1187_vm1, %v1499_v60  ;;  %v1618_v22 = vmul.f32 %v6590_v7, %v7668_v32 }
 0x3ee   : > { %5998 = vmatpush3.bf16.msra.mxu0 %v7517_v11  ;;  %v1854_v30 = vpop.xlane.xlu0 %1853  ;;  %5999 = vmatprep.mubr.msk.bf16.mxu0 %vm7017_vm0, %v7016_v31 }
 0x3ef   : > { %6009 = vmatprep.subr.bf16.mxu0 %v7016_v31  ;;  %6597 = vrcp.f32 %v1854_v30 }
 0x3f0   : > { %v6592_v8 = vpop.eup %6591 }
 0x3f1   : > { %v1619_v41 = vmul.f32 %v6592_v8, %v7673_v39 }
 0x3f2   : > { %v1857_v3 = vpop.xlane.xlu0 %1856 }
 0x3f3   : > { %6599 = vrcp.f32 %v1857_v3  ;;  %v1620_v59 = vpack.c.bf16 %v1619_v41, %v1618_v22 }
 0x3f4   : > { %v6594_v1 = vpop.eup %6593 }
 0x3f5   : > { %6000 = vmatmul.mubr.msk.bf16.vlgmr.msra.gmra.mxu0 %vm1187_vm1, %v1620_v59  ;;  %v1739_v6 = vmul.f32 %v6594_v1, %v7677_v37  ;;  %v2425_v37 = vpop.permute.xlu1 %2424 }
 0x3f6   : > { %6010 = vmatpush3.bf16.msra.mxu0 %v7527_v18  ;;  %6011 = vmatprep.mubr.msk.bf16.mxu0 %vm7017_vm0, %v7016_v31 }
 0x3f7   : > { %6021 = vmatprep.subr.bf16.mxu0 %v7016_v31 }
 0x3f8   : > { %v6596_v11 = vpop.eup %6595 }
 0x3f9   : > { %v1740_v32 = vmul.f32 %v6596_v11, %v7682_v40 }
 0x3fb   : > { %v1741_v4 = vpack.c.bf16 %v1740_v32, %v1739_v6 }
 0x3fc   : > { %v6598_v39 = vpop.eup %6597 }
 0x3fd   : > { %6012 = vmatmul.mubr.msk.bf16.vlgmr.msra.gmra.mxu0 %vm1187_vm1, %v1741_v4  ;;  %v1860_v57 = vmul.f32 %v6598_v39, %v7687_v15 }
 0x3fe   : > { %6022 = vmatpush3.bf16.msra.mxu0 %v7521_v14  ;;  %6023 = vmatprep.mubr.msk.bf16.mxu0 %vm7017_vm0, %v7016_v31  ;;  %v1978_v14 = vpop.xlane.xlu0 %1977 }
 0x3ff   : > { %6033 = vmatprep.subr.bf16.mxu0 %v7016_v31  ;;  %6601 = vrcp.f32 %v1978_v14 }
 0x400   : > { %v6600_v18 = vpop.eup %6599 }
 0x401   : > { %v1861_v55 = vmul.f32 %v6600_v18, %v7692_v19 }
 0x402   : > { %v2096_v40 = vpop.xlane.xlu0 %2095 }
 0x403   : > { %v1862_v9 = vpack.c.bf16 %v1861_v55, %v1860_v57 }
 0x405   : > { %6024 = vmatmul.mubr.msk.bf16.vlgmr.msra.gmra.mxu0 %vm1187_vm1, %v1862_v9 }
 0x406   : > { %6034 = vmatpush3.bf16.msra.mxu0 %v7537_v24  ;;  %6035 = vmatprep.mubr.msk.bf16.mxu0 %vm7017_vm0, %v7016_v31  ;;  %v2099_v10 = vpop.xlane.xlu0 %2098 }
 0x407   : > { %6045 = vmatprep.subr.bf16.mxu0 %v7016_v31 }
 0x40c   : > { %v6602_v15 = vpop.eup %6601 }
 0x40d   : > { %v1982_v24 = vmul.f32 %v6602_v15, %v7698_v29 }
 0x41b   : > { %v1975_v17 = vpop.xlane.xlu1 %1974 }
 0x41c   : > { %6603 = vrcp.f32 %v1975_v17 }
 0x41d   : > { %6605 = vrcp.f32 %v2099_v10 }
 0x41e   : > { %6607 = vrcp.f32 %v2096_v40 }
 0x41f   : > { %v2297_v13 = vpop.xlane.xlu1 %2296 }
 0x420   : > { %6609 = vrcp.f32 %v2297_v13 }
 0x423   : > { %v2417_v23 = vpop.xlane.xlu1 %2416 }
 0x427   : > { %v2539_v53 = vpop.xlane.xlu1 %2538 }
 0x429   : > { %v6604_v19 = vpop.eup %6603 }
 0x42a   : > { %v1981_v43 = vmul.f32 %v6604_v19, %v7723_v52  ;;  %v6606_v28 = vpop.eup %6605  ;;  %v2546_v52 = vpop.permute.xlu0 %2545 }
 0x42b   : > { %v6608_v26 = vpop.eup %6607  ;;  %v2103_v45 = vmul.f32 %v6606_v28, %v7712_v44  ;;  %v2660_v33 = vpop.xlane.xlu1 %2659 }
 0x42c   : > { %v1983_v48 = vpack.c.bf16 %v1982_v24, %v1981_v43  ;;  %v2102_v27 = vmul.f32 %v6608_v26, %v7704_v38 }
 0x42d   : > { %v6610_v36 = vpop.eup %6609 }
 0x42e   : > { %6036 = vmatmul.mubr.msk.bf16.vlgmr.msra.gmra.mxu0 %vm1187_vm1, %v1983_v48  ;;  %v2104_v12 = vpack.c.bf16 %v2103_v45, %v2102_v27  ;;  %v2301_v30 = vmul.f32 %v6610_v36, %v7730_v56 }
 0x42f   : > { %6046 = vmatpush3.bf16.msra.mxu0 %v7531_v20  ;;  %6047 = vmatprep.mubr.msk.bf16.mxu0 %vm7017_vm0, %v7016_v31  ;;  %v2778_v8 = vpop.xlane.xlu1 %2777 }
 0x430   : > { %6057 = vmatprep.subr.bf16.mxu0 %v7016_v31 }
 0x435   : > { %v7858_v29 = vpop.f32.mrf.mxu0 }
 0x436   : > { %6048 = vmatmul.mubr.msk.bf16.vlgmr.msra.gmra.mxu0 %vm1187_vm1, %v2104_v12 }
 0x437   : > { %v5965_v25 = vpop.f32.mrf.mxu0  ;;  %6058 = vmatpush3.bf16.msra.mxu0 %v7369_v2  ;;  %v2294_v20 = vpop.xlane.xlu0 %2293  ;;  %6059 = vmatprep.mubr.msk.bf16.mxu0 %vm7017_vm0, %v7016_v31 }
 0x438   : > { %6611 = vrcp.f32 %v2294_v20  ;;  %6069 = vmatprep.subr.bf16.mxu0 %v7016_v31 }
 0x439   : > { %v7865_v44 = vpop.f32.mrf.mxu0 }
 0x43b   : > { %v5966_v38 = vpop.f32.mrf.mxu0  ;;  %v2414_v34 = vpop.xlane.xlu0 %2413 }
 0x43c   : > { %6613 = vrcp.f32 %v2414_v34 }
 0x43d   : > { %6615 = vrcp.f32 %v2417_v23 }
 0x43f   : > { %v2536_v58 = vpop.xlane.xlu0 %2535 }
 0x440   : > { %6617 = vrcp.f32 %v2536_v58 }
 0x441   : > { %6619 = vrcp.f32 %v2539_v53 }
 0x443   : > { %v2657_v60 = vpop.xlane.xlu0 %2656 }
 0x444   : > { %6621 = vrcp.f32 %v2657_v60 }
 0x445   : > { %v6612_v2 = vpop.eup %6611  ;;  %6623 = vrcp.f32 %v2660_v33 }
 0x446   : > { %v2300_v7 = vmul.f32 %v6612_v2, %v7761_v21  ;;  %v2781_v21 = vpop.xlane.xlu1 %2780 }
 0x447   : > { %v2899_v3 = vpop.xlane.xlu0 %2898  ;;  %6625 = vrcp.f32 %v2781_v21 }
 0x448   : > { %v2302_v22 = vpack.c.bf16 %v2301_v30, %v2300_v7  ;;  %6627 = vrcp.f32 %v2778_v8 }
 0x449   : > { %v6614_v41 = vpop.eup %6613 }
 0x44a   : > { %6060 = vmatmul.mubr.msk.bf16.vlgmr.msra.gmra.mxu0 %vm1187_vm1, %v2302_v22  ;;  %v6616_v59 = vpop.eup %6615  ;;  %v2420_v1 = vmul.f32 %v6614_v41, %v7770_v50  ;;  %v3020_v39 = vpop.xlane.xlu1 %3019 }
 0x44b   : > { %6070 = vmatpush3.bf16.msra.mxu0 %v2425_v37  ;;  %6071 = vmatprep.mubr.msk.bf16.mxu0 %vm7017_vm0, %v7016_v31  ;;  %v2421_v56 = vmul.f32 %v6616_v59, %v7735_v42  ;;  %v2902_v11 = vpop.xlane.xlu0 %2901 }
 0x44c   : > { %6081 = vmatprep.subr.bf16.mxu0 %v7016_v31  ;;  %6629 = vrcp.f32 %v2902_v11 }
 0x44d   : > { %v2422_v6 = vpack.c.bf16 %v2421_v56, %v2420_v1  ;;  %v6618_v32 = vpop.eup %6617  ;;  %6631 = vrcp.f32 %v2899_v3 }
 0x44e   : > { %v6620_v4 = vpop.eup %6619  ;;  %v2542_v50 = vmul.f32 %v6618_v32, %v7775_v35  ;;  %v2667_v9 = vpop.permute.xlu1 %2666 }
 0x44f   : > { %v3023_v18 = vpop.xlane.xlu0 %3022  ;;  %v2543_v42 = vmul.f32 %v6620_v4, %v7740_v54 }
 0x450   : > { %6633 = vrcp.f32 %v3023_v18 }
 0x451   : > { %v2544_v57 = vpack.c.bf16 %v2543_v42, %v2542_v50  ;;  %v6622_v55 = vpop.eup %6621  ;;  %6635 = vrcp.f32 %v3020_v39 }
 0x452   : > { %6072 = vmatmul.mubr.msk.bf16.vlgmr.msra.gmra.mxu0 %vm1187_vm1, %v2422_v6  ;;  %v6624_v14 = vpop.eup %6623  ;;  %v2663_v35 = vmul.f32 %v6622_v55, %v7779_v46 }
 0x453   : > { %6082 = vmatpush3.bf16.msra.mxu0 %v2546_v52  ;;  %6083 = vmatprep.mubr.msk.bf16.mxu0 %vm7017_vm0, %v7016_v31  ;;  %v3141_v37 = vpop.xlane.xlu0 %3140  ;;  %v2664_v40 = vmul.f32 %v6624_v14, %v7746_v61 }
 0x454   : > { %6093 = vmatprep.subr.bf16.mxu0 %v7016_v31  ;;  %v6626_v17 = vpop.eup %6625 }
 0x455   : > { %v2665_v54 = vpack.c.bf16 %v2664_v40, %v2663_v35  ;;  %v6628_v15 = vpop.eup %6627  ;;  %v2785_v19 = vmul.f32 %v6626_v17, %v7756_v47 }
 0x456   : > { %v2784_v46 = vmul.f32 %v6628_v15, %v7751_v0 }
 0x457   : > { %v2788_v10 = vpop.permute.xlu0 %2787 }
 0x458   : > { %v2786_v43 = vpack.c.bf16 %v2785_v19, %v2784_v46 }
 0x459   : > { %v6630_v61 = vpop.eup %6629 }
 0x45a   : > { %6084 = vmatmul.mubr.msk.bf16.vlgmr.msra.gmra.mxu0 %vm1187_vm1, %v2544_v57  ;;  %v6632_v48 = vpop.eup %6631  ;;  %v2906_v26 = vmul.f32 %v6630_v61, %v7787_v62 }
 0x45b   : > { %6094 = vmatpush3.bf16.msra.mxu0 %v2667_v9  ;;  %6095 = vmatprep.mubr.msk.bf16.mxu0 %vm7017_vm0, %v7016_v31  ;;  %v2909_v24 = vpop.permute.xlu0 %2908  ;;  %v2905_v47 = vmul.f32 %v6632_v48, %v7783_v51 }
 0x45c   : > { %6105 = vmatprep.subr.bf16.mxu0 %v7016_v31 }
 0x45d   : > { %v2907_v0 = vpack.c.bf16 %v2906_v26, %v2905_v47  ;;  %v6634_v13 = vpop.eup %6633 }
 0x45e   : > { %v6636_v27 = vpop.eup %6635  ;;  %v3027_v52 = vmul.f32 %v6634_v13, %v7793_v49 }
 0x45f   : > { %v3030_v45 = vpop.permute.xlu0 %3029  ;;  %v3026_v62 = vmul.f32 %v6636_v27, %v7763_v63  ;;  %v6506_v27 = vld [vmem:[%s8585_s4 + $0x30] sm:$0xff]  }
 0x461   : > { %v3028_v12 = vpack.c.bf16 %v3027_v52, %v3026_v62  ;;  %v6507_v62 = vld [vmem:[%s8585_s4 + $0x28] sm:$0xff]  }
 0x462   : > { %6096 = vmatmul.mubr.msk.bf16.vlgmr.msra.gmra.mxu0 %vm1187_vm1, %v2665_v54 }
 0x463   : > { %6106 = vmatpush3.bf16.msra.mxu0 %v2788_v10  ;;  %6107 = vmatprep.mubr.msk.bf16.mxu0 %vm7017_vm0, %v7016_v31  ;;  %v3151_v25 = vpop.permute.xlu0 %3150 }
 0x464   : > { %6117 = vmatprep.subr.bf16.mxu0 %v7016_v31 }
 0x46a   : > { %6108 = vmatmul.mubr.msk.bf16.vlgmr.msra.gmra.mxu0 %vm1187_vm1, %v2786_v43 }
 0x46b   : > { %6118 = vmatpush3.bf16.msra.mxu0 %v2909_v24  ;;  %6119 = vmatprep.mubr.msk.bf16.mxu0 %vm7017_vm0, %v7016_v31 }
 0x46c   : > { %v3144_v28 = vpop.xlane.xlu1 %3143  ;;  %6129 = vmatprep.subr.bf16.mxu0 %v7016_v31 }
 0x46d   : > { %6637 = vrcp.f32 %v3144_v28  ;;  %v6505_v28 = vld [vmem:[%s8584_s29 + $0x38] sm:$0xff]   ;;  %s8589_s29 = sld [smem:[#allocation30_spill]] }
 0x46e   : > { %6639 = vrcp.f32 %v3141_v37  ;;  %6147 = vmatprep.subr.bf16.mxu1 %v6505_v28 }
 0x46f   : > { %6148 = vmatpush3.bf16.msra.mxu1 %v6505_v28 }
 0x470   : > { %6149 = vmatprep.subr.bf16.mxu1 %v6506_v27 }
 0x472   : > { %6120 = vmatmul.mubr.msk.bf16.vlgmr.msra.gmra.mxu0 %vm1187_vm1, %v2907_v0 }
 0x473   : > { %6130 = vmatpush3.bf16.msra.mxu0 %v3030_v45  ;;  %6131 = vmatprep.mubr.msk.bf16.mxu0 %vm7017_vm0, %v7016_v31 }
 0x474   : > { %6141 = vmatprep.subr.bf16.mxu0 %v7016_v31  ;;  %6150 = vmatpush3.bf16.msra.mxu1 %v6506_v27 }
 0x475   : > { %6151 = vmatprep.subr.bf16.mxu1 %v6507_v62 }
 0x478   : > { %6152 = vmatpush3.bf16.msra.mxu1 %v6507_v62 }
 0x47a   : > { %v6638_v23 = vpop.eup %6637  ;;  %6132 = vmatmul.mubr.msk.bf16.vlgmr.msra.gmra.mxu0 %vm1187_vm1, %v3028_v12 }
 0x47b   : > { %v6640_v51 = vpop.eup %6639  ;;  %6142 = vmatpush3.bf16.msra.mxu0 %v3151_v25  ;;  %6143 = vmatprep.mubr.msk.bf16.mxu0 %vm7017_vm0, %v7016_v31  ;;  %v3148_v20 = vmul.f32 %v6638_v23, %v7802_v16 }
 0x47c   : > { %v3147_v38 = vmul.f32 %v6640_v51, %v7797_v5 }
 0x47e   : > { %v3149_v34 = vpack.c.bf16 %v3148_v20, %v3147_v38  ;;  %v6508_v20 = vld [vmem:[%s8585_s4 + $0x20] sm:$0xff]  }
 0x47f   : > { %6153 = vmatprep.subr.bf16.mxu1 %v6508_v20 }
 0x480   : > { %6154 = vmatpush3.bf16.msra.mxu1 %v6508_v20 }
 0x482   : > { %6144 = vmatmul.mubr.msk.bf16.vlgmr.msra.gmra.mxu0 %vm1187_vm1, %v3149_v34  ;;  %v6509_v34 = vld [vmem:[%s8585_s4 + $0x18] sm:$0xff]  }
 0x483   : > { %6155 = vmatprep.subr.bf16.mxu1 %v6509_v34 }
 0x484   : > { %6156 = vmatpush3.bf16.msra.mxu1 %v6509_v34 }
 0x4a5   : > { %v1419_v49 = vpop.f32.mrf.mxu0 }
 0x4a7   : > { %v5977_v53 = vpop.f32.mrf.mxu0 }
 0x4a9   : > { %v1422_v63 = vpop.f32.mrf.mxu0 }
 0x4aa   : > { %v6403_v58 = vpack.i.bf16 %v1422_v63, %v1419_v49 }
 0x4ab   : > { %v5978_v33 = vpop.f32.mrf.mxu0 }
 0x4ac   : > { %6404 = vrot.lane.b32.xlu0 %v6403_v58, %s7024_s30  ;;  %v6510_v33 = vld [vmem:[%s8585_s4 + $0x10] sm:$0xff]  }
 0x4ad   : > { %v1540_v36 = vpop.f32.mrf.mxu0  ;;  %6157 = vmatprep.subr.bf16.mxu1 %v6510_v33 }
 0x4ae   : > { %6158 = vmatpush3.bf16.msra.mxu1 %v6510_v33 }
 0x4af   : > { %v5989_v60 = vpop.f32.mrf.mxu0 }
 0x4b0   : > { %v6511_v60 = vld [vmem:[%s8585_s4 + $0x8] sm:$0xff]  }
 0x4b1   : > { %v1543_v2 = vpop.f32.mrf.mxu0  ;;  %6159 = vmatprep.subr.bf16.mxu1 %v6511_v60 }
 0x4b2   : > { %v6408_v7 = vpack.i.bf16 %v1543_v2, %v1540_v36  ;;  %6160 = vmatpush3.bf16.msra.mxu1 %v6511_v60 }
 0x4b3   : > { %v5990_v30 = vpop.f32.mrf.mxu0 }
 0x4b4   : > { %6409 = vrot.lane.b32.xlu1 %v6408_v7, %s7023_s28 }
 0x4b5   : > { %v1661_v31 = vpop.f32.mrf.mxu0 }
 0x4b7   : > { %v6001_v16 = vpop.f32.mrf.mxu0 }
 0x4b8   : > { %v6512_v16 = vld [vmem:[%s8585_s4] sm:$0xff]  }
 0x4b9   : > { %v1664_v5 = vpop.f32.mrf.mxu0  ;;  %6161 = vmatprep.subr.bf16.mxu1 %v6512_v16 }
 0x4ba   : > { %v6413_v8 = vpack.i.bf16 %v1664_v5, %v1661_v31  ;;  %6162 = vmatpush3.bf16.msra.mxu1 %v6512_v16 }
 0x4bb   : > { %v6002_v22 = vpop.f32.mrf.mxu0 }
 0x4bc   : > { %6414 = vrot.lane.b32.xlu0 %v6413_v8, %s7022_s13 }
 0x4bd   : > { %v1782_v41 = vpop.f32.mrf.mxu0 }
 0x4bf   : > { %v6013_v3 = vpop.f32.mrf.mxu0 }
 0x4c1   : > { %v1785_v59 = vpop.f32.mrf.mxu0 }
 0x4c2   : > { %v6418_v1 = vpack.i.bf16 %v1785_v59, %v1782_v41 }
 0x4c3   : > { %v6014_v21 = vpop.f32.mrf.mxu0 }
 0x4c4   : > { %6419 = vrot.lane.b32.xlu0 %v6418_v1, %s7021_s5 }
 0x4c5   : > { %v1903_v56 = vpop.f32.mrf.mxu0 }
 0x4c7   : > { %v6025_v11 = vpop.f32.mrf.mxu0 }
 0x4c9   : > { %v1906_v6 = vpop.f32.mrf.mxu0 }
 0x4ca   : > { %v6423_v32 = vpack.i.bf16 %v1906_v6, %v1903_v56 }
 0x4cb   : > { %v6026_v4 = vpop.f32.mrf.mxu0 }
 0x4cc   : > { %6424 = vrot.lane.b32.xlu0 %v6423_v32, %s7020_s2 }
 0x4ee   : > { %v2024_v39 = vpop.f32.mrf.mxu0 }
 0x4f0   : > { %v6037_v50 = vpop.f32.mrf.mxu0 }
 0x4f2   : > { %v2027_v18 = vpop.f32.mrf.mxu0 }
 0x4f3   : > { %v6428_v42 = vpack.i.bf16 %v2027_v18, %v2024_v39 }
 0x4f4   : > { %v6038_v57 = vpop.f32.mrf.mxu0 }
 0x4f5   : > { %6429 = vrot.lane.b32.xlu0 %v6428_v42, %s7018_s21 }
 0x4f6   : > { %v2145_v55 = vpop.f32.mrf.mxu0 }
 0x4f8   : > { %v6049_v9 = vpop.f32.mrf.mxu0 }
 0x4fa   : > { %v2148_v14 = vpop.f32.mrf.mxu0 }
 0x4fb   : > { %v6443_v13 = vpack.i.bf16 %v2148_v14, %v2145_v55 }
 0x4fc   : > { %v6050_v37 = vpop.f32.mrf.mxu0 }
 0x50a   : > { %v7917_v35 = vpop.f32.mrf.mxu0 }
 0x50c   : > { %v6061_v40 = vpop.f32.mrf.mxu0 }
 0x50e   : > { %v7919_v54 = vpop.f32.mrf.mxu0 }
 0x510   : > { %v6062_v17 = vpop.f32.mrf.mxu0 }
 0x512   : > { %v2464_v10 = vpop.f32.mrf.mxu0 }
 0x514   : > { %v6073_v15 = vpop.f32.mrf.mxu0 }
 0x516   : > { %v2467_v19 = vpop.f32.mrf.mxu0 }
 0x517   : > { %v6433_v46 = vpack.i.bf16 %v2467_v19, %v2464_v10 }
 0x518   : > { %v6074_v43 = vpop.f32.mrf.mxu0 }
 0x519   : > { %6434 = vrot.lane.b32.xlu0 %v6433_v46, %s7024_s30  ;;  %s8587_s30 = sld [smem:[#allocation31_spill]] }
 0x51a   : > { %v2585_v61 = vpop.f32.mrf.mxu0 }
 0x51c   : > { %v6085_v24 = vpop.f32.mrf.mxu0 }
 0x51e   : > { %v2588_v48 = vpop.f32.mrf.mxu0  ;;  %v6405_v56 = vpop.permute.xlu0 %6404 }
 0x51f   : > { %v6438_v26 = vpack.i.bf16 %v2588_v48, %v2585_v61  ;;  %v6407_v18 = vunpack.i.h.bf16 %v6405_v56  ;;  %v6406_v42 = vunpack.i.l.bf16 %v6405_v56  ;;  %s8588_s7 = smov %s8587_s30 }
 0x520   : > { %v6086_v47 = vpop.f32.mrf.mxu0 }
 0x521   : > { %6439 = vrot.lane.b32.xlu0 %v6438_v26, %s7023_s28  ;;  %v2209_v10 = vsel %vm1187_vm1, %v7865_v44, %v6407_v18  ;;  %v2208_v15 = vsel %vm1187_vm1, %v7858_v29, %v6406_v42 }
 0x522   : > { %v2706_v0 = vpop.f32.mrf.mxu0 }
 0x524   : > { %v6097_v45 = vpop.f32.mrf.mxu0 }
 0x525   : > { %6444 = vrot.lane.b32.xlu0 %v6443_v13, %s7019_s22 }
 0x526   : > { %v2709_v52 = vpop.f32.mrf.mxu0  ;;  %v6410_v39 = vpop.permute.xlu1 %6409 }
 0x527   : > { %v6448_v12 = vpack.i.bf16 %v2709_v52, %v2706_v0  ;;  %v6412_v57 = vunpack.i.h.bf16 %v6410_v39  ;;  %v6411_v55 = vunpack.i.l.bf16 %v6410_v39 }
 0x528   : > { %v6098_v23 = vpop.f32.mrf.mxu0 }
 0x529   : > { %6449 = vrot.lane.b32.xlu1 %v6448_v12, %s7022_s13  ;;  %v2212_v43 = vsel %vm2210_vm2, %v2209_v10, %v6412_v57  ;;  %v2211_v61 = vsel %vm2210_vm2, %v2208_v15, %v6411_v55 }
 0x52a   : > { %v2827_v25 = vpop.f32.mrf.mxu0 }
 0x52c   : > { %v6109_v51 = vpop.f32.mrf.mxu0 }
 0x52e   : > { %v2830_v38 = vpop.f32.mrf.mxu0  ;;  %v6415_v11 = vpop.permute.xlu0 %6414 }
 0x52f   : > { %v6453_v49 = vpack.i.bf16 %v2830_v38, %v2827_v25  ;;  %v6417_v9 = vunpack.i.h.bf16 %v6415_v11  ;;  %v6416_v14 = vunpack.i.l.bf16 %v6415_v11 }
 0x530   : > { %v6110_v53 = vpop.f32.mrf.mxu0 }
 0x531   : > { %6454 = vrot.lane.b32.xlu1 %v6453_v49, %s7021_s5  ;;  %v2215_v28 = vsel %vm2213_vm3, %v2212_v43, %v6417_v9  ;;  %v2214_v26 = vsel %vm2213_vm3, %v2211_v61, %v6416_v14 }
 0x532   : > { %v2948_v63 = vpop.f32.mrf.mxu0 }
 0x534   : > { %v6121_v58 = vpop.f32.mrf.mxu0 }
 0x536   : > { %v2951_v36 = vpop.f32.mrf.mxu0  ;;  %v6420_v6 = vpop.permute.xlu0 %6419 }
 0x537   : > { %v6458_v2 = vpack.i.bf16 %v2951_v36, %v2948_v63  ;;  %v6422_v37 = vunpack.i.h.bf16 %v6420_v6  ;;  %v6421_v40 = vunpack.i.l.bf16 %v6420_v6 }
 0x538   : > { %v6122_v7 = vpop.f32.mrf.mxu0 }
 0x539   : > { %6459 = vrot.lane.b32.xlu1 %v6458_v2, %s7020_s2  ;;  %v2218_v47 = vsel %vm2216_vm4, %v2215_v28, %v6422_v37  ;;  %v2217_v44 = vsel %vm2216_vm4, %v2214_v26, %v6421_v40  ;;  %s8586_s2 = sld [smem:[#allocation21_spill]] }
 0x53a   : > { %v3069_v30 = vpop.f32.mrf.mxu0 }
 0x53c   : > { %v6133_v31 = vpop.f32.mrf.mxu0 }
 0x53e   : > { %v3072_v5 = vpop.f32.mrf.mxu0  ;;  %v6425_v32 = vpop.permute.xlu0 %6424 }
 0x53f   : > { %v6463_v8 = vpack.i.bf16 %v3072_v5, %v3069_v30  ;;  %v6427_v19 = vunpack.i.h.bf16 %v6425_v32  ;;  %v6426_v46 = vunpack.i.l.bf16 %v6425_v32  ;;  %v5667_v42 = vld [vmem:[%s8586_s2] ss:$0 sm:$0xff] }
 0x540   : > { %v6134_v22 = vpop.f32.mrf.mxu0 }
 0x541   : > { %6464 = vrot.lane.b32.xlu1 %v6463_v8, %s7018_s21  ;;  %v2221_v29 = vsel %vm2219_vm5, %v2218_v47, %v6427_v19  ;;  %v2220_v13 = vsel %vm2219_vm5, %v2217_v44, %v6426_v46 }
 0x542   : > { %v3190_v41 = vpop.f32.mrf.mxu0 }
 0x544   : > { %v6145_v3 = vpop.f32.mrf.mxu0 }
 0x546   : > { %v3193_v59 = vpop.f32.mrf.mxu0 }
 0x547   : > { %v6468_v1 = vpack.i.bf16 %v3193_v59, %v3190_v41 }
 0x548   : > { %v6146_v21 = vpop.f32.mrf.mxu0 }
 0x549   : > { %6469 = vrot.lane.b32.xlu0 %v6468_v1, %s7019_s22 }
 0x567   : > { %v6430_v4 = vpop.permute.xlu0 %6429 }
 0x568   : > { %v6432_v24 = vunpack.i.h.bf16 %v6430_v4  ;;  %v6431_v48 = vunpack.i.l.bf16 %v6430_v4 }
 0x56a   : > { %v2224_v52 = vsel %vm2222_vm6, %v2221_v29, %v6432_v24  ;;  %v2223_v62 = vsel %vm2222_vm6, %v2220_v13, %v6431_v48 }
 0x58b   : > { %v6435_v50 = vpop.permute.xlu0 %6434 }
 0x58c   : > { %v6437_v34 = vunpack.i.h.bf16 %v6435_v50  ;;  %v6436_v49 = vunpack.i.l.bf16 %v6435_v50 }
 0x58e   : > { %v3254_v7 = vsel %vm1187_vm1, %v7919_v54, %v6437_v34  ;;  %v3253_v30 = vsel %vm1187_vm1, %v7917_v35, %v6436_v49 }
 0x593   : > { %v6440_v17 = vpop.permute.xlu0 %6439 }
 0x594   : > { %v6442_v53 = vunpack.i.h.bf16 %v6440_v17  ;;  %v6441_v63 = vunpack.i.l.bf16 %v6440_v17 }
 0x596   : > { %v3256_v5 = vsel %vm2210_vm2, %v3254_v7, %v6442_v53  ;;  %v3255_v8 = vsel %vm2210_vm2, %v3253_v30, %v6441_v63 }
 0x597   : > { %v6445_v0 = vpop.permute.xlu0 %6444 }
 0x598   : > { %v6447_v45 = vunpack.i.h.bf16 %v6445_v0  ;;  %v6446_v27 = vunpack.i.l.bf16 %v6445_v0 }
 0x59a   : > { %v2226_v12 = vsel %vm2225_vm7, %v2223_v62, %v6446_v27  ;;  %v2227_v23 = vsel %vm2225_vm7, %v2224_v52, %v6447_v45 }
 0x59b   : > { %v3267_v25 = vpack.c.bf16 %v2227_v23, %v2226_v12  ;;  %v6450_v51 = vpop.permute.xlu1 %6449 }
 0x59c   : > { %v6452_v58 = vunpack.i.h.bf16 %v6450_v51  ;;  %v6451_v33 = vunpack.i.l.bf16 %v6450_v51 }
 0x59d   : > { %6163 = vmatprep.mubr.bf16.mxu1 %v3267_v25 }
 0x59e   : > { %v3258_v3 = vsel %vm2213_vm3, %v3256_v5, %v6452_v58  ;;  %v3257_v59 = vsel %vm2213_vm3, %v3255_v8, %v6451_v33 }
 0x5a3   : > { %v6455_v20 = vpop.permute.xlu1 %6454 }
 0x5a4   : > { %v6457_v60 = vunpack.i.h.bf16 %v6455_v20  ;;  %v6456_v2 = vunpack.i.l.bf16 %v6455_v20 }
 0x5a6   : > { %v3260_v1 = vsel %vm2216_vm4, %v3258_v3, %v6457_v60  ;;  %v3259_v21 = vsel %vm2216_vm4, %v3257_v59, %v6456_v2 }
 0x5ab   : > { %v6460_v38 = vpop.permute.xlu1 %6459 }
 0x5ac   : > { %v6462_v31 = vunpack.i.h.bf16 %v6460_v38  ;;  %v6461_v16 = vunpack.i.l.bf16 %v6460_v38 }
 0x5ae   : > { %v3262_v56 = vsel %vm2219_vm5, %v3260_v1, %v6462_v31  ;;  %v3261_v35 = vsel %vm2219_vm5, %v3259_v21, %v6461_v16 }
 0x5b3   : > { %v6465_v36 = vpop.permute.xlu1 %6464 }
 0x5b4   : > { %v6467_v22 = vunpack.i.h.bf16 %v6465_v36  ;;  %v6466_v41 = vunpack.i.l.bf16 %v6465_v36 }
 0x5b6   : > { %v3264_v32 = vsel %vm2222_vm6, %v3262_v56, %v6467_v22  ;;  %v3263_v4 = vsel %vm2222_vm6, %v3261_v35, %v6466_v41 }
 0x5bb   : > { %v6470_v54 = vpop.permute.xlu0 %6469 }
 0x5bc   : > { %v6472_v11 = vunpack.i.h.bf16 %v6470_v54  ;;  %v6471_v6 = vunpack.i.l.bf16 %v6470_v54 }
 0x5be   : > { %v3266_v39 = vsel %vm2225_vm7, %v3264_v32, %v6472_v11  ;;  %v3265_v50 = vsel %vm2225_vm7, %v3263_v4, %v6471_v6 }
 0x5bf   : > { %v3268_v18 = vpack.c.bf16 %v3266_v39, %v3265_v50 }
 0x5c1   : > { %6164 = vmatmul.mubr.bf16.vlgmr.msra.gmra.mxu1 %v3268_v18 }
 0x681   : > { %v6165_v57 = vpop.f32.mrf.mxu1 }
 0x682   : > { %v3366_v55 = vadd.f32 %v6165_v57, %v5667_v42 }
 0x683   : > { %v3357_v9 = vpop.f32.mrf.mxu1 }
 0x684   : > { %3374 = vst [vmem:[%s8587_s30 + $0x10] sm:$0xff] %v3366_v55  ;;  %3378 = vst [vmem:[%s8589_s29 + $0x10] sm:$0xff] %v3366_v55  ;;  %v3358_v14 = vadd.f32 %v5667_v42, %v3357_v9 }
 0x685   : > { %v6166_v37 = vpop.f32.mrf.mxu1 }
 0x686   : > { %3372 = vst [vmem:[%s8588_s7] sm:$0xff] %v3358_v14  ;;  %3376 = vst [vmem:[%s8589_s29] sm:$0xff] %v3358_v14  ;;  %v3369_v40 = vadd.f32 %v6166_v37, %v5667_v42 }
 0x687   : > { %v3360_v17 = vpop.f32.mrf.mxu1 }
 0x688   : > { %3375 = vst [vmem:[%s8588_s7 + $0x18] sm:$0xff] %v3369_v40  ;;  %3379 = vst [vmem:[%s8589_s29 + $0x18] sm:$0xff] %v3369_v40  ;;  %v3361_v10 = vadd.f32 %v5667_v42, %v3360_v17 }
 0x68a   : > { %3373 = vst [vmem:[%s8588_s7 + $0x8] sm:$0xff] %v3361_v10  ;;  %3377 = vst [vmem:[%s8589_s29 + $0x8] sm:$0xff] %v3361_v10 }
 0x68b PF: > { %v6671_v15 = vld [vmem:[%s7305_s12 + $0xac] ss:$12 sps:$4 sm:$0xff]   ;;  %v6673_v19 = vld [vmem:[%s7305_s12 + $0xa8] ss:$12 sps:$4 sm:$0xff]   ;;  %v7025_v46 = vmov 0   ;;  %s8590_s15 = sld [smem:[#allocation30_spill]]  ;;  %v3437_v2 = vlaneseq  ;;  %s8591_s0 = scalar_lea.vmem %s8514_s8, %s7290_s1 }
 0x68c   : > { %3612 = vmatprep.mubr.bf16.mxu0 %v7025_v46  ;;  %3580 = vmatprep.subr.bf16.mxu0 %v6671_v15  ;;  %v6674_v43 = vld [vmem:[%s7305_s12 + $0x94] ss:$12 sps:$4 sm:$0xff]   ;;  %v6676_v61 = vld [vmem:[%s7305_s12 + $0x90] ss:$12 sps:$4 sm:$0xff]   ;;  %v6679_v48 = vld [vmem:[%s7305_s12 + $0x78] ss:$12 sps:$4 sm:$0xff]  }
 0x68d   : > { %3581 = vmatpush1.bf16.msra.mxu0 %v6673_v19  ;;  %v6677_v24 = vld [vmem:[%s7305_s12 + $0x7c] ss:$12 sps:$4 sm:$0xff]   ;;  %v6680_v28 = vld [vmem:[%s7305_s12 + $0x64] ss:$12 sps:$4 sm:$0xff]   ;;  %v6682_v47 = vld [vmem:[%s7305_s12 + $0x60] ss:$12 sps:$4 sm:$0xff]  }
 0x68e   : > { %3582 = vmatprep.subr.bf16.mxu0 %v6674_v43  ;;  %v6683_v0 = vld [vmem:[%s7305_s12 + $0x4c] ss:$12 sps:$4 sm:$0xff]   ;;  %v6685_v13 = vld [vmem:[%s7305_s12 + $0x48] ss:$12 sps:$4 sm:$0xff]   ;;  %v6688_v27 = vld [vmem:[%s7305_s12 + $0x30] ss:$12 sps:$4 sm:$0xff]  }
 0x68f   : > { %v6686_v45 = vld [vmem:[%s7305_s12 + $0x34] ss:$12 sps:$4 sm:$0xff]   ;;  %v6689_v52 = vld [vmem:[%s7305_s12 + $0x1c] ss:$12 sps:$4 sm:$0xff]   ;;  %v6691_v62 = vld [vmem:[%s7305_s12 + $0x18] ss:$12 sps:$4 sm:$0xff]  }
 0x690   : > { %v6692_v12 = vld [vmem:[%s7305_s12 + $0x4] ss:$12 sps:$4 sm:$0xff]   ;;  %v6694_v23 = vld [vmem:[%s7305_s12] ss:$12 sps:$4 sm:$0xff]   ;;  %v7026_v38 = vmov 0.0   ;;  %vm7027_vm8 = vmmov 0  }
 0x691   : > { %3583 = vmatpush1.bf16.msra.mxu0 %v6676_v61  ;;  %v3380_v26 = vld [vmem:[%s8590_s15] sm:$0xff]  ;;  %v3381_v44 = vld [vmem:[%s8590_s15 + $0x8] sm:$0xff]  ;;  %v3382_v25 = vld [vmem:[%s8590_s15 + $0x10] sm:$0xff]  ;;  %v8056_v7 = vshrl.u32 %v3437_v2, 7  ;;  %vm3687_vm9 = vcmask 261120   ;;  %s7030_s28 = smov 32  }
 0x692   : > { %3584 = vmatprep.subr.bf16.mxu0 %v6677_v24  ;;  %v3434_v29 = vpack.c.bf16 %v3381_v44, %v3380_v26  ;;  %v3383_v51 = vld [vmem:[%s8590_s15 + $0x18] sm:$0xff]  ;;  %v6697_v53 = vld [vmem:[%s7305_s12 + $0x80] ss:$12 sps:$4 sm:$0xff]   ;;  %v6698_v63 = vld [vmem:[%s7305_s12 + $0x68] ss:$12 sps:$4 sm:$0xff]   ;;  %vm3735_vm10 = vcmask 130048  }
 0x693   : > { %v3435_v20 = vpack.c.bf16 %v3383_v51, %v3382_v25  ;;  %v6695_v34 = vld [vmem:[%s7305_s12 + $0xb0] ss:$12 sps:$4 sm:$0xff]   ;;  %v6696_v49 = vld [vmem:[%s7305_s12 + $0x98] ss:$12 sps:$4 sm:$0xff]   ;;  %v6701_v36 = vld [vmem:[%s7305_s12 + $0x20] ss:$12 sps:$4 sm:$0xff]  }
 0x694   : > { %6183 = vmatprep.mubr.bf16.mxu1 %v3434_v29  ;;  %6167 = vmatprep.subr.bf16.mxu1 %v6695_v34  ;;  %v6699_v58 = vld [vmem:[%s7305_s12 + $0x50] ss:$12 sps:$4 sm:$0xff]   ;;  %v6700_v33 = vld [vmem:[%s7305_s12 + $0x38] ss:$12 sps:$4 sm:$0xff]   ;;  %v6702_v60 = vld [vmem:[%s7305_s12 + $0x8] ss:$12 sps:$4 sm:$0xff]  }
 0x695   : > { %3585 = vmatpush1.bf16.msra.mxu0 %v6679_v48  ;;  %6168 = vmatpush3.bf16.msra.mxu1 %v6695_v34  ;;  %v3439_v30 = vsub.s32 0, %v8056_v7  ;;  %v3443_v31 = vsub.s32 1, %v8056_v7  ;;  %v3416_v16 = vld [vmem:[%s7314_s20] sm:$0x7]  ;;  %s7028_s12 = smov 64   ;;  %s7029_s20 = smov 96  }
 0x696   : > { %3586 = vmatprep.subr.bf16.mxu0 %v6680_v28  ;;  %6169 = vmatprep.subr.bf16.mxu1 %v6696_v49  ;;  %v3447_v15 = vsub.s32 2, %v8056_v7  ;;  %vm4195_vm11 = vcmask 523264   ;;  %vm4198_vm12 = vcmask 785408  }
 0x697   : > { %v3440_v22 = vrot.slane %v3416_v16, %v3439_v30  ;;  %v3444_v41 = vrot.slane %v3416_v16, %v3443_v31 }
 0x698   : > { %v3448_v61 = vrot.slane %v3416_v16, %v3447_v15 }
 0x699   : > { %3587 = vmatpush1.bf16.msra.mxu0 %v6682_v47  ;;  %6170 = vmatpush3.bf16.msra.mxu1 %v6696_v49 }
 0x69a   : > { %3588 = vmatprep.subr.bf16.mxu0 %v6683_v0  ;;  %6171 = vmatprep.subr.bf16.mxu1 %v6697_v53 }
 0x69d   : > { %3589 = vmatpush1.bf16.msra.mxu0 %v6685_v13  ;;  %6172 = vmatpush3.bf16.msra.mxu1 %v6697_v53 }
 0x69e   : > { %3590 = vmatprep.subr.bf16.mxu0 %v6686_v45  ;;  %6173 = vmatprep.subr.bf16.mxu1 %v6698_v63 }
 0x6a1   : > { %3591 = vmatpush1.bf16.msra.mxu0 %v6688_v27  ;;  %6174 = vmatpush3.bf16.msra.mxu1 %v6698_v63 }
 0x6a2   : > { %3592 = vmatprep.subr.bf16.mxu0 %v6689_v52  ;;  %6175 = vmatprep.subr.bf16.mxu1 %v6699_v58 }
 0x6a5   : > { %3593 = vmatpush1.bf16.msra.mxu0 %v6691_v62  ;;  %6176 = vmatpush3.bf16.msra.mxu1 %v6699_v58 }
 0x6a6   : > { %3594 = vmatprep.subr.bf16.mxu0 %v6692_v12  ;;  %6177 = vmatprep.subr.bf16.mxu1 %v6700_v33 }
 0x6a9   : > { %3595 = vmatpush1.bf16.msra.mxu0 %v6694_v23  ;;  %6178 = vmatpush3.bf16.msra.mxu1 %v6700_v33 }
 0x6aa   : > { %6187 = vmatprep.subr.bf16.mxu0 %v7026_v38  ;;  %6179 = vmatprep.subr.bf16.mxu1 %v6701_v36 }
 0x6ac   : > { %3613 = vmatmul.mubr.bf16.vlgmr.msra.gmra.mxu0 %v3434_v29 }
 0x6ad   : > { %3622 = vmatprep.mubr.bf16.mxu0 %v7025_v46  ;;  %6180 = vmatpush3.bf16.msra.mxu1 %v6701_v36 }
 0x6ae   : > { %6181 = vmatprep.subr.bf16.mxu1 %v6702_v60 }
 0x6b1   : > { %6182 = vmatpush3.bf16.msra.mxu1 %v6702_v60 }
 0x6b2   : > { %6199 = vmatprep.subr.bf16.mxu1 %v7026_v38 }
 0x6b4   : > { %3623 = vmatmul.mubr.bf16.gmra.mxu0 %v3435_v20  ;;  %6184 = vmatmul.mubr.bf16.vlgmr.msra.gmra.mxu1 %v3435_v20 }
 0x6b5   : > { %6189 = vmatprep.mubr.msk.bf16.mxu0 %vm7027_vm8, %v7026_v38  ;;  %6201 = vmatprep.mubr.msk.bf16.mxu1 %vm7027_vm8, %v7026_v38 }
 0x76c   : > { %v3614_v5 = vpop.f32.mrf.mxu0 }
 0x76d   : > { %v3615_v21 = vadd.f32 %v3614_v5, %v3440_v22 }
 0x76e   : > { %v3616_v8 = vpop.f32.mrf.mxu0 }
 0x76f   : > { %v3617_v54 = vadd.f32 %v3616_v8, %v3444_v41  ;;  %v3682_v4 = vmul.f32 0.17677669, %v3615_v21 }
 0x770   : > { %v3618_v3 = vpop.f32.mrf.mxu0 }
 0x771   : > { %v3619_v59 = vadd.f32 %v3618_v3, %v3440_v22 }
 0x772   : > { %v3620_v1 = vpop.f32.mrf.mxu0 }
 0x773   : > { %v3621_v56 = vadd.f32 %v3620_v1, %v3444_v41  ;;  %v3683_v11 = vmul.f32 0.17677669, %v3619_v59 }
 0x774   : > { %v3624_v35 = vpop.f32.mrf.mxu0  ;;  %v6185_v24 = vpop.f32.mrf.mxu1 }
 0x775   : > { %v3685_v6 = vpack.c.bf16 %v3621_v56, %v3617_v54  ;;  %v3625_v50 = vadd.f32 %v3624_v35, %v3440_v22  ;;  %v3684_v42 = vpack.c.bf16 %v3683_v11, %v3682_v4  ;;  %v3676_v28 = vadd.f32 %v6185_v24, %v3448_v61 }
 0x776   : > { %v3626_v32 = vpop.f32.mrf.mxu0  ;;  %v3667_v26 = vpop.f32.mrf.mxu1 }
 0x777   : > { %3929 = vrot.lane.b32.xlu1 %v3685_v6, %s7028_s12  ;;  %3807 = vrot.lane.b32.xlu0 %v3685_v6, %s7029_s20  ;;  %v3692_v39 = vsel %vm3687_vm9, %v3685_v6, 0  ;;  %v4201_v9 = vmul.f32 0.17677669, %v3625_v50  ;;  %v3627_v14 = vadd.f32 %v3626_v32, %v3444_v41  ;;  %v3668_v29 = vadd.f32 %v3667_v26, %v3448_v61 }
 0x778   : > { %6188 = vmatpush3.bf16.xpose.msra.mxu0 %v3692_v39  ;;  %v3628_v18 = vpop.f32.mrf.mxu0  ;;  %v6186_v0 = vpop.f32.mrf.mxu1 }
 0x779   : > { %v3629_v57 = vadd.f32 %v3628_v18, %v3440_v22  ;;  %6193 = vmatprep.subr.bf16.mxu0 %v7026_v38  ;;  %v3679_v13 = vadd.f32 %v6186_v0, %v3448_v61 }
 0x77a   : > { %v3630_v55 = vpop.f32.mrf.mxu0  ;;  %v3670_v45 = vpop.f32.mrf.mxu1 }
 0x77b   : > { %3927 = vrot.lane.b32.xlu1 %v3684_v42, %s7028_s12  ;;  %3804 = vrot.lane.b32.xlu0 %v3684_v42, %s7029_s20  ;;  %v4202_v37 = vmul.f32 0.17677669, %v3629_v57  ;;  %v3631_v40 = vadd.f32 %v3630_v55, %v3444_v41  ;;  %v8090_v27 = vpack.c.bf16 %v3679_v13, %v3676_v28  ;;  %v3671_v52 = vadd.f32 %v3670_v45, %v3448_v61 }
 0x77d   : > { %v4203_v17 = vpack.c.bf16 %v4202_v37, %v4201_v9  ;;  %v4204_v10 = vpack.c.bf16 %v3631_v40, %v3627_v14  ;;  %v8092_v12 = vpack.c.bf16 %v3671_v52, %v3668_v29 }
 0x77f   : > { %4048 = vrot.lane.b32.xlu1 %v3684_v42, %s7030_s28  ;;  %4050 = vrot.lane.b32.xlu0 %v3685_v6, %s7030_s28  ;;  %v4210_v20 = vsel %vm3687_vm9, %v4204_v10, 0 }
 0x780   : > { %6190 = vmatmul.mubr.msk.bf16.vlgmr.msra.gmra.mxu0 %vm3687_vm9, %v3684_v42 }
 0x781   : > { %6195 = vmatprep.mubr.msk.bf16.mxu0 %vm7027_vm8, %v7026_v38  ;;  %6194 = vmatpush3.bf16.msra.mxu0 %v8092_v12 }
 0x782   : > { %6205 = vmatprep.subr.bf16.mxu0 %v7026_v38 }
 0x783   : > { %4324 = vrot.lane.b32.xlu0 %v4204_v10, %s7029_s20  ;;  %4321 = vrot.lane.b32.xlu1 %v4203_v17, %s7029_s20 }
 0x787   : > { %4446 = vrot.lane.b32.xlu0 %v4204_v10, %s7028_s12  ;;  %4444 = vrot.lane.b32.xlu1 %v4203_v17, %s7028_s12 }
 0x78b   : > { %4567 = vrot.lane.b32.xlu0 %v4204_v10, %s7030_s28  ;;  %4565 = vrot.lane.b32.xlu1 %v4203_v17, %s7030_s28 }
 0x7e9   : > { %v3808_v19 = vpop.permute.xlu0 %3807  ;;  %v3930_v48 = vpop.permute.xlu1 %3929 }
 0x7ea   : > { %v3813_v43 = vsel %vm3687_vm9, %v3808_v19, 0  ;;  %v3935_v44 = vsel %vm3687_vm9, %v3930_v48, 0 }
 0x7eb   : > { %6200 = vmatpush3.bf16.xpose.msra.mxu1 %v3813_v43 }
 0x7ec   : > { %6211 = vmatprep.subr.bf16.mxu1 %v7026_v38 }
 0x7ed   : > { %v3805_v47 = vpop.permute.xlu0 %3804  ;;  %v3928_v23 = vpop.permute.xlu1 %3927 }
 0x7f1   : > { %v4051_v62 = vpop.permute.xlu0 %4050  ;;  %v4049_v51 = vpop.permute.xlu1 %4048 }
 0x7f2   : > { %6202 = vmatmul.mubr.msk.bf16.vlgmr.msra.gmra.mxu1 %vm3687_vm9, %v3805_v47  ;;  %v4056_v25 = vsel %vm3687_vm9, %v4051_v62, 0 }
 0x7f3   : > { %6212 = vmatpush3.bf16.xpose.msra.mxu1 %v3935_v44  ;;  %6213 = vmatprep.mubr.msk.bf16.mxu1 %vm7027_vm8, %v7026_v38 }
 0x7f4   : > { %6223 = vmatprep.subr.bf16.mxu1 %v7026_v38 }
 0x7f5   : > { %v4325_v34 = vpop.permute.xlu0 %4324  ;;  %v4322_v63 = vpop.permute.xlu1 %4321 }
 0x7f6   : > { %v4330_v49 = vsel %vm3687_vm9, %v4325_v34, 0 }
 0x7f9   : > { %v4447_v53 = vpop.permute.xlu0 %4446  ;;  %v4445_v36 = vpop.permute.xlu1 %4444 }
 0x7fa   : > { %6214 = vmatmul.mubr.msk.bf16.vlgmr.msra.gmra.mxu1 %vm3687_vm9, %v3928_v23  ;;  %v4452_v58 = vsel %vm3687_vm9, %v4447_v53, 0 }
 0x7fb   : > { %6224 = vmatpush3.bf16.xpose.msra.mxu1 %v4056_v25  ;;  %6225 = vmatprep.mubr.msk.bf16.mxu1 %vm7027_vm8, %v7026_v38 }
 0x7fc   : > { %6235 = vmatprep.subr.bf16.mxu1 %v7026_v38 }
 0x7fd   : > { %v4568_v33 = vpop.permute.xlu0 %4567  ;;  %v4566_v2 = vpop.permute.xlu1 %4565 }
 0x7fe   : > { %v4573_v60 = vsel %vm3687_vm9, %v4568_v33, 0 }
 0x802   : > { %6226 = vmatmul.mubr.msk.bf16.vlgmr.msra.gmra.mxu1 %vm3687_vm9, %v4049_v51 }
 0x803   : > { %6236 = vmatpush3.bf16.xpose.msra.mxu1 %v4210_v20  ;;  %6237 = vmatprep.mubr.msk.bf16.mxu1 %vm7027_vm8, %v7026_v38 }
 0x804   : > { %6247 = vmatprep.subr.bf16.mxu1 %v7026_v38 }
 0x80a   : > { %6238 = vmatmul.mubr.msk.bf16.vlgmr.msra.gmra.mxu1 %vm3687_vm9, %v4203_v17 }
 0x80b   : > { %6248 = vmatpush3.bf16.xpose.msra.mxu1 %v4330_v49  ;;  %6249 = vmatprep.mubr.msk.bf16.mxu1 %vm7027_vm8, %v7026_v38 }
 0x80c   : > { %6259 = vmatprep.subr.bf16.mxu1 %v7026_v38 }
 0x812   : > { %6250 = vmatmul.mubr.msk.bf16.vlgmr.msra.gmra.mxu1 %vm3687_vm9, %v4322_v63 }
 0x813   : > { %6260 = vmatpush3.bf16.xpose.msra.mxu1 %v4452_v58  ;;  %6261 = vmatprep.mubr.msk.bf16.mxu1 %vm7027_vm8, %v7026_v38 }
 0x814   : > { %6271 = vmatprep.subr.bf16.mxu1 %v7026_v38 }
 0x81a   : > { %6262 = vmatmul.mubr.msk.bf16.vlgmr.msra.gmra.mxu1 %vm3687_vm9, %v4445_v36 }
 0x81b   : > { %6272 = vmatpush3.bf16.xpose.msra.mxu1 %v4573_v60  ;;  %6273 = vmatprep.mubr.msk.bf16.mxu1 %vm7027_vm8, %v7026_v38 }
 0x822   : > { %6274 = vmatmul.mubr.msk.bf16.vlgmr.msra.gmra.mxu1 %vm3687_vm9, %v4566_v2 }
 0x840   : > { %v8121_v16 = vpop.f32.mrf.mxu0 }
 0x841   : > { %v3736_v5 = vsel %vm3735_vm10, %v8121_v16, -inf }
 0x842   : > { %3737 = vmax.xlane.f32.xlu0 %v3736_v5  ;;  %v6191_v8 = vpop.f32.mrf.mxu0 }
 0x844   : > { %v3731_v22 = vpop.f32.mrf.mxu0 }
 0x845   : > { %v3739_v41 = vsel %vm3735_vm10, %v3731_v22, -inf }
 0x846   : > { %3740 = vmax.xlane.f32.xlu1 %v3739_v41  ;;  %v6192_v3 = vpop.f32.mrf.mxu0 }
 0x8b2   : > { %v8126_v59 = vpop.f32.mrf.mxu1 }
 0x8b3   : > { %v3856_v1 = vsel %vm3735_vm10, %v8126_v59, -inf }
 0x8b4   : > { %v6203_v21 = vpop.f32.mrf.mxu1  ;;  %3857 = vmax.xlane.f32.xlu0 %v3856_v1 }
 0x8b6   : > { %v8130_v54 = vpop.f32.mrf.mxu1 }
 0x8b7   : > { %v3859_v56 = vsel %vm3735_vm10, %v8130_v54, -inf }
 0x8b8   : > { %v6204_v35 = vpop.f32.mrf.mxu1  ;;  %3860 = vmax.xlane.f32.xlu0 %v3859_v56 }
 0x8ba   : > { %v8134_v11 = vpop.f32.mrf.mxu1 }
 0x8bb   : > { %v3978_v6 = vsel %vm3735_vm10, %v8134_v11, -inf }
 0x8bc   : > { %v6215_v32 = vpop.f32.mrf.mxu1  ;;  %3979 = vmax.xlane.f32.xlu1 %v3978_v6 }
 0x8be   : > { %v8138_v4 = vpop.f32.mrf.mxu1 }
 0x8bf   : > { %v3981_v39 = vsel %vm3735_vm10, %v8138_v4, -inf }
 0x8c0   : > { %v6216_v50 = vpop.f32.mrf.mxu1  ;;  %3982 = vmax.xlane.f32.xlu0 %v3981_v39 }
 0x8c2   : > { %v8142_v18 = vpop.f32.mrf.mxu1 }
 0x8c3   : > { %v4099_v42 = vsel %vm3735_vm10, %v8142_v18, -inf }
 0x8c4   : > { %v6227_v57 = vpop.f32.mrf.mxu1  ;;  %4100 = vmax.xlane.f32.xlu1 %v4099_v42 }
 0x8c6   : > { %v8146_v55 = vpop.f32.mrf.mxu1 }
 0x8c7   : > { %v4102_v9 = vsel %vm3735_vm10, %v8146_v55, -inf }
 0x8c8   : > { %v6228_v14 = vpop.f32.mrf.mxu1  ;;  %4103 = vmax.xlane.f32.xlu0 %v4102_v9 }
 0x8ca   : > { %v8150_v37 = vpop.f32.mrf.mxu1 }
 0x8cb   : > { %v3738_v49 = vpop.xlane.xlu0 %3737  ;;  %v4253_v58 = vsel %vm3735_vm10, %v8150_v37, -inf }
 0x8cc   : > { %v6239_v40 = vpop.f32.mrf.mxu1  ;;  %v3742_v53 = vsub.f32 %v8121_v16, %v3738_v49 }
 0x8ce   : > { %v8152_v17 = vpop.f32.mrf.mxu1  ;;  %v3744_v63 = vmul.f32 1.442695, %v3742_v53 }
 0x8cf   : > { %v3741_v10 = vpop.xlane.xlu1 %3740  ;;  %v4256_v15 = vsel %vm3735_vm10, %v8152_v17, -inf }
 0x8d0   : > { %v3743_v19 = vsub.f32 %v3731_v22, %v3741_v10  ;;  %v6240_v43 = vpop.f32.mrf.mxu1  ;;  %4257 = vmax.xlane.f32.xlu0 %v4256_v15 }
 0x8d2   : > { %v3746_v61 = vmul.f32 1.442695, %v3743_v19  ;;  %v8156_v24 = vpop.f32.mrf.mxu1 }
 0x8d3   : > { %v4373_v33 = vsel %vm3735_vm10, %v8156_v24, -inf }
 0x8d4   : > { %6751 = vpow2.f32 %v3746_v61  ;;  %v6251_v48 = vpop.f32.mrf.mxu1 }
 0x8d5   : > { %3880 = vrot.lane.b32.xlu1 %v8092_v12, %s7029_s20  ;;  %6753 = vpow2.f32 %v3744_v63 }
 0x8d6   : > { %v8160_v28 = vpop.f32.mrf.mxu1 }
 0x8d7   : > { %v4376_v26 = vsel %vm3735_vm10, %v8160_v28, -inf }
 0x8d8   : > { %v6252_v47 = vpop.f32.mrf.mxu1  ;;  %4377 = vmax.xlane.f32.xlu0 %v4376_v26 }
 0x8da   : > { %v8164_v44 = vpop.f32.mrf.mxu1 }
 0x8db   : > { %v4495_v36 = vsel %vm3735_vm10, %v8164_v44, -inf }
 0x8dc   : > { %v6263_v0 = vpop.f32.mrf.mxu1 }
 0x8de   : > { %v8166_v29 = vpop.f32.mrf.mxu1 }
 0x8df   : > { %v4498_v13 = vsel %vm3735_vm10, %v8166_v29, -inf }
 0x8e0   : > { %v6264_v45 = vpop.f32.mrf.mxu1  ;;  %4499 = vmax.xlane.f32.xlu0 %v4498_v13 }
 0x8e1   : > { %v8170_v52 = vpop.eup %6751 }
 0x8e2   : > { %v8172_v62 = vpop.f32.mrf.mxu1  ;;  %v3751_v23 = vsel %vm3735_vm10, %v8170_v52, 0.0  ;;  %v8187_v60 = vpop.eup %6753 }
 0x8e3   : > { %v3748_v2 = vsel %vm3735_vm10, %v8187_v60, 0.0  ;;  %v4616_v16 = vsel %vm3735_vm10, %v8172_v62, -inf }
 0x8e4   : > { %v6275_v25 = vpop.f32.mrf.mxu1  ;;  %3752 = vadd.xlane.f32.xlu0 %v3751_v23 }
 0x8e6   : > { %v8176_v51 = vpop.f32.mrf.mxu1 }
 0x8e7   : > { %v4619_v20 = vsel %vm3735_vm10, %v8176_v51, -inf }
 0x8e8   : > { %4620 = vmax.xlane.f32.xlu0 %v4619_v20  ;;  %v6276_v34 = vpop.f32.mrf.mxu1 }
 0x8f9   : > { %4254 = vmax.xlane.f32.xlu1 %v4253_v58 }
 0x8fd   : > { %4374 = vmax.xlane.f32.xlu1 %v4373_v33 }
 0x901   : > { %4496 = vmax.xlane.f32.xlu1 %v4495_v36 }
 0x905   : > { %3749 = vadd.xlane.f32.xlu1 %v3748_v2 }
 0x909   : > { %4617 = vmax.xlane.f32.xlu1 %v4616_v16 }
 0x93d   : > { %v3858_v5 = vpop.xlane.xlu0 %3857 }
 0x93e   : > { %v3862_v8 = vsub.f32 %v8126_v59, %v3858_v5 }
 0x940   : > { %v3864_v22 = vmul.f32 1.442695, %v3862_v8 }
 0x941   : > { %v3861_v41 = vpop.xlane.xlu0 %3860 }
 0x942   : > { %6755 = vpow2.f32 %v3864_v22  ;;  %v3863_v3 = vsub.f32 %v8130_v54, %v3861_v41 }
 0x944   : > { %v3866_v1 = vmul.f32 1.442695, %v3863_v3 }
 0x945   : > { %v3980_v59 = vpop.xlane.xlu1 %3979 }
 0x946   : > { %6757 = vpow2.f32 %v3866_v1  ;;  %v3984_v54 = vsub.f32 %v8134_v11, %v3980_v59 }
 0x948   : > { %v3986_v42 = vmul.f32 1.442695, %v3984_v54 }
 0x949   : > { %v3983_v32 = vpop.xlane.xlu0 %3982 }
 0x94a   : > { %v3985_v50 = vsub.f32 %v8138_v4, %v3983_v32  ;;  %6759 = vpow2.f32 %v3986_v42 }
 0x94c   : > { %v3988_v14 = vmul.f32 1.442695, %v3985_v50 }
 0x94d   : > { %v4101_v39 = vpop.xlane.xlu1 %4100 }
 0x94e   : > { %v4105_v57 = vsub.f32 %v8142_v18, %v4101_v39  ;;  %6761 = vpow2.f32 %v3988_v14 }
 0x94f   : > { %v8195_v21 = vpop.eup %6755 }
 0x950   : > { %v3868_v56 = vsel %vm3735_vm10, %v8195_v21, 0.0  ;;  %v4107_v40 = vmul.f32 1.442695, %v4105_v57 }
 0x951   : > { %3869 = vadd.xlane.f32.xlu1 %v3868_v56  ;;  %v4104_v9 = vpop.xlane.xlu0 %4103  ;;  %v8212_v43 = vpop.permute.xlu1 %3880 }
 0x952   : > { %v4106_v10 = vsub.f32 %v8146_v55, %v4104_v9  ;;  %6763 = vpow2.f32 %v4107_v40 }
 0x953   : > { %v8199_v35 = vpop.eup %6757 }
 0x954   : > { %v3871_v6 = vsel %vm3735_vm10, %v8199_v35, 0.0  ;;  %v4109_v19 = vmul.f32 1.442695, %v4106_v10 }
 0x955   : > { %3872 = vadd.xlane.f32.xlu0 %v3871_v6 }
 0x956   : > { %6765 = vpow2.f32 %v4109_v19 }
 0x957   : > { %v8214_v61 = vpop.eup %6759 }
 0x959   : > { %v4258_v15 = vpop.xlane.xlu0 %4257 }
 0x95b   : > { %v8217_v47 = vpop.eup %6761 }
 0x95c   : > { %v3993_v20 = vsel %vm3735_vm10, %v8217_v47, 0.0 }
 0x95f   : > { %v8222_v13 = vpop.eup %6763 }
 0x961   : > { %v4378_v4 = vpop.xlane.xlu0 %4377 }
 0x962   : > { %4122 = vrot.lane.b32.xlu1 %v8092_v12, %s7030_s28  ;;  %v4380_v55 = vsub.f32 %v8160_v28, %v4378_v4  ;;  %v4111_v28 = vsel %vm3735_vm10, %v8222_v13, 0.0 }
 0x963   : > { %v8230_v53 = vpop.eup %6765 }
 0x969   : > { %v4500_v18 = vpop.xlane.xlu0 %4499 }
 0x96a   : > { %v4502_v34 = vsub.f32 %v8166_v29, %v4500_v18 }
 0x96b   : > { %4001 = vrot.lane.b32.xlu0 %v8092_v12, %s7028_s12  ;;  %v4260_v12 = vsub.f32 %v8152_v17, %v4258_v15  ;;  %v3990_v17 = vsel %vm3735_vm10, %v8214_v61, 0.0 }
 0x96c   : > { %v4505_v58 = vmul.f32 1.442695, %v4502_v34 }
 0x96d   : > { %v4263_v11 = vmul.f32 1.442695, %v4260_v12  ;;  %v3753_v25 = vpop.xlane.xlu0 %3752 }
 0x96f   : > { %6767 = vpow2.f32 %v4263_v11 }
 0x971   : > { %v4621_v36 = vpop.xlane.xlu0 %4620 }
 0x972   : > { %v4623_v2 = vsub.f32 %v8176_v51, %v4621_v36 }
 0x974   : > { %v4626_v41 = vmul.f32 1.442695, %v4623_v2 }
 0x97c   : > { %v8234_v33 = vpop.eup %6767 }
 0x97d   : > { %v4268_v16 = vsel %vm3735_vm10, %v8234_v33, 0.0 }
 0x982   : > { %v4255_v48 = vpop.xlane.xlu1 %4254 }
 0x983   : > { %v4259_v26 = vsub.f32 %v8150_v37, %v4255_v48  ;;  %v4383_v37 = vmul.f32 1.442695, %v4380_v55 }
 0x985   : > { %v4261_v0 = vmul.f32 1.442695, %v4259_v26 }
 0x986   : > { %3991 = vadd.xlane.f32.xlu1 %v3990_v17  ;;  %v4375_v45 = vpop.xlane.xlu1 %4374 }
 0x987   : > { %6769 = vpow2.f32 %v4261_v0  ;;  %v4379_v23 = vsub.f32 %v8156_v24, %v4375_v45  ;;  %v4114_v24 = vsel %vm3735_vm10, %v8230_v53, 0.0 }
 0x989   : > { %v4381_v49 = vmul.f32 1.442695, %v4379_v23 }
 0x98a   : > { %3994 = vadd.xlane.f32.xlu0 %v3993_v20  ;;  %4112 = vadd.xlane.f32.xlu1 %v4111_v28  ;;  %v4497_v63 = vpop.xlane.xlu1 %4496 }
 0x98b   : > { %6771 = vpow2.f32 %v4381_v49  ;;  %v4501_v40 = vsub.f32 %v8164_v44, %v4497_v63 }
 0x98c   : > { %6773 = vpow2.f32 %v4383_v37 }
 0x98d   : > { %6775 = vrcp.f32 %v3753_v25  ;;  %v4503_v10 = vmul.f32 1.442695, %v4501_v40 }
 0x98e   : > { %4115 = vadd.xlane.f32.xlu0 %v4114_v24  ;;  %v3750_v29 = vpop.xlane.xlu1 %3749 }
 0x98f   : > { %6777 = vrcp.f32 %v3750_v29 }
 0x990   : > { %6779 = vpow2.f32 %v4505_v58 }
 0x992   : > { %4269 = vadd.xlane.f32.xlu0 %v4268_v16  ;;  %v4618_v5 = vpop.xlane.xlu1 %4617 }
 0x993   : > { %v4622_v8 = vsub.f32 %v8172_v62, %v4618_v5 }
 0x994   : > { %v8240_v22 = vpop.eup %6769 }
 0x995   : > { %v4624_v3 = vmul.f32 1.442695, %v4622_v8  ;;  %v4265_v1 = vsel %vm3735_vm10, %v8240_v22, 0.0 }
 0x996   : > { %4266 = vadd.xlane.f32.xlu1 %v4265_v1 }
 0x997   : > { %6781 = vpow2.f32 %v4624_v3 }
 0x998   : > { %v8244_v56 = vpop.eup %6771  ;;  %6783 = vpow2.f32 %v4626_v41 }
 0x999   : > { %v4385_v51 = vsel %vm3735_vm10, %v8244_v56, 0.0  ;;  %v8248_v6 = vpop.eup %6773  ;;  %6785 = vpow2.f32 %v4503_v10 }
 0x99a   : > { %4386 = vadd.xlane.f32.xlu0 %v4385_v51  ;;  %v6776_v59 = vpop.eup %6775  ;;  %v4388_v54 = vsel %vm3735_vm10, %v8248_v6, 0.0 }
 0x99b   : > { %v3757_v50 = vmul.f32 %v6776_v59, %v8170_v52 }
 0x99c   : > { %v6778_v62 = vpop.eup %6777 }
 0x99d   : > { %v8252_v32 = vpop.eup %6779  ;;  %v3756_v39 = vmul.f32 %v6778_v62, %v8187_v60 }
 0x99e   : > { %4389 = vadd.xlane.f32.xlu0 %v4388_v54  ;;  %v4510_v57 = vsel %vm3735_vm10, %v8252_v32, 0.0 }
 0x99f   : > { %v3758_v42 = vpack.c.bf16 %v3757_v50, %v3756_v39 }
 0x9a1   : > { %6196 = vmatmul.mubr.msk.bf16.vlgmr.msra.gmra.mxu0 %vm3735_vm10, %v3758_v42 }
 0x9a2   : > { %4511 = vadd.xlane.f32.xlu0 %v4510_v57  ;;  %6206 = vmatpush3.bf16.msra.mxu0 %v8212_v43 }
 0x9a3   : > { %6207 = vmatprep.mubr.msk.bf16.mxu0 %vm7027_vm8, %v7026_v38  ;;  %6217 = vmatprep.subr.bf16.mxu0 %v7026_v38 }
 0x9a4   : > { %v8262_v9 = vpop.eup %6781 }
 0x9a5   : > { %v4628_v60 = vsel %vm3735_vm10, %v8262_v9, 0.0  ;;  %v8267_v52 = vpop.eup %6783 }
 0x9a6   : > { %4629 = vadd.xlane.f32.xlu0 %v4628_v60  ;;  %v4631_v14 = vsel %vm3735_vm10, %v8267_v52, 0.0  ;;  %v8276_v15 = vpop.eup %6785 }
 0x9a7   : > { %4397 = vrot.lane.b32.xlu1 %v8090_v27, %s7029_s20  ;;  %v4507_v19 = vsel %vm3735_vm10, %v8276_v15, 0.0 }
 0x9aa   : > { %4632 = vadd.xlane.f32.xlu0 %v4631_v14 }
 0x9c0   : > { %4518 = vrot.lane.b32.xlu0 %v8090_v27, %s7028_s12 }
 0x9cb   : > { %4508 = vadd.xlane.f32.xlu1 %v4507_v19 }
 0x9da   : > { %v3870_v12 = vpop.xlane.xlu1 %3869 }
 0x9db   : > { %6787 = vrcp.f32 %v3870_v12 }
 0x9dc   : > { %4639 = vrot.lane.b32.xlu1 %v8090_v27, %s7030_s28 }
 0x9de   : > { %v3873_v11 = vpop.xlane.xlu0 %3872  ;;  %v4123_v55 = vpop.permute.xlu1 %4122 }
 0x9df   : > { %6789 = vrcp.f32 %v3873_v11 }
 0x9e2   : > { %v4002_v26 = vpop.permute.xlu0 %4001 }
 0x9e8   : > { %v6788_v43 = vpop.eup %6787 }
 0x9e9   : > { %v3876_v4 = vmul.f32 %v6788_v43, %v8195_v21 }
 0x9ec   : > { %v6790_v44 = vpop.eup %6789 }
 0x9ed   : > { %v3877_v18 = vmul.f32 %v6790_v44, %v8199_v35 }
 0x9ef   : > { %v3878_v48 = vpack.c.bf16 %v3877_v18, %v3876_v4 }
 0x9f1   : > { %6208 = vmatmul.mubr.msk.bf16.vlgmr.msra.gmra.mxu0 %vm3735_vm10, %v3878_v48 }
 0x9f2   : > { %6218 = vmatpush3.bf16.msra.mxu0 %v4002_v26  ;;  %6219 = vmatprep.mubr.msk.bf16.mxu0 %vm7027_vm8, %v7026_v38 }
 0x9f3   : > { %6229 = vmatprep.subr.bf16.mxu0 %v7026_v38 }
 0xa0f   : > { %v3992_v0 = vpop.xlane.xlu1 %3991 }
 0xa10   : > { %6791 = vrcp.f32 %v3992_v0 }
 0xa13   : > { %v3995_v17 = vpop.xlane.xlu0 %3994  ;;  %v4113_v45 = vpop.xlane.xlu1 %4112 }
 0xa14   : > { %6793 = vrcp.f32 %v3995_v17 }
 0xa17   : > { %v4116_v23 = vpop.xlane.xlu0 %4115 }
 0xa18   : > { %6795 = vrcp.f32 %v4116_v23 }
 0xa19   : > { %6797 = vrcp.f32 %v4113_v45 }
 0xa1b   : > { %v4270_v35 = vpop.xlane.xlu0 %4269 }
 0xa1d   : > { %v6792_v21 = vpop.eup %6791 }
 0xa1e   : > { %v3998_v37 = vmul.f32 %v6792_v21, %v8214_v61 }
 0xa1f   : > { %v4267_v25 = vpop.xlane.xlu1 %4266 }
 0xa20   : > { %6799 = vrcp.f32 %v4267_v25 }
 0xa21   : > { %v6794_v20 = vpop.eup %6793  ;;  %6801 = vrcp.f32 %v4270_v35 }
 0xa22   : > { %v3999_v34 = vmul.f32 %v6794_v20, %v8217_v47  ;;  %v6703_v20 = vld [vmem:[%s7274_s16 + $0x38] sm:$0xff]  }
 0xa23   : > { %v4387_v49 = vpop.xlane.xlu0 %4386  ;;  %v4398_v3 = vpop.permute.xlu1 %4397  ;;  %6283 = vmatprep.subr.bf16.mxu1 %v6703_v20 }
 0xa24   : > { %v4000_v28 = vpack.c.bf16 %v3999_v34, %v3998_v37  ;;  %v6704_v37 = vld [vmem:[%s7274_s16 + $0x30] sm:$0xff]   ;;  %6284 = vmatpush3.bf16.msra.mxu1 %v6703_v20 }
 0xa25   : > { %v6796_v63 = vpop.eup %6795  ;;  %6285 = vmatprep.subr.bf16.mxu1 %v6704_v37 }
 0xa26   : > { %6220 = vmatmul.mubr.msk.bf16.vlgmr.msra.gmra.mxu0 %vm3735_vm10, %v4000_v28  ;;  %v6798_v58 = vpop.eup %6797  ;;  %v4120_v36 = vmul.f32 %v6796_v63, %v8230_v53  ;;  %v6705_v28 = vld [vmem:[%s7274_s16 + $0x28] sm:$0xff]  }
 0xa27   : > { %6230 = vmatpush3.bf16.msra.mxu0 %v4123_v55  ;;  %v4390_v24 = vpop.xlane.xlu0 %4389  ;;  %6231 = vmatprep.mubr.msk.bf16.mxu0 %vm7027_vm8, %v7026_v38  ;;  %v4119_v61 = vmul.f32 %v6798_v58, %v8222_v13 }
 0xa28   : > { %6803 = vrcp.f32 %v4390_v24  ;;  %6241 = vmatprep.subr.bf16.mxu0 %v7026_v38  ;;  %6286 = vmatpush3.bf16.msra.mxu1 %v6704_v37  ;;  %v6706_v24 = vld [vmem:[%s7274_s16 + $0x20] sm:$0xff]  }
 0xa29   : > { %6805 = vrcp.f32 %v4387_v49  ;;  %v4121_v29 = vpack.c.bf16 %v4120_v36, %v4119_v61  ;;  %6287 = vmatprep.subr.bf16.mxu1 %v6705_v28 }
 0xa2b   : > { %v4512_v47 = vpop.xlane.xlu0 %4511 }
 0xa2c   : > { %6807 = vrcp.f32 %v4512_v47  ;;  %6288 = vmatpush3.bf16.msra.mxu1 %v6705_v28  ;;  %v6707_v47 = vld [vmem:[%s7274_s16 + $0x18] sm:$0xff]  }
 0xa2d   : > { %v6800_v2 = vpop.eup %6799  ;;  %6289 = vmatprep.subr.bf16.mxu1 %v6706_v24 }
 0xa2e   : > { %6232 = vmatmul.mubr.msk.bf16.vlgmr.msra.gmra.mxu0 %vm3735_vm10, %v4121_v29  ;;  %v6802_v16 = vpop.eup %6801  ;;  %v4273_v5 = vmul.f32 %v6800_v2, %v8240_v22  ;;  %v6708_v29 = vld [vmem:[%s7274_s16 + $0x10] sm:$0xff]   ;;  %v6709_v2 = vld [vmem:[%s7274_s16 + $0x8] sm:$0xff]  }
 0xa2f   : > { %6242 = vmatpush3.bf16.msra.mxu0 %v8090_v27  ;;  %6243 = vmatprep.mubr.msk.bf16.mxu0 %vm7027_vm8, %v7026_v38  ;;  %v4630_v8 = vpop.xlane.xlu0 %4629  ;;  %v4274_v53 = vmul.f32 %v6802_v16, %v8234_v33 }
 0xa30   : > { %6253 = vmatprep.subr.bf16.mxu0 %v7026_v38  ;;  %6290 = vmatpush3.bf16.msra.mxu1 %v6706_v24  ;;  %v6832_v24 = vld [vmem:[%s8590_s15 + $0x8] sm:$0xff] }
 0xa31   : > { %v4275_v41 = vpack.c.bf16 %v4274_v53, %v4273_v5  ;;  %6291 = vmatprep.subr.bf16.mxu1 %v6707_v47 }
 0xa33   : > { %v4633_v27 = vpop.xlane.xlu0 %4632 }
 0xa34   : > { %6292 = vmatpush3.bf16.msra.mxu1 %v6707_v47 }
 0xa35   : > { %v6804_v13 = vpop.eup %6803  ;;  %6293 = vmatprep.subr.bf16.mxu1 %v6708_v29 }
 0xa36   : > { %6244 = vmatmul.mubr.msk.bf16.vlgmr.msra.gmra.mxu0 %vm3735_vm10, %v4275_v41  ;;  %v6806_v1 = vpop.eup %6805  ;;  %v4394_v51 = vmul.f32 %v6804_v13, %v8248_v6 }
 0xa37   : > { %6254 = vmatpush3.bf16.msra.mxu0 %v4398_v3  ;;  %6255 = vmatprep.mubr.msk.bf16.mxu0 %vm7027_vm8, %v7026_v38  ;;  %v4393_v22 = vmul.f32 %v6806_v1, %v8244_v56  ;;  %v4519_v62 = vpop.permute.xlu0 %4518 }
 0xa38   : > { %6265 = vmatprep.subr.bf16.mxu0 %v7026_v38  ;;  %6294 = vmatpush3.bf16.msra.mxu1 %v6708_v29  ;;  %v6834_v29 = vld [vmem:[%s8590_s15 + $0x18] sm:$0xff] }
 0xa39   : > { %v4395_v59 = vpack.c.bf16 %v4394_v51, %v4393_v22  ;;  %v6808_v54 = vpop.eup %6807  ;;  %6295 = vmatprep.subr.bf16.mxu1 %v6709_v2 }
 0xa3a   : > { %v4516_v50 = vmul.f32 %v6808_v54, %v8252_v32 }
 0xa3c   : > { %6296 = vmatpush3.bf16.msra.mxu1 %v6709_v2 }
 0xa3e   : > { %6256 = vmatmul.mubr.msk.bf16.vlgmr.msra.gmra.mxu0 %vm3735_vm10, %v4395_v59 }
 0xa3f   : > { %6266 = vmatpush3.bf16.msra.mxu0 %v4519_v62  ;;  %6267 = vmatprep.mubr.msk.bf16.mxu0 %vm7027_vm8, %v7026_v38 }
 0xa40   : > { %6277 = vmatprep.subr.bf16.mxu0 %v7026_v38 }
 0xa54   : > { %v4509_v33 = vpop.xlane.xlu1 %4508 }
 0xa55   : > { %6809 = vrcp.f32 %v4509_v33 }
 0xa56   : > { %6811 = vrcp.f32 %v4633_v27 }
 0xa57   : > { %6813 = vrcp.f32 %v4630_v8  ;;  %v6710_v8 = vld [vmem:[%s7274_s16] sm:$0xff]   ;;  %s8593_s16 = scalar_lea.vmem %s8516_s10, %s7290_s1 }
 0xa58   : > { %v4640_v40 = vpop.permute.xlu1 %4639  ;;  %6297 = vmatprep.subr.bf16.mxu1 %v6710_v8 }
 0xa59   : > { %6298 = vmatpush3.bf16.msra.mxu1 %v6710_v8 }
 0xa61   : > { %v8313_v6 = vpop.f32.mrf.mxu0 }
 0xa62   : > { %v6810_v39 = vpop.eup %6809 }
 0xa63   : > { %v4515_v56 = vmul.f32 %v6810_v39, %v8276_v15  ;;  %v6197_v42 = vpop.f32.mrf.mxu0  ;;  %v6812_v60 = vpop.eup %6811 }
 0xa64   : > { %v6814_v10 = vpop.eup %6813  ;;  %v4637_v12 = vmul.f32 %v6812_v60, %v8267_v52 }
 0xa65   : > { %v4517_v57 = vpack.c.bf16 %v4516_v50, %v4515_v56  ;;  %v8317_v14 = vpop.f32.mrf.mxu0  ;;  %v4636_v15 = vmul.f32 %v6814_v10, %v8262_v9 }
 0xa67   : > { %6268 = vmatmul.mubr.msk.bf16.vlgmr.msra.gmra.mxu0 %vm3735_vm10, %v4517_v57  ;;  %v6198_v19 = vpop.f32.mrf.mxu0  ;;  %v4638_v11 = vpack.c.bf16 %v4637_v12, %v4636_v15 }
 0xa68   : > { %6278 = vmatpush3.bf16.msra.mxu0 %v4640_v40  ;;  %6279 = vmatprep.mubr.msk.bf16.mxu0 %vm7027_vm8, %v7026_v38 }
 0xa6f   : > { %6280 = vmatmul.mubr.msk.bf16.vlgmr.msra.gmra.mxu0 %vm3735_vm10, %v4638_v11 }
 0xa70   : > { %5034 = vmatprep.mubr.bf16.mxu0 %v7025_v46 }
 0xab1   : > { %v3920_v32 = vpop.f32.mrf.mxu0 }
 0xab3   : > { %v6209_v43 = vpop.f32.mrf.mxu0 }
 0xab5   : > { %v3923_v44 = vpop.f32.mrf.mxu0 }
 0xab6   : > { %v6641_v4 = vpack.i.bf16 %v3923_v44, %v3920_v32 }
 0xab7   : > { %v6210_v18 = vpop.f32.mrf.mxu0 }
 0xab8   : > { %6642 = vrot.lane.b32.xlu1 %v6641_v4, %s7030_s28 }
 0xae6   : > { %v4041_v48 = vpop.f32.mrf.mxu0 }
 0xae8   : > { %v6221_v38 = vpop.f32.mrf.mxu0 }
 0xaea   : > { %v4044_v26 = vpop.f32.mrf.mxu0 }
 0xaeb   : > { %v6646_v52 = vpack.i.bf16 %v4044_v26, %v4041_v48 }
 0xaec   : > { %v6222_v55 = vpop.f32.mrf.mxu0 }
 0xaed   : > { %6647 = vrot.lane.b32.xlu1 %v6646_v52, %s7028_s12 }
 0xaee   : > { %v4162_v9 = vpop.f32.mrf.mxu0 }
 0xaf0   : > { %v6233_v0 = vpop.f32.mrf.mxu0 }
 0xaf2   : > { %v4165_v17 = vpop.f32.mrf.mxu0 }
 0xaf3   : > { %v6651_v45 = vpack.i.bf16 %v4165_v17, %v4162_v9 }
 0xaf4   : > { %v6234_v23 = vpop.f32.mrf.mxu0 }
 0xaf5   : > { %6652 = vrot.lane.b32.xlu1 %v6651_v45, %s7029_s20 }
 0xaf6   : > { %v8329_v21 = vpop.f32.mrf.mxu0 }
 0xaf8   : > { %v6245_v35 = vpop.f32.mrf.mxu0 }
 0xaf9   : > { %v5716_v35 = vld [vmem:[%s8591_s0] ss:$0 sm:$0xff] }
 0xafa   : > { %v8331_v25 = vpop.f32.mrf.mxu0 }
 0xafc   : > { %v6246_v34 = vpop.f32.mrf.mxu0 }
 0xafd   : > { %v6831_v34 = vld [vmem:[%s8590_s15] sm:$0xff] }
 0xafe   : > { %v4437_v49 = vpop.f32.mrf.mxu0 }
 0xb00   : > { %v6257_v63 = vpop.f32.mrf.mxu0 }
 0xb02   : > { %v4440_v58 = vpop.f32.mrf.mxu0 }
 0xb03   : > { %v6656_v36 = vpack.i.bf16 %v4440_v58, %v4437_v49 }
 0xb04   : > { %v6258_v61 = vpop.f32.mrf.mxu0 }
 0xb05   : > { %6657 = vrot.lane.b32.xlu1 %v6656_v36, %s7030_s28  ;;  %v6833_v61 = vld [vmem:[%s8590_s15 + $0x10] sm:$0xff] }
 0xb27   : > { %v4558_v16 = vpop.f32.mrf.mxu0 }
 0xb29   : > { %v6269_v5 = vpop.f32.mrf.mxu0 }
 0xb2a   : > { %v6643_v59 = vpop.permute.xlu1 %6642  ;;  %v6713_v5 = vld [vmem:[%s7280_s18 + $0x74] ss:$8 sps:$4 sm:$0xff]  }
 0xb2b   : > { %v4561_v53 = vpop.f32.mrf.mxu0  ;;  %v6645_v33 = vunpack.i.h.bf16 %v6643_v59  ;;  %v6644_v54 = vunpack.i.l.bf16 %v6643_v59  ;;  %5002 = vmatprep.subr.bf16.mxu0 %v6713_v5  ;;  %v5726_v5 = vld [vmem:[%s8593_s16] ss:$0 sm:$0xff] }
 0xb2c   : > { %v6661_v41 = vpack.i.bf16 %v4561_v53, %v4558_v16  ;;  %v6711_v16 = vld [vmem:[%s7280_s18 + $0x70] ss:$8 sps:$4 sm:$0xff]  }
 0xb2d   : > { %v6270_v13 = vpop.f32.mrf.mxu0  ;;  %v4194_v42 = vsel %vm3687_vm9, %v8317_v14, %v6645_v33  ;;  %v4193_v57 = vsel %vm3687_vm9, %v8313_v6, %v6644_v54  ;;  %5003 = vmatpush1.bf16.msra.mxu0 %v6711_v16 }
 0xb2e   : > { %6662 = vrot.lane.b32.xlu0 %v6661_v41, %s7028_s12  ;;  %s8592_s12 = scalar_lea.vmem %s8515_s9, %s7290_s1 }
 0xb2f   : > { %v4679_v3 = vpop.f32.mrf.mxu0 }
 0xb31   : > { %v6281_v1 = vpop.f32.mrf.mxu0 }
 0xb33   : > { %v4682_v27 = vpop.f32.mrf.mxu0 }
 0xb34   : > { %v6666_v51 = vpack.i.bf16 %v4682_v27, %v4679_v3 }
 0xb35   : > { %v6282_v22 = vpop.f32.mrf.mxu0 }
 0xb36   : > { %6667 = vrot.lane.b32.xlu1 %v6666_v51, %s7029_s20 }
 0xb5f   : > { %v6648_v62 = vpop.permute.xlu1 %6647 }
 0xb60   : > { %v6650_v39 = vunpack.i.h.bf16 %v6648_v62  ;;  %v6649_v56 = vunpack.i.l.bf16 %v6648_v62 }
 0xb62   : > { %v4197_v10 = vsel %vm4195_vm11, %v4194_v42, %v6650_v39  ;;  %v4196_v19 = vsel %vm4195_vm11, %v4193_v57, %v6649_v56  ;;  %v6716_v42 = vld [vmem:[%s7280_s18 + $0x64] ss:$8 sps:$4 sm:$0xff]   ;;  %v6714_v57 = vld [vmem:[%s7280_s18 + $0x60] ss:$8 sps:$4 sm:$0xff]  }
 0xb63   : > { %5004 = vmatprep.subr.bf16.mxu0 %v6716_v42  ;;  %v6749_v42 = vld [vmem:[%s7282_s27 + $0x40] sm:$0xff]  }
 0xb64   : > { %5005 = vmatpush1.bf16.msra.mxu0 %v6714_v57  ;;  %v6750_v57 = vld [vmem:[%s7282_s27] sm:$0xff]  }
 0xb67   : > { %v6653_v50 = vpop.permute.xlu1 %6652 }
 0xb68   : > { %v6655_v60 = vunpack.i.h.bf16 %v6653_v50  ;;  %v6654_v40 = vunpack.i.l.bf16 %v6653_v50 }
 0xb6a   : > { %v4199_v12 = vsel %vm4198_vm12, %v4196_v19, %v6654_v40  ;;  %v4200_v15 = vsel %vm4198_vm12, %v4197_v10, %v6655_v60  ;;  %v6719_v60 = vld [vmem:[%s7280_s18 + $0x54] ss:$8 sps:$4 sm:$0xff]   ;;  %v6717_v40 = vld [vmem:[%s7280_s18 + $0x50] ss:$8 sps:$4 sm:$0xff]   ;;  %v6722_v10 = vld [vmem:[%s7280_s18 + $0x44] ss:$8 sps:$4 sm:$0xff]  }
 0xb6b   : > { %v4716_v11 = vpack.c.bf16 %v4200_v15, %v4199_v12  ;;  %5006 = vmatprep.subr.bf16.mxu0 %v6719_v60  ;;  %v6720_v19 = vld [vmem:[%s7280_s18 + $0x40] ss:$8 sps:$4 sm:$0xff]   ;;  %v6725_v12 = vld [vmem:[%s7280_s18 + $0x34] ss:$8 sps:$4 sm:$0xff]   ;;  %v6723_v15 = vld [vmem:[%s7280_s18 + $0x30] ss:$8 sps:$4 sm:$0xff]  }
 0xb6c   : > { %5007 = vmatpush1.bf16.msra.mxu0 %v6717_v40 }
 0xb6d   : > { %6299 = vmatprep.mubr.bf16.mxu1 %v4716_v11  ;;  %5008 = vmatprep.subr.bf16.mxu0 %v6722_v10  ;;  %v6728_v11 = vld [vmem:[%s7280_s18 + $0x24] ss:$8 sps:$4 sm:$0xff]  }
 0xb70   : > { %5009 = vmatpush1.bf16.msra.mxu0 %v6720_v19 }
 0xb71   : > { %5010 = vmatprep.subr.bf16.mxu0 %v6725_v12 }
 0xb74   : > { %5011 = vmatpush1.bf16.msra.mxu0 %v6723_v15 }
 0xb75   : > { %5012 = vmatprep.subr.bf16.mxu0 %v6728_v11 }
 0xb77   : > { %v6658_v32 = vpop.permute.xlu1 %6657 }
 0xb78   : > { %v6660_v44 = vunpack.i.h.bf16 %v6658_v32  ;;  %v6659_v14 = vunpack.i.l.bf16 %v6658_v32  ;;  %v6726_v32 = vld [vmem:[%s7280_s18 + $0x20] ss:$8 sps:$4 sm:$0xff]  }
 0xb79   : > { %5013 = vmatpush1.bf16.msra.mxu0 %v6726_v32 }
 0xb7a   : > { %v4711_v48 = vsel %vm3687_vm9, %v8331_v25, %v6660_v44  ;;  %v4710_v38 = vsel %vm3687_vm9, %v8329_v21, %v6659_v14  ;;  %v6729_v44 = vld [vmem:[%s7280_s18 + $0x10] ss:$8 sps:$4 sm:$0xff]   ;;  %v6734_v14 = vld [vmem:[%s7280_s18 + $0x4] ss:$8 sps:$4 sm:$0xff]  }
 0xba0   : > { %v6663_v43 = vpop.permute.xlu0 %6662 }
 0xba1   : > { %v6665_v4 = vunpack.i.h.bf16 %v6663_v43  ;;  %v6664_v18 = vunpack.i.l.bf16 %v6663_v43  ;;  %v6731_v43 = vld [vmem:[%s7280_s18 + $0x14] ss:$8 sps:$4 sm:$0xff]  }
 0xba2   : > { %5014 = vmatprep.subr.bf16.mxu0 %v6731_v43 }
 0xba3   : > { %v4713_v55 = vsel %vm4195_vm11, %v4711_v48, %v6665_v4  ;;  %v4712_v9 = vsel %vm4195_vm11, %v4710_v38, %v6664_v18  ;;  %5015 = vmatpush1.bf16.msra.mxu0 %v6729_v44  ;;  %v6732_v4 = vld [vmem:[%s7280_s18] ss:$8 sps:$4 sm:$0xff]   ;;  %v6735_v18 = vld [vmem:[%s7282_s27 + $0x78] sm:$0xff]   ;;  %v6737_v48 = vld [vmem:[%s7282_s27 + $0x70] sm:$0xff]  }
 0xba4   : > { %5016 = vmatprep.subr.bf16.mxu0 %v6734_v14  ;;  %5907 = vmatprep.subr.bf16.mxu1 %v6735_v18  ;;  %v6738_v38 = vld [vmem:[%s7282_s27 + $0x30] sm:$0xff]  }
 0xba7   : > { %5017 = vmatpush1.bf16.msra.mxu0 %v6732_v4 }
 0xba8   : > { %v6668_v6 = vpop.permute.xlu1 %6667 }
 0xba9   : > { %v6670_v26 = vunpack.i.h.bf16 %v6668_v6  ;;  %v6669_v52 = vunpack.i.l.bf16 %v6668_v6  ;;  %v6736_v6 = vld [vmem:[%s7282_s27 + $0x38] sm:$0xff]  }
 0xbab   : > { %v4715_v0 = vsel %vm4198_vm12, %v4713_v55, %v6670_v26  ;;  %v4714_v17 = vsel %vm4198_vm12, %v4712_v9, %v6669_v52  ;;  %v6739_v26 = vld [vmem:[%s7282_s27 + $0x68] sm:$0xff]   ;;  %v6741_v55 = vld [vmem:[%s7282_s27 + $0x60] sm:$0xff]  }
 0xbac   : > { %v4717_v45 = vpack.c.bf16 %v4715_v0, %v4714_v17  ;;  %v6740_v52 = vld [vmem:[%s7282_s27 + $0x28] sm:$0xff]   ;;  %v6742_v9 = vld [vmem:[%s7282_s27 + $0x20] sm:$0xff]   ;;  %v6743_v0 = vld [vmem:[%s7282_s27 + $0x58] sm:$0xff]  }
 0xbad   : > { %v6744_v17 = vld [vmem:[%s7282_s27 + $0x18] sm:$0xff]  }
 0xbae   : > { %6300 = vmatmul.mubr.bf16.vlgmr.msra.gmra.mxu1 %v4717_v45 }
 0xbaf   : > { %5908 = vmatpush3.bf16.msra.mxu1 %v6736_v6 }
 0xbb0   : > { %5909 = vmatprep.subr.bf16.mxu1 %v6737_v48 }
 0xbb3   : > { %5910 = vmatpush3.bf16.msra.mxu1 %v6738_v38 }
 0xbb4   : > { %5911 = vmatprep.subr.bf16.mxu1 %v6739_v26 }
 0xbb7   : > { %5912 = vmatpush3.bf16.msra.mxu1 %v6740_v52 }
 0xbb8   : > { %5913 = vmatprep.subr.bf16.mxu1 %v6741_v55 }
 0xbbb   : > { %5914 = vmatpush3.bf16.msra.mxu1 %v6742_v9 }
 0xbbc   : > { %5915 = vmatprep.subr.bf16.mxu1 %v6743_v0 }
 0xbbf   : > { %5916 = vmatpush3.bf16.msra.mxu1 %v6744_v17 }
 0xc6e   : > { %v6301_v23 = vpop.f32.mrf.mxu1 }
 0xc6f   : > { %v4815_v37 = vadd.f32 %v6301_v23, %v5716_v35 }
 0xc70   : > { %v4806_v25 = vpop.f32.mrf.mxu1 }
 0xc71   : > { %v4807_v21 = vadd.f32 %v5716_v35, %v4806_v25  ;;  %v4823_v47 = vadd.f32 %v6833_v61, %v4815_v37  ;;  %v5725_v61 = vld [vmem:[%s8592_s12] ss:$0 sm:$0xff] }
 0xc72   : > { %v6302_v20 = vpop.f32.mrf.mxu1 }
 0xc73   : > { %v4821_v49 = vadd.f32 %v6831_v34, %v4807_v21  ;;  %v4818_v58 = vadd.f32 %v6302_v20, %v5716_v35 }
 0xc74   : > { %v4809_v28 = vpop.f32.mrf.mxu1 }
 0xc75   : > { %v4810_v63 = vadd.f32 %v5716_v35, %v4809_v28  ;;  %4827 = vadd.xlane.f32.xlu0 %v4821_v49  ;;  %v4824_v2 = vadd.f32 %v6834_v29, %v4818_v58 }
 0xc77   : > { %v4822_v36 = vadd.f32 %v6832_v24, %v4810_v63 }
 0xc79   : > { %4829 = vadd.xlane.f32.xlu1 %v4822_v36  ;;  %4831 = vadd.xlane.f32.xlu0 %v4823_v47 }
 0xc7d   : > { %4833 = vadd.xlane.f32.xlu0 %v4824_v2 }
 0xcfe   : > { %v4828_v8 = vpop.xlane.xlu0 %4827 }
 0xcff   : > { %v4836_v53 = vmul.f32 0.0078125, %v4828_v8 }
 0xd01   : > { %v8379_v41 = vsub.f32 %v4821_v49, %v4836_v53 }
 0xd02   : > { %v4830_v13 = vpop.xlane.xlu1 %4829  ;;  %v4832_v3 = vpop.xlane.xlu0 %4831 }
 0xd03   : > { %v4837_v1 = vmul.f32 0.0078125, %v4830_v13  ;;  %v4838_v27 = vmul.f32 0.0078125, %v4832_v3  ;;  %v4844_v51 = vmul.f32 %v8379_v41, %v8379_v41 }
 0xd05   : > { %v8383_v22 = vsub.f32 %v4822_v36, %v4837_v1  ;;  %v8385_v59 = vsub.f32 %v4823_v47, %v4838_v27  ;;  %4848 = vadd.xlane.f32.xlu1 %v4844_v51 }
 0xd06   : > { %v4834_v62 = vpop.xlane.xlu0 %4833 }
 0xd07   : > { %v4839_v33 = vmul.f32 0.0078125, %v4834_v62  ;;  %v4845_v54 = vmul.f32 %v8383_v22, %v8383_v22  ;;  %v4846_v39 = vmul.f32 %v8385_v59, %v8385_v59 }
 0xd09   : > { %v8391_v56 = vsub.f32 %v4824_v2, %v4839_v33  ;;  %4850 = vadd.xlane.f32.xlu0 %v4845_v54  ;;  %4852 = vadd.xlane.f32.xlu1 %v4846_v39  ;;  %v6746_v39 = vld [vmem:[%s7282_s27 + $0x10] sm:$0xff]  }
 0xd0b   : > { %v4847_v50 = vmul.f32 %v8391_v56, %v8391_v56 }
 0xd0d   : > { %4854 = vadd.xlane.f32.xlu0 %v4847_v50  ;;  %v6748_v50 = vld [vmem:[%s7282_s27 + $0x8] sm:$0xff]  }
 0xd8e   : > { %v4849_v45 = vpop.xlane.xlu1 %4848 }
 0xd8f   : > { %v4856_v23 = vmul.f32 0.0078125, %v4849_v45 }
 0xd91   : > { %v4860_v35 = vadd.f32 1e-05, %v4856_v23 }
 0xd92   : > { %v4853_v25 = vpop.xlane.xlu1 %4852  ;;  %v4851_v21 = vpop.xlane.xlu0 %4850 }
 0xd93   : > { %6815 = vrsqrt.f32 %v4860_v35  ;;  %v4858_v20 = vmul.f32 0.0078125, %v4853_v25  ;;  %v4857_v37 = vmul.f32 0.0078125, %v4851_v21 }
 0xd95   : > { %v4861_v34 = vadd.f32 1e-05, %v4857_v37  ;;  %v4862_v49 = vadd.f32 1e-05, %v4858_v20  ;;  %v5743_v37 = vld [vmem:[%s856_s11] ss:$0 sm:$0xff] }
 0xd96   : > { %v4855_v28 = vpop.xlane.xlu0 %4854 }
 0xd97   : > { %v4859_v63 = vmul.f32 0.0078125, %v4855_v28  ;;  %6817 = vrsqrt.f32 %v4861_v34 }
 0xd98   : > { %6819 = vrsqrt.f32 %v4862_v49 }
 0xd99   : > { %v4863_v58 = vadd.f32 1e-05, %v4859_v63 }
 0xd9b   : > { %6821 = vrsqrt.f32 %v4863_v58 }
 0xda0   : > { %v6816_v24 = vpop.eup %6815 }
 0xda1   : > { %v4868_v36 = vmul.f32 %v6816_v24, %v8379_v41 }
 0xda3   : > { %v4878_v2 = vmul.f32 %v5725_v61, %v4868_v36 }
 0xda4   : > { %v6818_v47 = vpop.eup %6817 }
 0xda5   : > { %v4869_v29 = vmul.f32 %v6818_v47, %v8383_v22  ;;  %v6820_v16 = vpop.eup %6819  ;;  %v8432_v13 = vadd.f32 %v5726_v5, %v4878_v2 }
 0xda6   : > { %v4870_v1 = vmul.f32 %v6820_v16, %v8385_v59  ;;  %v6745_v59 = vld [vmem:[%s7282_s27 + $0x50] sm:$0xff]  }
 0xda7   : > { %v4879_v53 = vmul.f32 %v5725_v61, %v4869_v29  ;;  %5917 = vmatprep.subr.bf16.mxu1 %v6745_v59 }
 0xda8   : > { %v6822_v8 = vpop.eup %6821  ;;  %v4880_v22 = vmul.f32 %v5725_v61, %v4870_v1  ;;  %5918 = vmatpush3.bf16.msra.mxu1 %v6746_v39 }
 0xda9   : > { %v4871_v41 = vmul.f32 %v6822_v8, %v8391_v56  ;;  %v8434_v3 = vadd.f32 %v5726_v5, %v4879_v53  ;;  %v6747_v56 = vld [vmem:[%s7282_s27 + $0x48] sm:$0xff]  }
 0xdaa   : > { %v8442_v33 = vadd.f32 %v5726_v5, %v4880_v22  ;;  %5919 = vmatprep.subr.bf16.mxu1 %v6747_v56 }
 0xdab   : > { %v4909_v27 = vpack.c.bf16 %v8434_v3, %v8432_v13  ;;  %v4881_v51 = vmul.f32 %v5725_v61, %v4871_v41 }
 0xdac   : > { %5920 = vmatpush3.bf16.msra.mxu1 %v6748_v50 }
 0xdad   : > { %5035 = vmatmul.mubr.bf16.vlgmr.msra.gmra.mxu0 %v4909_v27  ;;  %v8440_v62 = vadd.f32 %v5726_v5, %v4881_v51  ;;  %5921 = vmatprep.subr.bf16.mxu1 %v6749_v42 }
 0xdae   : > { %5044 = vmatprep.mubr.bf16.mxu0 %v7025_v46  ;;  %v4908_v46 = vld [vmem:[%s7320_s24] sm:$0x3] }
 0xdaf   : > { %v4910_v54 = vpack.c.bf16 %v8440_v62, %v8442_v33  ;;  %v4919_v40 = vrot.slane %v4908_v46, %v3443_v31  ;;  %v4915_v10 = vrot.slane %v4908_v46, %v3439_v30 }
 0xdb0   : > { %5922 = vmatpush3.bf16.msra.mxu1 %v6750_v57 }
 0xdb5   : > { %5045 = vmatmul.mubr.bf16.gmra.mxu0 %v4910_v54 }
 0xe6d   : > { %v5036_v60 = vpop.f32.mrf.mxu0 }
 0xe6e   : > { %v5037_v32 = vadd.f32 %v5036_v60, %v4915_v10 }
 0xe6f   : > { %v5038_v19 = vpop.f32.mrf.mxu0 }
 0xe70   : > { %v5039_v15 = vadd.f32 %v5038_v19, %v4919_v40  ;;  %v5055_v48 = vmax.f32 %v5037_v32, 0.0 }
 0xe71   : > { %v5040_v12 = vpop.f32.mrf.mxu0 }
 0xe72   : > { %v5041_v11 = vadd.f32 %v5040_v12, %v4915_v10  ;;  %v5056_v18 = vmax.f32 %v5039_v15, 0.0 }
 0xe73   : > { %v5042_v43 = vpop.f32.mrf.mxu0 }
 0xe74   : > { %v5043_v44 = vadd.f32 %v5042_v43, %v4919_v40  ;;  %v5057_v14 = vmax.f32 %v5041_v11, 0.0 }
 0xe75   : > { %v5046_v4 = vpop.f32.mrf.mxu0 }
 0xe76   : > { %v5058_v6 = vmax.f32 %v5043_v44, 0.0  ;;  %v5096_v52 = vpack.c.bf16 %v5057_v14, %v5055_v48  ;;  %v5047_v30 = vadd.f32 %v5046_v4, %v4915_v10 }
 0xe77   : > { %v5048_v38 = vpop.f32.mrf.mxu0 }
 0xe78   : > { %v5097_v26 = vpack.c.bf16 %v5058_v6, %v5056_v18  ;;  %v5049_v31 = vadd.f32 %v5048_v38, %v4919_v40  ;;  %v5059_v35 = vmax.f32 %v5047_v30, 0.0 }
 0xe79   : > { %v5050_v55 = vpop.f32.mrf.mxu0 }
 0xe7a   : > { %v5051_v7 = vadd.f32 %v5050_v55, %v4915_v10  ;;  %5234 = vmatprep.mubr.bf16.mxu1 %v5097_v26  ;;  %v5060_v45 = vmax.f32 %v5049_v31, 0.0  ;;  %v5760_v26 = vld [vmem:[%s859_s14] ss:$0 sm:$0xff] }
 0xe7b   : > { %v5052_v9 = vpop.f32.mrf.mxu0  ;;  %5235 = vmatmul.mubr.bf16.vlgmr.msra.gmra.mxu1 %v5096_v52  ;;  %v5761_v55 = vld [vmem:[%s862_s26] ss:$0 sm:$0xff] }
 0xe7c   : > { %v5053_v0 = vadd.f32 %v5052_v9, %v4919_v40  ;;  %v5061_v17 = vmax.f32 %v5051_v7, 0.0 }
 0xe7e   : > { %v5062_v23 = vmax.f32 %v5053_v0, 0.0  ;;  %v5098_v21 = vpack.c.bf16 %v5061_v17, %v5059_v35 }
 0xe80   : > { %v5099_v25 = vpack.c.bf16 %v5062_v23, %v5060_v45 }
 0xe82   : > { %5242 = vmatprep.mubr.bf16.mxu1 %v5099_v25 }
 0xe83   : > { %5243 = vmatmul.mubr.bf16.gmra.mxu1 %v5098_v21 }
 0xf3b   : > { %v5923_v20 = vpop.f32.mrf.mxu1 }
 0xf3d   : > { %v5924_v34 = vpop.f32.mrf.mxu1 }
 0xf3e   : > { %v5925_v49 = vadd.f32 %v5924_v34, %v5923_v20 }
 0xf3f   : > { %v5926_v28 = vpop.f32.mrf.mxu1 }
 0xf40   : > { %v5237_v63 = vadd.f32 %v5925_v49, %v5743_v37 }
 0xf41   : > { %v5927_v58 = vpop.f32.mrf.mxu1 }
 0xf42   : > { %v5928_v24 = vadd.f32 %v5927_v58, %v5926_v28  ;;  %v5251_v36 = vadd.f32 %v5237_v63, %v8432_v13 }
 0xf43   : > { %v5929_v61 = vpop.f32.mrf.mxu1 }
 0xf44   : > { %v5240_v47 = vadd.f32 %v5928_v24, %v5743_v37  ;;  %5257 = vadd.xlane.f32.xlu1 %v5251_v36 }
 0xf45   : > { %v5930_v29 = vpop.f32.mrf.mxu1 }
 0xf46   : > { %v5931_v2 = vadd.f32 %v5930_v29, %v5929_v61  ;;  %v5252_v16 = vadd.f32 %v5240_v47, %v8434_v3 }
 0xf47   : > { %v5932_v5 = vpop.f32.mrf.mxu1 }
 0xf48   : > { %v5245_v8 = vadd.f32 %v5931_v2, %v5743_v37  ;;  %5259 = vadd.xlane.f32.xlu0 %v5252_v16 }
 0xf49   : > { %v5933_v53 = vpop.f32.mrf.mxu1 }
 0xf4a   : > { %v5934_v41 = vadd.f32 %v5933_v53, %v5932_v5  ;;  %v5253_v1 = vadd.f32 %v5245_v8, %v8442_v33 }
 0xf4c   : > { %v5248_v27 = vadd.f32 %v5934_v41, %v5743_v37  ;;  %5261 = vadd.xlane.f32.xlu1 %v5253_v1 }
 0xf4e   : > { %v5254_v51 = vadd.f32 %v5248_v27, %v8440_v62 }
 0xf50   : > { %5263 = vadd.xlane.f32.xlu0 %v5254_v51 }
 0xfcd   : > { %v5258_v13 = vpop.xlane.xlu1 %5257 }
 0xfce   : > { %v5265_v22 = vmul.f32 0.0078125, %v5258_v13 }
 0xfd0   : > { %v5269_v54 = vsub.f32 %v5251_v36, %v5265_v22 }
 0xfd1   : > { %v5260_v59 = vpop.xlane.xlu0 %5259 }
 0xfd2   : > { %v5266_v39 = vmul.f32 0.0078125, %v5260_v59  ;;  %v5273_v56 = vmul.f32 %v5269_v54, %v5269_v54 }
 0xfd4   : > { %v5270_v50 = vsub.f32 %v5252_v16, %v5266_v39  ;;  %5277 = vadd.xlane.f32.xlu1 %v5273_v56 }
 0xfd5   : > { %v5262_v3 = vpop.xlane.xlu1 %5261 }
 0xfd6   : > { %v5267_v42 = vmul.f32 0.0078125, %v5262_v3  ;;  %v5274_v57 = vmul.f32 %v5270_v50, %v5270_v50 }
 0xfd8   : > { %v5271_v46 = vsub.f32 %v5253_v1, %v5267_v42  ;;  %5279 = vadd.xlane.f32.xlu0 %v5274_v57 }
 0xfd9   : > { %v5264_v60 = vpop.xlane.xlu0 %5263 }
 0xfda   : > { %v5268_v33 = vmul.f32 0.0078125, %v5264_v60  ;;  %v5275_v40 = vmul.f32 %v5271_v46, %v5271_v46 }
 0xfdc   : > { %v5272_v10 = vsub.f32 %v5254_v51, %v5268_v33  ;;  %5281 = vadd.xlane.f32.xlu1 %v5275_v40 }
 0xfde   : > { %v5276_v62 = vmul.f32 %v5272_v10, %v5272_v10 }
 0xfe0   : > { %5283 = vadd.xlane.f32.xlu0 %v5276_v62 }
0x105d   : > { %v5278_v19 = vpop.xlane.xlu1 %5277 }
0x105e   : > { %v5285_v12 = vmul.f32 0.0078125, %v5278_v19 }
0x1060   : > { %v5289_v15 = vadd.f32 1e-05, %v5285_v12 }
0x1061   : > { %v5280_v11 = vpop.xlane.xlu0 %5279 }
0x1062   : > { %6823 = vrsqrt.f32 %v5289_v15  ;;  %v5286_v32 = vmul.f32 0.0078125, %v5280_v11 }
0x1064   : > { %v5290_v43 = vadd.f32 1e-05, %v5286_v32 }
0x1065   : > { %v5282_v44 = vpop.xlane.xlu1 %5281 }
0x1066   : > { %6825 = vrsqrt.f32 %v5290_v43  ;;  %v5287_v14 = vmul.f32 0.0078125, %v5282_v44 }
0x1068   : > { %v5291_v4 = vadd.f32 1e-05, %v5287_v14 }
0x1069   : > { %v5284_v18 = vpop.xlane.xlu0 %5283 }
0x106a   : > { %6827 = vrsqrt.f32 %v5291_v4  ;;  %v5288_v6 = vmul.f32 0.0078125, %v5284_v18 }
0x106c   : > { %v5292_v48 = vadd.f32 1e-05, %v5288_v6 }
0x106e   : > { %6829 = vrsqrt.f32 %v5292_v48 }
0x106f   : > { %v6824_v38 = vpop.eup %6823 }
0x1070   : > { %v5297_v52 = vmul.f32 %v6824_v38, %v5269_v54 }
0x1072   : > { %v5307_v31 = vmul.f32 %v5760_v26, %v5297_v52 }
0x1073   : > { %v6826_v7 = vpop.eup %6825 }
0x1074   : > { %v5317_v30 = vadd.f32 %v5761_v55, %v5307_v31  ;;  %v5298_v9 = vmul.f32 %v6826_v7, %v5270_v50 }
0x1076   : > { %5321 = vst [vmem:[%s8590_s15] sm:$0xff] %v5317_v30  ;;  %v5308_v0 = vmul.f32 %v5760_v26, %v5298_v9 }
0x1077   : > { %v6828_v17 = vpop.eup %6827 }
0x1078   : > { %v5318_v45 = vadd.f32 %v5761_v55, %v5308_v0  ;;  %v5299_v23 = vmul.f32 %v6828_v17, %v5271_v46 }
0x107a   : > { %5322 = vst [vmem:[%s8590_s15 + $0x8] sm:$0xff] %v5318_v45  ;;  %v5309_v35 = vmul.f32 %v5760_v26, %v5299_v23 }
0x107b   : > { %v6830_v25 = vpop.eup %6829 }
0x107c   : > { %v5319_v21 = vadd.f32 %v5761_v55, %v5309_v35  ;;  %v5300_v20 = vmul.f32 %v6830_v25, %v5272_v10 }
0x107e   : > { %5323 = vst [vmem:[%s8590_s15 + $0x10] sm:$0xff] %v5319_v21  ;;  %v5310_v37 = vmul.f32 %v5760_v26, %v5300_v20 }
0x1080   : > { %v5320_v34 = vadd.f32 %v5761_v55, %v5310_v37 }
0x1082   : > { %5324 = vst [vmem:[%s8590_s15 + $0x18] sm:$0xff] %v5320_v34 }
0x1083 PF: > { %s36_s19 = sadd.s32 1, %s7003_s19   ;;  %s8597_s27 = sld [smem:[#allocation12_spill]] }
0x1084   : > { %p33_p5 = scmp.ge.s32.totalorder %s36_s19, 4   ;;  %s8598_s28 = sld [smem:[#allocation13_spill]] }
0x1085   : > { %s8599_s29 = sld [smem:[#allocation16_spill]] }
0x1086   : > { %s8600_s30 = sld [smem:[#allocation14_spill]]  ;;  %35 = sbr.rel (!%p33_p5) target bundleno = 23 (0x17), region = 203 }
0x1087   : > { %s8601_s0 = sld [smem:[#allocation15_spill]] }
0x108b   :  { %5364 = vsyncpa [#allocation3], 1 }
0x108c   :  { %5366 = vsyncpa [#allocation3 + $0x1], 1 }
0x108d   :  { %5367 = vsyncpa [#allocation5], 1 }
0x108e   :  { %5369 = vsyncpa [#allocation5 + $0x1], 1 }
0x108f   :  { %5370 = vsyncpa [#allocation8], 1 }
0x1090   :  { %5372 = vsyncpa [#allocation8 + $0x1], 1 }

</bundles_post_ra>
